<compile_context>
chip_gen: v5e
topology: v5e:2x2
jax: 0.10.0
libtpu: 0.0.40
codegen_flags: <defaults>
</compile_context>

<pallas_src>
import jax
import jax.numpy as jnp
from jax.experimental import pallas as pl
from jax.experimental.pallas import tpu as pltpu

IN_FEATURES = 3 * 224 * 224       # 150528
HIDDEN = 128
OUT = 2

TK = 37632                        # 150528 / 37632 = 4 K tiles; 37632 % 128 == 0
NK = IN_FEATURES // TK            # 4 grid steps


def mlp_kernel(x_ref, w1_ref, b1_ref, w2_ref, b2_ref, o_ref, acc_ref):
    """Accumulates x_tile @ W1_tile (bf16 in, f32 acc) into a resident VMEM
    accumulator; on the last K step applies bias + ReLU + fc2 and writes logits."""
    k = pl.program_id(0)

    @pl.when(k == 0)
    def _():
        acc_ref[...] = jnp.zeros_like(acc_ref)

    acc_ref[...] += jnp.dot(
        x_ref[...], w1_ref[...], preferred_element_type=jnp.float32
    )

    @pl.when(k == pl.num_programs(0) - 1)
    def _():
        h = jnp.maximum(acc_ref[...] + b1_ref[...], 0.0)          # (B, 128) f32
        logits = jnp.dot(h, w2_ref[...],
                         preferred_element_type=jnp.float32) + b2_ref[...]
        o_ref[...] = logits.astype(o_ref.dtype)


@jax.jit
def image_classifier_forward(x_nchw, w1_bf16, b1, w2, b2):
    """x_nchw: (B, 3, 224, 224) f32. w1_bf16: (150528, 128) bf16 (persistent).
    Returns logits (B, 2) f32."""
    B = x_nchw.shape[0]
    # Same flattening as PyTorch x.view(-1, 3*224*224); stream x as bf16.
    x = x_nchw.reshape(B, IN_FEATURES).astype(jnp.bfloat16)
    b1_2d = b1.reshape(1, HIDDEN).astype(jnp.float32)
    w2_f32 = w2.astype(jnp.float32)
    b2_2d = b2.reshape(1, OUT).astype(jnp.float32)

    cost = pl.CostEstimate(
        flops=2 * B * IN_FEATURES * HIDDEN + 2 * B * HIDDEN * OUT,
        transcendentals=0,
        bytes_accessed=int(
            IN_FEATURES * HIDDEN * 2      # W1 bf16 (dominant stream)
            + B * IN_FEATURES * 2         # x bf16
            + HIDDEN * 4 + HIDDEN * OUT * 4 + OUT * 4  # b1, w2, b2
            + B * OUT * 4                 # logits
        ),
    )

    return pl.pallas_call(
        mlp_kernel,
        out_shape=jax.ShapeDtypeStruct((B, OUT), jnp.float32),
        grid_spec=pltpu.PrefetchScalarGridSpec(
            num_scalar_prefetch=0,
            grid=(NK,),
            in_specs=[
                # x K-tile for this step
                pl.BlockSpec((B, TK), lambda k: (0, k)),
                # W1 K-tile (the dominant HBM stream, bf16)
                pl.BlockSpec((TK, HIDDEN), lambda k: (k, 0)),
                # Tiny resident epilogue operands (constant block index).
                pl.BlockSpec((1, HIDDEN), lambda k: (0, 0)),
                pl.BlockSpec((HIDDEN, OUT), lambda k: (0, 0)),
                pl.BlockSpec((1, OUT), lambda k: (0, 0)),
            ],
            # Logits written once on the last K step; resident across k.
            out_specs=pl.BlockSpec((B, OUT), lambda k: (0, 0)),
            scratch_shapes=[pltpu.VMEM((B, HIDDEN), jnp.float32)],
        ),
        compiler_params=pltpu.CompilerParams(
            dimension_semantics=("arbitrary",),
            # bf16 W1 tile = ~9.6 MiB -> ~19 MiB double-buffered + ~2.5 MiB x
            # + tiny operands; 32 MiB scoped limit is safe on v5e/v6e/v7x.
            vmem_limit_bytes=32 * 1024 * 1024,
        ),
        cost_estimate=cost,
    )(x, w1_bf16, b1_2d, w2_f32, b2_2d)


def init_params(key):
    """Deterministic init mimicking nn.Linear (uniform +-1/sqrt(fan_in)).
    W1 is persisted in bf16 so every forward streams half the bytes."""
    k1, k2, k3, k4 = jax.random.split(key, 4)
    lim1 = 1.0 / jnp.sqrt(jnp.float32(IN_FEATURES))
    lim2 = 1.0 / jnp.sqrt(jnp.float32(HIDDEN))
    # Stored as (in, out) so the kernel computes x @ W.
    w1 = jax.random.uniform(k1, (IN_FEATURES, HIDDEN), jnp.float32, -lim1, lim1)
    b1 = jax.random.uniform(k2, (HIDDEN,), jnp.float32, -lim1, lim1)
    w2 = jax.random.uniform(k3, (HIDDEN, OUT), jnp.float32, -lim2, lim2)
    b2 = jax.random.uniform(k4, (OUT,), jnp.float32, -lim2, lim2)
    return w1.astype(jnp.bfloat16), b1, w2, b2


if __name__ == "__main__":
    key = jax.random.PRNGKey(0)
    kx, kp = jax.random.split(key)

    B = 2  # fc1 fixes the per-sample shape at (3, 224, 224)
    x = jax.random.normal(kx, (B, 3, 224, 224), jnp.float32)
    w1_bf16, b1, w2, b2 = init_params(kp)

    logits = image_classifier_forward(x, w1_bf16, b1, w2, b2)
    logits = jax.block_until_ready(logits)
    assert logits.shape == (B, OUT)

    x_flat = x.reshape(B, IN_FEATURES)

    # Reference with the same bf16 weight/activation streaming + f32 accumulate
    # (matches kernel numerics closely).
    ref_bf16 = (
        jnp.maximum(
            jnp.dot(
                x_flat.astype(jnp.bfloat16),
                w1_bf16,
                preferred_element_type=jnp.float32,
            )
            + b1,
            0.0,
        )
        @ w2
        + b2
    )
    assert jnp.allclose(logits, ref_bf16, atol=1e-2, rtol=1e-2)

    # f32 reference sanity check (loose tolerance: bf16 streaming of x/W1
    # introduces small differences on the 150528-long reduction).
    ref_f32 = (
        jnp.maximum(x_flat @ w1_bf16.astype(jnp.float32) + b1, 0.0) @ w2 + b2
    )
    assert jnp.allclose(logits, ref_f32, atol=5e-2, rtol=5e-2)

    print("KERNEL_OK")
</pallas_src>

<mosaic_0001>
module attributes {stable_mosaic.version = 11 : i64} {
  func.func @mlp_kernel(%arg0: i32, %arg1: memref<2x37632xbf16, #tpu.memory_space<vmem>>, %arg2: memref<37632x128xbf16, #tpu.memory_space<vmem>>, %arg3: memref<1x128xf32, #tpu.memory_space<vmem>>, %arg4: memref<128x2xf32, #tpu.memory_space<vmem>>, %arg5: memref<1x2xf32, #tpu.memory_space<vmem>>, %arg6: memref<2x2xf32, #tpu.memory_space<vmem>>, %arg7: memref<2x128xf32, #tpu.memory_space<vmem>>) attributes {dimension_semantics = [#tpu.dimension_semantics<arbitrary>], iteration_bounds = array<i64: 4>, scalar_prefetch = 0 : i64, scratch_operands = 1 : i64, tpu.core_type = #tpu.core_type<tc>, window_params = [{transform_indices = @transform_0, window_bounds = array<i64: 2, 37632>}, {transform_indices = @transform_1, window_bounds = array<i64: 37632, 128>}, {pipeline_mode = #tpu.pipeline_mode<synchronous>, transform_indices = @transform_2, window_bounds = array<i64: 1, 128>}, {pipeline_mode = #tpu.pipeline_mode<synchronous>, transform_indices = @transform_3, window_bounds = array<i64: 128, 2>}, {pipeline_mode = #tpu.pipeline_mode<synchronous>, transform_indices = @transform_4, window_bounds = array<i64: 1, 2>}, {pipeline_mode = #tpu.pipeline_mode<synchronous>, transform_indices = @transform_5, window_bounds = array<i64: 2, 2>}]} {
    %c0_i32 = arith.constant 0 : i32
    %0 = arith.cmpi eq, %arg0, %c0_i32 : i32
    %1 = arith.extui %0 : i1 to i32
    %c0_i32_0 = arith.constant 0 : i32
    %2 = arith.cmpi ne, %1, %c0_i32_0 : i32
    scf.if %2 {
      %cst_9 = arith.constant 0.000000e+00 : f32
      %12 = vector.broadcast %cst_9 : f32 to vector<2x128xf32>
      %c0_10 = arith.constant 0 : index
      %c0_11 = arith.constant 0 : index
      %13 = vector.load %arg7[%c0_10, %c0_11] : memref<2x128xf32, #tpu.memory_space<vmem>>, vector<2x128xf32>
      tpu.vector_store %arg7[%c0_10, %c0_11], %12 {strides = array<i32>} : memref<2x128xf32, #tpu.memory_space<vmem>>, vector<2x128xf32>,
    } else {
    }
    %c0 = arith.constant 0 : index
    %c0_1 = arith.constant 0 : index
    %3 = vector.load %arg7[%c0, %c0_1] : memref<2x128xf32, #tpu.memory_space<vmem>>, vector<2x128xf32>
    %c0_2 = arith.constant 0 : index
    %c0_3 = arith.constant 0 : index
    %4 = vector.load %arg1[%c0_2, %c0_3] : memref<2x37632xbf16, #tpu.memory_space<vmem>>, vector<2x37632xbf16>
    %c0_4 = arith.constant 0 : index
    %c0_5 = arith.constant 0 : index
    %5 = vector.load %arg2[%c0_4, %c0_5] : memref<37632x128xbf16, #tpu.memory_space<vmem>>, vector<37632x128xbf16>
    %cst = arith.constant dense<0.000000e+00> : vector<2x128xf32>
    %6 = tpu.matmul %4, %5, %cst {dimension_numbers = #tpu.dot_dimension_numbers<[1], [0], [0], [1], [0, 0, 1, 1], [], []>} : vector<2x37632xbf16>, vector<37632x128xbf16>, vector<2x128xf32> -> vector<2x128xf32>
    %7 = arith.addf %3, %6 : vector<2x128xf32>
    %c0_6 = arith.constant 0 : index
    %c0_7 = arith.constant 0 : index
    %8 = vector.load %arg7[%c0_6, %c0_7] : memref<2x128xf32, #tpu.memory_space<vmem>>, vector<2x128xf32>
    tpu.vector_store %arg7[%c0_6, %c0_7], %7 {strides = array<i32>} : memref<2x128xf32, #tpu.memory_space<vmem>>, vector<2x128xf32>,
    %c3_i32 = arith.constant 3 : i32
    %9 = arith.cmpi eq, %arg0, %c3_i32 : i32
    %10 = arith.extui %9 : i1 to i32
    %c0_i32_8 = arith.constant 0 : i32
    %11 = arith.cmpi ne, %10, %c0_i32_8 : i32
    scf.if %11 {
      %c0_9 = arith.constant 0 : index
      %c0_10 = arith.constant 0 : index
      %12 = vector.load %arg7[%c0_9, %c0_10] : memref<2x128xf32, #tpu.memory_space<vmem>>, vector<2x128xf32>
      %c0_11 = arith.constant 0 : index
      %c0_12 = arith.constant 0 : index
      %13 = vector.load %arg3[%c0_11, %c0_12] : memref<1x128xf32, #tpu.memory_space<vmem>>, vector<1x128xf32>
      %14 = vector.broadcast %13 : vector<1x128xf32> to vector<2x128xf32>
      %15 = arith.addf %12, %14 : vector<2x128xf32>
      %cst_13 = arith.constant 0.000000e+00 : f32
      %16 = vector.broadcast %cst_13 : f32 to vector<2x128xf32>
      %17 = arith.maximumf %15, %16 : vector<2x128xf32>
      %c0_14 = arith.constant 0 : index
      %c0_15 = arith.constant 0 : index
      %18 = vector.load %arg4[%c0_14, %c0_15] : memref<128x2xf32, #tpu.memory_space<vmem>>, vector<128x2xf32>
      %cst_16 = arith.constant dense<0.000000e+00> : vector<2x2xf32>
      %19 = tpu.matmul %17, %18, %cst_16 {dimension_numbers = #tpu.dot_dimension_numbers<[1], [0], [0], [1], [0, 0, 1, 1], [], []>} : vector<2x128xf32>, vector<128x2xf32>, vector<2x2xf32> -> vector<2x2xf32>
      %c0_17 = arith.constant 0 : index
      %c0_18 = arith.constant 0 : index
      %20 = vector.load %arg5[%c0_17, %c0_18] : memref<1x2xf32, #tpu.memory_space<vmem>>, vector<1x2xf32>
      %21 = vector.broadcast %20 : vector<1x2xf32> to vector<2x2xf32>
      %22 = arith.addf %19, %21 : vector<2x2xf32>
      %c0_19 = arith.constant 0 : index
      %c0_20 = arith.constant 0 : index
      %23 = vector.load %arg6[%c0_19, %c0_20] : memref<2x2xf32, #tpu.memory_space<vmem>>, vector<2x2xf32>
      tpu.vector_store %arg6[%c0_19, %c0_20], %22 {strides = array<i32>} : memref<2x2xf32, #tpu.memory_space<vmem>>, vector<2x2xf32>,
    } else {
    }
    return
  }
  func.func @transform_0(%arg0: i32) -> (i32, i32) {
    %c0_i32 = arith.constant 0 : i32
    %c0_i32_0 = arith.constant 0 : i32
    return %c0_i32, %arg0 : i32, i32
  }
  func.func @transform_1(%arg0: i32) -> (i32, i32) {
    %c0_i32 = arith.constant 0 : i32
    %c0_i32_0 = arith.constant 0 : i32
    return %arg0, %c0_i32 : i32, i32
  }
  func.func @transform_2(%arg0: i32) -> (i32, i32) {
    %c0_i32 = arith.constant 0 : i32
    %c0_i32_0 = arith.constant 0 : i32
    %c0_i32_1 = arith.constant 0 : i32
    return %c0_i32, %c0_i32_0 : i32, i32
  }
  func.func @transform_3(%arg0: i32) -> (i32, i32) {
    %c0_i32 = arith.constant 0 : i32
    %c0_i32_0 = arith.constant 0 : i32
    %c0_i32_1 = arith.constant 0 : i32
    return %c0_i32, %c0_i32_0 : i32, i32
  }
  func.func @transform_4(%arg0: i32) -> (i32, i32) {
    %c0_i32 = arith.constant 0 : i32
    %c0_i32_0 = arith.constant 0 : i32
    %c0_i32_1 = arith.constant 0 : i32
    return %c0_i32, %c0_i32_0 : i32, i32
  }
  func.func @transform_5(%arg0: i32) -> (i32, i32) {
    %c0_i32 = arith.constant 0 : i32
    %c0_i32_0 = arith.constant 0 : i32
    %c0_i32_1 = arith.constant 0 : i32
    return %c0_i32, %c0_i32_0 : i32, i32
  }
}

</mosaic_0001>

<bundles_post_ra>
// kernel: image_classifier_forward.1
= control target key start
LH: loop header
LB: loop body
LE: loop exit
PB: predicated region body
PF: predicated region fallthrough
CT: control target
= control target key end

     0   :  { %10 = vsyncpa [#allocation4], 0  ;;  %s38471_s0 = inlined_call_operand.vmem [shape: bf16[2,150528], index: 0, kind: input, shape index: {}]   ;;  %s38472_s1 = inlined_call_operand.hbm [shape: bf16[150528,128], index: 1, kind: input, shape index: {}]   ;;  %s38473_s2 = inlined_call_operand.hbm [shape: f32[1,128], index: 2, kind: input, shape index: {}]   ;;  %s38474_s3 = inlined_call_operand.vmem [shape: f32[128,2], index: 3, kind: input, shape index: {}]   ;;  %s38475_s4 = inlined_call_operand.hbm [shape: f32[1,2], index: 4, kind: input, shape index: {}]   ;;  %s38476_s5 = inlined_call_operand.hbm [shape: f32[2,2], index: 5, kind: output, shape index: {}]  }
   0x1   :  { %12 = vsyncpa [#allocation4 + $0x1], 0 }
   0x2   :  { %13 = vsyncpa [#allocation7], 0 }
   0x3   :  { %14 = vsyncpa [#allocation5], 0  ;;  %s35815_s18 = smov 0   ;;  %s35817_s19 = smov 0  }
   0x4   :  { %s35819_s20 = smov 0   ;;  %s35821_s21 = smov 0  }
   0x5 LB: > { %s35834_s22 = sadd.s32 4294967295, %s35777_s21   ;;  %s35837_s23 = sadd.s32 1, %s35777_s21   ;;  %s35777_s21 = sphi %s35821_s21, %s38484_s21   ;;  %s35773_s20 = sphi %s35819_s20, %s38483_s20   ;;  %s35769_s19 = sphi %s35817_s19, %s38482_s19   ;;  %s35765_s18 = sphi %s35815_s18, %s38481_s18  }
   0x6   : > { %s50_s24 = ssub.s32 %s35777_s21, %s35837_s23  ;;  %s53_s25 = sadd.s32 1, %s35773_s20 }
   0x7   : > { %p51_p0 = scmp.eq.s32.totalorder %s50_s24, 0  ;;  %p60_p1 = scmp.ne.s32.totalorder %s35773_s20, %s35769_s19 }
   0x8   : > { %p61_p2 = scmp.eq.s32.totalorder %s35777_s21, 0  ;;  %p66_p3 = scmp.ne.s32.totalorder %s35769_s19, %s35765_s18 }
   0x9   : > { %s35847_s26 = scalar_select %p51_p0, %s35773_s20, %s53_s25  }
   0xa   : > { %p35849_p4 = por %p61_p2, %p60_p1  ;;  %p67_p5 = scmp.eq.s32.totalorder %s35834_s22, 0 }
   0xb   : > { %p23768_p6 = scmp.ge.s32.totalorder %s35777_s21, 1  ;;  %p161_p7 = scmp.lt.s32.totalorder %s35777_s21, 5 }
   0xc   : > { %p35858_p8 = por %p67_p5, %p66_p3  ;;  %p23769_p9 = scmp.ne.s32.totalorder %s35834_s22, 0 }
   0xd   : > { %p35863_p10 = pnand %p23768_p6, %p161_p7  ;;  %s173_s7 = sshll.u32 %s38473_s2, 4  ;;  %s174_s7 = int_to_ptr.hbm [resolvable:$true] %s173_s7 }
   0xe   : > { %s35779_s8 = smov [#allocation6]   ;;  %p35572_p13 = scmp.lt.s32.totalorder %s35777_s21, 4 }
   0xf   : > { %p35559_p11 = pneg %p35863_p10  ;;  %s175_s9 = sshll.u32 %s35779_s8, 4  ;;  %s176_s9 = int_to_ptr.vmem [resolvable:$true] %s175_s9 }
  0x10   : > { %s188_s12 = sshll.u32 %s38475_s4, 4  ;;  %p35880_p0 = pnand %p35572_p13, %p35849_p4  ;;  %s189_s12 = int_to_ptr.hbm [resolvable:$true] %s188_s12 }
  0x11   : > { %p35560_p12 = pnand %p35559_p11, %p67_p5  ;;  %s35780_s14 = smov [#allocation8]  }
  0x12   : > { %s190_s15 = sshll.u32 %s35780_s14, 4  ;;  %s209_s16 = sand.u32 1, %s35773_s20   ;;  %s191_s15 = int_to_ptr.vmem [resolvable:$true] %s190_s15 }
  0x13   : > { %35562 = dma.hbm_to_vmem [thread:$0]  (!%p35560_p12), %s174_s7, 16, %s176_s9, [#allocation7]  }
  0x14   : > { %35565 = dma.hbm_to_vmem [thread:$0]  (!%p35560_p12), %s189_s12, 16, %s191_s15, [#allocation7]  }
  0x15   : > { %s35543_s17 = smul.u32 18816, %s209_s16  ;;  %s210_s10 = scalar_lea.sflag [#allocation4], %s209_s16 }
  0x16   : > { %s33190_s18 = smul.u32 18816, %s35777_s21  ;;  %p35681_p2 = pneg %p35880_p0 }
  0x17   : > { %s213_s6 = scalar_lea.vmem [#allocation3], %s35543_s17  ;;  %s35684_s12 = scalar_lea.hbm %s38472_s1, 75264 }
  0x18   : > { %s218_s30 = scalar_lea.hbm %s38472_s1, %s33190_s18  ;;  %s221_s27 = sshll.u32 %s213_s6, 4  ;;  %s222_s27 = int_to_ptr.vmem [resolvable:$true] %s221_s27 }
  0x19   : > { %s219_s8 = sshll.u32 %s218_s30, 4  ;;  %s220_s8 = int_to_ptr.hbm [resolvable:$true] %s219_s8 }
  0x1a   : > { %s35677_s7 = sshra.s32 %s220_s8, 4  ;;  %s35678_s7 = int_to_ptr.hbm [resolvable:$true] %s35677_s7 }
  0x1b   : > { %s35679_s9 = scalar_lea.hbm %s35678_s7, 18816  ;;  %p35685_p6 = scmp.lt.s32.totalorder %s35678_s7, %s38472_s1 }
  0x1c   : > { %p35680_p1 = scmp.ne.s32.totalorder %s35678_s7, %s35679_s9  ;;  %p35686_p7 = scmp.lt.s32.totalorder %s35684_s12, %s35679_s9 }
  0x1e   : > { %p35682_p3 = pnand %p35681_p2, %p35680_p1  ;;  %p35687_p11 = por %p35686_p7, %p35685_p6 }
  0x20   : > { %p35683_p4 = pneg %p35682_p3 }
  0x22   : > { %p35688_p12 = pnand %p35687_p11, %p35683_p4 }
  0x24   : > { %35691 = shalt.err (!%p35688_p12)
}
  0x25   : > { %s35781_s16 = smov 64   ;;  %s35782_s17 = smov 4  }
  0x26   : > { %35569 = dma.hbm_to_vmem [thread:$0]  (!%p35880_p0), %s220_s8, 301056, %s222_s27, %s210_s10, %s35781_s16, %s35781_s16, %s35782_s17  }
  0x27   : > { %233 = sbr.rel (%p35863_p10) target bundleno = 2724 (0xaa4), region = 40  ;;  %s235_s18 = sand.u32 (!%p35863_p10), 1, %s35769_s19  }
  0x28   : > { %s35544_s24 = smul.u32 (!%p35863_p10), 18816, %s235_s18  ;;  %s236_s25 = scalar_lea.sflag (!%p35863_p10), [#allocation4], %s235_s18 }
  0x2a   : > { %s35902_s30 = scalar_lea.vmem (!%p35863_p10), [#allocation3], %s35544_s24 }
  0x2c   : > { %35752 = dma.done.wait (%p35858_p8), %s236_s25, 301056  }
  0x2d   : > { %35754 = vsyncadd (%p35858_p8), %s236_s25, 4294666240 }
  0x2e   : > { %35756 = dma.done.wait (%p67_p5), [#allocation7], 32  }
  0x2f   : > { %35758 = vsyncadd (%p67_p5), [#allocation7], 4294967264  ;;  %s276_s29 = smul.u32 294, %s35834_s22 }
  0x30   : > { %285 = sbr.rel (%p23769_p9) target bundleno = 55 (0x37), region = 56 }
  0x31   : > { %p277_p10 = scmp.lt.s32.totalorder %s276_s29, 1175 }
  0x33   : > { %s38486_s29 = smov (!%p277_p10, %s276_s29), 1175 }
  0x34   : > { %s35916_s27 = scalar_lea.vmem %s38471_s0, %s38486_s29 }
  0x35   : > { %v35783_v0 = vmov 0.0  }
  0x36   : > { %286 = vst [vmem:[#allocation2] sm:$0x3] %v35783_v0 }
  0x37 PF: > { %v33198_v1 = vld [vmem:[%s35902_s30 + $0x38] sm:$0xff]  ;;  %v33197_v5 = vld [vmem:[%s35902_s30 + $0x30] sm:$0xff]  ;;  %v33196_v9 = vld [vmem:[%s35902_s30 + $0x28] sm:$0xff]  ;;  %p33185_p5 = scmp.ne.s32.totalorder %s35834_s22, 3 }
  0x38   : > { %v33206_v2 = vld [vmem:[%s35902_s30 + $0x78] sm:$0xff]  ;;  %19803 = vmatpush.bf16.msra.mxu0 %v33198_v1  ;;  %v33205_v6 = vld [vmem:[%s35902_s30 + $0x70] sm:$0xff]  ;;  %v33204_v10 = vld [vmem:[%s35902_s30 + $0x68] sm:$0xff] }
  0x39   : > { %v33214_v3 = vld [vmem:[%s35902_s30 + $0xb8] sm:$0xff]  ;;  %19816 = vmatpush.bf16.msra.mxu1 %v33206_v2  ;;  %v33213_v7 = vld [vmem:[%s35902_s30 + $0xb0] sm:$0xff]  ;;  %v33212_v11 = vld [vmem:[%s35902_s30 + $0xa8] sm:$0xff] }
  0x3a   : > { %v33222_v4 = vld [vmem:[%s35902_s30 + $0xf8] sm:$0xff]  ;;  %19829 = vmatpush.bf16.msra.mxu2 %v33214_v3  ;;  %v33221_v8 = vld [vmem:[%s35902_s30 + $0xf0] sm:$0xff]  ;;  %v33220_v12 = vld [vmem:[%s35902_s30 + $0xe8] sm:$0xff] }
  0x3b   : > { %19842 = vmatpush.bf16.msra.mxu3 %v33222_v4  ;;  %v33195_v13 = vld [vmem:[%s35902_s30 + $0x20] sm:$0xff]  ;;  %v33194_v17 = vld [vmem:[%s35902_s30 + $0x18] sm:$0xff]  ;;  %v33193_v22 = vld [vmem:[%s35902_s30 + $0x10] sm:$0xff] }
  0x3c   : > { %19804 = vmatpush.bf16.msra.mxu0 %v33197_v5  ;;  %v33203_v14 = vld [vmem:[%s35902_s30 + $0x60] sm:$0xff]  ;;  %v33202_v18 = vld [vmem:[%s35902_s30 + $0x58] sm:$0xff]  ;;  %v33201_v23 = vld [vmem:[%s35902_s30 + $0x50] sm:$0xff] }
  0x3d   : > { %19817 = vmatpush.bf16.msra.mxu1 %v33205_v6  ;;  %v33211_v15 = vld [vmem:[%s35902_s30 + $0xa0] sm:$0xff]  ;;  %v33210_v19 = vld [vmem:[%s35902_s30 + $0x98] sm:$0xff]  ;;  %v33209_v24 = vld [vmem:[%s35902_s30 + $0x90] sm:$0xff] }
  0x3e   : > { %19830 = vmatpush.bf16.msra.mxu2 %v33213_v7  ;;  %v33219_v16 = vld [vmem:[%s35902_s30 + $0xe0] sm:$0xff]  ;;  %v33218_v20 = vld [vmem:[%s35902_s30 + $0xd8] sm:$0xff]  ;;  %v33217_v25 = vld [vmem:[%s35902_s30 + $0xd0] sm:$0xff] }
  0x3f   : > { %19843 = vmatpush.bf16.msra.mxu3 %v33221_v8  ;;  %v288_v21 = vld [vmem:[%s35916_s27] sm:$0xff]  ;;  %v33192_v26 = vld [vmem:[%s35902_s30 + $0x8] sm:$0xff]  ;;  %v33191_v30 = vld [vmem:[%s35902_s30] sm:$0xff] }
  0x40   : > { %19805 = vmatpush.bf16.msra.mxu0 %v33196_v9  ;;  %5030 = vst [vmem:[#allocation1] ss:$9 sm:$0xff] %v288_v21  ;;  %v33200_v27 = vld [vmem:[%s35902_s30 + $0x48] sm:$0xff]  ;;  %v33199_v31 = vld [vmem:[%s35902_s30 + $0x40] sm:$0xff]  ;;  %v33230_v33 = vld [vmem:[%s35902_s30 + $0x138] sm:$0xff] }
  0x41   : > { %19818 = vmatpush.bf16.msra.mxu1 %v33204_v10  ;;  %v33208_v28 = vld [vmem:[%s35902_s30 + $0x88] sm:$0xff]  ;;  %v33207_v32 = vld [vmem:[%s35902_s30 + $0x80] sm:$0xff]  ;;  %v33238_v34 = vld [vmem:[%s35902_s30 + $0x178] sm:$0xff] }
  0x42   : > { %19831 = vmatpush.bf16.msra.mxu2 %v33212_v11  ;;  %v33216_v29 = vld [vmem:[%s35902_s30 + $0xc8] sm:$0xff]  ;;  %v33246_v35 = vld [vmem:[%s35902_s30 + $0x1b8] sm:$0xff]  ;;  %v33215_v36 = vld [vmem:[%s35902_s30 + $0xc0] sm:$0xff] }
  0x43   : > { %19844 = vmatpush.bf16.msra.mxu3 %v33220_v12  ;;  %v33254_v37 = vld [vmem:[%s35902_s30 + $0x1f8] sm:$0xff]  ;;  %v33229_v39 = vld [vmem:[%s35902_s30 + $0x130] sm:$0xff]  ;;  %v33228_v46 = vld [vmem:[%s35902_s30 + $0x128] sm:$0xff] }
  0x44   : > { %19806 = vmatpush.bf16.msra.mxu0 %v33195_v13  ;;  %v33237_v41 = vld [vmem:[%s35902_s30 + $0x170] sm:$0xff]  ;;  %v33236_v47 = vld [vmem:[%s35902_s30 + $0x168] sm:$0xff]  ;;  %v33227_v50 = vld [vmem:[%s35902_s30 + $0x120] sm:$0xff] }
  0x45   : > { %19819 = vmatpush.bf16.msra.mxu1 %v33203_v14  ;;  %v33245_v42 = vld [vmem:[%s35902_s30 + $0x1b0] sm:$0xff]  ;;  %v33244_v48 = vld [vmem:[%s35902_s30 + $0x1a8] sm:$0xff]  ;;  %v33235_v51 = vld [vmem:[%s35902_s30 + $0x160] sm:$0xff] }
  0x46   : > { %19832 = vmatpush.bf16.msra.mxu2 %v33211_v15  ;;  %v33253_v44 = vld [vmem:[%s35902_s30 + $0x1f0] sm:$0xff]  ;;  %v33252_v49 = vld [vmem:[%s35902_s30 + $0x1e8] sm:$0xff]  ;;  %v33243_v52 = vld [vmem:[%s35902_s30 + $0x1a0] sm:$0xff] }
  0x47   : > { %19845 = vmatpush.bf16.msra.mxu3 %v33219_v16  ;;  %v5031_v38 = vld [vmem:[#allocation1] sm:$0xff]  ;;  %v5033_v40 = vld [vmem:[#allocation1 + $0x12] sm:$0xff]  ;;  %v5032_v43 = vld [vmem:[#allocation1 + $0x9] sm:$0xff] }
  0x48   : > { %19807 = vmatpush.bf16.msra.mxu0 %v33194_v17  ;;  %v5034_v45 = vld [vmem:[#allocation1 + $0x1b] sm:$0xff]  ;;  %v33251_v53 = vld [vmem:[%s35902_s30 + $0x1e0] sm:$0xff]  ;;  %v33224_v62 = vld [vmem:[%s35902_s30 + $0x108] sm:$0xff] }
  0x49   : > { %19820 = vmatpush.bf16.msra.mxu1 %v33202_v18  ;;  %v33226_v54 = vld [vmem:[%s35902_s30 + $0x118] sm:$0xff]  ;;  %v33225_v58 = vld [vmem:[%s35902_s30 + $0x110] sm:$0xff]  ;;  %v33232_v63 = vld [vmem:[%s35902_s30 + $0x148] sm:$0xff] }
  0x4a   : > { %19833 = vmatpush.bf16.msra.mxu2 %v33210_v19  ;;  %v33234_v55 = vld [vmem:[%s35902_s30 + $0x158] sm:$0xff]  ;;  %v33233_v59 = vld [vmem:[%s35902_s30 + $0x150] sm:$0xff]  ;;  %v33240_v0 = vld [vmem:[%s35902_s30 + $0x188] sm:$0xff] }
  0x4b   : > { %19846 = vmatpush.bf16.msra.mxu3 %v33218_v20  ;;  %v33242_v56 = vld [vmem:[%s35902_s30 + $0x198] sm:$0xff]  ;;  %v33241_v60 = vld [vmem:[%s35902_s30 + $0x190] sm:$0xff]  ;;  %v5036_v4 = vld [vmem:[#allocation1 + $0x2d] sm:$0xff] }
  0x4c   : > { %19808 = vmatpush.bf16.msra.mxu0 %v33193_v22  ;;  %v33250_v57 = vld [vmem:[%s35902_s30 + $0x1d8] sm:$0xff]  ;;  %v33249_v61 = vld [vmem:[%s35902_s30 + $0x1d0] sm:$0xff]  ;;  %v33248_v6 = vld [vmem:[%s35902_s30 + $0x1c8] sm:$0xff] }
  0x4d   : > { %19821 = vmatpush.bf16.msra.mxu1 %v33201_v23  ;;  %v5037_v1 = vld [vmem:[#allocation1 + $0x36] sm:$0xff]  ;;  %v5035_v2 = vld [vmem:[#allocation1 + $0x24] sm:$0xff] }
  0x4e   : > { %19834 = vmatpush.bf16.msra.mxu2 %v33209_v24  ;;  %v5038_v3 = vld [vmem:[#allocation1 + $0x3f] sm:$0xff]  ;;  %v289_v5 = vld [vmem:[%s35916_s27 + $0x8] sm:$0xff]  ;;  %v33260_v19 = vld [vmem:[%s35902_s30 + $0x228] sm:$0xff] }
  0x4f   : > { %19847 = vmatpush.bf16.msra.mxu3 %v33217_v25  ;;  %5040 = vst [vmem:[#allocation1] ss:$9 sm:$0xff] %v289_v5  ;;  %v33223_v7 = vld [vmem:[%s35902_s30 + $0x100] sm:$0xff]  ;;  %v33262_v10 = vld [vmem:[%s35902_s30 + $0x238] sm:$0xff]  ;;  %v33261_v15 = vld [vmem:[%s35902_s30 + $0x230] sm:$0xff] }
  0x50   : > { %19809 = vmatpush.bf16.msra.mxu0 %v33192_v26  ;;  %v33231_v8 = vld [vmem:[%s35902_s30 + $0x140] sm:$0xff]  ;;  %v33270_v11 = vld [vmem:[%s35902_s30 + $0x278] sm:$0xff]  ;;  %v33269_v16 = vld [vmem:[%s35902_s30 + $0x270] sm:$0xff] }
  0x51   : > { %19822 = vmatpush.bf16.msra.mxu1 %v33200_v27  ;;  %v33239_v9 = vld [vmem:[%s35902_s30 + $0x180] sm:$0xff]  ;;  %v33278_v12 = vld [vmem:[%s35902_s30 + $0x2b8] sm:$0xff]  ;;  %v33277_v17 = vld [vmem:[%s35902_s30 + $0x2b0] sm:$0xff] }
  0x52   : > { %19835 = vmatpush.bf16.msra.mxu2 %v33208_v28  ;;  %v33247_v13 = vld [vmem:[%s35902_s30 + $0x1c0] sm:$0xff]  ;;  %v33286_v14 = vld [vmem:[%s35902_s30 + $0x2f8] sm:$0xff]  ;;  %v33285_v18 = vld [vmem:[%s35902_s30 + $0x2f0] sm:$0xff] }
  0x53   : > { %19848 = vmatpush.bf16.msra.mxu3 %v33216_v29  ;;  %v33268_v20 = vld [vmem:[%s35902_s30 + $0x268] sm:$0xff]  ;;  %v33259_v23 = vld [vmem:[%s35902_s30 + $0x220] sm:$0xff]  ;;  %v33258_v27 = vld [vmem:[%s35902_s30 + $0x218] sm:$0xff] }
  0x54   : > { %19810 = vmatpush.bf16.msra.mxu0 %v33191_v30  ;;  %v33276_v21 = vld [vmem:[%s35902_s30 + $0x2a8] sm:$0xff]  ;;  %v33267_v24 = vld [vmem:[%s35902_s30 + $0x260] sm:$0xff]  ;;  %v33266_v28 = vld [vmem:[%s35902_s30 + $0x258] sm:$0xff] }
  0x55   : > { %19823 = vmatpush.bf16.msra.mxu1 %v33199_v31  ;;  %v33284_v22 = vld [vmem:[%s35902_s30 + $0x2e8] sm:$0xff]  ;;  %v33275_v25 = vld [vmem:[%s35902_s30 + $0x2a0] sm:$0xff]  ;;  %v33274_v29 = vld [vmem:[%s35902_s30 + $0x298] sm:$0xff] }
  0x56   : > { %19836 = vmatpush.bf16.msra.mxu2 %v33207_v32  ;;  %v33283_v26 = vld [vmem:[%s35902_s30 + $0x2e0] sm:$0xff]  ;;  %v33282_v30 = vld [vmem:[%s35902_s30 + $0x2d8] sm:$0xff]  ;;  %v33257_v31 = vld [vmem:[%s35902_s30 + $0x210] sm:$0xff] }
  0x57   : > { %19849 = vmatpush.bf16.msra.mxu3 %v33215_v36  ;;  %19811 = vmatmul.bf16.vlgmr.msra.gmra.mxu0 %v5031_v38  ;;  %v33265_v32 = vld [vmem:[%s35902_s30 + $0x250] sm:$0xff]  ;;  %v33264_v36 = vld [vmem:[%s35902_s30 + $0x248] sm:$0xff] }
  0x58   : > { %19855 = vmatpush.bf16.msrb.mxu0 %v33230_v33  ;;  %19824 = vmatmul.bf16.vlgmr.msra.gmra.mxu1 %v5032_v43  ;;  %v33273_v33 = vld [vmem:[%s35902_s30 + $0x290] sm:$0xff]  ;;  %v33280_v38 = vld [vmem:[%s35902_s30 + $0x2c8] sm:$0xff]  ;;  %v33302_v43 = vld [vmem:[%s35902_s30 + $0x378] sm:$0xff] }
  0x59   : > { %19868 = vmatpush.bf16.msrb.mxu1 %v33238_v34  ;;  %19837 = vmatmul.bf16.vlgmr.msra.gmra.mxu2 %v5033_v40  ;;  %v33281_v34 = vld [vmem:[%s35902_s30 + $0x2d0] sm:$0xff]  ;;  %v33263_v40 = vld [vmem:[%s35902_s30 + $0x240] sm:$0xff] }
  0x5a   : > { %19881 = vmatpush.bf16.msrb.mxu2 %v33246_v35  ;;  %19850 = vmatmul.bf16.vlgmr.msra.gmra.mxu3 %v5034_v45  ;;  %v33256_v35 = vld [vmem:[%s35902_s30 + $0x208] sm:$0xff]  ;;  %v33279_v45 = vld [vmem:[%s35902_s30 + $0x2c0] sm:$0xff]  ;;  %v33305_v5 = vld [vmem:[%s35902_s30 + $0x390] sm:$0xff] }
  0x5b   : > { %19894 = vmatpush.bf16.msrb.mxu3 %v33254_v37  ;;  %v33272_v37 = vld [vmem:[%s35902_s30 + $0x288] sm:$0xff] }
  0x5c   : > { %19856 = vmatpush.bf16.msrb.mxu0 %v33229_v39  ;;  %v33255_v39 = vld [vmem:[%s35902_s30 + $0x200] sm:$0xff] }
  0x5d   : > { %19869 = vmatpush.bf16.msrb.mxu1 %v33237_v41  ;;  %v33271_v41 = vld [vmem:[%s35902_s30 + $0x280] sm:$0xff] }
  0x5e   : > { %19882 = vmatpush.bf16.msrb.mxu2 %v33245_v42  ;;  %v33294_v42 = vld [vmem:[%s35902_s30 + $0x338] sm:$0xff] }
  0x5f   : > { %19895 = vmatpush.bf16.msrb.mxu3 %v33253_v44  ;;  %v33310_v44 = vld [vmem:[%s35902_s30 + $0x3b8] sm:$0xff] }
  0x60   : > { %19857 = vmatpush.bf16.msrb.mxu0 %v33228_v46  ;;  %v5041_v46 = vld [vmem:[#allocation1] sm:$0xff] }
  0x61   : > { %19870 = vmatpush.bf16.msrb.mxu1 %v33236_v47  ;;  %v33318_v47 = vld [vmem:[%s35902_s30 + $0x3f8] sm:$0xff] }
  0x62   : > { %19883 = vmatpush.bf16.msrb.mxu2 %v33244_v48  ;;  %v5043_v48 = vld [vmem:[#allocation1 + $0x12] sm:$0xff] }
  0x63   : > { %19896 = vmatpush.bf16.msrb.mxu3 %v33252_v49  ;;  %v33293_v49 = vld [vmem:[%s35902_s30 + $0x330] sm:$0xff] }
  0x64   : > { %19858 = vmatpush.bf16.msrb.mxu0 %v33227_v50  ;;  %v5042_v50 = vld [vmem:[#allocation1 + $0x9] sm:$0xff] }
  0x65   : > { %19871 = vmatpush.bf16.msrb.mxu1 %v33235_v51  ;;  %v33301_v51 = vld [vmem:[%s35902_s30 + $0x370] sm:$0xff] }
  0x66   : > { %19884 = vmatpush.bf16.msrb.mxu2 %v33243_v52  ;;  %v5044_v52 = vld [vmem:[#allocation1 + $0x1b] sm:$0xff] }
  0x67   : > { %19897 = vmatpush.bf16.msrb.mxu3 %v33251_v53  ;;  %v33309_v53 = vld [vmem:[%s35902_s30 + $0x3b0] sm:$0xff] }
  0x68   : > { %19859 = vmatpush.bf16.msrb.mxu0 %v33226_v54  ;;  %v33317_v54 = vld [vmem:[%s35902_s30 + $0x3f0] sm:$0xff] }
  0x69   : > { %19872 = vmatpush.bf16.msrb.mxu1 %v33234_v55  ;;  %v33292_v55 = vld [vmem:[%s35902_s30 + $0x328] sm:$0xff] }
  0x6a   : > { %19885 = vmatpush.bf16.msrb.mxu2 %v33242_v56  ;;  %v33300_v56 = vld [vmem:[%s35902_s30 + $0x368] sm:$0xff] }
  0x6b   : > { %19898 = vmatpush.bf16.msrb.mxu3 %v33250_v57  ;;  %v33308_v57 = vld [vmem:[%s35902_s30 + $0x3a8] sm:$0xff] }
  0x6c   : > { %19860 = vmatpush.bf16.msrb.mxu0 %v33225_v58  ;;  %v33316_v58 = vld [vmem:[%s35902_s30 + $0x3e8] sm:$0xff] }
  0x6d   : > { %19873 = vmatpush.bf16.msrb.mxu1 %v33233_v59  ;;  %v33291_v59 = vld [vmem:[%s35902_s30 + $0x320] sm:$0xff] }
  0x6e   : > { %19886 = vmatpush.bf16.msrb.mxu2 %v33241_v60  ;;  %v33299_v60 = vld [vmem:[%s35902_s30 + $0x360] sm:$0xff] }
  0x6f   : > { %19899 = vmatpush.bf16.msrb.mxu3 %v33249_v61  ;;  %v33307_v61 = vld [vmem:[%s35902_s30 + $0x3a0] sm:$0xff] }
  0x70   : > { %19861 = vmatpush.bf16.msrb.mxu0 %v33224_v62  ;;  %v33315_v62 = vld [vmem:[%s35902_s30 + $0x3e0] sm:$0xff] }
  0x71   : > { %19874 = vmatpush.bf16.msrb.mxu1 %v33232_v63  ;;  %v33290_v63 = vld [vmem:[%s35902_s30 + $0x318] sm:$0xff] }
  0x72   : > { %19887 = vmatpush.bf16.msrb.mxu2 %v33240_v0  ;;  %v33298_v0 = vld [vmem:[%s35902_s30 + $0x358] sm:$0xff] }
  0x73   : > { %19900 = vmatpush.bf16.msrb.mxu3 %v33248_v6  ;;  %v33313_v6 = vld [vmem:[%s35902_s30 + $0x3d0] sm:$0xff] }
  0x74   : > { %19862 = vmatpush.bf16.msrb.mxu0 %v33223_v7  ;;  %v33288_v7 = vld [vmem:[%s35902_s30 + $0x308] sm:$0xff] }
  0x75   : > { %19875 = vmatpush.bf16.msrb.mxu1 %v33231_v8  ;;  %v33296_v8 = vld [vmem:[%s35902_s30 + $0x348] sm:$0xff] }
  0x76   : > { %19888 = vmatpush.bf16.msrb.mxu2 %v33239_v9  ;;  %v33304_v9 = vld [vmem:[%s35902_s30 + $0x388] sm:$0xff] }
  0x77   : > { %19901 = vmatpush.bf16.msrb.mxu3 %v33247_v13  ;;  %19863 = vmatmul.bf16.vlgmr.msrb.gmra.mxu0 %v5035_v2  ;;  %v33314_v2 = vld [vmem:[%s35902_s30 + $0x3d8] sm:$0xff] }
  0x78   : > { %19907 = vmatpush.bf16.msra.mxu0 %v33262_v10  ;;  %19876 = vmatmul.bf16.vlgmr.msrb.gmra.mxu1 %v5036_v4  ;;  %v33297_v4 = vld [vmem:[%s35902_s30 + $0x350] sm:$0xff]  ;;  %v5045_v10 = vld [vmem:[#allocation1 + $0x24] sm:$0xff] }
  0x79   : > { %19920 = vmatpush.bf16.msra.mxu1 %v33270_v11  ;;  %19889 = vmatmul.bf16.vlgmr.msrb.gmra.mxu2 %v5037_v1  ;;  %v33306_v1 = vld [vmem:[%s35902_s30 + $0x398] sm:$0xff]  ;;  %v5047_v11 = vld [vmem:[#allocation1 + $0x36] sm:$0xff] }
  0x7a   : > { %19933 = vmatpush.bf16.msra.mxu2 %v33278_v12  ;;  %19902 = vmatmul.bf16.vlgmr.msrb.gmra.mxu3 %v5038_v3  ;;  %v33289_v3 = vld [vmem:[%s35902_s30 + $0x310] sm:$0xff]  ;;  %v5046_v12 = vld [vmem:[#allocation1 + $0x2d] sm:$0xff] }
  0x7b   : > { %19946 = vmatpush.bf16.msra.mxu3 %v33286_v14  ;;  %v5048_v13 = vld [vmem:[#allocation1 + $0x3f] sm:$0xff]  ;;  %v290_v14 = vld [vmem:[%s35916_s27 + $0x10] sm:$0xff] }
  0x7c   : > { %19908 = vmatpush.bf16.msra.mxu0 %v33261_v15  ;;  %v33312_v15 = vld [vmem:[%s35902_s30 + $0x3c8] sm:$0xff]  ;;  %5050 = vst [vmem:[#allocation1] ss:$9 sm:$0xff] %v290_v14  ;;  %v33378_v14 = vld [vmem:[%s35902_s30 + $0x5d8] sm:$0xff] }
  0x7d   : > { %19921 = vmatpush.bf16.msra.mxu1 %v33269_v16  ;;  %v33287_v16 = vld [vmem:[%s35902_s30 + $0x300] sm:$0xff] }
  0x7e   : > { %19934 = vmatpush.bf16.msra.mxu2 %v33277_v17  ;;  %v33295_v17 = vld [vmem:[%s35902_s30 + $0x340] sm:$0xff] }
  0x7f   : > { %19947 = vmatpush.bf16.msra.mxu3 %v33285_v18  ;;  %v33326_v18 = vld [vmem:[%s35902_s30 + $0x438] sm:$0xff] }
  0x80   : > { %19909 = vmatpush.bf16.msra.mxu0 %v33260_v19  ;;  %v33303_v19 = vld [vmem:[%s35902_s30 + $0x380] sm:$0xff] }
  0x81   : > { %19922 = vmatpush.bf16.msra.mxu1 %v33268_v20  ;;  %v33334_v20 = vld [vmem:[%s35902_s30 + $0x478] sm:$0xff] }
  0x82   : > { %19935 = vmatpush.bf16.msra.mxu2 %v33276_v21  ;;  %v33342_v21 = vld [vmem:[%s35902_s30 + $0x4b8] sm:$0xff] }
  0x83   : > { %19948 = vmatpush.bf16.msra.mxu3 %v33284_v22  ;;  %v33311_v22 = vld [vmem:[%s35902_s30 + $0x3c0] sm:$0xff] }
  0x84   : > { %19910 = vmatpush.bf16.msra.mxu0 %v33259_v23  ;;  %v33350_v23 = vld [vmem:[%s35902_s30 + $0x4f8] sm:$0xff] }
  0x85   : > { %19923 = vmatpush.bf16.msra.mxu1 %v33267_v24  ;;  %v33325_v24 = vld [vmem:[%s35902_s30 + $0x430] sm:$0xff] }
  0x86   : > { %19936 = vmatpush.bf16.msra.mxu2 %v33275_v25  ;;  %v33333_v25 = vld [vmem:[%s35902_s30 + $0x470] sm:$0xff] }
  0x87   : > { %19949 = vmatpush.bf16.msra.mxu3 %v33283_v26  ;;  %v33341_v26 = vld [vmem:[%s35902_s30 + $0x4b0] sm:$0xff] }
  0x88   : > { %19911 = vmatpush.bf16.msra.mxu0 %v33258_v27  ;;  %v33349_v27 = vld [vmem:[%s35902_s30 + $0x4f0] sm:$0xff] }
  0x89   : > { %19924 = vmatpush.bf16.msra.mxu1 %v33266_v28  ;;  %v33324_v28 = vld [vmem:[%s35902_s30 + $0x428] sm:$0xff] }
  0x8a   : > { %19937 = vmatpush.bf16.msra.mxu2 %v33274_v29  ;;  %v33332_v29 = vld [vmem:[%s35902_s30 + $0x468] sm:$0xff] }
  0x8b   : > { %19950 = vmatpush.bf16.msra.mxu3 %v33282_v30  ;;  %v33340_v30 = vld [vmem:[%s35902_s30 + $0x4a8] sm:$0xff] }
  0x8c   : > { %19912 = vmatpush.bf16.msra.mxu0 %v33257_v31  ;;  %v33348_v31 = vld [vmem:[%s35902_s30 + $0x4e8] sm:$0xff] }
  0x8d   : > { %19925 = vmatpush.bf16.msra.mxu1 %v33265_v32  ;;  %v33323_v32 = vld [vmem:[%s35902_s30 + $0x420] sm:$0xff] }
  0x8e   : > { %19938 = vmatpush.bf16.msra.mxu2 %v33273_v33  ;;  %v33331_v33 = vld [vmem:[%s35902_s30 + $0x460] sm:$0xff] }
  0x8f   : > { %19951 = vmatpush.bf16.msra.mxu3 %v33281_v34  ;;  %v33339_v34 = vld [vmem:[%s35902_s30 + $0x4a0] sm:$0xff] }
  0x90   : > { %19913 = vmatpush.bf16.msra.mxu0 %v33256_v35  ;;  %v33347_v35 = vld [vmem:[%s35902_s30 + $0x4e0] sm:$0xff] }
  0x91   : > { %19926 = vmatpush.bf16.msra.mxu1 %v33264_v36  ;;  %v33322_v36 = vld [vmem:[%s35902_s30 + $0x418] sm:$0xff] }
  0x92   : > { %19939 = vmatpush.bf16.msra.mxu2 %v33272_v37  ;;  %v33330_v37 = vld [vmem:[%s35902_s30 + $0x458] sm:$0xff] }
  0x93   : > { %19952 = vmatpush.bf16.msra.mxu3 %v33280_v38  ;;  %v33338_v38 = vld [vmem:[%s35902_s30 + $0x498] sm:$0xff] }
  0x94   : > { %19914 = vmatpush.bf16.msra.mxu0 %v33255_v39  ;;  %v33346_v39 = vld [vmem:[%s35902_s30 + $0x4d8] sm:$0xff] }
  0x95   : > { %19927 = vmatpush.bf16.msra.mxu1 %v33263_v40  ;;  %v33321_v40 = vld [vmem:[%s35902_s30 + $0x410] sm:$0xff] }
  0x96   : > { %19940 = vmatpush.bf16.msra.mxu2 %v33271_v41  ;;  %v33329_v41 = vld [vmem:[%s35902_s30 + $0x450] sm:$0xff] }
  0x97   : > { %19953 = vmatpush.bf16.msra.mxu3 %v33279_v45  ;;  %19915 = vmatmul.bf16.vlgmr.msra.gmra.mxu0 %v5041_v46  ;;  %v33328_v45 = vld [vmem:[%s35902_s30 + $0x448] sm:$0xff] }
  0x98   : > { %19959 = vmatpush.bf16.msrb.mxu0 %v33294_v42  ;;  %19928 = vmatmul.bf16.vlgmr.msra.gmra.mxu1 %v5042_v50  ;;  %v33337_v42 = vld [vmem:[%s35902_s30 + $0x490] sm:$0xff]  ;;  %v33336_v46 = vld [vmem:[%s35902_s30 + $0x488] sm:$0xff]  ;;  %v33335_v50 = vld [vmem:[%s35902_s30 + $0x480] sm:$0xff] }
  0x99   : > { %19972 = vmatpush.bf16.msrb.mxu1 %v33302_v43  ;;  %19941 = vmatmul.bf16.vlgmr.msra.gmra.mxu2 %v5043_v48  ;;  %v33345_v43 = vld [vmem:[%s35902_s30 + $0x4d0] sm:$0xff]  ;;  %v33319_v48 = vld [vmem:[%s35902_s30 + $0x400] sm:$0xff] }
  0x9a   : > { %19985 = vmatpush.bf16.msrb.mxu2 %v33310_v44  ;;  %19954 = vmatmul.bf16.vlgmr.msra.gmra.mxu3 %v5044_v52  ;;  %v33320_v44 = vld [vmem:[%s35902_s30 + $0x408] sm:$0xff]  ;;  %v33366_v52 = vld [vmem:[%s35902_s30 + $0x578] sm:$0xff] }
  0x9b   : > { %19998 = vmatpush.bf16.msrb.mxu3 %v33318_v47  ;;  %v33344_v47 = vld [vmem:[%s35902_s30 + $0x4c8] sm:$0xff] }
  0x9c   : > { %19960 = vmatpush.bf16.msrb.mxu0 %v33293_v49  ;;  %v33327_v49 = vld [vmem:[%s35902_s30 + $0x440] sm:$0xff] }
  0x9d   : > { %19973 = vmatpush.bf16.msrb.mxu1 %v33301_v51  ;;  %v33358_v51 = vld [vmem:[%s35902_s30 + $0x538] sm:$0xff] }
  0x9e   : > { %19986 = vmatpush.bf16.msrb.mxu2 %v33309_v53  ;;  %v33374_v53 = vld [vmem:[%s35902_s30 + $0x5b8] sm:$0xff] }
  0x9f   : > { %19999 = vmatpush.bf16.msrb.mxu3 %v33317_v54  ;;  %v33343_v54 = vld [vmem:[%s35902_s30 + $0x4c0] sm:$0xff] }
  0xa0   : > { %19961 = vmatpush.bf16.msrb.mxu0 %v33292_v55  ;;  %v5051_v55 = vld [vmem:[#allocation1] sm:$0xff] }
  0xa1   : > { %19974 = vmatpush.bf16.msrb.mxu1 %v33300_v56  ;;  %v5053_v56 = vld [vmem:[#allocation1 + $0x12] sm:$0xff] }
  0xa2   : > { %19987 = vmatpush.bf16.msrb.mxu2 %v33308_v57  ;;  %v33382_v57 = vld [vmem:[%s35902_s30 + $0x5f8] sm:$0xff] }
  0xa3   : > { %20000 = vmatpush.bf16.msrb.mxu3 %v33316_v58  ;;  %v5052_v58 = vld [vmem:[#allocation1 + $0x9] sm:$0xff] }
  0xa4   : > { %19962 = vmatpush.bf16.msrb.mxu0 %v33291_v59  ;;  %v33357_v59 = vld [vmem:[%s35902_s30 + $0x530] sm:$0xff] }
  0xa5   : > { %19975 = vmatpush.bf16.msrb.mxu1 %v33299_v60  ;;  %v5054_v60 = vld [vmem:[#allocation1 + $0x1b] sm:$0xff] }
  0xa6   : > { %19988 = vmatpush.bf16.msrb.mxu2 %v33307_v61  ;;  %v33365_v61 = vld [vmem:[%s35902_s30 + $0x570] sm:$0xff] }
  0xa7   : > { %20001 = vmatpush.bf16.msrb.mxu3 %v33315_v62  ;;  %v33373_v62 = vld [vmem:[%s35902_s30 + $0x5b0] sm:$0xff] }
  0xa8   : > { %19963 = vmatpush.bf16.msrb.mxu0 %v33290_v63  ;;  %v33381_v63 = vld [vmem:[%s35902_s30 + $0x5f0] sm:$0xff] }
  0xa9   : > { %19976 = vmatpush.bf16.msrb.mxu1 %v33298_v0  ;;  %v33356_v0 = vld [vmem:[%s35902_s30 + $0x528] sm:$0xff] }
  0xaa   : > { %19989 = vmatpush.bf16.msrb.mxu2 %v33306_v1  ;;  %v33364_v1 = vld [vmem:[%s35902_s30 + $0x568] sm:$0xff] }
  0xab   : > { %20002 = vmatpush.bf16.msrb.mxu3 %v33314_v2  ;;  %v33372_v2 = vld [vmem:[%s35902_s30 + $0x5a8] sm:$0xff] }
  0xac   : > { %19964 = vmatpush.bf16.msrb.mxu0 %v33289_v3  ;;  %v33380_v3 = vld [vmem:[%s35902_s30 + $0x5e8] sm:$0xff] }
  0xad   : > { %19977 = vmatpush.bf16.msrb.mxu1 %v33297_v4  ;;  %v33355_v4 = vld [vmem:[%s35902_s30 + $0x520] sm:$0xff] }
  0xae   : > { %19990 = vmatpush.bf16.msrb.mxu2 %v33305_v5 }
  0xaf   : > { %20003 = vmatpush.bf16.msrb.mxu3 %v33313_v6  ;;  %v33363_v6 = vld [vmem:[%s35902_s30 + $0x560] sm:$0xff] }
  0xb0   : > { %19965 = vmatpush.bf16.msrb.mxu0 %v33288_v7  ;;  %v33371_v7 = vld [vmem:[%s35902_s30 + $0x5a0] sm:$0xff] }
  0xb1   : > { %19978 = vmatpush.bf16.msrb.mxu1 %v33296_v8 }
  0xb2   : > { %19991 = vmatpush.bf16.msrb.mxu2 %v33304_v9  ;;  %v33379_v9 = vld [vmem:[%s35902_s30 + $0x5e0] sm:$0xff] }
  0xb3   : > { %20004 = vmatpush.bf16.msrb.mxu3 %v33312_v15 }
  0xb4   : > { %19966 = vmatpush.bf16.msrb.mxu0 %v33287_v16  ;;  %v33353_v16 = vld [vmem:[%s35902_s30 + $0x510] sm:$0xff] }
  0xb5   : > { %19979 = vmatpush.bf16.msrb.mxu1 %v33295_v17 }
  0xb6   : > { %19992 = vmatpush.bf16.msrb.mxu2 %v33303_v19  ;;  %v33361_v19 = vld [vmem:[%s35902_s30 + $0x550] sm:$0xff] }
  0xb7   : > { %20005 = vmatpush.bf16.msrb.mxu3 %v33311_v22  ;;  %19967 = vmatmul.bf16.vlgmr.msrb.gmra.mxu0 %v5045_v10 }
  0xb8   : > { %20011 = vmatpush.bf16.msra.mxu0 %v33326_v18  ;;  %19980 = vmatmul.bf16.vlgmr.msrb.gmra.mxu1 %v5046_v12  ;;  %v33362_v12 = vld [vmem:[%s35902_s30 + $0x558] sm:$0xff] }
  0xb9   : > { %20024 = vmatpush.bf16.msra.mxu1 %v33334_v20  ;;  %19993 = vmatmul.bf16.vlgmr.msrb.gmra.mxu2 %v5047_v11  ;;  %v33354_v11 = vld [vmem:[%s35902_s30 + $0x518] sm:$0xff]  ;;  %v33369_v20 = vld [vmem:[%s35902_s30 + $0x590] sm:$0xff] }
  0xba   : > { %20037 = vmatpush.bf16.msra.mxu2 %v33342_v21  ;;  %20006 = vmatmul.bf16.vlgmr.msrb.gmra.mxu3 %v5048_v13  ;;  %v33370_v13 = vld [vmem:[%s35902_s30 + $0x598] sm:$0xff] }
  0xbb   : > { %20050 = vmatpush.bf16.msra.mxu3 %v33350_v23  ;;  %v33377_v23 = vld [vmem:[%s35902_s30 + $0x5d0] sm:$0xff] }
  0xbc   : > { %20012 = vmatpush.bf16.msra.mxu0 %v33325_v24 }
  0xbd   : > { %20025 = vmatpush.bf16.msra.mxu1 %v33333_v25  ;;  %v33352_v25 = vld [vmem:[%s35902_s30 + $0x508] sm:$0xff] }
  0xbe   : > { %20038 = vmatpush.bf16.msra.mxu2 %v33341_v26  ;;  %v33360_v26 = vld [vmem:[%s35902_s30 + $0x548] sm:$0xff] }
  0xbf   : > { %20051 = vmatpush.bf16.msra.mxu3 %v33349_v27  ;;  %v33368_v27 = vld [vmem:[%s35902_s30 + $0x588] sm:$0xff] }
  0xc0   : > { %20013 = vmatpush.bf16.msra.mxu0 %v33324_v28  ;;  %v5055_v28 = vld [vmem:[#allocation1 + $0x24] sm:$0xff] }
  0xc1   : > { %20026 = vmatpush.bf16.msra.mxu1 %v33332_v29  ;;  %v5057_v29 = vld [vmem:[#allocation1 + $0x36] sm:$0xff] }
  0xc2   : > { %20039 = vmatpush.bf16.msra.mxu2 %v33340_v30  ;;  %v5056_v30 = vld [vmem:[#allocation1 + $0x2d] sm:$0xff] }
  0xc3   : > { %20052 = vmatpush.bf16.msra.mxu3 %v33348_v31  ;;  %v5058_v31 = vld [vmem:[#allocation1 + $0x3f] sm:$0xff] }
  0xc4   : > { %20014 = vmatpush.bf16.msra.mxu0 %v33323_v32  ;;  %v291_v32 = vld [vmem:[%s35916_s27 + $0x18] sm:$0xff] }
  0xc5   : > { %20027 = vmatpush.bf16.msra.mxu1 %v33331_v33  ;;  %v33376_v33 = vld [vmem:[%s35902_s30 + $0x5c8] sm:$0xff]  ;;  %5060 = vst [vmem:[#allocation1] ss:$9 sm:$0xff] %v291_v32 }
  0xc6   : > { %20040 = vmatpush.bf16.msra.mxu2 %v33339_v34  ;;  %v33420_v32 = vld [vmem:[%s35902_s30 + $0x728] sm:$0xff] }
  0xc7   : > { %20053 = vmatpush.bf16.msra.mxu3 %v33347_v35  ;;  %v33351_v35 = vld [vmem:[%s35902_s30 + $0x500] sm:$0xff] }
  0xc8   : > { %20015 = vmatpush.bf16.msra.mxu0 %v33322_v36  ;;  %v33359_v36 = vld [vmem:[%s35902_s30 + $0x540] sm:$0xff] }
  0xc9   : > { %20028 = vmatpush.bf16.msra.mxu1 %v33330_v37  ;;  %v33367_v37 = vld [vmem:[%s35902_s30 + $0x580] sm:$0xff] }
  0xca   : > { %20041 = vmatpush.bf16.msra.mxu2 %v33338_v38  ;;  %v33390_v38 = vld [vmem:[%s35902_s30 + $0x638] sm:$0xff] }
  0xcb   : > { %20054 = vmatpush.bf16.msra.mxu3 %v33346_v39  ;;  %v33398_v39 = vld [vmem:[%s35902_s30 + $0x678] sm:$0xff] }
  0xcc   : > { %20016 = vmatpush.bf16.msra.mxu0 %v33321_v40 }
  0xcd   : > { %20029 = vmatpush.bf16.msra.mxu1 %v33329_v41  ;;  %v33406_v41 = vld [vmem:[%s35902_s30 + $0x6b8] sm:$0xff] }
  0xce   : > { %20042 = vmatpush.bf16.msra.mxu2 %v33337_v42  ;;  %v33375_v42 = vld [vmem:[%s35902_s30 + $0x5c0] sm:$0xff] }
  0xcf   : > { %20055 = vmatpush.bf16.msra.mxu3 %v33345_v43  ;;  %v33414_v43 = vld [vmem:[%s35902_s30 + $0x6f8] sm:$0xff] }
  0xd0   : > { %20017 = vmatpush.bf16.msra.mxu0 %v33320_v44  ;;  %v33389_v44 = vld [vmem:[%s35902_s30 + $0x630] sm:$0xff] }
  0xd1   : > { %20030 = vmatpush.bf16.msra.mxu1 %v33328_v45  ;;  %v33397_v45 = vld [vmem:[%s35902_s30 + $0x670] sm:$0xff] }
  0xd2   : > { %20043 = vmatpush.bf16.msra.mxu2 %v33336_v46  ;;  %v33405_v46 = vld [vmem:[%s35902_s30 + $0x6b0] sm:$0xff] }
  0xd3   : > { %20056 = vmatpush.bf16.msra.mxu3 %v33344_v47  ;;  %v33413_v47 = vld [vmem:[%s35902_s30 + $0x6f0] sm:$0xff] }
  0xd4   : > { %20018 = vmatpush.bf16.msra.mxu0 %v33319_v48  ;;  %v19812_v5 = vpop.f32.mrf.mxu0  ;;  %v33388_v48 = vld [vmem:[%s35902_s30 + $0x628] sm:$0xff] }
  0xd5   : > { %20031 = vmatpush.bf16.msra.mxu1 %v33327_v49  ;;  %v19825_v8 = vpop.f32.mrf.mxu1  ;;  %v33396_v49 = vld [vmem:[%s35902_s30 + $0x668] sm:$0xff] }
  0xd6   : > { %20044 = vmatpush.bf16.msra.mxu2 %v33335_v50  ;;  %v19826_v10 = vadd.f32 %v19825_v8, %v19812_v5  ;;  %v33404_v50 = vld [vmem:[%s35902_s30 + $0x6a8] sm:$0xff] }
  0xd7   : > { %20057 = vmatpush.bf16.msra.mxu3 %v33343_v54  ;;  %20019 = vmatmul.bf16.vlgmr.msra.gmra.mxu0 %v5051_v55  ;;  %v33403_v54 = vld [vmem:[%s35902_s30 + $0x6a0] sm:$0xff] }
  0xd8   : > { %20063 = vmatpush.bf16.msrb.mxu0 %v33358_v51  ;;  %20032 = vmatmul.bf16.vlgmr.msra.gmra.mxu1 %v5052_v58  ;;  %v33412_v51 = vld [vmem:[%s35902_s30 + $0x6e8] sm:$0xff]  ;;  %v33411_v58 = vld [vmem:[%s35902_s30 + $0x6e0] sm:$0xff] }
  0xd9   : > { %20076 = vmatpush.bf16.msrb.mxu1 %v33366_v52  ;;  %20045 = vmatmul.bf16.vlgmr.msra.gmra.mxu2 %v5053_v56  ;;  %v33387_v52 = vld [vmem:[%s35902_s30 + $0x620] sm:$0xff] }
  0xda   : > { %20089 = vmatpush.bf16.msrb.mxu2 %v33374_v53  ;;  %20058 = vmatmul.bf16.vlgmr.msra.gmra.mxu3 %v5054_v60  ;;  %v33395_v53 = vld [vmem:[%s35902_s30 + $0x660] sm:$0xff] }
  0xdb   : > { %20102 = vmatpush.bf16.msrb.mxu3 %v33382_v57 }
  0xdc   : > { %20064 = vmatpush.bf16.msrb.mxu0 %v33357_v59  ;;  %v19838_v15 = vpop.f32.mrf.mxu2  ;;  %v19814_v18 = vpop.f32.mrf.mxu0  ;;  %v33386_v59 = vld [vmem:[%s35902_s30 + $0x618] sm:$0xff] }
  0xdd   : > { %20077 = vmatpush.bf16.msrb.mxu1 %v33365_v61  ;;  %v19839_v17 = vadd.f32 %v19838_v15, %v19826_v10  ;;  %v19851_v21 = vpop.f32.mrf.mxu3  ;;  %v19827_v22 = vpop.f32.mrf.mxu1  ;;  %v33394_v61 = vld [vmem:[%s35902_s30 + $0x658] sm:$0xff]  ;;  %v33384_v10 = vld [vmem:[%s35902_s30 + $0x608] sm:$0xff]  ;;  %v33383_v15 = vld [vmem:[%s35902_s30 + $0x600] sm:$0xff] }
  0xde   : > { %20090 = vmatpush.bf16.msrb.mxu2 %v33373_v62  ;;  %v33402_v62 = vld [vmem:[%s35902_s30 + $0x698] sm:$0xff]  ;;  %v33407_v22 = vld [vmem:[%s35902_s30 + $0x6c0] sm:$0xff] }
  0xdf   : > { %20103 = vmatpush.bf16.msrb.mxu3 %v33381_v63  ;;  %v19852_v24 = vadd.f32 %v19851_v21, %v19839_v17  ;;  %v33399_v17 = vld [vmem:[%s35902_s30 + $0x680] sm:$0xff]  ;;  %v33438_v21 = vld [vmem:[%s35902_s30 + $0x7b8] sm:$0xff] }
  0xe0   : > { %20065 = vmatpush.bf16.msrb.mxu0 %v33356_v0  ;;  %v33410_v0 = vld [vmem:[%s35902_s30 + $0x6d8] sm:$0xff] }
  0xe1   : > { %20078 = vmatpush.bf16.msrb.mxu1 %v33364_v1 }
  0xe2   : > { %20091 = vmatpush.bf16.msrb.mxu2 %v33372_v2  ;;  %v33385_v2 = vld [vmem:[%s35902_s30 + $0x610] sm:$0xff] }
  0xe3   : > { %20104 = vmatpush.bf16.msrb.mxu3 %v33380_v3  ;;  %v33393_v3 = vld [vmem:[%s35902_s30 + $0x650] sm:$0xff] }
  0xe4   : > { %20066 = vmatpush.bf16.msrb.mxu0 %v33355_v4  ;;  %v19840_v34 = vpop.f32.mrf.mxu2  ;;  %v33401_v4 = vld [vmem:[%s35902_s30 + $0x690] sm:$0xff] }
  0xe5   : > { %20079 = vmatpush.bf16.msrb.mxu1 %v33363_v6  ;;  %v19853_v40 = vpop.f32.mrf.mxu3  ;;  %v33436_v34 = vld [vmem:[%s35902_s30 + $0x7a8] sm:$0xff] }
  0xe6   : > { %20092 = vmatpush.bf16.msrb.mxu2 %v33371_v7  ;;  %v33435_v40 = vld [vmem:[%s35902_s30 + $0x7a0] sm:$0xff] }
  0xe7   : > { %20105 = vmatpush.bf16.msrb.mxu3 %v33379_v9  ;;  %v33409_v9 = vld [vmem:[%s35902_s30 + $0x6d0] sm:$0xff] }
  0xe8   : > { %20067 = vmatpush.bf16.msrb.mxu0 %v33354_v11  ;;  %v33392_v11 = vld [vmem:[%s35902_s30 + $0x648] sm:$0xff] }
  0xe9   : > { %20080 = vmatpush.bf16.msrb.mxu1 %v33362_v12  ;;  %v33400_v12 = vld [vmem:[%s35902_s30 + $0x688] sm:$0xff] }
  0xea   : > { %20093 = vmatpush.bf16.msrb.mxu2 %v33370_v13 }
  0xeb   : > { %20106 = vmatpush.bf16.msrb.mxu3 %v33378_v14  ;;  %v33408_v14 = vld [vmem:[%s35902_s30 + $0x6c8] sm:$0xff] }
  0xec   : > { %20068 = vmatpush.bf16.msrb.mxu0 %v33353_v16  ;;  %v33391_v16 = vld [vmem:[%s35902_s30 + $0x640] sm:$0xff] }
  0xed   : > { %20081 = vmatpush.bf16.msrb.mxu1 %v33361_v19  ;;  %v33422_v19 = vld [vmem:[%s35902_s30 + $0x738] sm:$0xff] }
  0xee   : > { %20094 = vmatpush.bf16.msrb.mxu2 %v33369_v20  ;;  %v33430_v20 = vld [vmem:[%s35902_s30 + $0x778] sm:$0xff] }
  0xef   : > { %20107 = vmatpush.bf16.msrb.mxu3 %v33377_v23  ;;  %v5061_v23 = vld [vmem:[#allocation1] sm:$0xff] }
  0xf0   : > { %20069 = vmatpush.bf16.msrb.mxu0 %v33352_v25  ;;  %v33446_v25 = vld [vmem:[%s35902_s30 + $0x7f8] sm:$0xff] }
  0xf1   : > { %20082 = vmatpush.bf16.msrb.mxu1 %v33360_v26  ;;  %v5062_v26 = vld [vmem:[#allocation1 + $0x9] sm:$0xff] }
  0xf2   : > { %20095 = vmatpush.bf16.msrb.mxu2 %v33368_v27  ;;  %v33421_v27 = vld [vmem:[%s35902_s30 + $0x730] sm:$0xff] }
  0xf3   : > { %20108 = vmatpush.bf16.msrb.mxu3 %v33376_v33  ;;  %v33428_v33 = vld [vmem:[%s35902_s30 + $0x768] sm:$0xff] }
  0xf4   : > { %20070 = vmatpush.bf16.msrb.mxu0 %v33351_v35  ;;  %v19864_v55 = vpop.f32.mrf.mxu0  ;;  %v33444_v35 = vld [vmem:[%s35902_s30 + $0x7e8] sm:$0xff] }
  0xf5   : > { %20083 = vmatpush.bf16.msrb.mxu1 %v33359_v36  ;;  %v19877_v56 = vpop.f32.mrf.mxu1  ;;  %v19865_v57 = vadd.f32 %v19864_v55, %v19852_v24  ;;  %v5063_v24 = vld [vmem:[#allocation1 + $0x12] sm:$0xff]  ;;  %v33433_v55 = vld [vmem:[%s35902_s30 + $0x790] sm:$0xff] }
  0xf6   : > { %20096 = vmatpush.bf16.msrb.mxu2 %v33367_v37 }
  0xf7   : > { %20109 = vmatpush.bf16.msrb.mxu3 %v33375_v42  ;;  %20071 = vmatmul.bf16.vlgmr.msrb.gmra.mxu0 %v5055_v28  ;;  %v19878_v60 = vadd.f32 %v19877_v56, %v19865_v57  ;;  %v5064_v28 = vld [vmem:[#allocation1 + $0x1b] sm:$0xff] }
  0xf8   : > { %20115 = vmatpush.bf16.msra.mxu0 %v33390_v38  ;;  %20084 = vmatmul.bf16.vlgmr.msrb.gmra.mxu1 %v5056_v30  ;;  %v33437_v30 = vld [vmem:[%s35902_s30 + $0x7b0] sm:$0xff]  ;;  %v33419_v38 = vld [vmem:[%s35902_s30 + $0x720] sm:$0xff] }
  0xf9   : > { %20128 = vmatpush.bf16.msra.mxu1 %v33398_v39  ;;  %20097 = vmatmul.bf16.vlgmr.msrb.gmra.mxu2 %v5057_v29  ;;  %v33429_v29 = vld [vmem:[%s35902_s30 + $0x770] sm:$0xff]  ;;  %v33427_v39 = vld [vmem:[%s35902_s30 + $0x760] sm:$0xff] }
  0xfa   : > { %20141 = vmatpush.bf16.msra.mxu2 %v33406_v41  ;;  %20110 = vmatmul.bf16.vlgmr.msrb.gmra.mxu3 %v5058_v31  ;;  %v33445_v31 = vld [vmem:[%s35902_s30 + $0x7f0] sm:$0xff] }
  0xfb   : > { %20154 = vmatpush.bf16.msra.mxu3 %v33414_v43  ;;  %v33443_v43 = vld [vmem:[%s35902_s30 + $0x7e0] sm:$0xff]  ;;  %v33441_v57 = vld [vmem:[%s35902_s30 + $0x7d0] sm:$0xff] }
  0xfc   : > { %20116 = vmatpush.bf16.msra.mxu0 %v33389_v44  ;;  %v19890_v63 = vpop.f32.mrf.mxu2  ;;  %v19866_v6 = vpop.f32.mrf.mxu0  ;;  %v33418_v44 = vld [vmem:[%s35902_s30 + $0x718] sm:$0xff] }
  0xfd   : > { %20129 = vmatpush.bf16.msra.mxu1 %v33397_v45  ;;  %v19891_v1 = vadd.f32 %v19890_v63, %v19878_v60  ;;  %v19903_v5 = vpop.f32.mrf.mxu3  ;;  %v19879_v8 = vpop.f32.mrf.mxu1  ;;  %v33426_v45 = vld [vmem:[%s35902_s30 + $0x758] sm:$0xff]  ;;  %v33432_v60 = vld [vmem:[%s35902_s30 + $0x788] sm:$0xff]  ;;  %v33423_v6 = vld [vmem:[%s35902_s30 + $0x740] sm:$0xff] }
  0xfe   : > { %20142 = vmatpush.bf16.msra.mxu2 %v33405_v46  ;;  %v33434_v46 = vld [vmem:[%s35902_s30 + $0x798] sm:$0xff]  ;;  %v5066_v63 = vld [vmem:[#allocation1 + $0x2d] sm:$0xff] }
  0xff   : > { %20155 = vmatpush.bf16.msra.mxu3 %v33413_v47  ;;  %v19904_v7 = vadd.f32 %v19903_v5, %v19891_v1  ;;  %v33454_v8 = vld [vmem:[%s35902_s30 + $0x838] sm:$0xff] }
 0x100   : > { %20117 = vmatpush.bf16.msra.mxu0 %v33388_v48 }
 0x101   : > { %20130 = vmatpush.bf16.msra.mxu1 %v33396_v49  ;;  %v33442_v49 = vld [vmem:[%s35902_s30 + $0x7d8] sm:$0xff] }
 0x102   : > { %20143 = vmatpush.bf16.msra.mxu2 %v33404_v50 }
 0x103   : > { %20156 = vmatpush.bf16.msra.mxu3 %v33412_v51 }
 0x104   : > { %20118 = vmatpush.bf16.msra.mxu0 %v33387_v52  ;;  %v19892_v13 = vpop.f32.mrf.mxu2  ;;  %v33417_v52 = vld [vmem:[%s35902_s30 + $0x710] sm:$0xff] }
 0x105   : > { %20131 = vmatpush.bf16.msra.mxu1 %v33395_v53  ;;  %v19905_v18 = vpop.f32.mrf.mxu3  ;;  %v33453_v13 = vld [vmem:[%s35902_s30 + $0x830] sm:$0xff] }
 0x106   : > { %20144 = vmatpush.bf16.msra.mxu2 %v33403_v54  ;;  %v33425_v54 = vld [vmem:[%s35902_s30 + $0x750] sm:$0xff]  ;;  %v33460_v18 = vld [vmem:[%s35902_s30 + $0x868] sm:$0xff] }
 0x107   : > { %20157 = vmatpush.bf16.msra.mxu3 %v33411_v58  ;;  %v33416_v58 = vld [vmem:[%s35902_s30 + $0x708] sm:$0xff] }
 0x108   : > { %20119 = vmatpush.bf16.msra.mxu0 %v33386_v59  ;;  %v33424_v59 = vld [vmem:[%s35902_s30 + $0x748] sm:$0xff] }
 0x109   : > { %20132 = vmatpush.bf16.msra.mxu1 %v33394_v61  ;;  %v5065_v61 = vld [vmem:[#allocation1 + $0x24] sm:$0xff] }
 0x10a   : > { %20145 = vmatpush.bf16.msra.mxu2 %v33402_v62  ;;  %v5067_v62 = vld [vmem:[#allocation1 + $0x36] sm:$0xff] }
 0x10b   : > { %20158 = vmatpush.bf16.msra.mxu3 %v33410_v0  ;;  %v5068_v0 = vld [vmem:[#allocation1 + $0x3f] sm:$0xff] }
 0x10c   : > { %20120 = vmatpush.bf16.msra.mxu0 %v33385_v2  ;;  %v292_v2 = vld [vmem:[%s35916_s27 + $0x20] sm:$0xff] }
 0x10d   : > { %20133 = vmatpush.bf16.msra.mxu1 %v33393_v3  ;;  %v33440_v3 = vld [vmem:[%s35902_s30 + $0x7c8] sm:$0xff]  ;;  %5070 = vst [vmem:[#allocation1] ss:$9 sm:$0xff] %v292_v2 }
 0x10e   : > { %20146 = vmatpush.bf16.msra.mxu2 %v33401_v4  ;;  %v33415_v4 = vld [vmem:[%s35902_s30 + $0x700] sm:$0xff]  ;;  %v33492_v2 = vld [vmem:[%s35902_s30 + $0x968] sm:$0xff] }
 0x10f   : > { %20159 = vmatpush.bf16.msra.mxu3 %v33409_v9  ;;  %v33462_v9 = vld [vmem:[%s35902_s30 + $0x878] sm:$0xff] }
 0x110   : > { %20121 = vmatpush.bf16.msra.mxu0 %v33384_v10  ;;  %v33470_v10 = vld [vmem:[%s35902_s30 + $0x8b8] sm:$0xff] }
 0x111   : > { %20134 = vmatpush.bf16.msra.mxu1 %v33392_v11  ;;  %v33439_v11 = vld [vmem:[%s35902_s30 + $0x7c0] sm:$0xff] }
 0x112   : > { %20147 = vmatpush.bf16.msra.mxu2 %v33400_v12  ;;  %v33478_v12 = vld [vmem:[%s35902_s30 + $0x8f8] sm:$0xff] }
 0x113   : > { %20160 = vmatpush.bf16.msra.mxu3 %v33408_v14  ;;  %v33461_v14 = vld [vmem:[%s35902_s30 + $0x870] sm:$0xff] }
 0x114   : > { %20122 = vmatpush.bf16.msra.mxu0 %v33383_v15  ;;  %v19916_v36 = vpop.f32.mrf.mxu0  ;;  %v33469_v15 = vld [vmem:[%s35902_s30 + $0x8b0] sm:$0xff] }
 0x115   : > { %20135 = vmatpush.bf16.msra.mxu1 %v33391_v16  ;;  %v19917_v37 = vadd.f32 %v19916_v36, %v19904_v7  ;;  %v19929_v41 = vpop.f32.mrf.mxu1  ;;  %v33431_v7 = vld [vmem:[%s35902_s30 + $0x780] sm:$0xff]  ;;  %v33477_v16 = vld [vmem:[%s35902_s30 + $0x8f0] sm:$0xff] }
 0x116   : > { %20148 = vmatpush.bf16.msra.mxu2 %v33399_v17  ;;  %v33452_v17 = vld [vmem:[%s35902_s30 + $0x828] sm:$0xff] }
 0x117   : > { %20161 = vmatpush.bf16.msra.mxu3 %v33407_v22  ;;  %20123 = vmatmul.bf16.vlgmr.msra.gmra.mxu0 %v5061_v23  ;;  %v19930_v42 = vadd.f32 %v19929_v41, %v19917_v37  ;;  %v33451_v23 = vld [vmem:[%s35902_s30 + $0x820] sm:$0xff]  ;;  %v33449_v37 = vld [vmem:[%s35902_s30 + $0x810] sm:$0xff] }
 0x118   : > { %20167 = vmatpush.bf16.msrb.mxu0 %v33422_v19  ;;  %20136 = vmatmul.bf16.vlgmr.msra.gmra.mxu1 %v5062_v26  ;;  %v33468_v19 = vld [vmem:[%s35902_s30 + $0x8a8] sm:$0xff]  ;;  %v33467_v26 = vld [vmem:[%s35902_s30 + $0x8a0] sm:$0xff]  ;;  %v33465_v41 = vld [vmem:[%s35902_s30 + $0x890] sm:$0xff] }
 0x119   : > { %20180 = vmatpush.bf16.msrb.mxu1 %v33430_v20  ;;  %20149 = vmatmul.bf16.vlgmr.msra.gmra.mxu2 %v5063_v24  ;;  %v33476_v20 = vld [vmem:[%s35902_s30 + $0x8e8] sm:$0xff] }
 0x11a   : > { %20193 = vmatpush.bf16.msrb.mxu2 %v33438_v21  ;;  %20162 = vmatmul.bf16.vlgmr.msra.gmra.mxu3 %v5064_v28  ;;  %v33475_v28 = vld [vmem:[%s35902_s30 + $0x8e0] sm:$0xff] }
 0x11b   : > { %20206 = vmatpush.bf16.msrb.mxu3 %v33446_v25  ;;  %v33459_v25 = vld [vmem:[%s35902_s30 + $0x860] sm:$0xff] }
 0x11c   : > { %20168 = vmatpush.bf16.msrb.mxu0 %v33421_v27  ;;  %v19942_v47 = vpop.f32.mrf.mxu2  ;;  %v19918_v50 = vpop.f32.mrf.mxu0 }
 0x11d   : > { %20181 = vmatpush.bf16.msrb.mxu1 %v33429_v29  ;;  %v19943_v48 = vadd.f32 %v19942_v47, %v19930_v42  ;;  %v19955_v51 = vpop.f32.mrf.mxu3  ;;  %v19931_v56 = vpop.f32.mrf.mxu1  ;;  %v33450_v29 = vld [vmem:[%s35902_s30 + $0x818] sm:$0xff]  ;;  %v33473_v42 = vld [vmem:[%s35902_s30 + $0x8d0] sm:$0xff]  ;;  %v33472_v47 = vld [vmem:[%s35902_s30 + $0x8c8] sm:$0xff] }
 0x11e   : > { %20194 = vmatpush.bf16.msrb.mxu2 %v33437_v30  ;;  %v33458_v30 = vld [vmem:[%s35902_s30 + $0x858] sm:$0xff]  ;;  %v33455_v50 = vld [vmem:[%s35902_s30 + $0x840] sm:$0xff] }
 0x11f   : > { %20207 = vmatpush.bf16.msrb.mxu3 %v33445_v31  ;;  %v19956_v53 = vadd.f32 %v19955_v51, %v19943_v48  ;;  %v33466_v31 = vld [vmem:[%s35902_s30 + $0x898] sm:$0xff]  ;;  %v33463_v51 = vld [vmem:[%s35902_s30 + $0x880] sm:$0xff] }
 0x120   : > { %20169 = vmatpush.bf16.msrb.mxu0 %v33420_v32  ;;  %v5071_v56 = vld [vmem:[#allocation1] sm:$0xff] }
 0x121   : > { %20182 = vmatpush.bf16.msrb.mxu1 %v33428_v33 }
 0x122   : > { %20195 = vmatpush.bf16.msrb.mxu2 %v33436_v34  ;;  %v33474_v34 = vld [vmem:[%s35902_s30 + $0x8d8] sm:$0xff] }
 0x123   : > { %20208 = vmatpush.bf16.msrb.mxu3 %v33444_v35 }
 0x124   : > { %20170 = vmatpush.bf16.msrb.mxu0 %v33419_v38  ;;  %v19944_v1 = vpop.f32.mrf.mxu2 }
 0x125   : > { %20183 = vmatpush.bf16.msrb.mxu1 %v33427_v39  ;;  %v19957_v5 = vpop.f32.mrf.mxu3  ;;  %v33484_v1 = vld [vmem:[%s35902_s30 + $0x928] sm:$0xff] }
 0x126   : > { %20196 = vmatpush.bf16.msrb.mxu2 %v33435_v40  ;;  %v33457_v40 = vld [vmem:[%s35902_s30 + $0x850] sm:$0xff] }
 0x127   : > { %20209 = vmatpush.bf16.msrb.mxu3 %v33443_v43  ;;  %v33448_v43 = vld [vmem:[%s35902_s30 + $0x808] sm:$0xff] }
 0x128   : > { %20171 = vmatpush.bf16.msrb.mxu0 %v33418_v44  ;;  %v33456_v44 = vld [vmem:[%s35902_s30 + $0x848] sm:$0xff] }
 0x129   : > { %20184 = vmatpush.bf16.msrb.mxu1 %v33426_v45  ;;  %v33464_v45 = vld [vmem:[%s35902_s30 + $0x888] sm:$0xff] }
 0x12a   : > { %20197 = vmatpush.bf16.msrb.mxu2 %v33434_v46 }
 0x12b   : > { %20210 = vmatpush.bf16.msrb.mxu3 %v33442_v49  ;;  %v33447_v49 = vld [vmem:[%s35902_s30 + $0x800] sm:$0xff] }
 0x12c   : > { %20172 = vmatpush.bf16.msrb.mxu0 %v33417_v52  ;;  %v33486_v52 = vld [vmem:[%s35902_s30 + $0x938] sm:$0xff] }
 0x12d   : > { %20185 = vmatpush.bf16.msrb.mxu1 %v33425_v54  ;;  %v33502_v54 = vld [vmem:[%s35902_s30 + $0x9b8] sm:$0xff] }
 0x12e   : > { %20198 = vmatpush.bf16.msrb.mxu2 %v33433_v55  ;;  %v33471_v55 = vld [vmem:[%s35902_s30 + $0x8c0] sm:$0xff] }
 0x12f   : > { %20211 = vmatpush.bf16.msrb.mxu3 %v33441_v57  ;;  %v5073_v57 = vld [vmem:[#allocation1 + $0x12] sm:$0xff] }
 0x130   : > { %20173 = vmatpush.bf16.msrb.mxu0 %v33416_v58  ;;  %v33510_v58 = vld [vmem:[%s35902_s30 + $0x9f8] sm:$0xff] }
 0x131   : > { %20186 = vmatpush.bf16.msrb.mxu1 %v33424_v59  ;;  %v5072_v59 = vld [vmem:[#allocation1 + $0x9] sm:$0xff] }
 0x132   : > { %20199 = vmatpush.bf16.msrb.mxu2 %v33432_v60  ;;  %v33485_v60 = vld [vmem:[%s35902_s30 + $0x930] sm:$0xff] }
 0x133   : > { %20212 = vmatpush.bf16.msrb.mxu3 %v33440_v3  ;;  %v33500_v3 = vld [vmem:[%s35902_s30 + $0x9a8] sm:$0xff] }
 0x134   : > { %20174 = vmatpush.bf16.msrb.mxu0 %v33415_v4  ;;  %v19968_v21 = vpop.f32.mrf.mxu0  ;;  %v33508_v4 = vld [vmem:[%s35902_s30 + $0x9e8] sm:$0xff] }
 0x135   : > { %20187 = vmatpush.bf16.msrb.mxu1 %v33423_v6  ;;  %v19969_v22 = vadd.f32 %v19968_v21, %v19956_v53  ;;  %v19981_v24 = vpop.f32.mrf.mxu1  ;;  %v33494_v53 = vld [vmem:[%s35902_s30 + $0x978] sm:$0xff] }
 0x136   : > { %20200 = vmatpush.bf16.msrb.mxu2 %v33431_v7  ;;  %v33483_v7 = vld [vmem:[%s35902_s30 + $0x920] sm:$0xff] }
 0x137   : > { %20213 = vmatpush.bf16.msrb.mxu3 %v33439_v11  ;;  %20175 = vmatmul.bf16.vlgmr.msrb.gmra.mxu0 %v5065_v61  ;;  %v19982_v27 = vadd.f32 %v19981_v24, %v19969_v22  ;;  %v5074_v61 = vld [vmem:[#allocation1 + $0x1b] sm:$0xff] }
 0x138   : > { %20219 = vmatpush.bf16.msra.mxu0 %v33454_v8  ;;  %20188 = vmatmul.bf16.vlgmr.msrb.gmra.mxu1 %v5066_v63  ;;  %v33501_v63 = vld [vmem:[%s35902_s30 + $0x9b0] sm:$0xff] }
 0x139   : > { %20232 = vmatpush.bf16.msra.mxu1 %v33462_v9  ;;  %20201 = vmatmul.bf16.vlgmr.msrb.gmra.mxu2 %v5067_v62  ;;  %v33493_v62 = vld [vmem:[%s35902_s30 + $0x970] sm:$0xff]  ;;  %v33491_v9 = vld [vmem:[%s35902_s30 + $0x960] sm:$0xff] }
 0x13a   : > { %20245 = vmatpush.bf16.msra.mxu2 %v33470_v10  ;;  %20214 = vmatmul.bf16.vlgmr.msrb.gmra.mxu3 %v5068_v0  ;;  %v33509_v0 = vld [vmem:[%s35902_s30 + $0x9f0] sm:$0xff]  ;;  %v33499_v10 = vld [vmem:[%s35902_s30 + $0x9a0] sm:$0xff] }
 0x13b   : > { %20258 = vmatpush.bf16.msra.mxu3 %v33478_v12  ;;  %v33507_v12 = vld [vmem:[%s35902_s30 + $0x9e0] sm:$0xff]  ;;  %v33481_v22 = vld [vmem:[%s35902_s30 + $0x910] sm:$0xff] }
 0x13c   : > { %20220 = vmatpush.bf16.msra.mxu0 %v33453_v13  ;;  %v19994_v32 = vpop.f32.mrf.mxu2  ;;  %v19970_v36 = vpop.f32.mrf.mxu0  ;;  %v33482_v13 = vld [vmem:[%s35902_s30 + $0x918] sm:$0xff]  ;;  %v33489_v24 = vld [vmem:[%s35902_s30 + $0x950] sm:$0xff] }
 0x13d   : > { %20233 = vmatpush.bf16.msra.mxu1 %v33461_v14  ;;  %v19995_v33 = vadd.f32 %v19994_v32, %v19982_v27  ;;  %v20007_v35 = vpop.f32.mrf.mxu3  ;;  %v19983_v38 = vpop.f32.mrf.mxu1  ;;  %v33490_v14 = vld [vmem:[%s35902_s30 + $0x958] sm:$0xff]  ;;  %v33480_v27 = vld [vmem:[%s35902_s30 + $0x908] sm:$0xff] }
 0x13e   : > { %20246 = vmatpush.bf16.msra.mxu2 %v33469_v15  ;;  %v33498_v15 = vld [vmem:[%s35902_s30 + $0x998] sm:$0xff]  ;;  %v33504_v36 = vld [vmem:[%s35902_s30 + $0x9c8] sm:$0xff]  ;;  %v33479_v38 = vld [vmem:[%s35902_s30 + $0x900] sm:$0xff] }
 0x13f   : > { %20259 = vmatpush.bf16.msra.mxu3 %v33477_v16  ;;  %v20008_v39 = vadd.f32 %v20007_v35, %v19995_v33  ;;  %v5076_v33 = vld [vmem:[#allocation1 + $0x2d] sm:$0xff] }
 0x140   : > { %20221 = vmatpush.bf16.msra.mxu0 %v33452_v17  ;;  %v293_v35 = vld [vmem:[%s35916_s27 + $0x28] sm:$0xff] }
 0x141   : > { %20234 = vmatpush.bf16.msra.mxu1 %v33460_v18  ;;  %v33506_v18 = vld [vmem:[%s35902_s30 + $0x9d8] sm:$0xff] }
 0x142   : > { %20247 = vmatpush.bf16.msra.mxu2 %v33468_v19 }
 0x143   : > { %20260 = vmatpush.bf16.msra.mxu3 %v33476_v20 }
 0x144   : > { %20222 = vmatpush.bf16.msra.mxu0 %v33451_v23  ;;  %v19996_v46 = vpop.f32.mrf.mxu2 }
 0x145   : > { %20235 = vmatpush.bf16.msra.mxu1 %v33459_v25  ;;  %v20009_v48 = vpop.f32.mrf.mxu3  ;;  %v33497_v25 = vld [vmem:[%s35902_s30 + $0x990] sm:$0xff] }
 0x146   : > { %20248 = vmatpush.bf16.msra.mxu2 %v33467_v26  ;;  %v33505_v26 = vld [vmem:[%s35902_s30 + $0x9d0] sm:$0xff] }
 0x147   : > { %20261 = vmatpush.bf16.msra.mxu3 %v33475_v28  ;;  %v33488_v28 = vld [vmem:[%s35902_s30 + $0x948] sm:$0xff]  ;;  %v33517_v46 = vld [vmem:[%s35902_s30 + $0xa30] sm:$0xff] }
 0x148   : > { %20223 = vmatpush.bf16.msra.mxu0 %v33450_v29  ;;  %v33496_v29 = vld [vmem:[%s35902_s30 + $0x988] sm:$0xff]  ;;  %v33533_v48 = vld [vmem:[%s35902_s30 + $0xab0] sm:$0xff] }
 0x149   : > { %20236 = vmatpush.bf16.msra.mxu1 %v33458_v30  ;;  %v5075_v30 = vld [vmem:[#allocation1 + $0x24] sm:$0xff] }
 0x14a   : > { %20249 = vmatpush.bf16.msra.mxu2 %v33466_v31  ;;  %v5077_v31 = vld [vmem:[#allocation1 + $0x36] sm:$0xff] }
 0x14b   : > { %20262 = vmatpush.bf16.msra.mxu3 %v33474_v34  ;;  %v5078_v34 = vld [vmem:[#allocation1 + $0x3f] sm:$0xff] }
 0x14c   : > { %20224 = vmatpush.bf16.msra.mxu0 %v33449_v37  ;;  %5080 = vst [vmem:[#allocation1] ss:$9 sm:$0xff] %v293_v35  ;;  %v33556_v35 = vld [vmem:[%s35902_s30 + $0xb68] sm:$0xff] }
 0x14d   : > { %20237 = vmatpush.bf16.msra.mxu1 %v33457_v40  ;;  %v33495_v40 = vld [vmem:[%s35902_s30 + $0x980] sm:$0xff] }
 0x14e   : > { %20250 = vmatpush.bf16.msra.mxu2 %v33465_v41  ;;  %v33518_v41 = vld [vmem:[%s35902_s30 + $0xa38] sm:$0xff] }
 0x14f   : > { %20263 = vmatpush.bf16.msra.mxu3 %v33473_v42  ;;  %v33526_v42 = vld [vmem:[%s35902_s30 + $0xa78] sm:$0xff] }
 0x150   : > { %20225 = vmatpush.bf16.msra.mxu0 %v33448_v43  ;;  %v33534_v43 = vld [vmem:[%s35902_s30 + $0xab8] sm:$0xff] }
 0x151   : > { %20238 = vmatpush.bf16.msra.mxu1 %v33456_v44  ;;  %v33503_v44 = vld [vmem:[%s35902_s30 + $0x9c0] sm:$0xff] }
 0x152   : > { %20251 = vmatpush.bf16.msra.mxu2 %v33464_v45  ;;  %v33542_v45 = vld [vmem:[%s35902_s30 + $0xaf8] sm:$0xff] }
 0x153   : > { %20264 = vmatpush.bf16.msra.mxu3 %v33472_v47  ;;  %v33525_v47 = vld [vmem:[%s35902_s30 + $0xa70] sm:$0xff] }
 0x154   : > { %20226 = vmatpush.bf16.msra.mxu0 %v33447_v49  ;;  %v20020_v5 = vpop.f32.mrf.mxu0  ;;  %v33541_v49 = vld [vmem:[%s35902_s30 + $0xaf0] sm:$0xff] }
 0x155   : > { %20239 = vmatpush.bf16.msra.mxu1 %v33455_v50  ;;  %v20021_v6 = vadd.f32 %v20020_v5, %v20008_v39  ;;  %v20033_v8 = vpop.f32.mrf.mxu1  ;;  %v33487_v39 = vld [vmem:[%s35902_s30 + $0x940] sm:$0xff]  ;;  %v33516_v50 = vld [vmem:[%s35902_s30 + $0xa28] sm:$0xff] }
 0x156   : > { %20252 = vmatpush.bf16.msra.mxu2 %v33463_v51  ;;  %v33524_v51 = vld [vmem:[%s35902_s30 + $0xa68] sm:$0xff] }
 0x157   : > { %20265 = vmatpush.bf16.msra.mxu3 %v33471_v55  ;;  %20227 = vmatmul.bf16.vlgmr.msra.gmra.mxu0 %v5071_v56  ;;  %v20034_v11 = vadd.f32 %v20033_v8, %v20021_v6  ;;  %v33515_v56 = vld [vmem:[%s35902_s30 + $0xa20] sm:$0xff] }
 0x158   : > { %20271 = vmatpush.bf16.msrb.mxu0 %v33486_v52  ;;  %20240 = vmatmul.bf16.vlgmr.msra.gmra.mxu1 %v5072_v59  ;;  %v33532_v52 = vld [vmem:[%s35902_s30 + $0xaa8] sm:$0xff]  ;;  %v33531_v59 = vld [vmem:[%s35902_s30 + $0xaa0] sm:$0xff] }
 0x159   : > { %20284 = vmatpush.bf16.msrb.mxu1 %v33494_v53  ;;  %20253 = vmatmul.bf16.vlgmr.msra.gmra.mxu2 %v5073_v57  ;;  %v33540_v53 = vld [vmem:[%s35902_s30 + $0xae8] sm:$0xff] }
 0x15a   : > { %20297 = vmatpush.bf16.msrb.mxu2 %v33502_v54  ;;  %20266 = vmatmul.bf16.vlgmr.msra.gmra.mxu3 %v5074_v61  ;;  %v33539_v61 = vld [vmem:[%s35902_s30 + $0xae0] sm:$0xff] }
 0x15b   : > { %20310 = vmatpush.bf16.msrb.mxu3 %v33510_v58  ;;  %v33523_v58 = vld [vmem:[%s35902_s30 + $0xa60] sm:$0xff] }
 0x15c   : > { %20272 = vmatpush.bf16.msrb.mxu0 %v33485_v60  ;;  %v20046_v16 = vpop.f32.mrf.mxu2  ;;  %v20022_v20 = vpop.f32.mrf.mxu0 }
 0x15d   : > { %20285 = vmatpush.bf16.msrb.mxu1 %v33493_v62  ;;  %v20047_v17 = vadd.f32 %v20046_v16, %v20034_v11  ;;  %v20059_v19 = vpop.f32.mrf.mxu3  ;;  %v20035_v23 = vpop.f32.mrf.mxu1  ;;  %v33514_v62 = vld [vmem:[%s35902_s30 + $0xa18] sm:$0xff]  ;;  %v33537_v11 = vld [vmem:[%s35902_s30 + $0xad0] sm:$0xff]  ;;  %v33536_v16 = vld [vmem:[%s35902_s30 + $0xac8] sm:$0xff] }
 0x15e   : > { %20298 = vmatpush.bf16.msrb.mxu2 %v33501_v63  ;;  %v33522_v63 = vld [vmem:[%s35902_s30 + $0xa58] sm:$0xff]  ;;  %v33527_v20 = vld [vmem:[%s35902_s30 + $0xa80] sm:$0xff] }
 0x15f   : > { %20311 = vmatpush.bf16.msrb.mxu3 %v33509_v0  ;;  %v36233_v21 = vadd.f32 %v20059_v19, %v20047_v17  ;;  %v33530_v0 = vld [vmem:[%s35902_s30 + $0xa98] sm:$0xff]  ;;  %v33519_v19 = vld [vmem:[%s35902_s30 + $0xa40] sm:$0xff] }
 0x160   : > { %20273 = vmatpush.bf16.msrb.mxu0 %v33484_v1  ;;  %v33566_v23 = vld [vmem:[%s35902_s30 + $0xbb8] sm:$0xff] }
 0x161   : > { %20286 = vmatpush.bf16.msrb.mxu1 %v33492_v2 }
 0x162   : > { %20299 = vmatpush.bf16.msrb.mxu2 %v33500_v3  ;;  %v33538_v3 = vld [vmem:[%s35902_s30 + $0xad8] sm:$0xff] }
 0x163   : > { %20312 = vmatpush.bf16.msrb.mxu3 %v33508_v4 }
 0x164   : > { %20274 = vmatpush.bf16.msrb.mxu0 %v33483_v7  ;;  %v20048_v32 = vpop.f32.mrf.mxu2  ;;  %v33513_v7 = vld [vmem:[%s35902_s30 + $0xa10] sm:$0xff] }
 0x165   : > { %20287 = vmatpush.bf16.msrb.mxu1 %v33491_v9  ;;  %v20061_v37 = vpop.f32.mrf.mxu3  ;;  %v33521_v9 = vld [vmem:[%s35902_s30 + $0xa50] sm:$0xff] }
 0x166   : > { %20300 = vmatpush.bf16.msrb.mxu2 %v33499_v10  ;;  %v33529_v10 = vld [vmem:[%s35902_s30 + $0xa90] sm:$0xff]  ;;  %v33572_v37 = vld [vmem:[%s35902_s30 + $0xbe8] sm:$0xff] }
 0x167   : > { %20313 = vmatpush.bf16.msrb.mxu3 %v33507_v12  ;;  %v33512_v12 = vld [vmem:[%s35902_s30 + $0xa08] sm:$0xff]  ;;  %v33565_v32 = vld [vmem:[%s35902_s30 + $0xbb0] sm:$0xff] }
 0x168   : > { %20275 = vmatpush.bf16.msrb.mxu0 %v33482_v13  ;;  %v33520_v13 = vld [vmem:[%s35902_s30 + $0xa48] sm:$0xff] }
 0x169   : > { %20288 = vmatpush.bf16.msrb.mxu1 %v33490_v14  ;;  %v33528_v14 = vld [vmem:[%s35902_s30 + $0xa88] sm:$0xff] }
 0x16a   : > { %20301 = vmatpush.bf16.msrb.mxu2 %v33498_v15 }
 0x16b   : > { %20314 = vmatpush.bf16.msrb.mxu3 %v33506_v18  ;;  %v33511_v18 = vld [vmem:[%s35902_s30 + $0xa00] sm:$0xff] }
 0x16c   : > { %20276 = vmatpush.bf16.msrb.mxu0 %v33481_v22  ;;  %v33558_v22 = vld [vmem:[%s35902_s30 + $0xb78] sm:$0xff] }
 0x16d   : > { %20289 = vmatpush.bf16.msrb.mxu1 %v33489_v24  ;;  %v33535_v24 = vld [vmem:[%s35902_s30 + $0xac0] sm:$0xff] }
 0x16e   : > { %20302 = vmatpush.bf16.msrb.mxu2 %v33497_v25  ;;  %v5081_v25 = vld [vmem:[#allocation1] sm:$0xff] }
 0x16f   : > { %20315 = vmatpush.bf16.msrb.mxu3 %v33505_v26  ;;  %v5083_v26 = vld [vmem:[#allocation1 + $0x12] sm:$0xff] }
 0x170   : > { %20277 = vmatpush.bf16.msrb.mxu0 %v33480_v27  ;;  %v33574_v27 = vld [vmem:[%s35902_s30 + $0xbf8] sm:$0xff] }
 0x171   : > { %20290 = vmatpush.bf16.msrb.mxu1 %v33488_v28  ;;  %v5082_v28 = vld [vmem:[#allocation1 + $0x9] sm:$0xff] }
 0x172   : > { %20303 = vmatpush.bf16.msrb.mxu2 %v33496_v29  ;;  %v33549_v29 = vld [vmem:[%s35902_s30 + $0xb30] sm:$0xff] }
 0x173   : > { %20316 = vmatpush.bf16.msrb.mxu3 %v33504_v36  ;;  %v33564_v36 = vld [vmem:[%s35902_s30 + $0xba8] sm:$0xff] }
 0x174   : > { %20278 = vmatpush.bf16.msrb.mxu0 %v33479_v38  ;;  %v20072_v54 = vpop.f32.mrf.mxu0 }
 0x175   : > { %20291 = vmatpush.bf16.msrb.mxu1 %v33487_v39  ;;  %v20073_v55 = vadd.f32 %v20072_v54, %v36233_v21  ;;  %v20085_v57 = vpop.f32.mrf.mxu1  ;;  %v33550_v21 = vld [vmem:[%s35902_s30 + $0xb38] sm:$0xff] }
 0x176   : > { %20304 = vmatpush.bf16.msrb.mxu2 %v33495_v40  ;;  %v33547_v40 = vld [vmem:[%s35902_s30 + $0xb20] sm:$0xff] }
 0x177   : > { %20317 = vmatpush.bf16.msrb.mxu3 %v33503_v44  ;;  %20279 = vmatmul.bf16.vlgmr.msrb.gmra.mxu0 %v5075_v30  ;;  %v20086_v60 = vadd.f32 %v20085_v57, %v20073_v55  ;;  %v5084_v30 = vld [vmem:[#allocation1 + $0x1b] sm:$0xff] }
 0x178   : > { %20323 = vmatpush.bf16.msra.mxu0 %v33518_v41  ;;  %20292 = vmatmul.bf16.vlgmr.msrb.gmra.mxu1 %v5076_v33  ;;  %v33573_v33 = vld [vmem:[%s35902_s30 + $0xbf0] sm:$0xff] }
 0x179   : > { %20336 = vmatpush.bf16.msra.mxu1 %v33526_v42  ;;  %20305 = vmatmul.bf16.vlgmr.msrb.gmra.mxu2 %v5077_v31  ;;  %v33557_v31 = vld [vmem:[%s35902_s30 + $0xb70] sm:$0xff]  ;;  %v33555_v42 = vld [vmem:[%s35902_s30 + $0xb60] sm:$0xff] }
 0x17a   : > { %20349 = vmatpush.bf16.msra.mxu2 %v33534_v43  ;;  %20318 = vmatmul.bf16.vlgmr.msrb.gmra.mxu3 %v5078_v34  ;;  %v33548_v34 = vld [vmem:[%s35902_s30 + $0xb28] sm:$0xff]  ;;  %v33563_v43 = vld [vmem:[%s35902_s30 + $0xba0] sm:$0xff]  ;;  %v33545_v55 = vld [vmem:[%s35902_s30 + $0xb10] sm:$0xff] }
 0x17b   : > { %20362 = vmatpush.bf16.msra.mxu3 %v33542_v45  ;;  %v33571_v45 = vld [vmem:[%s35902_s30 + $0xbe0] sm:$0xff]  ;;  %v33553_v57 = vld [vmem:[%s35902_s30 + $0xb50] sm:$0xff] }
 0x17c   : > { %20324 = vmatpush.bf16.msra.mxu0 %v33517_v46  ;;  %v20098_v1 = vpop.f32.mrf.mxu2  ;;  %v20074_v5 = vpop.f32.mrf.mxu0  ;;  %v33546_v46 = vld [vmem:[%s35902_s30 + $0xb18] sm:$0xff] }
 0x17d   : > { %20337 = vmatpush.bf16.msra.mxu1 %v33525_v47  ;;  %v20099_v2 = vadd.f32 %v20098_v1, %v20086_v60  ;;  %v20111_v4 = vpop.f32.mrf.mxu3  ;;  %v20087_v8 = vpop.f32.mrf.mxu1  ;;  %v33554_v47 = vld [vmem:[%s35902_s30 + $0xb58] sm:$0xff]  ;;  %v33544_v60 = vld [vmem:[%s35902_s30 + $0xb08] sm:$0xff] }
 0x17e   : > { %20350 = vmatpush.bf16.msra.mxu2 %v33533_v48  ;;  %v33562_v48 = vld [vmem:[%s35902_s30 + $0xb98] sm:$0xff]  ;;  %v33568_v5 = vld [vmem:[%s35902_s30 + $0xbc8] sm:$0xff]  ;;  %v33551_v8 = vld [vmem:[%s35902_s30 + $0xb40] sm:$0xff] }
 0x17f   : > { %20363 = vmatpush.bf16.msra.mxu3 %v33541_v49  ;;  %v20112_v6 = vadd.f32 %v20111_v4, %v20099_v2  ;;  %v5086_v2 = vld [vmem:[#allocation1 + $0x2d] sm:$0xff] }
 0x180   : > { %20325 = vmatpush.bf16.msra.mxu0 %v33516_v50  ;;  %v294_v4 = vld [vmem:[%s35916_s27 + $0x30] sm:$0xff] }
 0x181   : > { %20338 = vmatpush.bf16.msra.mxu1 %v33524_v51  ;;  %v33570_v51 = vld [vmem:[%s35902_s30 + $0xbd8] sm:$0xff] }
 0x182   : > { %20351 = vmatpush.bf16.msra.mxu2 %v33532_v52 }
 0x183   : > { %20364 = vmatpush.bf16.msra.mxu3 %v33540_v53 }
 0x184   : > { %20326 = vmatpush.bf16.msra.mxu0 %v33515_v56  ;;  %v20100_v15 = vpop.f32.mrf.mxu2 }
 0x185   : > { %20339 = vmatpush.bf16.msra.mxu1 %v33523_v58  ;;  %v20113_v17 = vpop.f32.mrf.mxu3  ;;  %v33561_v58 = vld [vmem:[%s35902_s30 + $0xb90] sm:$0xff] }
 0x186   : > { %20352 = vmatpush.bf16.msra.mxu2 %v33531_v59  ;;  %v33569_v59 = vld [vmem:[%s35902_s30 + $0xbd0] sm:$0xff] }
 0x187   : > { %20365 = vmatpush.bf16.msra.mxu3 %v33539_v61  ;;  %v33552_v61 = vld [vmem:[%s35902_s30 + $0xb48] sm:$0xff]  ;;  %v33581_v15 = vld [vmem:[%s35902_s30 + $0xc30] sm:$0xff] }
 0x188   : > { %20327 = vmatpush.bf16.msra.mxu0 %v33514_v62  ;;  %v33560_v62 = vld [vmem:[%s35902_s30 + $0xb88] sm:$0xff]  ;;  %v33597_v17 = vld [vmem:[%s35902_s30 + $0xcb0] sm:$0xff] }
 0x189   : > { %20340 = vmatpush.bf16.msra.mxu1 %v33522_v63  ;;  %v5085_v63 = vld [vmem:[#allocation1 + $0x24] sm:$0xff] }
 0x18a   : > { %20353 = vmatpush.bf16.msra.mxu2 %v33530_v0  ;;  %v5087_v0 = vld [vmem:[#allocation1 + $0x36] sm:$0xff] }
 0x18b   : > { %20366 = vmatpush.bf16.msra.mxu3 %v33538_v3  ;;  %v5088_v3 = vld [vmem:[#allocation1 + $0x3f] sm:$0xff] }
 0x18c   : > { %20328 = vmatpush.bf16.msra.mxu0 %v33513_v7  ;;  %5090 = vst [vmem:[#allocation1] ss:$9 sm:$0xff] %v294_v4  ;;  %v33543_v7 = vld [vmem:[%s35902_s30 + $0xb00] sm:$0xff]  ;;  %v33620_v4 = vld [vmem:[%s35902_s30 + $0xd68] sm:$0xff] }
 0x18d   : > { %20341 = vmatpush.bf16.msra.mxu1 %v33521_v9  ;;  %v33559_v9 = vld [vmem:[%s35902_s30 + $0xb80] sm:$0xff] }
 0x18e   : > { %20354 = vmatpush.bf16.msra.mxu2 %v33529_v10  ;;  %v33582_v10 = vld [vmem:[%s35902_s30 + $0xc38] sm:$0xff] }
 0x18f   : > { %20367 = vmatpush.bf16.msra.mxu3 %v33537_v11  ;;  %v33590_v11 = vld [vmem:[%s35902_s30 + $0xc78] sm:$0xff] }
 0x190   : > { %20329 = vmatpush.bf16.msra.mxu0 %v33512_v12  ;;  %v33598_v12 = vld [vmem:[%s35902_s30 + $0xcb8] sm:$0xff] }
 0x191   : > { %20342 = vmatpush.bf16.msra.mxu1 %v33520_v13  ;;  %v33567_v13 = vld [vmem:[%s35902_s30 + $0xbc0] sm:$0xff] }
 0x192   : > { %20355 = vmatpush.bf16.msra.mxu2 %v33528_v14  ;;  %v33606_v14 = vld [vmem:[%s35902_s30 + $0xcf8] sm:$0xff] }
 0x193   : > { %20368 = vmatpush.bf16.msra.mxu3 %v33536_v16  ;;  %v33589_v16 = vld [vmem:[%s35902_s30 + $0xc70] sm:$0xff] }
 0x194   : > { %20330 = vmatpush.bf16.msra.mxu0 %v33511_v18  ;;  %v20124_v38 = vpop.f32.mrf.mxu0  ;;  %v33605_v18 = vld [vmem:[%s35902_s30 + $0xcf0] sm:$0xff] }
 0x195   : > { %20343 = vmatpush.bf16.msra.mxu1 %v33519_v19  ;;  %v20125_v39 = vadd.f32 %v20124_v38, %v20112_v6  ;;  %v20137_v41 = vpop.f32.mrf.mxu1  ;;  %v33580_v19 = vld [vmem:[%s35902_s30 + $0xc28] sm:$0xff] }
 0x196   : > { %20356 = vmatpush.bf16.msra.mxu2 %v33527_v20  ;;  %v33588_v20 = vld [vmem:[%s35902_s30 + $0xc68] sm:$0xff] }
 0x197   : > { %20369 = vmatpush.bf16.msra.mxu3 %v33535_v24  ;;  %20331 = vmatmul.bf16.vlgmr.msra.gmra.mxu0 %v5081_v25  ;;  %v20138_v44 = vadd.f32 %v20137_v41, %v20125_v39  ;;  %v33579_v25 = vld [vmem:[%s35902_s30 + $0xc20] sm:$0xff] }
 0x198   : > { %20375 = vmatpush.bf16.msrb.mxu0 %v33550_v21  ;;  %20344 = vmatmul.bf16.vlgmr.msra.gmra.mxu1 %v5082_v28  ;;  %v33596_v21 = vld [vmem:[%s35902_s30 + $0xca8] sm:$0xff]  ;;  %v33595_v28 = vld [vmem:[%s35902_s30 + $0xca0] sm:$0xff] }
 0x199   : > { %20388 = vmatpush.bf16.msrb.mxu1 %v33558_v22  ;;  %20357 = vmatmul.bf16.vlgmr.msra.gmra.mxu2 %v5083_v26  ;;  %v33604_v22 = vld [vmem:[%s35902_s30 + $0xce8] sm:$0xff] }
 0x19a   : > { %20401 = vmatpush.bf16.msrb.mxu2 %v33566_v23  ;;  %20370 = vmatmul.bf16.vlgmr.msra.gmra.mxu3 %v5084_v30  ;;  %v33603_v30 = vld [vmem:[%s35902_s30 + $0xce0] sm:$0xff] }
 0x19b   : > { %20414 = vmatpush.bf16.msrb.mxu3 %v33574_v27  ;;  %v33587_v27 = vld [vmem:[%s35902_s30 + $0xc60] sm:$0xff] }
 0x19c   : > { %20376 = vmatpush.bf16.msrb.mxu0 %v33549_v29  ;;  %v20150_v49 = vpop.f32.mrf.mxu2  ;;  %v20126_v53 = vpop.f32.mrf.mxu0 }
 0x19d   : > { %20389 = vmatpush.bf16.msrb.mxu1 %v33557_v31  ;;  %v20151_v50 = vadd.f32 %v20150_v49, %v20138_v44  ;;  %v20163_v52 = vpop.f32.mrf.mxu3  ;;  %v20139_v56 = vpop.f32.mrf.mxu1  ;;  %v33578_v31 = vld [vmem:[%s35902_s30 + $0xc18] sm:$0xff]  ;;  %v33601_v44 = vld [vmem:[%s35902_s30 + $0xcd0] sm:$0xff]  ;;  %v33600_v49 = vld [vmem:[%s35902_s30 + $0xcc8] sm:$0xff] }
 0x19e   : > { %20402 = vmatpush.bf16.msrb.mxu2 %v33565_v32  ;;  %v33586_v32 = vld [vmem:[%s35902_s30 + $0xc58] sm:$0xff]  ;;  %v33591_v53 = vld [vmem:[%s35902_s30 + $0xc80] sm:$0xff] }
 0x19f   : > { %20415 = vmatpush.bf16.msrb.mxu3 %v33573_v33  ;;  %v36301_v54 = vadd.f32 %v20163_v52, %v20151_v50  ;;  %v33594_v33 = vld [vmem:[%s35902_s30 + $0xc98] sm:$0xff]  ;;  %v33583_v52 = vld [vmem:[%s35902_s30 + $0xc40] sm:$0xff] }
 0x1a0   : > { %20377 = vmatpush.bf16.msrb.mxu0 %v33548_v34  ;;  %v33630_v56 = vld [vmem:[%s35902_s30 + $0xdb8] sm:$0xff] }
 0x1a1   : > { %20390 = vmatpush.bf16.msrb.mxu1 %v33556_v35 }
 0x1a2   : > { %20403 = vmatpush.bf16.msrb.mxu2 %v33564_v36  ;;  %v33602_v36 = vld [vmem:[%s35902_s30 + $0xcd8] sm:$0xff] }
 0x1a3   : > { %20416 = vmatpush.bf16.msrb.mxu3 %v33572_v37 }
 0x1a4   : > { %20378 = vmatpush.bf16.msrb.mxu0 %v33547_v40  ;;  %v20152_v1 = vpop.f32.mrf.mxu2  ;;  %v33577_v40 = vld [vmem:[%s35902_s30 + $0xc10] sm:$0xff] }
 0x1a5   : > { %20391 = vmatpush.bf16.msrb.mxu1 %v33555_v42  ;;  %v20165_v6 = vpop.f32.mrf.mxu3  ;;  %v33585_v42 = vld [vmem:[%s35902_s30 + $0xc50] sm:$0xff] }
 0x1a6   : > { %20404 = vmatpush.bf16.msrb.mxu2 %v33563_v43  ;;  %v33593_v43 = vld [vmem:[%s35902_s30 + $0xc90] sm:$0xff]  ;;  %v33636_v6 = vld [vmem:[%s35902_s30 + $0xde8] sm:$0xff] }
 0x1a7   : > { %20417 = vmatpush.bf16.msrb.mxu3 %v33571_v45  ;;  %v33576_v45 = vld [vmem:[%s35902_s30 + $0xc08] sm:$0xff]  ;;  %v33629_v1 = vld [vmem:[%s35902_s30 + $0xdb0] sm:$0xff] }
 0x1a8   : > { %20379 = vmatpush.bf16.msrb.mxu0 %v33546_v46  ;;  %v33584_v46 = vld [vmem:[%s35902_s30 + $0xc48] sm:$0xff] }
 0x1a9   : > { %20392 = vmatpush.bf16.msrb.mxu1 %v33554_v47  ;;  %v33592_v47 = vld [vmem:[%s35902_s30 + $0xc88] sm:$0xff] }
 0x1aa   : > { %20405 = vmatpush.bf16.msrb.mxu2 %v33562_v48 }
 0x1ab   : > { %20418 = vmatpush.bf16.msrb.mxu3 %v33570_v51  ;;  %v33575_v51 = vld [vmem:[%s35902_s30 + $0xc00] sm:$0xff] }
 0x1ac   : > { %20380 = vmatpush.bf16.msrb.mxu0 %v33545_v55  ;;  %v33622_v55 = vld [vmem:[%s35902_s30 + $0xd78] sm:$0xff] }
 0x1ad   : > { %20393 = vmatpush.bf16.msrb.mxu1 %v33553_v57  ;;  %v33599_v57 = vld [vmem:[%s35902_s30 + $0xcc0] sm:$0xff] }
 0x1ae   : > { %20406 = vmatpush.bf16.msrb.mxu2 %v33561_v58  ;;  %v5091_v58 = vld [vmem:[#allocation1] sm:$0xff] }
 0x1af   : > { %20419 = vmatpush.bf16.msrb.mxu3 %v33569_v59  ;;  %v5093_v59 = vld [vmem:[#allocation1 + $0x12] sm:$0xff] }
 0x1b0   : > { %20381 = vmatpush.bf16.msrb.mxu0 %v33544_v60  ;;  %v33638_v60 = vld [vmem:[%s35902_s30 + $0xdf8] sm:$0xff] }
 0x1b1   : > { %20394 = vmatpush.bf16.msrb.mxu1 %v33552_v61  ;;  %v5092_v61 = vld [vmem:[#allocation1 + $0x9] sm:$0xff] }
 0x1b2   : > { %20407 = vmatpush.bf16.msrb.mxu2 %v33560_v62  ;;  %v33613_v62 = vld [vmem:[%s35902_s30 + $0xd30] sm:$0xff] }
 0x1b3   : > { %20420 = vmatpush.bf16.msrb.mxu3 %v33568_v5  ;;  %v33628_v5 = vld [vmem:[%s35902_s30 + $0xda8] sm:$0xff] }
 0x1b4   : > { %20382 = vmatpush.bf16.msrb.mxu0 %v33543_v7  ;;  %v20176_v23 = vpop.f32.mrf.mxu0 }
 0x1b5   : > { %20395 = vmatpush.bf16.msrb.mxu1 %v33551_v8  ;;  %v20177_v24 = vadd.f32 %v20176_v23, %v36301_v54  ;;  %v20189_v26 = vpop.f32.mrf.mxu1  ;;  %v33614_v54 = vld [vmem:[%s35902_s30 + $0xd38] sm:$0xff] }
 0x1b6   : > { %20408 = vmatpush.bf16.msrb.mxu2 %v33559_v9  ;;  %v33611_v9 = vld [vmem:[%s35902_s30 + $0xd20] sm:$0xff] }
 0x1b7   : > { %20421 = vmatpush.bf16.msrb.mxu3 %v33567_v13  ;;  %20383 = vmatmul.bf16.vlgmr.msrb.gmra.mxu0 %v5085_v63  ;;  %v20190_v29 = vadd.f32 %v20189_v26, %v20177_v24  ;;  %v5094_v63 = vld [vmem:[#allocation1 + $0x1b] sm:$0xff] }
 0x1b8   : > { %20427 = vmatpush.bf16.msra.mxu0 %v33582_v10  ;;  %20396 = vmatmul.bf16.vlgmr.msrb.gmra.mxu1 %v5086_v2  ;;  %v33637_v2 = vld [vmem:[%s35902_s30 + $0xdf0] sm:$0xff] }
 0x1b9   : > { %20440 = vmatpush.bf16.msra.mxu1 %v33590_v11  ;;  %20409 = vmatmul.bf16.vlgmr.msrb.gmra.mxu2 %v5087_v0  ;;  %v33621_v0 = vld [vmem:[%s35902_s30 + $0xd70] sm:$0xff]  ;;  %v33619_v11 = vld [vmem:[%s35902_s30 + $0xd60] sm:$0xff] }
 0x1ba   : > { %20453 = vmatpush.bf16.msra.mxu2 %v33598_v12  ;;  %20422 = vmatmul.bf16.vlgmr.msrb.gmra.mxu3 %v5088_v3  ;;  %v33612_v3 = vld [vmem:[%s35902_s30 + $0xd28] sm:$0xff]  ;;  %v33627_v12 = vld [vmem:[%s35902_s30 + $0xda0] sm:$0xff]  ;;  %v33609_v24 = vld [vmem:[%s35902_s30 + $0xd10] sm:$0xff] }
 0x1bb   : > { %20466 = vmatpush.bf16.msra.mxu3 %v33606_v14  ;;  %v33635_v14 = vld [vmem:[%s35902_s30 + $0xde0] sm:$0xff]  ;;  %v33617_v26 = vld [vmem:[%s35902_s30 + $0xd50] sm:$0xff] }
 0x1bc   : > { %20428 = vmatpush.bf16.msra.mxu0 %v33581_v15  ;;  %v20202_v34 = vpop.f32.mrf.mxu2  ;;  %v20178_v38 = vpop.f32.mrf.mxu0  ;;  %v33610_v15 = vld [vmem:[%s35902_s30 + $0xd18] sm:$0xff] }
 0x1bd   : > { %20441 = vmatpush.bf16.msra.mxu1 %v33589_v16  ;;  %v20203_v35 = vadd.f32 %v20202_v34, %v20190_v29  ;;  %v20215_v37 = vpop.f32.mrf.mxu3  ;;  %v20191_v41 = vpop.f32.mrf.mxu1  ;;  %v33618_v16 = vld [vmem:[%s35902_s30 + $0xd58] sm:$0xff]  ;;  %v33608_v29 = vld [vmem:[%s35902_s30 + $0xd08] sm:$0xff] }
 0x1be   : > { %20454 = vmatpush.bf16.msra.mxu2 %v33597_v17  ;;  %v33626_v17 = vld [vmem:[%s35902_s30 + $0xd98] sm:$0xff]  ;;  %v33632_v38 = vld [vmem:[%s35902_s30 + $0xdc8] sm:$0xff]  ;;  %v33615_v41 = vld [vmem:[%s35902_s30 + $0xd40] sm:$0xff] }
 0x1bf   : > { %20467 = vmatpush.bf16.msra.mxu3 %v33605_v18  ;;  %v20216_v39 = vadd.f32 %v20215_v37, %v20203_v35  ;;  %v5096_v35 = vld [vmem:[#allocation1 + $0x2d] sm:$0xff]  ;;  %v295_v37 = vld [vmem:[%s35916_s27 + $0x38] sm:$0xff] }
 0x1c0   : > { %20429 = vmatpush.bf16.msra.mxu0 %v33580_v19 }
 0x1c1   : > { %20442 = vmatpush.bf16.msra.mxu1 %v33588_v20  ;;  %v33634_v20 = vld [vmem:[%s35902_s30 + $0xdd8] sm:$0xff] }
 0x1c2   : > { %20455 = vmatpush.bf16.msra.mxu2 %v33596_v21 }
 0x1c3   : > { %20468 = vmatpush.bf16.msra.mxu3 %v33604_v22 }
 0x1c4   : > { %20430 = vmatpush.bf16.msra.mxu0 %v33579_v25  ;;  %v20204_v48 = vpop.f32.mrf.mxu2 }
 0x1c5   : > { %20443 = vmatpush.bf16.msra.mxu1 %v33587_v27  ;;  %v20217_v50 = vpop.f32.mrf.mxu3  ;;  %v33625_v27 = vld [vmem:[%s35902_s30 + $0xd90] sm:$0xff] }
 0x1c6   : > { %20456 = vmatpush.bf16.msra.mxu2 %v33595_v28  ;;  %v33633_v28 = vld [vmem:[%s35902_s30 + $0xdd0] sm:$0xff] }
 0x1c7   : > { %20469 = vmatpush.bf16.msra.mxu3 %v33603_v30  ;;  %v33616_v30 = vld [vmem:[%s35902_s30 + $0xd48] sm:$0xff]  ;;  %v33645_v48 = vld [vmem:[%s35902_s30 + $0xe30] sm:$0xff] }
 0x1c8   : > { %20431 = vmatpush.bf16.msra.mxu0 %v33578_v31  ;;  %v33624_v31 = vld [vmem:[%s35902_s30 + $0xd88] sm:$0xff]  ;;  %v33661_v50 = vld [vmem:[%s35902_s30 + $0xeb0] sm:$0xff] }
 0x1c9   : > { %20444 = vmatpush.bf16.msra.mxu1 %v33586_v32  ;;  %v5095_v32 = vld [vmem:[#allocation1 + $0x24] sm:$0xff] }
 0x1ca   : > { %20457 = vmatpush.bf16.msra.mxu2 %v33594_v33  ;;  %v5097_v33 = vld [vmem:[#allocation1 + $0x36] sm:$0xff] }
 0x1cb   : > { %20470 = vmatpush.bf16.msra.mxu3 %v33602_v36  ;;  %v5098_v36 = vld [vmem:[#allocation1 + $0x3f] sm:$0xff] }
 0x1cc   : > { %20432 = vmatpush.bf16.msra.mxu0 %v33577_v40  ;;  %5100 = vst [vmem:[#allocation1] ss:$9 sm:$0xff] %v295_v37  ;;  %v33607_v40 = vld [vmem:[%s35902_s30 + $0xd00] sm:$0xff]  ;;  %v33684_v37 = vld [vmem:[%s35902_s30 + $0xf68] sm:$0xff] }
 0x1cd   : > { %20445 = vmatpush.bf16.msra.mxu1 %v33585_v42  ;;  %v33623_v42 = vld [vmem:[%s35902_s30 + $0xd80] sm:$0xff] }
 0x1ce   : > { %20458 = vmatpush.bf16.msra.mxu2 %v33593_v43  ;;  %v33646_v43 = vld [vmem:[%s35902_s30 + $0xe38] sm:$0xff] }
 0x1cf   : > { %20471 = vmatpush.bf16.msra.mxu3 %v33601_v44  ;;  %v33654_v44 = vld [vmem:[%s35902_s30 + $0xe78] sm:$0xff] }
 0x1d0   : > { %20433 = vmatpush.bf16.msra.mxu0 %v33576_v45  ;;  %v33662_v45 = vld [vmem:[%s35902_s30 + $0xeb8] sm:$0xff] }
 0x1d1   : > { %20446 = vmatpush.bf16.msra.mxu1 %v33584_v46  ;;  %v33631_v46 = vld [vmem:[%s35902_s30 + $0xdc0] sm:$0xff] }
 0x1d2   : > { %20459 = vmatpush.bf16.msra.mxu2 %v33592_v47  ;;  %v33670_v47 = vld [vmem:[%s35902_s30 + $0xef8] sm:$0xff] }
 0x1d3   : > { %20472 = vmatpush.bf16.msra.mxu3 %v33600_v49  ;;  %v33653_v49 = vld [vmem:[%s35902_s30 + $0xe70] sm:$0xff] }
 0x1d4   : > { %20434 = vmatpush.bf16.msra.mxu0 %v33575_v51  ;;  %v20228_v7 = vpop.f32.mrf.mxu0  ;;  %v33669_v51 = vld [vmem:[%s35902_s30 + $0xef0] sm:$0xff] }
 0x1d5   : > { %20447 = vmatpush.bf16.msra.mxu1 %v33583_v52  ;;  %v20229_v8 = vadd.f32 %v20228_v7, %v20216_v39  ;;  %v20241_v10 = vpop.f32.mrf.mxu1  ;;  %v33644_v52 = vld [vmem:[%s35902_s30 + $0xe28] sm:$0xff] }
 0x1d6   : > { %20460 = vmatpush.bf16.msra.mxu2 %v33591_v53  ;;  %v33652_v53 = vld [vmem:[%s35902_s30 + $0xe68] sm:$0xff] }
 0x1d7   : > { %20473 = vmatpush.bf16.msra.mxu3 %v33599_v57  ;;  %20435 = vmatmul.bf16.vlgmr.msra.gmra.mxu0 %v5091_v58  ;;  %v20242_v13 = vadd.f32 %v20241_v10, %v20229_v8  ;;  %v33643_v58 = vld [vmem:[%s35902_s30 + $0xe20] sm:$0xff] }
 0x1d8   : > { %20479 = vmatpush.bf16.msrb.mxu0 %v33614_v54  ;;  %20448 = vmatmul.bf16.vlgmr.msra.gmra.mxu1 %v5092_v61  ;;  %v33660_v54 = vld [vmem:[%s35902_s30 + $0xea8] sm:$0xff]  ;;  %v33659_v61 = vld [vmem:[%s35902_s30 + $0xea0] sm:$0xff] }
 0x1d9   : > { %20492 = vmatpush.bf16.msrb.mxu1 %v33622_v55  ;;  %20461 = vmatmul.bf16.vlgmr.msra.gmra.mxu2 %v5093_v59  ;;  %v33668_v55 = vld [vmem:[%s35902_s30 + $0xee8] sm:$0xff] }
 0x1da   : > { %20505 = vmatpush.bf16.msrb.mxu2 %v33630_v56  ;;  %20474 = vmatmul.bf16.vlgmr.msra.gmra.mxu3 %v5094_v63  ;;  %v33667_v63 = vld [vmem:[%s35902_s30 + $0xee0] sm:$0xff] }
 0x1db   : > { %20518 = vmatpush.bf16.msrb.mxu3 %v33638_v60  ;;  %v33651_v60 = vld [vmem:[%s35902_s30 + $0xe60] sm:$0xff] }
 0x1dc   : > { %20480 = vmatpush.bf16.msrb.mxu0 %v33613_v62  ;;  %v20254_v18 = vpop.f32.mrf.mxu2  ;;  %v20230_v22 = vpop.f32.mrf.mxu0 }
 0x1dd   : > { %20493 = vmatpush.bf16.msrb.mxu1 %v33621_v0  ;;  %v20255_v19 = vadd.f32 %v20254_v18, %v20242_v13  ;;  %v20267_v21 = vpop.f32.mrf.mxu3  ;;  %v20243_v25 = vpop.f32.mrf.mxu1  ;;  %v33642_v0 = vld [vmem:[%s35902_s30 + $0xe18] sm:$0xff]  ;;  %v33665_v13 = vld [vmem:[%s35902_s30 + $0xed0] sm:$0xff]  ;;  %v33664_v18 = vld [vmem:[%s35902_s30 + $0xec8] sm:$0xff] }
 0x1de   : > { %20506 = vmatpush.bf16.msrb.mxu2 %v33629_v1  ;;  %v33650_v1 = vld [vmem:[%s35902_s30 + $0xe58] sm:$0xff]  ;;  %v33655_v22 = vld [vmem:[%s35902_s30 + $0xe80] sm:$0xff] }
 0x1df   : > { %20519 = vmatpush.bf16.msrb.mxu3 %v33637_v2  ;;  %v36369_v23 = vadd.f32 %v20267_v21, %v20255_v19  ;;  %v33658_v2 = vld [vmem:[%s35902_s30 + $0xe98] sm:$0xff]  ;;  %v33647_v21 = vld [vmem:[%s35902_s30 + $0xe40] sm:$0xff] }
 0x1e0   : > { %20481 = vmatpush.bf16.msrb.mxu0 %v33612_v3  ;;  %v33694_v25 = vld [vmem:[%s35902_s30 + $0xfb8] sm:$0xff] }
 0x1e1   : > { %20494 = vmatpush.bf16.msrb.mxu1 %v33620_v4 }
 0x1e2   : > { %20507 = vmatpush.bf16.msrb.mxu2 %v33628_v5  ;;  %v33666_v5 = vld [vmem:[%s35902_s30 + $0xed8] sm:$0xff] }
 0x1e3   : > { %20520 = vmatpush.bf16.msrb.mxu3 %v33636_v6 }
 0x1e4   : > { %20482 = vmatpush.bf16.msrb.mxu0 %v33611_v9  ;;  %v20256_v34 = vpop.f32.mrf.mxu2  ;;  %v33641_v9 = vld [vmem:[%s35902_s30 + $0xe10] sm:$0xff] }
 0x1e5   : > { %20495 = vmatpush.bf16.msrb.mxu1 %v33619_v11  ;;  %v20269_v39 = vpop.f32.mrf.mxu3  ;;  %v33649_v11 = vld [vmem:[%s35902_s30 + $0xe50] sm:$0xff] }
 0x1e6   : > { %20508 = vmatpush.bf16.msrb.mxu2 %v33627_v12  ;;  %v33657_v12 = vld [vmem:[%s35902_s30 + $0xe90] sm:$0xff]  ;;  %v33700_v39 = vld [vmem:[%s35902_s30 + $0xfe8] sm:$0xff] }
 0x1e7   : > { %20521 = vmatpush.bf16.msrb.mxu3 %v33635_v14  ;;  %v33640_v14 = vld [vmem:[%s35902_s30 + $0xe08] sm:$0xff]  ;;  %v33693_v34 = vld [vmem:[%s35902_s30 + $0xfb0] sm:$0xff] }
 0x1e8   : > { %20483 = vmatpush.bf16.msrb.mxu0 %v33610_v15  ;;  %v33648_v15 = vld [vmem:[%s35902_s30 + $0xe48] sm:$0xff] }
 0x1e9   : > { %20496 = vmatpush.bf16.msrb.mxu1 %v33618_v16  ;;  %v33656_v16 = vld [vmem:[%s35902_s30 + $0xe88] sm:$0xff] }
 0x1ea   : > { %20509 = vmatpush.bf16.msrb.mxu2 %v33626_v17 }
 0x1eb   : > { %20522 = vmatpush.bf16.msrb.mxu3 %v33634_v20  ;;  %v33639_v20 = vld [vmem:[%s35902_s30 + $0xe00] sm:$0xff] }
 0x1ec   : > { %20484 = vmatpush.bf16.msrb.mxu0 %v33609_v24  ;;  %v33686_v24 = vld [vmem:[%s35902_s30 + $0xf78] sm:$0xff] }
 0x1ed   : > { %20497 = vmatpush.bf16.msrb.mxu1 %v33617_v26  ;;  %v33663_v26 = vld [vmem:[%s35902_s30 + $0xec0] sm:$0xff] }
 0x1ee   : > { %20510 = vmatpush.bf16.msrb.mxu2 %v33625_v27  ;;  %v5101_v27 = vld [vmem:[#allocation1] sm:$0xff] }
 0x1ef   : > { %20523 = vmatpush.bf16.msrb.mxu3 %v33633_v28  ;;  %v5103_v28 = vld [vmem:[#allocation1 + $0x12] sm:$0xff] }
 0x1f0   : > { %20485 = vmatpush.bf16.msrb.mxu0 %v33608_v29  ;;  %v33702_v29 = vld [vmem:[%s35902_s30 + $0xff8] sm:$0xff] }
 0x1f1   : > { %20498 = vmatpush.bf16.msrb.mxu1 %v33616_v30  ;;  %v5102_v30 = vld [vmem:[#allocation1 + $0x9] sm:$0xff] }
 0x1f2   : > { %20511 = vmatpush.bf16.msrb.mxu2 %v33624_v31  ;;  %v33677_v31 = vld [vmem:[%s35902_s30 + $0xf30] sm:$0xff] }
 0x1f3   : > { %20524 = vmatpush.bf16.msrb.mxu3 %v33632_v38  ;;  %v33692_v38 = vld [vmem:[%s35902_s30 + $0xfa8] sm:$0xff] }
 0x1f4   : > { %20486 = vmatpush.bf16.msrb.mxu0 %v33607_v40  ;;  %v20280_v56 = vpop.f32.mrf.mxu0 }
 0x1f5   : > { %20499 = vmatpush.bf16.msrb.mxu1 %v33615_v41  ;;  %v20281_v57 = vadd.f32 %v20280_v56, %v36369_v23  ;;  %v20293_v59 = vpop.f32.mrf.mxu1  ;;  %v33678_v23 = vld [vmem:[%s35902_s30 + $0xf38] sm:$0xff] }
 0x1f6   : > { %20512 = vmatpush.bf16.msrb.mxu2 %v33623_v42  ;;  %v33675_v42 = vld [vmem:[%s35902_s30 + $0xf20] sm:$0xff] }
 0x1f7   : > { %20525 = vmatpush.bf16.msrb.mxu3 %v33631_v46  ;;  %20487 = vmatmul.bf16.vlgmr.msrb.gmra.mxu0 %v5095_v32  ;;  %v20294_v62 = vadd.f32 %v20293_v59, %v20281_v57  ;;  %v5104_v32 = vld [vmem:[#allocation1 + $0x1b] sm:$0xff] }
 0x1f8   : > { %20531 = vmatpush.bf16.msra.mxu0 %v33646_v43  ;;  %20500 = vmatmul.bf16.vlgmr.msrb.gmra.mxu1 %v5096_v35  ;;  %v33701_v35 = vld [vmem:[%s35902_s30 + $0xff0] sm:$0xff] }
 0x1f9   : > { %20544 = vmatpush.bf16.msra.mxu1 %v33654_v44  ;;  %20513 = vmatmul.bf16.vlgmr.msrb.gmra.mxu2 %v5097_v33  ;;  %v33685_v33 = vld [vmem:[%s35902_s30 + $0xf70] sm:$0xff]  ;;  %v33683_v44 = vld [vmem:[%s35902_s30 + $0xf60] sm:$0xff] }
 0x1fa   : > { %20557 = vmatpush.bf16.msra.mxu2 %v33662_v45  ;;  %20526 = vmatmul.bf16.vlgmr.msrb.gmra.mxu3 %v5098_v36  ;;  %v33676_v36 = vld [vmem:[%s35902_s30 + $0xf28] sm:$0xff]  ;;  %v33691_v45 = vld [vmem:[%s35902_s30 + $0xfa0] sm:$0xff]  ;;  %v33673_v57 = vld [vmem:[%s35902_s30 + $0xf10] sm:$0xff] }
 0x1fb   : > { %20570 = vmatpush.bf16.msra.mxu3 %v33670_v47  ;;  %v33699_v47 = vld [vmem:[%s35902_s30 + $0xfe0] sm:$0xff]  ;;  %v33681_v59 = vld [vmem:[%s35902_s30 + $0xf50] sm:$0xff] }
 0x1fc   : > { %20532 = vmatpush.bf16.msra.mxu0 %v33645_v48  ;;  %v20306_v3 = vpop.f32.mrf.mxu2  ;;  %v20282_v7 = vpop.f32.mrf.mxu0  ;;  %v33674_v48 = vld [vmem:[%s35902_s30 + $0xf18] sm:$0xff] }
 0x1fd   : > { %20545 = vmatpush.bf16.msra.mxu1 %v33653_v49  ;;  %v20307_v4 = vadd.f32 %v20306_v3, %v20294_v62  ;;  %v20319_v6 = vpop.f32.mrf.mxu3  ;;  %v20295_v10 = vpop.f32.mrf.mxu1  ;;  %v33682_v49 = vld [vmem:[%s35902_s30 + $0xf58] sm:$0xff]  ;;  %v33672_v62 = vld [vmem:[%s35902_s30 + $0xf08] sm:$0xff] }
 0x1fe   : > { %20558 = vmatpush.bf16.msra.mxu2 %v33661_v50  ;;  %v33690_v50 = vld [vmem:[%s35902_s30 + $0xf98] sm:$0xff]  ;;  %v33696_v7 = vld [vmem:[%s35902_s30 + $0xfc8] sm:$0xff]  ;;  %v33679_v10 = vld [vmem:[%s35902_s30 + $0xf40] sm:$0xff] }
 0x1ff   : > { %20571 = vmatpush.bf16.msra.mxu3 %v33669_v51  ;;  %v20320_v8 = vadd.f32 %v20319_v6, %v20307_v4  ;;  %v5106_v4 = vld [vmem:[#allocation1 + $0x2d] sm:$0xff]  ;;  %v296_v6 = vld [vmem:[%s35916_s27 + $0x40] sm:$0xff] }
 0x200   : > { %20533 = vmatpush.bf16.msra.mxu0 %v33644_v52 }
 0x201   : > { %20546 = vmatpush.bf16.msra.mxu1 %v33652_v53  ;;  %v33698_v53 = vld [vmem:[%s35902_s30 + $0xfd8] sm:$0xff] }
 0x202   : > { %20559 = vmatpush.bf16.msra.mxu2 %v33660_v54 }
 0x203   : > { %20572 = vmatpush.bf16.msra.mxu3 %v33668_v55 }
 0x204   : > { %20534 = vmatpush.bf16.msra.mxu0 %v33643_v58  ;;  %v20308_v17 = vpop.f32.mrf.mxu2 }
 0x205   : > { %20547 = vmatpush.bf16.msra.mxu1 %v33651_v60  ;;  %v20321_v19 = vpop.f32.mrf.mxu3  ;;  %v33689_v60 = vld [vmem:[%s35902_s30 + $0xf90] sm:$0xff] }
 0x206   : > { %20560 = vmatpush.bf16.msra.mxu2 %v33659_v61  ;;  %v33697_v61 = vld [vmem:[%s35902_s30 + $0xfd0] sm:$0xff] }
 0x207   : > { %20573 = vmatpush.bf16.msra.mxu3 %v33667_v63  ;;  %v33680_v63 = vld [vmem:[%s35902_s30 + $0xf48] sm:$0xff]  ;;  %v33709_v17 = vld [vmem:[%s35902_s30 + $0x1030] sm:$0xff] }
 0x208   : > { %20535 = vmatpush.bf16.msra.mxu0 %v33642_v0  ;;  %v33688_v0 = vld [vmem:[%s35902_s30 + $0xf88] sm:$0xff]  ;;  %v33725_v19 = vld [vmem:[%s35902_s30 + $0x10b0] sm:$0xff] }
 0x209   : > { %20548 = vmatpush.bf16.msra.mxu1 %v33650_v1  ;;  %v5105_v1 = vld [vmem:[#allocation1 + $0x24] sm:$0xff] }
 0x20a   : > { %20561 = vmatpush.bf16.msra.mxu2 %v33658_v2  ;;  %v5107_v2 = vld [vmem:[#allocation1 + $0x36] sm:$0xff] }
 0x20b   : > { %20574 = vmatpush.bf16.msra.mxu3 %v33666_v5  ;;  %v5108_v5 = vld [vmem:[#allocation1 + $0x3f] sm:$0xff] }
 0x20c   : > { %20536 = vmatpush.bf16.msra.mxu0 %v33641_v9  ;;  %5110 = vst [vmem:[#allocation1] ss:$9 sm:$0xff] %v296_v6  ;;  %v33671_v9 = vld [vmem:[%s35902_s30 + $0xf00] sm:$0xff]  ;;  %v33748_v6 = vld [vmem:[%s35902_s30 + $0x1168] sm:$0xff] }
 0x20d   : > { %20549 = vmatpush.bf16.msra.mxu1 %v33649_v11  ;;  %v33687_v11 = vld [vmem:[%s35902_s30 + $0xf80] sm:$0xff] }
 0x20e   : > { %20562 = vmatpush.bf16.msra.mxu2 %v33657_v12  ;;  %v33710_v12 = vld [vmem:[%s35902_s30 + $0x1038] sm:$0xff] }
 0x20f   : > { %20575 = vmatpush.bf16.msra.mxu3 %v33665_v13  ;;  %v33718_v13 = vld [vmem:[%s35902_s30 + $0x1078] sm:$0xff] }
 0x210   : > { %20537 = vmatpush.bf16.msra.mxu0 %v33640_v14  ;;  %v33726_v14 = vld [vmem:[%s35902_s30 + $0x10b8] sm:$0xff] }
 0x211   : > { %20550 = vmatpush.bf16.msra.mxu1 %v33648_v15  ;;  %v33695_v15 = vld [vmem:[%s35902_s30 + $0xfc0] sm:$0xff] }
 0x212   : > { %20563 = vmatpush.bf16.msra.mxu2 %v33656_v16  ;;  %v33734_v16 = vld [vmem:[%s35902_s30 + $0x10f8] sm:$0xff] }
 0x213   : > { %20576 = vmatpush.bf16.msra.mxu3 %v33664_v18  ;;  %v33717_v18 = vld [vmem:[%s35902_s30 + $0x1070] sm:$0xff] }
 0x214   : > { %20538 = vmatpush.bf16.msra.mxu0 %v33639_v20  ;;  %v20332_v40 = vpop.f32.mrf.mxu0  ;;  %v33733_v20 = vld [vmem:[%s35902_s30 + $0x10f0] sm:$0xff] }
 0x215   : > { %20551 = vmatpush.bf16.msra.mxu1 %v33647_v21  ;;  %v20333_v41 = vadd.f32 %v20332_v40, %v20320_v8  ;;  %v20345_v43 = vpop.f32.mrf.mxu1  ;;  %v33708_v21 = vld [vmem:[%s35902_s30 + $0x1028] sm:$0xff] }
 0x216   : > { %20564 = vmatpush.bf16.msra.mxu2 %v33655_v22  ;;  %v33716_v22 = vld [vmem:[%s35902_s30 + $0x1068] sm:$0xff] }
 0x217   : > { %20577 = vmatpush.bf16.msra.mxu3 %v33663_v26  ;;  %20539 = vmatmul.bf16.vlgmr.msra.gmra.mxu0 %v5101_v27  ;;  %v20346_v46 = vadd.f32 %v20345_v43, %v20333_v41  ;;  %v33707_v27 = vld [vmem:[%s35902_s30 + $0x1020] sm:$0xff] }
 0x218   : > { %20583 = vmatpush.bf16.msrb.mxu0 %v33678_v23  ;;  %20552 = vmatmul.bf16.vlgmr.msra.gmra.mxu1 %v5102_v30  ;;  %v33724_v23 = vld [vmem:[%s35902_s30 + $0x10a8] sm:$0xff]  ;;  %v33723_v30 = vld [vmem:[%s35902_s30 + $0x10a0] sm:$0xff] }
 0x219   : > { %20596 = vmatpush.bf16.msrb.mxu1 %v33686_v24  ;;  %20565 = vmatmul.bf16.vlgmr.msra.gmra.mxu2 %v5103_v28  ;;  %v33732_v24 = vld [vmem:[%s35902_s30 + $0x10e8] sm:$0xff] }
 0x21a   : > { %20609 = vmatpush.bf16.msrb.mxu2 %v33694_v25  ;;  %20578 = vmatmul.bf16.vlgmr.msra.gmra.mxu3 %v5104_v32  ;;  %v33731_v32 = vld [vmem:[%s35902_s30 + $0x10e0] sm:$0xff] }
 0x21b   : > { %20622 = vmatpush.bf16.msrb.mxu3 %v33702_v29  ;;  %v33715_v29 = vld [vmem:[%s35902_s30 + $0x1060] sm:$0xff] }
 0x21c   : > { %20584 = vmatpush.bf16.msrb.mxu0 %v33677_v31  ;;  %v20358_v51 = vpop.f32.mrf.mxu2  ;;  %v20334_v55 = vpop.f32.mrf.mxu0 }
 0x21d   : > { %20597 = vmatpush.bf16.msrb.mxu1 %v33685_v33  ;;  %v20359_v52 = vadd.f32 %v20358_v51, %v20346_v46  ;;  %v20371_v54 = vpop.f32.mrf.mxu3  ;;  %v20347_v58 = vpop.f32.mrf.mxu1  ;;  %v33706_v33 = vld [vmem:[%s35902_s30 + $0x1018] sm:$0xff]  ;;  %v33729_v46 = vld [vmem:[%s35902_s30 + $0x10d0] sm:$0xff]  ;;  %v33728_v51 = vld [vmem:[%s35902_s30 + $0x10c8] sm:$0xff] }
 0x21e   : > { %20610 = vmatpush.bf16.msrb.mxu2 %v33693_v34  ;;  %v33714_v34 = vld [vmem:[%s35902_s30 + $0x1058] sm:$0xff]  ;;  %v33719_v55 = vld [vmem:[%s35902_s30 + $0x1080] sm:$0xff] }
 0x21f   : > { %20623 = vmatpush.bf16.msrb.mxu3 %v33701_v35  ;;  %v36437_v56 = vadd.f32 %v20371_v54, %v20359_v52  ;;  %v33722_v35 = vld [vmem:[%s35902_s30 + $0x1098] sm:$0xff]  ;;  %v33711_v54 = vld [vmem:[%s35902_s30 + $0x1040] sm:$0xff] }
 0x220   : > { %20585 = vmatpush.bf16.msrb.mxu0 %v33676_v36  ;;  %v33758_v58 = vld [vmem:[%s35902_s30 + $0x11b8] sm:$0xff] }
 0x221   : > { %20598 = vmatpush.bf16.msrb.mxu1 %v33684_v37 }
 0x222   : > { %20611 = vmatpush.bf16.msrb.mxu2 %v33692_v38  ;;  %v33730_v38 = vld [vmem:[%s35902_s30 + $0x10d8] sm:$0xff] }
 0x223   : > { %20624 = vmatpush.bf16.msrb.mxu3 %v33700_v39 }
 0x224   : > { %20586 = vmatpush.bf16.msrb.mxu0 %v33675_v42  ;;  %v20360_v3 = vpop.f32.mrf.mxu2  ;;  %v33705_v42 = vld [vmem:[%s35902_s30 + $0x1010] sm:$0xff] }
 0x225   : > { %20599 = vmatpush.bf16.msrb.mxu1 %v33683_v44  ;;  %v20373_v8 = vpop.f32.mrf.mxu3  ;;  %v33713_v44 = vld [vmem:[%s35902_s30 + $0x1050] sm:$0xff] }
 0x226   : > { %20612 = vmatpush.bf16.msrb.mxu2 %v33691_v45  ;;  %v33721_v45 = vld [vmem:[%s35902_s30 + $0x1090] sm:$0xff]  ;;  %v33764_v8 = vld [vmem:[%s35902_s30 + $0x11e8] sm:$0xff] }
 0x227   : > { %20625 = vmatpush.bf16.msrb.mxu3 %v33699_v47  ;;  %v33704_v47 = vld [vmem:[%s35902_s30 + $0x1008] sm:$0xff]  ;;  %v33757_v3 = vld [vmem:[%s35902_s30 + $0x11b0] sm:$0xff] }
 0x228   : > { %20587 = vmatpush.bf16.msrb.mxu0 %v33674_v48  ;;  %v33712_v48 = vld [vmem:[%s35902_s30 + $0x1048] sm:$0xff] }
 0x229   : > { %20600 = vmatpush.bf16.msrb.mxu1 %v33682_v49  ;;  %v33720_v49 = vld [vmem:[%s35902_s30 + $0x1088] sm:$0xff] }
 0x22a   : > { %20613 = vmatpush.bf16.msrb.mxu2 %v33690_v50 }
 0x22b   : > { %20626 = vmatpush.bf16.msrb.mxu3 %v33698_v53  ;;  %v33703_v53 = vld [vmem:[%s35902_s30 + $0x1000] sm:$0xff] }
 0x22c   : > { %20588 = vmatpush.bf16.msrb.mxu0 %v33673_v57  ;;  %v33750_v57 = vld [vmem:[%s35902_s30 + $0x1178] sm:$0xff] }
 0x22d   : > { %20601 = vmatpush.bf16.msrb.mxu1 %v33681_v59  ;;  %v33727_v59 = vld [vmem:[%s35902_s30 + $0x10c0] sm:$0xff] }
 0x22e   : > { %20614 = vmatpush.bf16.msrb.mxu2 %v33689_v60  ;;  %v5111_v60 = vld [vmem:[#allocation1] sm:$0xff] }
 0x22f   : > { %20627 = vmatpush.bf16.msrb.mxu3 %v33697_v61  ;;  %v5113_v61 = vld [vmem:[#allocation1 + $0x12] sm:$0xff] }
 0x230   : > { %20589 = vmatpush.bf16.msrb.mxu0 %v33672_v62  ;;  %v33766_v62 = vld [vmem:[%s35902_s30 + $0x11f8] sm:$0xff] }
 0x231   : > { %20602 = vmatpush.bf16.msrb.mxu1 %v33680_v63  ;;  %v5112_v63 = vld [vmem:[#allocation1 + $0x9] sm:$0xff] }
 0x232   : > { %20615 = vmatpush.bf16.msrb.mxu2 %v33688_v0  ;;  %v33741_v0 = vld [vmem:[%s35902_s30 + $0x1130] sm:$0xff] }
 0x233   : > { %20628 = vmatpush.bf16.msrb.mxu3 %v33696_v7  ;;  %v33756_v7 = vld [vmem:[%s35902_s30 + $0x11a8] sm:$0xff] }
 0x234   : > { %20590 = vmatpush.bf16.msrb.mxu0 %v33671_v9  ;;  %v20384_v25 = vpop.f32.mrf.mxu0 }
 0x235   : > { %20603 = vmatpush.bf16.msrb.mxu1 %v33679_v10  ;;  %v20385_v26 = vadd.f32 %v20384_v25, %v36437_v56  ;;  %v20397_v28 = vpop.f32.mrf.mxu1  ;;  %v33742_v56 = vld [vmem:[%s35902_s30 + $0x1138] sm:$0xff] }
 0x236   : > { %20616 = vmatpush.bf16.msrb.mxu2 %v33687_v11  ;;  %v33739_v11 = vld [vmem:[%s35902_s30 + $0x1120] sm:$0xff] }
 0x237   : > { %20629 = vmatpush.bf16.msrb.mxu3 %v33695_v15  ;;  %20591 = vmatmul.bf16.vlgmr.msrb.gmra.mxu0 %v5105_v1  ;;  %v20398_v31 = vadd.f32 %v20397_v28, %v20385_v26  ;;  %v5114_v1 = vld [vmem:[#allocation1 + $0x1b] sm:$0xff] }
 0x238   : > { %20635 = vmatpush.bf16.msra.mxu0 %v33710_v12  ;;  %20604 = vmatmul.bf16.vlgmr.msrb.gmra.mxu1 %v5106_v4  ;;  %v33765_v4 = vld [vmem:[%s35902_s30 + $0x11f0] sm:$0xff] }
 0x239   : > { %20648 = vmatpush.bf16.msra.mxu1 %v33718_v13  ;;  %20617 = vmatmul.bf16.vlgmr.msrb.gmra.mxu2 %v5107_v2  ;;  %v33749_v2 = vld [vmem:[%s35902_s30 + $0x1170] sm:$0xff]  ;;  %v33747_v13 = vld [vmem:[%s35902_s30 + $0x1160] sm:$0xff] }
 0x23a   : > { %20661 = vmatpush.bf16.msra.mxu2 %v33726_v14  ;;  %20630 = vmatmul.bf16.vlgmr.msrb.gmra.mxu3 %v5108_v5  ;;  %v33740_v5 = vld [vmem:[%s35902_s30 + $0x1128] sm:$0xff]  ;;  %v33755_v14 = vld [vmem:[%s35902_s30 + $0x11a0] sm:$0xff]  ;;  %v33737_v26 = vld [vmem:[%s35902_s30 + $0x1110] sm:$0xff] }
 0x23b   : > { %20674 = vmatpush.bf16.msra.mxu3 %v33734_v16  ;;  %v33763_v16 = vld [vmem:[%s35902_s30 + $0x11e0] sm:$0xff]  ;;  %v33745_v28 = vld [vmem:[%s35902_s30 + $0x1150] sm:$0xff] }
 0x23c   : > { %20636 = vmatpush.bf16.msra.mxu0 %v33709_v17  ;;  %v20410_v36 = vpop.f32.mrf.mxu2  ;;  %v20386_v40 = vpop.f32.mrf.mxu0  ;;  %v33738_v17 = vld [vmem:[%s35902_s30 + $0x1118] sm:$0xff] }
 0x23d   : > { %20649 = vmatpush.bf16.msra.mxu1 %v33717_v18  ;;  %v20411_v37 = vadd.f32 %v20410_v36, %v20398_v31  ;;  %v20423_v39 = vpop.f32.mrf.mxu3  ;;  %v20399_v43 = vpop.f32.mrf.mxu1  ;;  %v33746_v18 = vld [vmem:[%s35902_s30 + $0x1158] sm:$0xff]  ;;  %v33736_v31 = vld [vmem:[%s35902_s30 + $0x1108] sm:$0xff] }
 0x23e   : > { %20662 = vmatpush.bf16.msra.mxu2 %v33725_v19  ;;  %v33754_v19 = vld [vmem:[%s35902_s30 + $0x1198] sm:$0xff]  ;;  %v33760_v40 = vld [vmem:[%s35902_s30 + $0x11c8] sm:$0xff]  ;;  %v33743_v43 = vld [vmem:[%s35902_s30 + $0x1140] sm:$0xff] }
 0x23f   : > { %20675 = vmatpush.bf16.msra.mxu3 %v33733_v20  ;;  %v20424_v41 = vadd.f32 %v20423_v39, %v20411_v37  ;;  %v5116_v37 = vld [vmem:[#allocation1 + $0x2d] sm:$0xff] }
 0x240   : > { %20637 = vmatpush.bf16.msra.mxu0 %v33708_v21  ;;  %v297_v39 = vld [vmem:[%s35916_s27 + $0x48] sm:$0xff] }
 0x241   : > { %20650 = vmatpush.bf16.msra.mxu1 %v33716_v22  ;;  %v33762_v22 = vld [vmem:[%s35902_s30 + $0x11d8] sm:$0xff] }
 0x242   : > { %20663 = vmatpush.bf16.msra.mxu2 %v33724_v23 }
 0x243   : > { %20676 = vmatpush.bf16.msra.mxu3 %v33732_v24 }
 0x244   : > { %20638 = vmatpush.bf16.msra.mxu0 %v33707_v27  ;;  %v20412_v50 = vpop.f32.mrf.mxu2 }
 0x245   : > { %20651 = vmatpush.bf16.msra.mxu1 %v33715_v29  ;;  %v20425_v52 = vpop.f32.mrf.mxu3  ;;  %v33753_v29 = vld [vmem:[%s35902_s30 + $0x1190] sm:$0xff] }
 0x246   : > { %20664 = vmatpush.bf16.msra.mxu2 %v33723_v30  ;;  %v33761_v30 = vld [vmem:[%s35902_s30 + $0x11d0] sm:$0xff] }
 0x247   : > { %20677 = vmatpush.bf16.msra.mxu3 %v33731_v32  ;;  %v33744_v32 = vld [vmem:[%s35902_s30 + $0x1148] sm:$0xff]  ;;  %v33773_v50 = vld [vmem:[%s35902_s30 + $0x1230] sm:$0xff] }
 0x248   : > { %20639 = vmatpush.bf16.msra.mxu0 %v33706_v33  ;;  %v33752_v33 = vld [vmem:[%s35902_s30 + $0x1188] sm:$0xff]  ;;  %v33789_v52 = vld [vmem:[%s35902_s30 + $0x12b0] sm:$0xff] }
 0x249   : > { %20652 = vmatpush.bf16.msra.mxu1 %v33714_v34  ;;  %v5115_v34 = vld [vmem:[#allocation1 + $0x24] sm:$0xff] }
 0x24a   : > { %20665 = vmatpush.bf16.msra.mxu2 %v33722_v35  ;;  %v5117_v35 = vld [vmem:[#allocation1 + $0x36] sm:$0xff] }
 0x24b   : > { %20678 = vmatpush.bf16.msra.mxu3 %v33730_v38  ;;  %v5118_v38 = vld [vmem:[#allocation1 + $0x3f] sm:$0xff] }
 0x24c   : > { %20640 = vmatpush.bf16.msra.mxu0 %v33705_v42  ;;  %5120 = vst [vmem:[#allocation1] ss:$9 sm:$0xff] %v297_v39  ;;  %v33735_v42 = vld [vmem:[%s35902_s30 + $0x1100] sm:$0xff]  ;;  %v33812_v39 = vld [vmem:[%s35902_s30 + $0x1368] sm:$0xff] }
 0x24d   : > { %20653 = vmatpush.bf16.msra.mxu1 %v33713_v44  ;;  %v33751_v44 = vld [vmem:[%s35902_s30 + $0x1180] sm:$0xff] }
 0x24e   : > { %20666 = vmatpush.bf16.msra.mxu2 %v33721_v45  ;;  %v33774_v45 = vld [vmem:[%s35902_s30 + $0x1238] sm:$0xff] }
 0x24f   : > { %20679 = vmatpush.bf16.msra.mxu3 %v33729_v46  ;;  %v33782_v46 = vld [vmem:[%s35902_s30 + $0x1278] sm:$0xff] }
 0x250   : > { %20641 = vmatpush.bf16.msra.mxu0 %v33704_v47  ;;  %v33790_v47 = vld [vmem:[%s35902_s30 + $0x12b8] sm:$0xff] }
 0x251   : > { %20654 = vmatpush.bf16.msra.mxu1 %v33712_v48  ;;  %v33759_v48 = vld [vmem:[%s35902_s30 + $0x11c0] sm:$0xff] }
 0x252   : > { %20667 = vmatpush.bf16.msra.mxu2 %v33720_v49  ;;  %v33798_v49 = vld [vmem:[%s35902_s30 + $0x12f8] sm:$0xff] }
 0x253   : > { %20680 = vmatpush.bf16.msra.mxu3 %v33728_v51  ;;  %v33781_v51 = vld [vmem:[%s35902_s30 + $0x1270] sm:$0xff] }
 0x254   : > { %20642 = vmatpush.bf16.msra.mxu0 %v33703_v53  ;;  %v20436_v9 = vpop.f32.mrf.mxu0  ;;  %v33797_v53 = vld [vmem:[%s35902_s30 + $0x12f0] sm:$0xff] }
 0x255   : > { %20655 = vmatpush.bf16.msra.mxu1 %v33711_v54  ;;  %v20437_v10 = vadd.f32 %v20436_v9, %v20424_v41  ;;  %v20449_v12 = vpop.f32.mrf.mxu1  ;;  %v33772_v54 = vld [vmem:[%s35902_s30 + $0x1228] sm:$0xff] }
 0x256   : > { %20668 = vmatpush.bf16.msra.mxu2 %v33719_v55  ;;  %v33780_v55 = vld [vmem:[%s35902_s30 + $0x1268] sm:$0xff] }
 0x257   : > { %20681 = vmatpush.bf16.msra.mxu3 %v33727_v59  ;;  %20643 = vmatmul.bf16.vlgmr.msra.gmra.mxu0 %v5111_v60  ;;  %v20450_v15 = vadd.f32 %v20449_v12, %v20437_v10  ;;  %v33771_v60 = vld [vmem:[%s35902_s30 + $0x1220] sm:$0xff] }
 0x258   : > { %20687 = vmatpush.bf16.msrb.mxu0 %v33742_v56  ;;  %20656 = vmatmul.bf16.vlgmr.msra.gmra.mxu1 %v5112_v63  ;;  %v33788_v56 = vld [vmem:[%s35902_s30 + $0x12a8] sm:$0xff]  ;;  %v33787_v63 = vld [vmem:[%s35902_s30 + $0x12a0] sm:$0xff] }
 0x259   : > { %20700 = vmatpush.bf16.msrb.mxu1 %v33750_v57  ;;  %20669 = vmatmul.bf16.vlgmr.msra.gmra.mxu2 %v5113_v61  ;;  %v33796_v57 = vld [vmem:[%s35902_s30 + $0x12e8] sm:$0xff] }
 0x25a   : > { %20713 = vmatpush.bf16.msrb.mxu2 %v33758_v58  ;;  %20682 = vmatmul.bf16.vlgmr.msra.gmra.mxu3 %v5114_v1  ;;  %v33795_v1 = vld [vmem:[%s35902_s30 + $0x12e0] sm:$0xff] }
 0x25b   : > { %20726 = vmatpush.bf16.msrb.mxu3 %v33766_v62  ;;  %v33779_v62 = vld [vmem:[%s35902_s30 + $0x1260] sm:$0xff] }
 0x25c   : > { %20688 = vmatpush.bf16.msrb.mxu0 %v33741_v0  ;;  %v20462_v20 = vpop.f32.mrf.mxu2  ;;  %v20438_v24 = vpop.f32.mrf.mxu0 }
 0x25d   : > { %20701 = vmatpush.bf16.msrb.mxu1 %v33749_v2  ;;  %v20463_v21 = vadd.f32 %v20462_v20, %v20450_v15  ;;  %v20475_v23 = vpop.f32.mrf.mxu3  ;;  %v20451_v27 = vpop.f32.mrf.mxu1  ;;  %v33770_v2 = vld [vmem:[%s35902_s30 + $0x1218] sm:$0xff]  ;;  %v33793_v15 = vld [vmem:[%s35902_s30 + $0x12d0] sm:$0xff]  ;;  %v33792_v20 = vld [vmem:[%s35902_s30 + $0x12c8] sm:$0xff] }
 0x25e   : > { %20714 = vmatpush.bf16.msrb.mxu2 %v33757_v3  ;;  %v33778_v3 = vld [vmem:[%s35902_s30 + $0x1258] sm:$0xff]  ;;  %v33783_v24 = vld [vmem:[%s35902_s30 + $0x1280] sm:$0xff] }
 0x25f   : > { %20727 = vmatpush.bf16.msrb.mxu3 %v33765_v4  ;;  %v36505_v25 = vadd.f32 %v20475_v23, %v20463_v21  ;;  %v33786_v4 = vld [vmem:[%s35902_s30 + $0x1298] sm:$0xff]  ;;  %v33775_v23 = vld [vmem:[%s35902_s30 + $0x1240] sm:$0xff] }
 0x260   : > { %20689 = vmatpush.bf16.msrb.mxu0 %v33740_v5  ;;  %v33822_v27 = vld [vmem:[%s35902_s30 + $0x13b8] sm:$0xff] }
 0x261   : > { %20702 = vmatpush.bf16.msrb.mxu1 %v33748_v6 }
 0x262   : > { %20715 = vmatpush.bf16.msrb.mxu2 %v33756_v7  ;;  %v33794_v7 = vld [vmem:[%s35902_s30 + $0x12d8] sm:$0xff] }
 0x263   : > { %20728 = vmatpush.bf16.msrb.mxu3 %v33764_v8 }
 0x264   : > { %20690 = vmatpush.bf16.msrb.mxu0 %v33739_v11  ;;  %v20464_v36 = vpop.f32.mrf.mxu2  ;;  %v33769_v11 = vld [vmem:[%s35902_s30 + $0x1210] sm:$0xff] }
 0x265   : > { %20703 = vmatpush.bf16.msrb.mxu1 %v33747_v13  ;;  %v20477_v41 = vpop.f32.mrf.mxu3  ;;  %v33777_v13 = vld [vmem:[%s35902_s30 + $0x1250] sm:$0xff] }
 0x266   : > { %20716 = vmatpush.bf16.msrb.mxu2 %v33755_v14  ;;  %v33785_v14 = vld [vmem:[%s35902_s30 + $0x1290] sm:$0xff]  ;;  %v33828_v41 = vld [vmem:[%s35902_s30 + $0x13e8] sm:$0xff] }
 0x267   : > { %20729 = vmatpush.bf16.msrb.mxu3 %v33763_v16  ;;  %v33768_v16 = vld [vmem:[%s35902_s30 + $0x1208] sm:$0xff]  ;;  %v33821_v36 = vld [vmem:[%s35902_s30 + $0x13b0] sm:$0xff] }
 0x268   : > { %20691 = vmatpush.bf16.msrb.mxu0 %v33738_v17  ;;  %v33776_v17 = vld [vmem:[%s35902_s30 + $0x1248] sm:$0xff] }
 0x269   : > { %20704 = vmatpush.bf16.msrb.mxu1 %v33746_v18  ;;  %v33784_v18 = vld [vmem:[%s35902_s30 + $0x1288] sm:$0xff] }
 0x26a   : > { %20717 = vmatpush.bf16.msrb.mxu2 %v33754_v19 }
 0x26b   : > { %20730 = vmatpush.bf16.msrb.mxu3 %v33762_v22  ;;  %v33767_v22 = vld [vmem:[%s35902_s30 + $0x1200] sm:$0xff] }
 0x26c   : > { %20692 = vmatpush.bf16.msrb.mxu0 %v33737_v26  ;;  %v33814_v26 = vld [vmem:[%s35902_s30 + $0x1378] sm:$0xff] }
 0x26d   : > { %20705 = vmatpush.bf16.msrb.mxu1 %v33745_v28  ;;  %v33791_v28 = vld [vmem:[%s35902_s30 + $0x12c0] sm:$0xff] }
 0x26e   : > { %20718 = vmatpush.bf16.msrb.mxu2 %v33753_v29  ;;  %v5121_v29 = vld [vmem:[#allocation1] sm:$0xff] }
 0x26f   : > { %20731 = vmatpush.bf16.msrb.mxu3 %v33761_v30  ;;  %v5123_v30 = vld [vmem:[#allocation1 + $0x12] sm:$0xff] }
 0x270   : > { %20693 = vmatpush.bf16.msrb.mxu0 %v33736_v31  ;;  %v33830_v31 = vld [vmem:[%s35902_s30 + $0x13f8] sm:$0xff] }
 0x271   : > { %20706 = vmatpush.bf16.msrb.mxu1 %v33744_v32  ;;  %v5122_v32 = vld [vmem:[#allocation1 + $0x9] sm:$0xff] }
 0x272   : > { %20719 = vmatpush.bf16.msrb.mxu2 %v33752_v33  ;;  %v33805_v33 = vld [vmem:[%s35902_s30 + $0x1330] sm:$0xff] }
 0x273   : > { %20732 = vmatpush.bf16.msrb.mxu3 %v33760_v40  ;;  %v33820_v40 = vld [vmem:[%s35902_s30 + $0x13a8] sm:$0xff] }
 0x274   : > { %20694 = vmatpush.bf16.msrb.mxu0 %v33735_v42  ;;  %v20488_v58 = vpop.f32.mrf.mxu0 }
 0x275   : > { %20707 = vmatpush.bf16.msrb.mxu1 %v33743_v43  ;;  %v20489_v59 = vadd.f32 %v20488_v58, %v36505_v25  ;;  %v20501_v61 = vpop.f32.mrf.mxu1  ;;  %v33806_v25 = vld [vmem:[%s35902_s30 + $0x1338] sm:$0xff] }
 0x276   : > { %20720 = vmatpush.bf16.msrb.mxu2 %v33751_v44  ;;  %v33803_v44 = vld [vmem:[%s35902_s30 + $0x1320] sm:$0xff] }
 0x277   : > { %20733 = vmatpush.bf16.msrb.mxu3 %v33759_v48  ;;  %20695 = vmatmul.bf16.vlgmr.msrb.gmra.mxu0 %v5115_v34  ;;  %v20502_v0 = vadd.f32 %v20501_v61, %v20489_v59  ;;  %v5124_v34 = vld [vmem:[#allocation1 + $0x1b] sm:$0xff] }
 0x278   : > { %20739 = vmatpush.bf16.msra.mxu0 %v33774_v45  ;;  %20708 = vmatmul.bf16.vlgmr.msrb.gmra.mxu1 %v5116_v37  ;;  %v33829_v37 = vld [vmem:[%s35902_s30 + $0x13f0] sm:$0xff] }
 0x279   : > { %20752 = vmatpush.bf16.msra.mxu1 %v33782_v46  ;;  %20721 = vmatmul.bf16.vlgmr.msrb.gmra.mxu2 %v5117_v35  ;;  %v33813_v35 = vld [vmem:[%s35902_s30 + $0x1370] sm:$0xff]  ;;  %v33811_v46 = vld [vmem:[%s35902_s30 + $0x1360] sm:$0xff] }
 0x27a   : > { %20765 = vmatpush.bf16.msra.mxu2 %v33790_v47  ;;  %20734 = vmatmul.bf16.vlgmr.msrb.gmra.mxu3 %v5118_v38  ;;  %v33804_v38 = vld [vmem:[%s35902_s30 + $0x1328] sm:$0xff]  ;;  %v33819_v47 = vld [vmem:[%s35902_s30 + $0x13a0] sm:$0xff]  ;;  %v33801_v59 = vld [vmem:[%s35902_s30 + $0x1310] sm:$0xff] }
 0x27b   : > { %20778 = vmatpush.bf16.msra.mxu3 %v33798_v49  ;;  %v33827_v49 = vld [vmem:[%s35902_s30 + $0x13e0] sm:$0xff]  ;;  %v33809_v61 = vld [vmem:[%s35902_s30 + $0x1350] sm:$0xff] }
 0x27c   : > { %20740 = vmatpush.bf16.msra.mxu0 %v33773_v50  ;;  %v20514_v5 = vpop.f32.mrf.mxu2  ;;  %v20490_v9 = vpop.f32.mrf.mxu0  ;;  %v33802_v50 = vld [vmem:[%s35902_s30 + $0x1318] sm:$0xff] }
 0x27d   : > { %20753 = vmatpush.bf16.msra.mxu1 %v33781_v51  ;;  %v20515_v6 = vadd.f32 %v20514_v5, %v20502_v0  ;;  %v20527_v8 = vpop.f32.mrf.mxu3  ;;  %v20503_v12 = vpop.f32.mrf.mxu1  ;;  %v33810_v51 = vld [vmem:[%s35902_s30 + $0x1358] sm:$0xff]  ;;  %v33800_v0 = vld [vmem:[%s35902_s30 + $0x1308] sm:$0xff] }
 0x27e   : > { %20766 = vmatpush.bf16.msra.mxu2 %v33789_v52  ;;  %v33818_v52 = vld [vmem:[%s35902_s30 + $0x1398] sm:$0xff]  ;;  %v33824_v9 = vld [vmem:[%s35902_s30 + $0x13c8] sm:$0xff]  ;;  %v33807_v12 = vld [vmem:[%s35902_s30 + $0x1340] sm:$0xff] }
 0x27f   : > { %20779 = vmatpush.bf16.msra.mxu3 %v33797_v53  ;;  %v20528_v10 = vadd.f32 %v20527_v8, %v20515_v6  ;;  %v5126_v6 = vld [vmem:[#allocation1 + $0x2d] sm:$0xff] }
 0x280   : > { %20741 = vmatpush.bf16.msra.mxu0 %v33772_v54  ;;  %v298_v8 = vld [vmem:[%s35916_s27 + $0x50] sm:$0xff] }
 0x281   : > { %20754 = vmatpush.bf16.msra.mxu1 %v33780_v55  ;;  %v33826_v55 = vld [vmem:[%s35902_s30 + $0x13d8] sm:$0xff] }
 0x282   : > { %20767 = vmatpush.bf16.msra.mxu2 %v33788_v56 }
 0x283   : > { %20780 = vmatpush.bf16.msra.mxu3 %v33796_v57 }
 0x284   : > { %20742 = vmatpush.bf16.msra.mxu0 %v33771_v60  ;;  %v20516_v19 = vpop.f32.mrf.mxu2 }
 0x285   : > { %20755 = vmatpush.bf16.msra.mxu1 %v33779_v62  ;;  %v20529_v21 = vpop.f32.mrf.mxu3  ;;  %v33817_v62 = vld [vmem:[%s35902_s30 + $0x1390] sm:$0xff] }
 0x286   : > { %20768 = vmatpush.bf16.msra.mxu2 %v33787_v63  ;;  %v33825_v63 = vld [vmem:[%s35902_s30 + $0x13d0] sm:$0xff] }
 0x287   : > { %20781 = vmatpush.bf16.msra.mxu3 %v33795_v1  ;;  %v33808_v1 = vld [vmem:[%s35902_s30 + $0x1348] sm:$0xff]  ;;  %v33837_v19 = vld [vmem:[%s35902_s30 + $0x1430] sm:$0xff] }
 0x288   : > { %20743 = vmatpush.bf16.msra.mxu0 %v33770_v2  ;;  %v33816_v2 = vld [vmem:[%s35902_s30 + $0x1388] sm:$0xff]  ;;  %v33853_v21 = vld [vmem:[%s35902_s30 + $0x14b0] sm:$0xff] }
 0x289   : > { %20756 = vmatpush.bf16.msra.mxu1 %v33778_v3  ;;  %v5125_v3 = vld [vmem:[#allocation1 + $0x24] sm:$0xff] }
 0x28a   : > { %20769 = vmatpush.bf16.msra.mxu2 %v33786_v4  ;;  %v5127_v4 = vld [vmem:[#allocation1 + $0x36] sm:$0xff] }
 0x28b   : > { %20782 = vmatpush.bf16.msra.mxu3 %v33794_v7  ;;  %v5128_v7 = vld [vmem:[#allocation1 + $0x3f] sm:$0xff] }
 0x28c   : > { %20744 = vmatpush.bf16.msra.mxu0 %v33769_v11  ;;  %5130 = vst [vmem:[#allocation1] ss:$9 sm:$0xff] %v298_v8  ;;  %v33799_v11 = vld [vmem:[%s35902_s30 + $0x1300] sm:$0xff]  ;;  %v33876_v8 = vld [vmem:[%s35902_s30 + $0x1568] sm:$0xff] }
 0x28d   : > { %20757 = vmatpush.bf16.msra.mxu1 %v33777_v13  ;;  %v33815_v13 = vld [vmem:[%s35902_s30 + $0x1380] sm:$0xff] }
 0x28e   : > { %20770 = vmatpush.bf16.msra.mxu2 %v33785_v14  ;;  %v33838_v14 = vld [vmem:[%s35902_s30 + $0x1438] sm:$0xff] }
 0x28f   : > { %20783 = vmatpush.bf16.msra.mxu3 %v33793_v15  ;;  %v33846_v15 = vld [vmem:[%s35902_s30 + $0x1478] sm:$0xff] }
 0x290   : > { %20745 = vmatpush.bf16.msra.mxu0 %v33768_v16  ;;  %v33854_v16 = vld [vmem:[%s35902_s30 + $0x14b8] sm:$0xff] }
 0x291   : > { %20758 = vmatpush.bf16.msra.mxu1 %v33776_v17  ;;  %v33823_v17 = vld [vmem:[%s35902_s30 + $0x13c0] sm:$0xff] }
 0x292   : > { %20771 = vmatpush.bf16.msra.mxu2 %v33784_v18  ;;  %v33862_v18 = vld [vmem:[%s35902_s30 + $0x14f8] sm:$0xff] }
 0x293   : > { %20784 = vmatpush.bf16.msra.mxu3 %v33792_v20  ;;  %v33845_v20 = vld [vmem:[%s35902_s30 + $0x1470] sm:$0xff] }
 0x294   : > { %20746 = vmatpush.bf16.msra.mxu0 %v33767_v22  ;;  %v20540_v42 = vpop.f32.mrf.mxu0  ;;  %v33861_v22 = vld [vmem:[%s35902_s30 + $0x14f0] sm:$0xff] }
 0x295   : > { %20759 = vmatpush.bf16.msra.mxu1 %v33775_v23  ;;  %v20541_v43 = vadd.f32 %v20540_v42, %v20528_v10  ;;  %v20553_v45 = vpop.f32.mrf.mxu1  ;;  %v33836_v23 = vld [vmem:[%s35902_s30 + $0x1428] sm:$0xff] }
 0x296   : > { %20772 = vmatpush.bf16.msra.mxu2 %v33783_v24  ;;  %v33844_v24 = vld [vmem:[%s35902_s30 + $0x1468] sm:$0xff] }
 0x297   : > { %20785 = vmatpush.bf16.msra.mxu3 %v33791_v28  ;;  %20747 = vmatmul.bf16.vlgmr.msra.gmra.mxu0 %v5121_v29  ;;  %v20554_v48 = vadd.f32 %v20553_v45, %v20541_v43  ;;  %v33835_v29 = vld [vmem:[%s35902_s30 + $0x1420] sm:$0xff] }
 0x298   : > { %20791 = vmatpush.bf16.msrb.mxu0 %v33806_v25  ;;  %20760 = vmatmul.bf16.vlgmr.msra.gmra.mxu1 %v5122_v32  ;;  %v33852_v25 = vld [vmem:[%s35902_s30 + $0x14a8] sm:$0xff]  ;;  %v33851_v32 = vld [vmem:[%s35902_s30 + $0x14a0] sm:$0xff] }
 0x299   : > { %20804 = vmatpush.bf16.msrb.mxu1 %v33814_v26  ;;  %20773 = vmatmul.bf16.vlgmr.msra.gmra.mxu2 %v5123_v30  ;;  %v33860_v26 = vld [vmem:[%s35902_s30 + $0x14e8] sm:$0xff] }
 0x29a   : > { %20817 = vmatpush.bf16.msrb.mxu2 %v33822_v27  ;;  %20786 = vmatmul.bf16.vlgmr.msra.gmra.mxu3 %v5124_v34  ;;  %v33859_v34 = vld [vmem:[%s35902_s30 + $0x14e0] sm:$0xff] }
 0x29b   : > { %20830 = vmatpush.bf16.msrb.mxu3 %v33830_v31  ;;  %v33843_v31 = vld [vmem:[%s35902_s30 + $0x1460] sm:$0xff] }
 0x29c   : > { %20792 = vmatpush.bf16.msrb.mxu0 %v33805_v33  ;;  %v20566_v53 = vpop.f32.mrf.mxu2  ;;  %v20542_v57 = vpop.f32.mrf.mxu0 }
 0x29d   : > { %20805 = vmatpush.bf16.msrb.mxu1 %v33813_v35  ;;  %v20567_v54 = vadd.f32 %v20566_v53, %v20554_v48  ;;  %v20579_v56 = vpop.f32.mrf.mxu3  ;;  %v20555_v60 = vpop.f32.mrf.mxu1  ;;  %v33834_v35 = vld [vmem:[%s35902_s30 + $0x1418] sm:$0xff]  ;;  %v33857_v48 = vld [vmem:[%s35902_s30 + $0x14d0] sm:$0xff]  ;;  %v33856_v53 = vld [vmem:[%s35902_s30 + $0x14c8] sm:$0xff] }
 0x29e   : > { %20818 = vmatpush.bf16.msrb.mxu2 %v33821_v36  ;;  %v33842_v36 = vld [vmem:[%s35902_s30 + $0x1458] sm:$0xff]  ;;  %v33847_v57 = vld [vmem:[%s35902_s30 + $0x1480] sm:$0xff] }
 0x29f   : > { %20831 = vmatpush.bf16.msrb.mxu3 %v33829_v37  ;;  %v36573_v58 = vadd.f32 %v20579_v56, %v20567_v54  ;;  %v33850_v37 = vld [vmem:[%s35902_s30 + $0x1498] sm:$0xff]  ;;  %v33839_v56 = vld [vmem:[%s35902_s30 + $0x1440] sm:$0xff] }
 0x2a0   : > { %20793 = vmatpush.bf16.msrb.mxu0 %v33804_v38  ;;  %v33886_v60 = vld [vmem:[%s35902_s30 + $0x15b8] sm:$0xff] }
 0x2a1   : > { %20806 = vmatpush.bf16.msrb.mxu1 %v33812_v39 }
 0x2a2   : > { %20819 = vmatpush.bf16.msrb.mxu2 %v33820_v40  ;;  %v33858_v40 = vld [vmem:[%s35902_s30 + $0x14d8] sm:$0xff] }
 0x2a3   : > { %20832 = vmatpush.bf16.msrb.mxu3 %v33828_v41 }
 0x2a4   : > { %20794 = vmatpush.bf16.msrb.mxu0 %v33803_v44  ;;  %v20568_v5 = vpop.f32.mrf.mxu2  ;;  %v33833_v44 = vld [vmem:[%s35902_s30 + $0x1410] sm:$0xff] }
 0x2a5   : > { %20807 = vmatpush.bf16.msrb.mxu1 %v33811_v46  ;;  %v20581_v10 = vpop.f32.mrf.mxu3  ;;  %v33841_v46 = vld [vmem:[%s35902_s30 + $0x1450] sm:$0xff] }
 0x2a6   : > { %20820 = vmatpush.bf16.msrb.mxu2 %v33819_v47  ;;  %v33849_v47 = vld [vmem:[%s35902_s30 + $0x1490] sm:$0xff]  ;;  %v33892_v10 = vld [vmem:[%s35902_s30 + $0x15e8] sm:$0xff] }
 0x2a7   : > { %20833 = vmatpush.bf16.msrb.mxu3 %v33827_v49  ;;  %v33832_v49 = vld [vmem:[%s35902_s30 + $0x1408] sm:$0xff]  ;;  %v33885_v5 = vld [vmem:[%s35902_s30 + $0x15b0] sm:$0xff] }
 0x2a8   : > { %20795 = vmatpush.bf16.msrb.mxu0 %v33802_v50  ;;  %v33840_v50 = vld [vmem:[%s35902_s30 + $0x1448] sm:$0xff] }
 0x2a9   : > { %20808 = vmatpush.bf16.msrb.mxu1 %v33810_v51  ;;  %v33848_v51 = vld [vmem:[%s35902_s30 + $0x1488] sm:$0xff] }
 0x2aa   : > { %20821 = vmatpush.bf16.msrb.mxu2 %v33818_v52 }
 0x2ab   : > { %20834 = vmatpush.bf16.msrb.mxu3 %v33826_v55  ;;  %v33831_v55 = vld [vmem:[%s35902_s30 + $0x1400] sm:$0xff] }
 0x2ac   : > { %20796 = vmatpush.bf16.msrb.mxu0 %v33801_v59  ;;  %v33878_v59 = vld [vmem:[%s35902_s30 + $0x1578] sm:$0xff] }
 0x2ad   : > { %20809 = vmatpush.bf16.msrb.mxu1 %v33809_v61  ;;  %v33855_v61 = vld [vmem:[%s35902_s30 + $0x14c0] sm:$0xff] }
 0x2ae   : > { %20822 = vmatpush.bf16.msrb.mxu2 %v33817_v62  ;;  %v5131_v62 = vld [vmem:[#allocation1] sm:$0xff] }
 0x2af   : > { %20835 = vmatpush.bf16.msrb.mxu3 %v33825_v63  ;;  %v5133_v63 = vld [vmem:[#allocation1 + $0x12] sm:$0xff] }
 0x2b0   : > { %20797 = vmatpush.bf16.msrb.mxu0 %v33800_v0  ;;  %v33894_v0 = vld [vmem:[%s35902_s30 + $0x15f8] sm:$0xff] }
 0x2b1   : > { %20810 = vmatpush.bf16.msrb.mxu1 %v33808_v1  ;;  %v5132_v1 = vld [vmem:[#allocation1 + $0x9] sm:$0xff] }
 0x2b2   : > { %20823 = vmatpush.bf16.msrb.mxu2 %v33816_v2  ;;  %v33869_v2 = vld [vmem:[%s35902_s30 + $0x1530] sm:$0xff] }
 0x2b3   : > { %20836 = vmatpush.bf16.msrb.mxu3 %v33824_v9  ;;  %v33884_v9 = vld [vmem:[%s35902_s30 + $0x15a8] sm:$0xff] }
 0x2b4   : > { %20798 = vmatpush.bf16.msrb.mxu0 %v33799_v11  ;;  %v20592_v27 = vpop.f32.mrf.mxu0 }
 0x2b5   : > { %20811 = vmatpush.bf16.msrb.mxu1 %v33807_v12  ;;  %v20593_v28 = vadd.f32 %v20592_v27, %v36573_v58  ;;  %v20605_v30 = vpop.f32.mrf.mxu1  ;;  %v33870_v58 = vld [vmem:[%s35902_s30 + $0x1538] sm:$0xff] }
 0x2b6   : > { %20824 = vmatpush.bf16.msrb.mxu2 %v33815_v13  ;;  %v33867_v13 = vld [vmem:[%s35902_s30 + $0x1520] sm:$0xff] }
 0x2b7   : > { %20837 = vmatpush.bf16.msrb.mxu3 %v33823_v17  ;;  %20799 = vmatmul.bf16.vlgmr.msrb.gmra.mxu0 %v5125_v3  ;;  %v20606_v33 = vadd.f32 %v20605_v30, %v20593_v28  ;;  %v5134_v3 = vld [vmem:[#allocation1 + $0x1b] sm:$0xff] }
 0x2b8   : > { %20843 = vmatpush.bf16.msra.mxu0 %v33838_v14  ;;  %20812 = vmatmul.bf16.vlgmr.msrb.gmra.mxu1 %v5126_v6  ;;  %v33893_v6 = vld [vmem:[%s35902_s30 + $0x15f0] sm:$0xff] }
 0x2b9   : > { %20856 = vmatpush.bf16.msra.mxu1 %v33846_v15  ;;  %20825 = vmatmul.bf16.vlgmr.msrb.gmra.mxu2 %v5127_v4  ;;  %v33877_v4 = vld [vmem:[%s35902_s30 + $0x1570] sm:$0xff]  ;;  %v33875_v15 = vld [vmem:[%s35902_s30 + $0x1560] sm:$0xff] }
 0x2ba   : > { %20869 = vmatpush.bf16.msra.mxu2 %v33854_v16  ;;  %20838 = vmatmul.bf16.vlgmr.msrb.gmra.mxu3 %v5128_v7  ;;  %v33868_v7 = vld [vmem:[%s35902_s30 + $0x1528] sm:$0xff]  ;;  %v33883_v16 = vld [vmem:[%s35902_s30 + $0x15a0] sm:$0xff]  ;;  %v33865_v28 = vld [vmem:[%s35902_s30 + $0x1510] sm:$0xff] }
 0x2bb   : > { %20882 = vmatpush.bf16.msra.mxu3 %v33862_v18  ;;  %v33891_v18 = vld [vmem:[%s35902_s30 + $0x15e0] sm:$0xff]  ;;  %v33873_v30 = vld [vmem:[%s35902_s30 + $0x1550] sm:$0xff] }
 0x2bc   : > { %20844 = vmatpush.bf16.msra.mxu0 %v33837_v19  ;;  %v20618_v38 = vpop.f32.mrf.mxu2  ;;  %v20594_v42 = vpop.f32.mrf.mxu0  ;;  %v33866_v19 = vld [vmem:[%s35902_s30 + $0x1518] sm:$0xff] }
 0x2bd   : > { %20857 = vmatpush.bf16.msra.mxu1 %v33845_v20  ;;  %v20619_v39 = vadd.f32 %v20618_v38, %v20606_v33  ;;  %v20631_v41 = vpop.f32.mrf.mxu3  ;;  %v20607_v45 = vpop.f32.mrf.mxu1  ;;  %v33874_v20 = vld [vmem:[%s35902_s30 + $0x1558] sm:$0xff]  ;;  %v33864_v33 = vld [vmem:[%s35902_s30 + $0x1508] sm:$0xff] }
 0x2be   : > { %20870 = vmatpush.bf16.msra.mxu2 %v33853_v21  ;;  %v33882_v21 = vld [vmem:[%s35902_s30 + $0x1598] sm:$0xff]  ;;  %v33888_v42 = vld [vmem:[%s35902_s30 + $0x15c8] sm:$0xff]  ;;  %v33871_v45 = vld [vmem:[%s35902_s30 + $0x1540] sm:$0xff] }
 0x2bf   : > { %20883 = vmatpush.bf16.msra.mxu3 %v33861_v22  ;;  %v20632_v43 = vadd.f32 %v20631_v41, %v20619_v39  ;;  %v5136_v39 = vld [vmem:[#allocation1 + $0x2d] sm:$0xff]  ;;  %v299_v41 = vld [vmem:[%s35916_s27 + $0x58] sm:$0xff] }
 0x2c0   : > { %20845 = vmatpush.bf16.msra.mxu0 %v33836_v23 }
 0x2c1   : > { %20858 = vmatpush.bf16.msra.mxu1 %v33844_v24  ;;  %v33890_v24 = vld [vmem:[%s35902_s30 + $0x15d8] sm:$0xff] }
 0x2c2   : > { %20871 = vmatpush.bf16.msra.mxu2 %v33852_v25 }
 0x2c3   : > { %20884 = vmatpush.bf16.msra.mxu3 %v33860_v26 }
 0x2c4   : > { %20846 = vmatpush.bf16.msra.mxu0 %v33835_v29  ;;  %v20620_v52 = vpop.f32.mrf.mxu2 }
 0x2c5   : > { %20859 = vmatpush.bf16.msra.mxu1 %v33843_v31  ;;  %v20633_v54 = vpop.f32.mrf.mxu3  ;;  %v33881_v31 = vld [vmem:[%s35902_s30 + $0x1590] sm:$0xff] }
 0x2c6   : > { %20872 = vmatpush.bf16.msra.mxu2 %v33851_v32  ;;  %v33889_v32 = vld [vmem:[%s35902_s30 + $0x15d0] sm:$0xff] }
 0x2c7   : > { %20885 = vmatpush.bf16.msra.mxu3 %v33859_v34  ;;  %v33872_v34 = vld [vmem:[%s35902_s30 + $0x1548] sm:$0xff]  ;;  %v33901_v52 = vld [vmem:[%s35902_s30 + $0x1630] sm:$0xff] }
 0x2c8   : > { %20847 = vmatpush.bf16.msra.mxu0 %v33834_v35  ;;  %v33880_v35 = vld [vmem:[%s35902_s30 + $0x1588] sm:$0xff]  ;;  %v33917_v54 = vld [vmem:[%s35902_s30 + $0x16b0] sm:$0xff] }
 0x2c9   : > { %20860 = vmatpush.bf16.msra.mxu1 %v33842_v36  ;;  %v5135_v36 = vld [vmem:[#allocation1 + $0x24] sm:$0xff] }
 0x2ca   : > { %20873 = vmatpush.bf16.msra.mxu2 %v33850_v37  ;;  %v5137_v37 = vld [vmem:[#allocation1 + $0x36] sm:$0xff] }
 0x2cb   : > { %20886 = vmatpush.bf16.msra.mxu3 %v33858_v40  ;;  %v5138_v40 = vld [vmem:[#allocation1 + $0x3f] sm:$0xff] }
 0x2cc   : > { %20848 = vmatpush.bf16.msra.mxu0 %v33833_v44  ;;  %5140 = vst [vmem:[#allocation1] ss:$9 sm:$0xff] %v299_v41  ;;  %v33863_v44 = vld [vmem:[%s35902_s30 + $0x1500] sm:$0xff]  ;;  %v33940_v41 = vld [vmem:[%s35902_s30 + $0x1768] sm:$0xff] }
 0x2cd   : > { %20861 = vmatpush.bf16.msra.mxu1 %v33841_v46  ;;  %v33879_v46 = vld [vmem:[%s35902_s30 + $0x1580] sm:$0xff] }
 0x2ce   : > { %20874 = vmatpush.bf16.msra.mxu2 %v33849_v47  ;;  %v33902_v47 = vld [vmem:[%s35902_s30 + $0x1638] sm:$0xff] }
 0x2cf   : > { %20887 = vmatpush.bf16.msra.mxu3 %v33857_v48  ;;  %v33910_v48 = vld [vmem:[%s35902_s30 + $0x1678] sm:$0xff] }
 0x2d0   : > { %20849 = vmatpush.bf16.msra.mxu0 %v33832_v49  ;;  %v33918_v49 = vld [vmem:[%s35902_s30 + $0x16b8] sm:$0xff] }
 0x2d1   : > { %20862 = vmatpush.bf16.msra.mxu1 %v33840_v50  ;;  %v33887_v50 = vld [vmem:[%s35902_s30 + $0x15c0] sm:$0xff] }
 0x2d2   : > { %20875 = vmatpush.bf16.msra.mxu2 %v33848_v51  ;;  %v33926_v51 = vld [vmem:[%s35902_s30 + $0x16f8] sm:$0xff] }
 0x2d3   : > { %20888 = vmatpush.bf16.msra.mxu3 %v33856_v53  ;;  %v33909_v53 = vld [vmem:[%s35902_s30 + $0x1670] sm:$0xff] }
 0x2d4   : > { %20850 = vmatpush.bf16.msra.mxu0 %v33831_v55  ;;  %v20644_v11 = vpop.f32.mrf.mxu0  ;;  %v33925_v55 = vld [vmem:[%s35902_s30 + $0x16f0] sm:$0xff] }
 0x2d5   : > { %20863 = vmatpush.bf16.msra.mxu1 %v33839_v56  ;;  %v20645_v12 = vadd.f32 %v20644_v11, %v20632_v43  ;;  %v20657_v14 = vpop.f32.mrf.mxu1  ;;  %v33900_v56 = vld [vmem:[%s35902_s30 + $0x1628] sm:$0xff] }
 0x2d6   : > { %20876 = vmatpush.bf16.msra.mxu2 %v33847_v57  ;;  %v33908_v57 = vld [vmem:[%s35902_s30 + $0x1668] sm:$0xff] }
 0x2d7   : > { %20889 = vmatpush.bf16.msra.mxu3 %v33855_v61  ;;  %20851 = vmatmul.bf16.vlgmr.msra.gmra.mxu0 %v5131_v62  ;;  %v20658_v17 = vadd.f32 %v20657_v14, %v20645_v12  ;;  %v33899_v62 = vld [vmem:[%s35902_s30 + $0x1620] sm:$0xff] }
 0x2d8   : > { %20895 = vmatpush.bf16.msrb.mxu0 %v33870_v58  ;;  %20864 = vmatmul.bf16.vlgmr.msra.gmra.mxu1 %v5132_v1  ;;  %v33916_v58 = vld [vmem:[%s35902_s30 + $0x16a8] sm:$0xff]  ;;  %v33915_v1 = vld [vmem:[%s35902_s30 + $0x16a0] sm:$0xff] }
 0x2d9   : > { %20908 = vmatpush.bf16.msrb.mxu1 %v33878_v59  ;;  %20877 = vmatmul.bf16.vlgmr.msra.gmra.mxu2 %v5133_v63  ;;  %v33924_v59 = vld [vmem:[%s35902_s30 + $0x16e8] sm:$0xff] }
 0x2da   : > { %20921 = vmatpush.bf16.msrb.mxu2 %v33886_v60  ;;  %20890 = vmatmul.bf16.vlgmr.msra.gmra.mxu3 %v5134_v3  ;;  %v33923_v3 = vld [vmem:[%s35902_s30 + $0x16e0] sm:$0xff] }
 0x2db   : > { %20934 = vmatpush.bf16.msrb.mxu3 %v33894_v0  ;;  %v33907_v0 = vld [vmem:[%s35902_s30 + $0x1660] sm:$0xff] }
 0x2dc   : > { %20896 = vmatpush.bf16.msrb.mxu0 %v33869_v2  ;;  %v20670_v22 = vpop.f32.mrf.mxu2  ;;  %v20646_v26 = vpop.f32.mrf.mxu0 }
 0x2dd   : > { %20909 = vmatpush.bf16.msrb.mxu1 %v33877_v4  ;;  %v20671_v23 = vadd.f32 %v20670_v22, %v20658_v17  ;;  %v20683_v25 = vpop.f32.mrf.mxu3  ;;  %v20659_v29 = vpop.f32.mrf.mxu1  ;;  %v33898_v4 = vld [vmem:[%s35902_s30 + $0x1618] sm:$0xff]  ;;  %v33921_v17 = vld [vmem:[%s35902_s30 + $0x16d0] sm:$0xff]  ;;  %v33920_v22 = vld [vmem:[%s35902_s30 + $0x16c8] sm:$0xff] }
 0x2de   : > { %20922 = vmatpush.bf16.msrb.mxu2 %v33885_v5  ;;  %v33906_v5 = vld [vmem:[%s35902_s30 + $0x1658] sm:$0xff]  ;;  %v33911_v26 = vld [vmem:[%s35902_s30 + $0x1680] sm:$0xff] }
 0x2df   : > { %20935 = vmatpush.bf16.msrb.mxu3 %v33893_v6  ;;  %v36641_v27 = vadd.f32 %v20683_v25, %v20671_v23  ;;  %v33914_v6 = vld [vmem:[%s35902_s30 + $0x1698] sm:$0xff]  ;;  %v33903_v25 = vld [vmem:[%s35902_s30 + $0x1640] sm:$0xff] }
 0x2e0   : > { %20897 = vmatpush.bf16.msrb.mxu0 %v33868_v7  ;;  %v33950_v29 = vld [vmem:[%s35902_s30 + $0x17b8] sm:$0xff] }
 0x2e1   : > { %20910 = vmatpush.bf16.msrb.mxu1 %v33876_v8 }
 0x2e2   : > { %20923 = vmatpush.bf16.msrb.mxu2 %v33884_v9  ;;  %v33922_v9 = vld [vmem:[%s35902_s30 + $0x16d8] sm:$0xff] }
 0x2e3   : > { %20936 = vmatpush.bf16.msrb.mxu3 %v33892_v10 }
 0x2e4   : > { %20898 = vmatpush.bf16.msrb.mxu0 %v33867_v13  ;;  %v20672_v38 = vpop.f32.mrf.mxu2  ;;  %v33897_v13 = vld [vmem:[%s35902_s30 + $0x1610] sm:$0xff] }
 0x2e5   : > { %20911 = vmatpush.bf16.msrb.mxu1 %v33875_v15  ;;  %v20685_v43 = vpop.f32.mrf.mxu3  ;;  %v33905_v15 = vld [vmem:[%s35902_s30 + $0x1650] sm:$0xff] }
 0x2e6   : > { %20924 = vmatpush.bf16.msrb.mxu2 %v33883_v16  ;;  %v33913_v16 = vld [vmem:[%s35902_s30 + $0x1690] sm:$0xff]  ;;  %v33956_v43 = vld [vmem:[%s35902_s30 + $0x17e8] sm:$0xff] }
 0x2e7   : > { %20937 = vmatpush.bf16.msrb.mxu3 %v33891_v18  ;;  %v33896_v18 = vld [vmem:[%s35902_s30 + $0x1608] sm:$0xff]  ;;  %v33949_v38 = vld [vmem:[%s35902_s30 + $0x17b0] sm:$0xff] }
 0x2e8   : > { %20899 = vmatpush.bf16.msrb.mxu0 %v33866_v19  ;;  %v33904_v19 = vld [vmem:[%s35902_s30 + $0x1648] sm:$0xff] }
 0x2e9   : > { %20912 = vmatpush.bf16.msrb.mxu1 %v33874_v20  ;;  %v33912_v20 = vld [vmem:[%s35902_s30 + $0x1688] sm:$0xff] }
 0x2ea   : > { %20925 = vmatpush.bf16.msrb.mxu2 %v33882_v21 }
 0x2eb   : > { %20938 = vmatpush.bf16.msrb.mxu3 %v33890_v24  ;;  %v33895_v24 = vld [vmem:[%s35902_s30 + $0x1600] sm:$0xff] }
 0x2ec   : > { %20900 = vmatpush.bf16.msrb.mxu0 %v33865_v28  ;;  %v33942_v28 = vld [vmem:[%s35902_s30 + $0x1778] sm:$0xff] }
 0x2ed   : > { %20913 = vmatpush.bf16.msrb.mxu1 %v33873_v30  ;;  %v33919_v30 = vld [vmem:[%s35902_s30 + $0x16c0] sm:$0xff] }
 0x2ee   : > { %20926 = vmatpush.bf16.msrb.mxu2 %v33881_v31  ;;  %v5141_v31 = vld [vmem:[#allocation1] sm:$0xff] }
 0x2ef   : > { %20939 = vmatpush.bf16.msrb.mxu3 %v33889_v32  ;;  %v5143_v32 = vld [vmem:[#allocation1 + $0x12] sm:$0xff] }
 0x2f0   : > { %20901 = vmatpush.bf16.msrb.mxu0 %v33864_v33  ;;  %v33958_v33 = vld [vmem:[%s35902_s30 + $0x17f8] sm:$0xff] }
 0x2f1   : > { %20914 = vmatpush.bf16.msrb.mxu1 %v33872_v34  ;;  %v5142_v34 = vld [vmem:[#allocation1 + $0x9] sm:$0xff] }
 0x2f2   : > { %20927 = vmatpush.bf16.msrb.mxu2 %v33880_v35  ;;  %v33933_v35 = vld [vmem:[%s35902_s30 + $0x1730] sm:$0xff] }
 0x2f3   : > { %20940 = vmatpush.bf16.msrb.mxu3 %v33888_v42  ;;  %v33948_v42 = vld [vmem:[%s35902_s30 + $0x17a8] sm:$0xff] }
 0x2f4   : > { %20902 = vmatpush.bf16.msrb.mxu0 %v33863_v44  ;;  %v20696_v60 = vpop.f32.mrf.mxu0 }
 0x2f5   : > { %20915 = vmatpush.bf16.msrb.mxu1 %v33871_v45  ;;  %v20697_v61 = vadd.f32 %v20696_v60, %v36641_v27  ;;  %v20709_v63 = vpop.f32.mrf.mxu1  ;;  %v33934_v27 = vld [vmem:[%s35902_s30 + $0x1738] sm:$0xff] }
 0x2f6   : > { %20928 = vmatpush.bf16.msrb.mxu2 %v33879_v46  ;;  %v33931_v46 = vld [vmem:[%s35902_s30 + $0x1720] sm:$0xff] }
 0x2f7   : > { %20941 = vmatpush.bf16.msrb.mxu3 %v33887_v50  ;;  %20903 = vmatmul.bf16.vlgmr.msrb.gmra.mxu0 %v5135_v36  ;;  %v20710_v2 = vadd.f32 %v20709_v63, %v20697_v61  ;;  %v5144_v36 = vld [vmem:[#allocation1 + $0x1b] sm:$0xff] }
 0x2f8   : > { %20947 = vmatpush.bf16.msra.mxu0 %v33902_v47  ;;  %20916 = vmatmul.bf16.vlgmr.msrb.gmra.mxu1 %v5136_v39  ;;  %v33957_v39 = vld [vmem:[%s35902_s30 + $0x17f0] sm:$0xff] }
 0x2f9   : > { %20960 = vmatpush.bf16.msra.mxu1 %v33910_v48  ;;  %20929 = vmatmul.bf16.vlgmr.msrb.gmra.mxu2 %v5137_v37  ;;  %v33941_v37 = vld [vmem:[%s35902_s30 + $0x1770] sm:$0xff]  ;;  %v33939_v48 = vld [vmem:[%s35902_s30 + $0x1760] sm:$0xff] }
 0x2fa   : > { %20973 = vmatpush.bf16.msra.mxu2 %v33918_v49  ;;  %20942 = vmatmul.bf16.vlgmr.msrb.gmra.mxu3 %v5138_v40  ;;  %v33932_v40 = vld [vmem:[%s35902_s30 + $0x1728] sm:$0xff]  ;;  %v33947_v49 = vld [vmem:[%s35902_s30 + $0x17a0] sm:$0xff]  ;;  %v33929_v61 = vld [vmem:[%s35902_s30 + $0x1710] sm:$0xff] }
 0x2fb   : > { %20986 = vmatpush.bf16.msra.mxu3 %v33926_v51  ;;  %v33955_v51 = vld [vmem:[%s35902_s30 + $0x17e0] sm:$0xff]  ;;  %v33937_v63 = vld [vmem:[%s35902_s30 + $0x1750] sm:$0xff] }
 0x2fc   : > { %20948 = vmatpush.bf16.msra.mxu0 %v33901_v52  ;;  %v20722_v7 = vpop.f32.mrf.mxu2  ;;  %v20698_v11 = vpop.f32.mrf.mxu0  ;;  %v33930_v52 = vld [vmem:[%s35902_s30 + $0x1718] sm:$0xff] }
 0x2fd   : > { %20961 = vmatpush.bf16.msra.mxu1 %v33909_v53  ;;  %v20723_v8 = vadd.f32 %v20722_v7, %v20710_v2  ;;  %v20735_v10 = vpop.f32.mrf.mxu3  ;;  %v20711_v14 = vpop.f32.mrf.mxu1  ;;  %v33938_v53 = vld [vmem:[%s35902_s30 + $0x1758] sm:$0xff]  ;;  %v33928_v2 = vld [vmem:[%s35902_s30 + $0x1708] sm:$0xff] }
 0x2fe   : > { %20974 = vmatpush.bf16.msra.mxu2 %v33917_v54  ;;  %v33946_v54 = vld [vmem:[%s35902_s30 + $0x1798] sm:$0xff]  ;;  %v33952_v11 = vld [vmem:[%s35902_s30 + $0x17c8] sm:$0xff]  ;;  %v33935_v14 = vld [vmem:[%s35902_s30 + $0x1740] sm:$0xff] }
 0x2ff   : > { %20987 = vmatpush.bf16.msra.mxu3 %v33925_v55  ;;  %v20736_v12 = vadd.f32 %v20735_v10, %v20723_v8  ;;  %v5146_v8 = vld [vmem:[#allocation1 + $0x2d] sm:$0xff]  ;;  %v300_v10 = vld [vmem:[%s35916_s27 + $0x60] sm:$0xff] }
 0x300   : > { %20949 = vmatpush.bf16.msra.mxu0 %v33900_v56 }
 0x301   : > { %20962 = vmatpush.bf16.msra.mxu1 %v33908_v57  ;;  %v33954_v57 = vld [vmem:[%s35902_s30 + $0x17d8] sm:$0xff] }
 0x302   : > { %20975 = vmatpush.bf16.msra.mxu2 %v33916_v58 }
 0x303   : > { %20988 = vmatpush.bf16.msra.mxu3 %v33924_v59 }
 0x304   : > { %20950 = vmatpush.bf16.msra.mxu0 %v33899_v62  ;;  %v20724_v21 = vpop.f32.mrf.mxu2 }
 0x305   : > { %20963 = vmatpush.bf16.msra.mxu1 %v33907_v0  ;;  %v20737_v23 = vpop.f32.mrf.mxu3  ;;  %v33945_v0 = vld [vmem:[%s35902_s30 + $0x1790] sm:$0xff] }
 0x306   : > { %20976 = vmatpush.bf16.msra.mxu2 %v33915_v1  ;;  %v33953_v1 = vld [vmem:[%s35902_s30 + $0x17d0] sm:$0xff] }
 0x307   : > { %20989 = vmatpush.bf16.msra.mxu3 %v33923_v3  ;;  %v33936_v3 = vld [vmem:[%s35902_s30 + $0x1748] sm:$0xff]  ;;  %v33965_v21 = vld [vmem:[%s35902_s30 + $0x1830] sm:$0xff] }
 0x308   : > { %20951 = vmatpush.bf16.msra.mxu0 %v33898_v4  ;;  %v33944_v4 = vld [vmem:[%s35902_s30 + $0x1788] sm:$0xff]  ;;  %v33981_v23 = vld [vmem:[%s35902_s30 + $0x18b0] sm:$0xff] }
 0x309   : > { %20964 = vmatpush.bf16.msra.mxu1 %v33906_v5  ;;  %v5145_v5 = vld [vmem:[#allocation1 + $0x24] sm:$0xff] }
 0x30a   : > { %20977 = vmatpush.bf16.msra.mxu2 %v33914_v6  ;;  %v5147_v6 = vld [vmem:[#allocation1 + $0x36] sm:$0xff] }
 0x30b   : > { %20990 = vmatpush.bf16.msra.mxu3 %v33922_v9  ;;  %v5148_v9 = vld [vmem:[#allocation1 + $0x3f] sm:$0xff] }
 0x30c   : > { %20952 = vmatpush.bf16.msra.mxu0 %v33897_v13  ;;  %5150 = vst [vmem:[#allocation1] ss:$9 sm:$0xff] %v300_v10  ;;  %v33927_v13 = vld [vmem:[%s35902_s30 + $0x1700] sm:$0xff]  ;;  %v34004_v10 = vld [vmem:[%s35902_s30 + $0x1968] sm:$0xff] }
 0x30d   : > { %20965 = vmatpush.bf16.msra.mxu1 %v33905_v15  ;;  %v33943_v15 = vld [vmem:[%s35902_s30 + $0x1780] sm:$0xff] }
 0x30e   : > { %20978 = vmatpush.bf16.msra.mxu2 %v33913_v16  ;;  %v33966_v16 = vld [vmem:[%s35902_s30 + $0x1838] sm:$0xff] }
 0x30f   : > { %20991 = vmatpush.bf16.msra.mxu3 %v33921_v17  ;;  %v33974_v17 = vld [vmem:[%s35902_s30 + $0x1878] sm:$0xff] }
 0x310   : > { %20953 = vmatpush.bf16.msra.mxu0 %v33896_v18  ;;  %v33982_v18 = vld [vmem:[%s35902_s30 + $0x18b8] sm:$0xff] }
 0x311   : > { %20966 = vmatpush.bf16.msra.mxu1 %v33904_v19  ;;  %v33951_v19 = vld [vmem:[%s35902_s30 + $0x17c0] sm:$0xff] }
 0x312   : > { %20979 = vmatpush.bf16.msra.mxu2 %v33912_v20  ;;  %v33990_v20 = vld [vmem:[%s35902_s30 + $0x18f8] sm:$0xff] }
 0x313   : > { %20992 = vmatpush.bf16.msra.mxu3 %v33920_v22  ;;  %v33973_v22 = vld [vmem:[%s35902_s30 + $0x1870] sm:$0xff] }
 0x314   : > { %20954 = vmatpush.bf16.msra.mxu0 %v33895_v24  ;;  %v20748_v44 = vpop.f32.mrf.mxu0  ;;  %v33989_v24 = vld [vmem:[%s35902_s30 + $0x18f0] sm:$0xff] }
 0x315   : > { %20967 = vmatpush.bf16.msra.mxu1 %v33903_v25  ;;  %v20749_v45 = vadd.f32 %v20748_v44, %v20736_v12  ;;  %v20761_v47 = vpop.f32.mrf.mxu1  ;;  %v33964_v25 = vld [vmem:[%s35902_s30 + $0x1828] sm:$0xff] }
 0x316   : > { %20980 = vmatpush.bf16.msra.mxu2 %v33911_v26  ;;  %v33972_v26 = vld [vmem:[%s35902_s30 + $0x1868] sm:$0xff] }
 0x317   : > { %20993 = vmatpush.bf16.msra.mxu3 %v33919_v30  ;;  %20955 = vmatmul.bf16.vlgmr.msra.gmra.mxu0 %v5141_v31  ;;  %v20762_v50 = vadd.f32 %v20761_v47, %v20749_v45  ;;  %v33963_v31 = vld [vmem:[%s35902_s30 + $0x1820] sm:$0xff] }
 0x318   : > { %20999 = vmatpush.bf16.msrb.mxu0 %v33934_v27  ;;  %20968 = vmatmul.bf16.vlgmr.msra.gmra.mxu1 %v5142_v34  ;;  %v33980_v27 = vld [vmem:[%s35902_s30 + $0x18a8] sm:$0xff]  ;;  %v33979_v34 = vld [vmem:[%s35902_s30 + $0x18a0] sm:$0xff] }
 0x319   : > { %21012 = vmatpush.bf16.msrb.mxu1 %v33942_v28  ;;  %20981 = vmatmul.bf16.vlgmr.msra.gmra.mxu2 %v5143_v32  ;;  %v33988_v28 = vld [vmem:[%s35902_s30 + $0x18e8] sm:$0xff] }
 0x31a   : > { %21025 = vmatpush.bf16.msrb.mxu2 %v33950_v29  ;;  %20994 = vmatmul.bf16.vlgmr.msra.gmra.mxu3 %v5144_v36  ;;  %v33987_v36 = vld [vmem:[%s35902_s30 + $0x18e0] sm:$0xff] }
 0x31b   : > { %21038 = vmatpush.bf16.msrb.mxu3 %v33958_v33  ;;  %v33971_v33 = vld [vmem:[%s35902_s30 + $0x1860] sm:$0xff] }
 0x31c   : > { %21000 = vmatpush.bf16.msrb.mxu0 %v33933_v35  ;;  %v20774_v55 = vpop.f32.mrf.mxu2  ;;  %v20750_v59 = vpop.f32.mrf.mxu0 }
 0x31d   : > { %21013 = vmatpush.bf16.msrb.mxu1 %v33941_v37  ;;  %v20775_v56 = vadd.f32 %v20774_v55, %v20762_v50  ;;  %v20787_v58 = vpop.f32.mrf.mxu3  ;;  %v20763_v62 = vpop.f32.mrf.mxu1  ;;  %v33962_v37 = vld [vmem:[%s35902_s30 + $0x1818] sm:$0xff]  ;;  %v33985_v50 = vld [vmem:[%s35902_s30 + $0x18d0] sm:$0xff]  ;;  %v33984_v55 = vld [vmem:[%s35902_s30 + $0x18c8] sm:$0xff] }
 0x31e   : > { %21026 = vmatpush.bf16.msrb.mxu2 %v33949_v38  ;;  %v33970_v38 = vld [vmem:[%s35902_s30 + $0x1858] sm:$0xff]  ;;  %v33975_v59 = vld [vmem:[%s35902_s30 + $0x1880] sm:$0xff] }
 0x31f   : > { %21039 = vmatpush.bf16.msrb.mxu3 %v33957_v39  ;;  %v36709_v60 = vadd.f32 %v20787_v58, %v20775_v56  ;;  %v33978_v39 = vld [vmem:[%s35902_s30 + $0x1898] sm:$0xff]  ;;  %v33967_v58 = vld [vmem:[%s35902_s30 + $0x1840] sm:$0xff] }
 0x320   : > { %21001 = vmatpush.bf16.msrb.mxu0 %v33932_v40  ;;  %v34014_v62 = vld [vmem:[%s35902_s30 + $0x19b8] sm:$0xff] }
 0x321   : > { %21014 = vmatpush.bf16.msrb.mxu1 %v33940_v41 }
 0x322   : > { %21027 = vmatpush.bf16.msrb.mxu2 %v33948_v42  ;;  %v33986_v42 = vld [vmem:[%s35902_s30 + $0x18d8] sm:$0xff] }
 0x323   : > { %21040 = vmatpush.bf16.msrb.mxu3 %v33956_v43 }
 0x324   : > { %21002 = vmatpush.bf16.msrb.mxu0 %v33931_v46  ;;  %v20776_v7 = vpop.f32.mrf.mxu2  ;;  %v33961_v46 = vld [vmem:[%s35902_s30 + $0x1810] sm:$0xff] }
 0x325   : > { %21015 = vmatpush.bf16.msrb.mxu1 %v33939_v48  ;;  %v20789_v12 = vpop.f32.mrf.mxu3  ;;  %v33969_v48 = vld [vmem:[%s35902_s30 + $0x1850] sm:$0xff] }
 0x326   : > { %21028 = vmatpush.bf16.msrb.mxu2 %v33947_v49  ;;  %v33977_v49 = vld [vmem:[%s35902_s30 + $0x1890] sm:$0xff]  ;;  %v34020_v12 = vld [vmem:[%s35902_s30 + $0x19e8] sm:$0xff] }
 0x327   : > { %21041 = vmatpush.bf16.msrb.mxu3 %v33955_v51  ;;  %v33960_v51 = vld [vmem:[%s35902_s30 + $0x1808] sm:$0xff]  ;;  %v34013_v7 = vld [vmem:[%s35902_s30 + $0x19b0] sm:$0xff] }
 0x328   : > { %21003 = vmatpush.bf16.msrb.mxu0 %v33930_v52  ;;  %v33968_v52 = vld [vmem:[%s35902_s30 + $0x1848] sm:$0xff] }
 0x329   : > { %21016 = vmatpush.bf16.msrb.mxu1 %v33938_v53  ;;  %v33976_v53 = vld [vmem:[%s35902_s30 + $0x1888] sm:$0xff] }
 0x32a   : > { %21029 = vmatpush.bf16.msrb.mxu2 %v33946_v54 }
 0x32b   : > { %21042 = vmatpush.bf16.msrb.mxu3 %v33954_v57  ;;  %v33959_v57 = vld [vmem:[%s35902_s30 + $0x1800] sm:$0xff] }
 0x32c   : > { %21004 = vmatpush.bf16.msrb.mxu0 %v33929_v61  ;;  %v34006_v61 = vld [vmem:[%s35902_s30 + $0x1978] sm:$0xff] }
 0x32d   : > { %21017 = vmatpush.bf16.msrb.mxu1 %v33937_v63  ;;  %v33983_v63 = vld [vmem:[%s35902_s30 + $0x18c0] sm:$0xff] }
 0x32e   : > { %21030 = vmatpush.bf16.msrb.mxu2 %v33945_v0  ;;  %v5151_v0 = vld [vmem:[#allocation1] sm:$0xff] }
 0x32f   : > { %21043 = vmatpush.bf16.msrb.mxu3 %v33953_v1  ;;  %v5153_v1 = vld [vmem:[#allocation1 + $0x12] sm:$0xff] }
 0x330   : > { %21005 = vmatpush.bf16.msrb.mxu0 %v33928_v2  ;;  %v34022_v2 = vld [vmem:[%s35902_s30 + $0x19f8] sm:$0xff] }
 0x331   : > { %21018 = vmatpush.bf16.msrb.mxu1 %v33936_v3  ;;  %v5152_v3 = vld [vmem:[#allocation1 + $0x9] sm:$0xff] }
 0x332   : > { %21031 = vmatpush.bf16.msrb.mxu2 %v33944_v4  ;;  %v33997_v4 = vld [vmem:[%s35902_s30 + $0x1930] sm:$0xff] }
 0x333   : > { %21044 = vmatpush.bf16.msrb.mxu3 %v33952_v11  ;;  %v34012_v11 = vld [vmem:[%s35902_s30 + $0x19a8] sm:$0xff] }
 0x334   : > { %21006 = vmatpush.bf16.msrb.mxu0 %v33927_v13  ;;  %v20800_v29 = vpop.f32.mrf.mxu0 }
 0x335   : > { %21019 = vmatpush.bf16.msrb.mxu1 %v33935_v14  ;;  %v20801_v30 = vadd.f32 %v20800_v29, %v36709_v60  ;;  %v20813_v32 = vpop.f32.mrf.mxu1  ;;  %v33998_v60 = vld [vmem:[%s35902_s30 + $0x1938] sm:$0xff] }
 0x336   : > { %21032 = vmatpush.bf16.msrb.mxu2 %v33943_v15  ;;  %v33995_v15 = vld [vmem:[%s35902_s30 + $0x1920] sm:$0xff] }
 0x337   : > { %21045 = vmatpush.bf16.msrb.mxu3 %v33951_v19  ;;  %21007 = vmatmul.bf16.vlgmr.msrb.gmra.mxu0 %v5145_v5  ;;  %v20814_v35 = vadd.f32 %v20813_v32, %v20801_v30  ;;  %v5154_v5 = vld [vmem:[#allocation1 + $0x1b] sm:$0xff] }
 0x338   : > { %21051 = vmatpush.bf16.msra.mxu0 %v33966_v16  ;;  %21020 = vmatmul.bf16.vlgmr.msrb.gmra.mxu1 %v5146_v8  ;;  %v34021_v8 = vld [vmem:[%s35902_s30 + $0x19f0] sm:$0xff] }
 0x339   : > { %21064 = vmatpush.bf16.msra.mxu1 %v33974_v17  ;;  %21033 = vmatmul.bf16.vlgmr.msrb.gmra.mxu2 %v5147_v6  ;;  %v34005_v6 = vld [vmem:[%s35902_s30 + $0x1970] sm:$0xff]  ;;  %v34003_v17 = vld [vmem:[%s35902_s30 + $0x1960] sm:$0xff] }
 0x33a   : > { %21077 = vmatpush.bf16.msra.mxu2 %v33982_v18  ;;  %21046 = vmatmul.bf16.vlgmr.msrb.gmra.mxu3 %v5148_v9  ;;  %v33996_v9 = vld [vmem:[%s35902_s30 + $0x1928] sm:$0xff]  ;;  %v34011_v18 = vld [vmem:[%s35902_s30 + $0x19a0] sm:$0xff]  ;;  %v33993_v30 = vld [vmem:[%s35902_s30 + $0x1910] sm:$0xff] }
 0x33b   : > { %21090 = vmatpush.bf16.msra.mxu3 %v33990_v20  ;;  %v34019_v20 = vld [vmem:[%s35902_s30 + $0x19e0] sm:$0xff]  ;;  %v34001_v32 = vld [vmem:[%s35902_s30 + $0x1950] sm:$0xff] }
 0x33c   : > { %21052 = vmatpush.bf16.msra.mxu0 %v33965_v21  ;;  %v20826_v40 = vpop.f32.mrf.mxu2  ;;  %v20802_v44 = vpop.f32.mrf.mxu0  ;;  %v33994_v21 = vld [vmem:[%s35902_s30 + $0x1918] sm:$0xff] }
 0x33d   : > { %21065 = vmatpush.bf16.msra.mxu1 %v33973_v22  ;;  %v20827_v41 = vadd.f32 %v20826_v40, %v20814_v35  ;;  %v20839_v43 = vpop.f32.mrf.mxu3  ;;  %v20815_v47 = vpop.f32.mrf.mxu1  ;;  %v34002_v22 = vld [vmem:[%s35902_s30 + $0x1958] sm:$0xff]  ;;  %v33992_v35 = vld [vmem:[%s35902_s30 + $0x1908] sm:$0xff] }
 0x33e   : > { %21078 = vmatpush.bf16.msra.mxu2 %v33981_v23  ;;  %v34010_v23 = vld [vmem:[%s35902_s30 + $0x1998] sm:$0xff]  ;;  %v34016_v44 = vld [vmem:[%s35902_s30 + $0x19c8] sm:$0xff]  ;;  %v33999_v47 = vld [vmem:[%s35902_s30 + $0x1940] sm:$0xff] }
 0x33f   : > { %21091 = vmatpush.bf16.msra.mxu3 %v33989_v24  ;;  %v20840_v45 = vadd.f32 %v20839_v43, %v20827_v41  ;;  %v5156_v41 = vld [vmem:[#allocation1 + $0x2d] sm:$0xff] }
 0x340   : > { %21053 = vmatpush.bf16.msra.mxu0 %v33964_v25  ;;  %v301_v43 = vld [vmem:[%s35916_s27 + $0x68] sm:$0xff] }
 0x341   : > { %21066 = vmatpush.bf16.msra.mxu1 %v33972_v26  ;;  %v34018_v26 = vld [vmem:[%s35902_s30 + $0x19d8] sm:$0xff] }
 0x342   : > { %21079 = vmatpush.bf16.msra.mxu2 %v33980_v27 }
 0x343   : > { %21092 = vmatpush.bf16.msra.mxu3 %v33988_v28 }
 0x344   : > { %21054 = vmatpush.bf16.msra.mxu0 %v33963_v31  ;;  %v20828_v54 = vpop.f32.mrf.mxu2 }
 0x345   : > { %21067 = vmatpush.bf16.msra.mxu1 %v33971_v33  ;;  %v20841_v56 = vpop.f32.mrf.mxu3  ;;  %v34009_v33 = vld [vmem:[%s35902_s30 + $0x1990] sm:$0xff] }
 0x346   : > { %21080 = vmatpush.bf16.msra.mxu2 %v33979_v34  ;;  %v34017_v34 = vld [vmem:[%s35902_s30 + $0x19d0] sm:$0xff] }
 0x347   : > { %21093 = vmatpush.bf16.msra.mxu3 %v33987_v36  ;;  %v34000_v36 = vld [vmem:[%s35902_s30 + $0x1948] sm:$0xff]  ;;  %v34029_v54 = vld [vmem:[%s35902_s30 + $0x1a30] sm:$0xff] }
 0x348   : > { %21055 = vmatpush.bf16.msra.mxu0 %v33962_v37  ;;  %v34008_v37 = vld [vmem:[%s35902_s30 + $0x1988] sm:$0xff]  ;;  %v34045_v56 = vld [vmem:[%s35902_s30 + $0x1ab0] sm:$0xff] }
 0x349   : > { %21068 = vmatpush.bf16.msra.mxu1 %v33970_v38  ;;  %v5155_v38 = vld [vmem:[#allocation1 + $0x24] sm:$0xff] }
 0x34a   : > { %21081 = vmatpush.bf16.msra.mxu2 %v33978_v39  ;;  %v5157_v39 = vld [vmem:[#allocation1 + $0x36] sm:$0xff] }
 0x34b   : > { %21094 = vmatpush.bf16.msra.mxu3 %v33986_v42  ;;  %v5158_v42 = vld [vmem:[#allocation1 + $0x3f] sm:$0xff] }
 0x34c   : > { %21056 = vmatpush.bf16.msra.mxu0 %v33961_v46  ;;  %5160 = vst [vmem:[#allocation1] ss:$9 sm:$0xff] %v301_v43  ;;  %v33991_v46 = vld [vmem:[%s35902_s30 + $0x1900] sm:$0xff]  ;;  %v34068_v43 = vld [vmem:[%s35902_s30 + $0x1b68] sm:$0xff] }
 0x34d   : > { %21069 = vmatpush.bf16.msra.mxu1 %v33969_v48  ;;  %v34007_v48 = vld [vmem:[%s35902_s30 + $0x1980] sm:$0xff] }
 0x34e   : > { %21082 = vmatpush.bf16.msra.mxu2 %v33977_v49  ;;  %v34030_v49 = vld [vmem:[%s35902_s30 + $0x1a38] sm:$0xff] }
 0x34f   : > { %21095 = vmatpush.bf16.msra.mxu3 %v33985_v50  ;;  %v34038_v50 = vld [vmem:[%s35902_s30 + $0x1a78] sm:$0xff] }
 0x350   : > { %21057 = vmatpush.bf16.msra.mxu0 %v33960_v51  ;;  %v34046_v51 = vld [vmem:[%s35902_s30 + $0x1ab8] sm:$0xff] }
 0x351   : > { %21070 = vmatpush.bf16.msra.mxu1 %v33968_v52  ;;  %v34015_v52 = vld [vmem:[%s35902_s30 + $0x19c0] sm:$0xff] }
 0x352   : > { %21083 = vmatpush.bf16.msra.mxu2 %v33976_v53  ;;  %v34054_v53 = vld [vmem:[%s35902_s30 + $0x1af8] sm:$0xff] }
 0x353   : > { %21096 = vmatpush.bf16.msra.mxu3 %v33984_v55  ;;  %v34037_v55 = vld [vmem:[%s35902_s30 + $0x1a70] sm:$0xff] }
 0x354   : > { %21058 = vmatpush.bf16.msra.mxu0 %v33959_v57  ;;  %v20852_v13 = vpop.f32.mrf.mxu0  ;;  %v34053_v57 = vld [vmem:[%s35902_s30 + $0x1af0] sm:$0xff] }
 0x355   : > { %21071 = vmatpush.bf16.msra.mxu1 %v33967_v58  ;;  %v20853_v14 = vadd.f32 %v20852_v13, %v20840_v45  ;;  %v20865_v16 = vpop.f32.mrf.mxu1  ;;  %v34028_v58 = vld [vmem:[%s35902_s30 + $0x1a28] sm:$0xff] }
 0x356   : > { %21084 = vmatpush.bf16.msra.mxu2 %v33975_v59  ;;  %v34036_v59 = vld [vmem:[%s35902_s30 + $0x1a68] sm:$0xff] }
 0x357   : > { %21097 = vmatpush.bf16.msra.mxu3 %v33983_v63  ;;  %21059 = vmatmul.bf16.vlgmr.msra.gmra.mxu0 %v5151_v0  ;;  %v20866_v19 = vadd.f32 %v20865_v16, %v20853_v14  ;;  %v34027_v0 = vld [vmem:[%s35902_s30 + $0x1a20] sm:$0xff] }
 0x358   : > { %21103 = vmatpush.bf16.msrb.mxu0 %v33998_v60  ;;  %21072 = vmatmul.bf16.vlgmr.msra.gmra.mxu1 %v5152_v3  ;;  %v34044_v60 = vld [vmem:[%s35902_s30 + $0x1aa8] sm:$0xff]  ;;  %v34043_v3 = vld [vmem:[%s35902_s30 + $0x1aa0] sm:$0xff] }
 0x359   : > { %21116 = vmatpush.bf16.msrb.mxu1 %v34006_v61  ;;  %21085 = vmatmul.bf16.vlgmr.msra.gmra.mxu2 %v5153_v1  ;;  %v34052_v61 = vld [vmem:[%s35902_s30 + $0x1ae8] sm:$0xff] }
 0x35a   : > { %21129 = vmatpush.bf16.msrb.mxu2 %v34014_v62  ;;  %21098 = vmatmul.bf16.vlgmr.msra.gmra.mxu3 %v5154_v5  ;;  %v34051_v5 = vld [vmem:[%s35902_s30 + $0x1ae0] sm:$0xff] }
 0x35b   : > { %21142 = vmatpush.bf16.msrb.mxu3 %v34022_v2  ;;  %v34035_v2 = vld [vmem:[%s35902_s30 + $0x1a60] sm:$0xff] }
 0x35c   : > { %21104 = vmatpush.bf16.msrb.mxu0 %v33997_v4  ;;  %v20878_v24 = vpop.f32.mrf.mxu2  ;;  %v20854_v28 = vpop.f32.mrf.mxu0 }
 0x35d   : > { %21117 = vmatpush.bf16.msrb.mxu1 %v34005_v6  ;;  %v20879_v25 = vadd.f32 %v20878_v24, %v20866_v19  ;;  %v20891_v27 = vpop.f32.mrf.mxu3  ;;  %v20867_v31 = vpop.f32.mrf.mxu1  ;;  %v34026_v6 = vld [vmem:[%s35902_s30 + $0x1a18] sm:$0xff]  ;;  %v34049_v19 = vld [vmem:[%s35902_s30 + $0x1ad0] sm:$0xff]  ;;  %v34048_v24 = vld [vmem:[%s35902_s30 + $0x1ac8] sm:$0xff] }
 0x35e   : > { %21130 = vmatpush.bf16.msrb.mxu2 %v34013_v7  ;;  %v34034_v7 = vld [vmem:[%s35902_s30 + $0x1a58] sm:$0xff]  ;;  %v34039_v28 = vld [vmem:[%s35902_s30 + $0x1a80] sm:$0xff] }
 0x35f   : > { %21143 = vmatpush.bf16.msrb.mxu3 %v34021_v8  ;;  %v36777_v29 = vadd.f32 %v20891_v27, %v20879_v25  ;;  %v34042_v8 = vld [vmem:[%s35902_s30 + $0x1a98] sm:$0xff]  ;;  %v34031_v27 = vld [vmem:[%s35902_s30 + $0x1a40] sm:$0xff] }
 0x360   : > { %21105 = vmatpush.bf16.msrb.mxu0 %v33996_v9  ;;  %v34078_v31 = vld [vmem:[%s35902_s30 + $0x1bb8] sm:$0xff] }
 0x361   : > { %21118 = vmatpush.bf16.msrb.mxu1 %v34004_v10 }
 0x362   : > { %21131 = vmatpush.bf16.msrb.mxu2 %v34012_v11  ;;  %v34050_v11 = vld [vmem:[%s35902_s30 + $0x1ad8] sm:$0xff] }
 0x363   : > { %21144 = vmatpush.bf16.msrb.mxu3 %v34020_v12 }
 0x364   : > { %21106 = vmatpush.bf16.msrb.mxu0 %v33995_v15  ;;  %v20880_v40 = vpop.f32.mrf.mxu2  ;;  %v34025_v15 = vld [vmem:[%s35902_s30 + $0x1a10] sm:$0xff] }
 0x365   : > { %21119 = vmatpush.bf16.msrb.mxu1 %v34003_v17  ;;  %v20893_v45 = vpop.f32.mrf.mxu3  ;;  %v34033_v17 = vld [vmem:[%s35902_s30 + $0x1a50] sm:$0xff] }
 0x366   : > { %21132 = vmatpush.bf16.msrb.mxu2 %v34011_v18  ;;  %v34041_v18 = vld [vmem:[%s35902_s30 + $0x1a90] sm:$0xff]  ;;  %v34084_v45 = vld [vmem:[%s35902_s30 + $0x1be8] sm:$0xff] }
 0x367   : > { %21145 = vmatpush.bf16.msrb.mxu3 %v34019_v20  ;;  %v34024_v20 = vld [vmem:[%s35902_s30 + $0x1a08] sm:$0xff]  ;;  %v34077_v40 = vld [vmem:[%s35902_s30 + $0x1bb0] sm:$0xff] }
 0x368   : > { %21107 = vmatpush.bf16.msrb.mxu0 %v33994_v21  ;;  %v34032_v21 = vld [vmem:[%s35902_s30 + $0x1a48] sm:$0xff] }
 0x369   : > { %21120 = vmatpush.bf16.msrb.mxu1 %v34002_v22  ;;  %v34040_v22 = vld [vmem:[%s35902_s30 + $0x1a88] sm:$0xff] }
 0x36a   : > { %21133 = vmatpush.bf16.msrb.mxu2 %v34010_v23 }
 0x36b   : > { %21146 = vmatpush.bf16.msrb.mxu3 %v34018_v26  ;;  %v34023_v26 = vld [vmem:[%s35902_s30 + $0x1a00] sm:$0xff] }
 0x36c   : > { %21108 = vmatpush.bf16.msrb.mxu0 %v33993_v30  ;;  %v34070_v30 = vld [vmem:[%s35902_s30 + $0x1b78] sm:$0xff] }
 0x36d   : > { %21121 = vmatpush.bf16.msrb.mxu1 %v34001_v32  ;;  %v34047_v32 = vld [vmem:[%s35902_s30 + $0x1ac0] sm:$0xff] }
 0x36e   : > { %21134 = vmatpush.bf16.msrb.mxu2 %v34009_v33  ;;  %v5161_v33 = vld [vmem:[#allocation1] sm:$0xff] }
 0x36f   : > { %21147 = vmatpush.bf16.msrb.mxu3 %v34017_v34  ;;  %v5163_v34 = vld [vmem:[#allocation1 + $0x12] sm:$0xff] }
 0x370   : > { %21109 = vmatpush.bf16.msrb.mxu0 %v33992_v35  ;;  %v34086_v35 = vld [vmem:[%s35902_s30 + $0x1bf8] sm:$0xff] }
 0x371   : > { %21122 = vmatpush.bf16.msrb.mxu1 %v34000_v36  ;;  %v5162_v36 = vld [vmem:[#allocation1 + $0x9] sm:$0xff] }
 0x372   : > { %21135 = vmatpush.bf16.msrb.mxu2 %v34008_v37  ;;  %v34061_v37 = vld [vmem:[%s35902_s30 + $0x1b30] sm:$0xff] }
 0x373   : > { %21148 = vmatpush.bf16.msrb.mxu3 %v34016_v44  ;;  %v34076_v44 = vld [vmem:[%s35902_s30 + $0x1ba8] sm:$0xff] }
 0x374   : > { %21110 = vmatpush.bf16.msrb.mxu0 %v33991_v46  ;;  %v20904_v62 = vpop.f32.mrf.mxu0 }
 0x375   : > { %21123 = vmatpush.bf16.msrb.mxu1 %v33999_v47  ;;  %v20905_v63 = vadd.f32 %v20904_v62, %v36777_v29  ;;  %v20917_v1 = vpop.f32.mrf.mxu1  ;;  %v34062_v29 = vld [vmem:[%s35902_s30 + $0x1b38] sm:$0xff] }
 0x376   : > { %21136 = vmatpush.bf16.msrb.mxu2 %v34007_v48  ;;  %v34059_v48 = vld [vmem:[%s35902_s30 + $0x1b20] sm:$0xff] }
 0x377   : > { %21149 = vmatpush.bf16.msrb.mxu3 %v34015_v52  ;;  %21111 = vmatmul.bf16.vlgmr.msrb.gmra.mxu0 %v5155_v38  ;;  %v20918_v4 = vadd.f32 %v20917_v1, %v20905_v63  ;;  %v5164_v38 = vld [vmem:[#allocation1 + $0x1b] sm:$0xff] }
 0x378   : > { %21155 = vmatpush.bf16.msra.mxu0 %v34030_v49  ;;  %21124 = vmatmul.bf16.vlgmr.msrb.gmra.mxu1 %v5156_v41  ;;  %v34085_v41 = vld [vmem:[%s35902_s30 + $0x1bf0] sm:$0xff] }
 0x379   : > { %21168 = vmatpush.bf16.msra.mxu1 %v34038_v50  ;;  %21137 = vmatmul.bf16.vlgmr.msrb.gmra.mxu2 %v5157_v39  ;;  %v34069_v39 = vld [vmem:[%s35902_s30 + $0x1b70] sm:$0xff]  ;;  %v34067_v50 = vld [vmem:[%s35902_s30 + $0x1b60] sm:$0xff] }
 0x37a   : > { %21181 = vmatpush.bf16.msra.mxu2 %v34046_v51  ;;  %21150 = vmatmul.bf16.vlgmr.msrb.gmra.mxu3 %v5158_v42  ;;  %v34060_v42 = vld [vmem:[%s35902_s30 + $0x1b28] sm:$0xff]  ;;  %v34075_v51 = vld [vmem:[%s35902_s30 + $0x1ba0] sm:$0xff]  ;;  %v34057_v63 = vld [vmem:[%s35902_s30 + $0x1b10] sm:$0xff] }
 0x37b   : > { %21194 = vmatpush.bf16.msra.mxu3 %v34054_v53  ;;  %v34083_v53 = vld [vmem:[%s35902_s30 + $0x1be0] sm:$0xff]  ;;  %v34065_v1 = vld [vmem:[%s35902_s30 + $0x1b50] sm:$0xff] }
 0x37c   : > { %21156 = vmatpush.bf16.msra.mxu0 %v34029_v54  ;;  %v20930_v9 = vpop.f32.mrf.mxu2  ;;  %v20906_v13 = vpop.f32.mrf.mxu0  ;;  %v34058_v54 = vld [vmem:[%s35902_s30 + $0x1b18] sm:$0xff] }
 0x37d   : > { %21169 = vmatpush.bf16.msra.mxu1 %v34037_v55  ;;  %v20931_v10 = vadd.f32 %v20930_v9, %v20918_v4  ;;  %v20943_v12 = vpop.f32.mrf.mxu3  ;;  %v20919_v16 = vpop.f32.mrf.mxu1  ;;  %v34066_v55 = vld [vmem:[%s35902_s30 + $0x1b58] sm:$0xff]  ;;  %v34056_v4 = vld [vmem:[%s35902_s30 + $0x1b08] sm:$0xff] }
 0x37e   : > { %21182 = vmatpush.bf16.msra.mxu2 %v34045_v56  ;;  %v34074_v56 = vld [vmem:[%s35902_s30 + $0x1b98] sm:$0xff]  ;;  %v34080_v13 = vld [vmem:[%s35902_s30 + $0x1bc8] sm:$0xff]  ;;  %v34063_v16 = vld [vmem:[%s35902_s30 + $0x1b40] sm:$0xff] }
 0x37f   : > { %21195 = vmatpush.bf16.msra.mxu3 %v34053_v57  ;;  %v20944_v14 = vadd.f32 %v20943_v12, %v20931_v10  ;;  %v5166_v10 = vld [vmem:[#allocation1 + $0x2d] sm:$0xff] }
 0x380   : > { %21157 = vmatpush.bf16.msra.mxu0 %v34028_v58  ;;  %v302_v12 = vld [vmem:[%s35916_s27 + $0x70] sm:$0xff] }
 0x381   : > { %21170 = vmatpush.bf16.msra.mxu1 %v34036_v59  ;;  %v34082_v59 = vld [vmem:[%s35902_s30 + $0x1bd8] sm:$0xff] }
 0x382   : > { %21183 = vmatpush.bf16.msra.mxu2 %v34044_v60 }
 0x383   : > { %21196 = vmatpush.bf16.msra.mxu3 %v34052_v61 }
 0x384   : > { %21158 = vmatpush.bf16.msra.mxu0 %v34027_v0  ;;  %v20932_v23 = vpop.f32.mrf.mxu2 }
 0x385   : > { %21171 = vmatpush.bf16.msra.mxu1 %v34035_v2  ;;  %v20945_v25 = vpop.f32.mrf.mxu3  ;;  %v34073_v2 = vld [vmem:[%s35902_s30 + $0x1b90] sm:$0xff] }
 0x386   : > { %21184 = vmatpush.bf16.msra.mxu2 %v34043_v3  ;;  %v34081_v3 = vld [vmem:[%s35902_s30 + $0x1bd0] sm:$0xff] }
 0x387   : > { %21197 = vmatpush.bf16.msra.mxu3 %v34051_v5  ;;  %v34064_v5 = vld [vmem:[%s35902_s30 + $0x1b48] sm:$0xff]  ;;  %v34093_v23 = vld [vmem:[%s35902_s30 + $0x1c30] sm:$0xff] }
 0x388   : > { %21159 = vmatpush.bf16.msra.mxu0 %v34026_v6  ;;  %v34072_v6 = vld [vmem:[%s35902_s30 + $0x1b88] sm:$0xff]  ;;  %v34109_v25 = vld [vmem:[%s35902_s30 + $0x1cb0] sm:$0xff] }
 0x389   : > { %21172 = vmatpush.bf16.msra.mxu1 %v34034_v7  ;;  %v5165_v7 = vld [vmem:[#allocation1 + $0x24] sm:$0xff] }
 0x38a   : > { %21185 = vmatpush.bf16.msra.mxu2 %v34042_v8  ;;  %v5167_v8 = vld [vmem:[#allocation1 + $0x36] sm:$0xff] }
 0x38b   : > { %21198 = vmatpush.bf16.msra.mxu3 %v34050_v11  ;;  %v5168_v11 = vld [vmem:[#allocation1 + $0x3f] sm:$0xff] }
 0x38c   : > { %21160 = vmatpush.bf16.msra.mxu0 %v34025_v15  ;;  %5170 = vst [vmem:[#allocation1] ss:$9 sm:$0xff] %v302_v12  ;;  %v34055_v15 = vld [vmem:[%s35902_s30 + $0x1b00] sm:$0xff]  ;;  %v34132_v12 = vld [vmem:[%s35902_s30 + $0x1d68] sm:$0xff] }
 0x38d   : > { %21173 = vmatpush.bf16.msra.mxu1 %v34033_v17  ;;  %v34071_v17 = vld [vmem:[%s35902_s30 + $0x1b80] sm:$0xff] }
 0x38e   : > { %21186 = vmatpush.bf16.msra.mxu2 %v34041_v18  ;;  %v34094_v18 = vld [vmem:[%s35902_s30 + $0x1c38] sm:$0xff] }
 0x38f   : > { %21199 = vmatpush.bf16.msra.mxu3 %v34049_v19  ;;  %v34102_v19 = vld [vmem:[%s35902_s30 + $0x1c78] sm:$0xff] }
 0x390   : > { %21161 = vmatpush.bf16.msra.mxu0 %v34024_v20  ;;  %v34110_v20 = vld [vmem:[%s35902_s30 + $0x1cb8] sm:$0xff] }
 0x391   : > { %21174 = vmatpush.bf16.msra.mxu1 %v34032_v21  ;;  %v34079_v21 = vld [vmem:[%s35902_s30 + $0x1bc0] sm:$0xff] }
 0x392   : > { %21187 = vmatpush.bf16.msra.mxu2 %v34040_v22  ;;  %v34118_v22 = vld [vmem:[%s35902_s30 + $0x1cf8] sm:$0xff] }
 0x393   : > { %21200 = vmatpush.bf16.msra.mxu3 %v34048_v24  ;;  %v34101_v24 = vld [vmem:[%s35902_s30 + $0x1c70] sm:$0xff] }
 0x394   : > { %21162 = vmatpush.bf16.msra.mxu0 %v34023_v26  ;;  %v20956_v46 = vpop.f32.mrf.mxu0  ;;  %v34117_v26 = vld [vmem:[%s35902_s30 + $0x1cf0] sm:$0xff] }
 0x395   : > { %21175 = vmatpush.bf16.msra.mxu1 %v34031_v27  ;;  %v20957_v47 = vadd.f32 %v20956_v46, %v20944_v14  ;;  %v20969_v49 = vpop.f32.mrf.mxu1  ;;  %v34092_v27 = vld [vmem:[%s35902_s30 + $0x1c28] sm:$0xff] }
 0x396   : > { %21188 = vmatpush.bf16.msra.mxu2 %v34039_v28  ;;  %v34100_v28 = vld [vmem:[%s35902_s30 + $0x1c68] sm:$0xff] }
 0x397   : > { %21201 = vmatpush.bf16.msra.mxu3 %v34047_v32  ;;  %21163 = vmatmul.bf16.vlgmr.msra.gmra.mxu0 %v5161_v33  ;;  %v20970_v52 = vadd.f32 %v20969_v49, %v20957_v47  ;;  %v34091_v33 = vld [vmem:[%s35902_s30 + $0x1c20] sm:$0xff] }
 0x398   : > { %21207 = vmatpush.bf16.msrb.mxu0 %v34062_v29  ;;  %21176 = vmatmul.bf16.vlgmr.msra.gmra.mxu1 %v5162_v36  ;;  %v34108_v29 = vld [vmem:[%s35902_s30 + $0x1ca8] sm:$0xff]  ;;  %v34107_v36 = vld [vmem:[%s35902_s30 + $0x1ca0] sm:$0xff] }
 0x399   : > { %21220 = vmatpush.bf16.msrb.mxu1 %v34070_v30  ;;  %21189 = vmatmul.bf16.vlgmr.msra.gmra.mxu2 %v5163_v34  ;;  %v34116_v30 = vld [vmem:[%s35902_s30 + $0x1ce8] sm:$0xff] }
 0x39a   : > { %21233 = vmatpush.bf16.msrb.mxu2 %v34078_v31  ;;  %21202 = vmatmul.bf16.vlgmr.msra.gmra.mxu3 %v5164_v38  ;;  %v34115_v38 = vld [vmem:[%s35902_s30 + $0x1ce0] sm:$0xff] }
 0x39b   : > { %21246 = vmatpush.bf16.msrb.mxu3 %v34086_v35  ;;  %v34099_v35 = vld [vmem:[%s35902_s30 + $0x1c60] sm:$0xff] }
 0x39c   : > { %21208 = vmatpush.bf16.msrb.mxu0 %v34061_v37  ;;  %v20982_v57 = vpop.f32.mrf.mxu2  ;;  %v20958_v61 = vpop.f32.mrf.mxu0 }
 0x39d   : > { %21221 = vmatpush.bf16.msrb.mxu1 %v34069_v39  ;;  %v20983_v58 = vadd.f32 %v20982_v57, %v20970_v52  ;;  %v20995_v60 = vpop.f32.mrf.mxu3  ;;  %v20971_v0 = vpop.f32.mrf.mxu1  ;;  %v34090_v39 = vld [vmem:[%s35902_s30 + $0x1c18] sm:$0xff]  ;;  %v34113_v52 = vld [vmem:[%s35902_s30 + $0x1cd0] sm:$0xff]  ;;  %v34112_v57 = vld [vmem:[%s35902_s30 + $0x1cc8] sm:$0xff] }
 0x39e   : > { %21234 = vmatpush.bf16.msrb.mxu2 %v34077_v40  ;;  %v34098_v40 = vld [vmem:[%s35902_s30 + $0x1c58] sm:$0xff]  ;;  %v34103_v61 = vld [vmem:[%s35902_s30 + $0x1c80] sm:$0xff] }
 0x39f   : > { %21247 = vmatpush.bf16.msrb.mxu3 %v34085_v41  ;;  %v36845_v62 = vadd.f32 %v20995_v60, %v20983_v58  ;;  %v34106_v41 = vld [vmem:[%s35902_s30 + $0x1c98] sm:$0xff]  ;;  %v34095_v60 = vld [vmem:[%s35902_s30 + $0x1c40] sm:$0xff] }
 0x3a0   : > { %21209 = vmatpush.bf16.msrb.mxu0 %v34060_v42  ;;  %v34142_v0 = vld [vmem:[%s35902_s30 + $0x1db8] sm:$0xff] }
 0x3a1   : > { %21222 = vmatpush.bf16.msrb.mxu1 %v34068_v43 }
 0x3a2   : > { %21235 = vmatpush.bf16.msrb.mxu2 %v34076_v44  ;;  %v34114_v44 = vld [vmem:[%s35902_s30 + $0x1cd8] sm:$0xff] }
 0x3a3   : > { %21248 = vmatpush.bf16.msrb.mxu3 %v34084_v45 }
 0x3a4   : > { %21210 = vmatpush.bf16.msrb.mxu0 %v34059_v48  ;;  %v20984_v9 = vpop.f32.mrf.mxu2  ;;  %v34089_v48 = vld [vmem:[%s35902_s30 + $0x1c10] sm:$0xff] }
 0x3a5   : > { %21223 = vmatpush.bf16.msrb.mxu1 %v34067_v50  ;;  %v20997_v14 = vpop.f32.mrf.mxu3  ;;  %v34097_v50 = vld [vmem:[%s35902_s30 + $0x1c50] sm:$0xff] }
 0x3a6   : > { %21236 = vmatpush.bf16.msrb.mxu2 %v34075_v51  ;;  %v34105_v51 = vld [vmem:[%s35902_s30 + $0x1c90] sm:$0xff]  ;;  %v34148_v14 = vld [vmem:[%s35902_s30 + $0x1de8] sm:$0xff] }
 0x3a7   : > { %21249 = vmatpush.bf16.msrb.mxu3 %v34083_v53  ;;  %v34088_v53 = vld [vmem:[%s35902_s30 + $0x1c08] sm:$0xff]  ;;  %v34141_v9 = vld [vmem:[%s35902_s30 + $0x1db0] sm:$0xff] }
 0x3a8   : > { %21211 = vmatpush.bf16.msrb.mxu0 %v34058_v54  ;;  %v34096_v54 = vld [vmem:[%s35902_s30 + $0x1c48] sm:$0xff] }
 0x3a9   : > { %21224 = vmatpush.bf16.msrb.mxu1 %v34066_v55  ;;  %v34104_v55 = vld [vmem:[%s35902_s30 + $0x1c88] sm:$0xff] }
 0x3aa   : > { %21237 = vmatpush.bf16.msrb.mxu2 %v34074_v56 }
 0x3ab   : > { %21250 = vmatpush.bf16.msrb.mxu3 %v34082_v59  ;;  %v34087_v59 = vld [vmem:[%s35902_s30 + $0x1c00] sm:$0xff] }
 0x3ac   : > { %21212 = vmatpush.bf16.msrb.mxu0 %v34057_v63  ;;  %v34134_v63 = vld [vmem:[%s35902_s30 + $0x1d78] sm:$0xff] }
 0x3ad   : > { %21225 = vmatpush.bf16.msrb.mxu1 %v34065_v1  ;;  %v34111_v1 = vld [vmem:[%s35902_s30 + $0x1cc0] sm:$0xff] }
 0x3ae   : > { %21238 = vmatpush.bf16.msrb.mxu2 %v34073_v2  ;;  %v5171_v2 = vld [vmem:[#allocation1] sm:$0xff] }
 0x3af   : > { %21251 = vmatpush.bf16.msrb.mxu3 %v34081_v3  ;;  %v5173_v3 = vld [vmem:[#allocation1 + $0x12] sm:$0xff] }
 0x3b0   : > { %21213 = vmatpush.bf16.msrb.mxu0 %v34056_v4  ;;  %v34150_v4 = vld [vmem:[%s35902_s30 + $0x1df8] sm:$0xff] }
 0x3b1   : > { %21226 = vmatpush.bf16.msrb.mxu1 %v34064_v5  ;;  %v5172_v5 = vld [vmem:[#allocation1 + $0x9] sm:$0xff] }
 0x3b2   : > { %21239 = vmatpush.bf16.msrb.mxu2 %v34072_v6  ;;  %v34125_v6 = vld [vmem:[%s35902_s30 + $0x1d30] sm:$0xff] }
 0x3b3   : > { %21252 = vmatpush.bf16.msrb.mxu3 %v34080_v13  ;;  %v34140_v13 = vld [vmem:[%s35902_s30 + $0x1da8] sm:$0xff] }
 0x3b4   : > { %21214 = vmatpush.bf16.msrb.mxu0 %v34055_v15  ;;  %v21008_v31 = vpop.f32.mrf.mxu0 }
 0x3b5   : > { %21227 = vmatpush.bf16.msrb.mxu1 %v34063_v16  ;;  %v21009_v32 = vadd.f32 %v21008_v31, %v36845_v62  ;;  %v21021_v34 = vpop.f32.mrf.mxu1  ;;  %v34126_v62 = vld [vmem:[%s35902_s30 + $0x1d38] sm:$0xff] }
 0x3b6   : > { %21240 = vmatpush.bf16.msrb.mxu2 %v34071_v17  ;;  %v34123_v17 = vld [vmem:[%s35902_s30 + $0x1d20] sm:$0xff] }
 0x3b7   : > { %21253 = vmatpush.bf16.msrb.mxu3 %v34079_v21  ;;  %21215 = vmatmul.bf16.vlgmr.msrb.gmra.mxu0 %v5165_v7  ;;  %v21022_v37 = vadd.f32 %v21021_v34, %v21009_v32  ;;  %v5174_v7 = vld [vmem:[#allocation1 + $0x1b] sm:$0xff] }
 0x3b8   : > { %21259 = vmatpush.bf16.msra.mxu0 %v34094_v18  ;;  %21228 = vmatmul.bf16.vlgmr.msrb.gmra.mxu1 %v5166_v10  ;;  %v34149_v10 = vld [vmem:[%s35902_s30 + $0x1df0] sm:$0xff] }
 0x3b9   : > { %21272 = vmatpush.bf16.msra.mxu1 %v34102_v19  ;;  %21241 = vmatmul.bf16.vlgmr.msrb.gmra.mxu2 %v5167_v8  ;;  %v34133_v8 = vld [vmem:[%s35902_s30 + $0x1d70] sm:$0xff]  ;;  %v34131_v19 = vld [vmem:[%s35902_s30 + $0x1d60] sm:$0xff] }
 0x3ba   : > { %21285 = vmatpush.bf16.msra.mxu2 %v34110_v20  ;;  %21254 = vmatmul.bf16.vlgmr.msrb.gmra.mxu3 %v5168_v11  ;;  %v34124_v11 = vld [vmem:[%s35902_s30 + $0x1d28] sm:$0xff]  ;;  %v34139_v20 = vld [vmem:[%s35902_s30 + $0x1da0] sm:$0xff]  ;;  %v34121_v32 = vld [vmem:[%s35902_s30 + $0x1d10] sm:$0xff] }
 0x3bb   : > { %21298 = vmatpush.bf16.msra.mxu3 %v34118_v22  ;;  %v34147_v22 = vld [vmem:[%s35902_s30 + $0x1de0] sm:$0xff]  ;;  %v34129_v34 = vld [vmem:[%s35902_s30 + $0x1d50] sm:$0xff] }
 0x3bc   : > { %21260 = vmatpush.bf16.msra.mxu0 %v34093_v23  ;;  %v21034_v42 = vpop.f32.mrf.mxu2  ;;  %v21010_v46 = vpop.f32.mrf.mxu0  ;;  %v34122_v23 = vld [vmem:[%s35902_s30 + $0x1d18] sm:$0xff] }
 0x3bd   : > { %21273 = vmatpush.bf16.msra.mxu1 %v34101_v24  ;;  %v21035_v43 = vadd.f32 %v21034_v42, %v21022_v37  ;;  %v21047_v45 = vpop.f32.mrf.mxu3  ;;  %v21023_v49 = vpop.f32.mrf.mxu1  ;;  %v34130_v24 = vld [vmem:[%s35902_s30 + $0x1d58] sm:$0xff]  ;;  %v34120_v37 = vld [vmem:[%s35902_s30 + $0x1d08] sm:$0xff] }
 0x3be   : > { %21286 = vmatpush.bf16.msra.mxu2 %v34109_v25  ;;  %v34138_v25 = vld [vmem:[%s35902_s30 + $0x1d98] sm:$0xff]  ;;  %v34144_v46 = vld [vmem:[%s35902_s30 + $0x1dc8] sm:$0xff]  ;;  %v34127_v49 = vld [vmem:[%s35902_s30 + $0x1d40] sm:$0xff] }
 0x3bf   : > { %21299 = vmatpush.bf16.msra.mxu3 %v34117_v26  ;;  %v21048_v47 = vadd.f32 %v21047_v45, %v21035_v43  ;;  %v5176_v43 = vld [vmem:[#allocation1 + $0x2d] sm:$0xff]  ;;  %v303_v45 = vld [vmem:[%s35916_s27 + $0x78] sm:$0xff] }
 0x3c0   : > { %21261 = vmatpush.bf16.msra.mxu0 %v34092_v27 }
 0x3c1   : > { %21274 = vmatpush.bf16.msra.mxu1 %v34100_v28  ;;  %v34146_v28 = vld [vmem:[%s35902_s30 + $0x1dd8] sm:$0xff] }
 0x3c2   : > { %21287 = vmatpush.bf16.msra.mxu2 %v34108_v29 }
 0x3c3   : > { %21300 = vmatpush.bf16.msra.mxu3 %v34116_v30 }
 0x3c4   : > { %21262 = vmatpush.bf16.msra.mxu0 %v34091_v33  ;;  %v21036_v56 = vpop.f32.mrf.mxu2 }
 0x3c5   : > { %21275 = vmatpush.bf16.msra.mxu1 %v34099_v35  ;;  %v21049_v58 = vpop.f32.mrf.mxu3  ;;  %v34137_v35 = vld [vmem:[%s35902_s30 + $0x1d90] sm:$0xff] }
 0x3c6   : > { %21288 = vmatpush.bf16.msra.mxu2 %v34107_v36  ;;  %v34145_v36 = vld [vmem:[%s35902_s30 + $0x1dd0] sm:$0xff] }
 0x3c7   : > { %21301 = vmatpush.bf16.msra.mxu3 %v34115_v38  ;;  %v34128_v38 = vld [vmem:[%s35902_s30 + $0x1d48] sm:$0xff]  ;;  %v34157_v56 = vld [vmem:[%s35902_s30 + $0x1e30] sm:$0xff] }
 0x3c8   : > { %21263 = vmatpush.bf16.msra.mxu0 %v34090_v39  ;;  %v34136_v39 = vld [vmem:[%s35902_s30 + $0x1d88] sm:$0xff]  ;;  %v34173_v58 = vld [vmem:[%s35902_s30 + $0x1eb0] sm:$0xff] }
 0x3c9   : > { %21276 = vmatpush.bf16.msra.mxu1 %v34098_v40  ;;  %v5175_v40 = vld [vmem:[#allocation1 + $0x24] sm:$0xff] }
 0x3ca   : > { %21289 = vmatpush.bf16.msra.mxu2 %v34106_v41  ;;  %v5177_v41 = vld [vmem:[#allocation1 + $0x36] sm:$0xff] }
 0x3cb   : > { %21302 = vmatpush.bf16.msra.mxu3 %v34114_v44  ;;  %v5178_v44 = vld [vmem:[#allocation1 + $0x3f] sm:$0xff] }
 0x3cc   : > { %21264 = vmatpush.bf16.msra.mxu0 %v34089_v48  ;;  %5180 = vst [vmem:[#allocation1] ss:$9 sm:$0xff] %v303_v45  ;;  %v34119_v48 = vld [vmem:[%s35902_s30 + $0x1d00] sm:$0xff]  ;;  %v34196_v45 = vld [vmem:[%s35902_s30 + $0x1f68] sm:$0xff] }
 0x3cd   : > { %21277 = vmatpush.bf16.msra.mxu1 %v34097_v50  ;;  %v34135_v50 = vld [vmem:[%s35902_s30 + $0x1d80] sm:$0xff] }
 0x3ce   : > { %21290 = vmatpush.bf16.msra.mxu2 %v34105_v51  ;;  %v34158_v51 = vld [vmem:[%s35902_s30 + $0x1e38] sm:$0xff] }
 0x3cf   : > { %21303 = vmatpush.bf16.msra.mxu3 %v34113_v52  ;;  %v34166_v52 = vld [vmem:[%s35902_s30 + $0x1e78] sm:$0xff] }
 0x3d0   : > { %21265 = vmatpush.bf16.msra.mxu0 %v34088_v53  ;;  %v34174_v53 = vld [vmem:[%s35902_s30 + $0x1eb8] sm:$0xff] }
 0x3d1   : > { %21278 = vmatpush.bf16.msra.mxu1 %v34096_v54  ;;  %v34143_v54 = vld [vmem:[%s35902_s30 + $0x1dc0] sm:$0xff] }
 0x3d2   : > { %21291 = vmatpush.bf16.msra.mxu2 %v34104_v55  ;;  %v34182_v55 = vld [vmem:[%s35902_s30 + $0x1ef8] sm:$0xff] }
 0x3d3   : > { %21304 = vmatpush.bf16.msra.mxu3 %v34112_v57  ;;  %v34165_v57 = vld [vmem:[%s35902_s30 + $0x1e70] sm:$0xff] }
 0x3d4   : > { %21266 = vmatpush.bf16.msra.mxu0 %v34087_v59  ;;  %v21060_v15 = vpop.f32.mrf.mxu0  ;;  %v34181_v59 = vld [vmem:[%s35902_s30 + $0x1ef0] sm:$0xff] }
 0x3d5   : > { %21279 = vmatpush.bf16.msra.mxu1 %v34095_v60  ;;  %v21061_v16 = vadd.f32 %v21060_v15, %v21048_v47  ;;  %v21073_v18 = vpop.f32.mrf.mxu1  ;;  %v34156_v60 = vld [vmem:[%s35902_s30 + $0x1e28] sm:$0xff] }
 0x3d6   : > { %21292 = vmatpush.bf16.msra.mxu2 %v34103_v61  ;;  %v34164_v61 = vld [vmem:[%s35902_s30 + $0x1e68] sm:$0xff] }
 0x3d7   : > { %21305 = vmatpush.bf16.msra.mxu3 %v34111_v1  ;;  %21267 = vmatmul.bf16.vlgmr.msra.gmra.mxu0 %v5171_v2  ;;  %v21074_v21 = vadd.f32 %v21073_v18, %v21061_v16  ;;  %v34155_v2 = vld [vmem:[%s35902_s30 + $0x1e20] sm:$0xff] }
 0x3d8   : > { %21311 = vmatpush.bf16.msrb.mxu0 %v34126_v62  ;;  %21280 = vmatmul.bf16.vlgmr.msra.gmra.mxu1 %v5172_v5  ;;  %v34172_v62 = vld [vmem:[%s35902_s30 + $0x1ea8] sm:$0xff]  ;;  %v34171_v5 = vld [vmem:[%s35902_s30 + $0x1ea0] sm:$0xff] }
 0x3d9   : > { %21324 = vmatpush.bf16.msrb.mxu1 %v34134_v63  ;;  %21293 = vmatmul.bf16.vlgmr.msra.gmra.mxu2 %v5173_v3  ;;  %v34180_v63 = vld [vmem:[%s35902_s30 + $0x1ee8] sm:$0xff] }
 0x3da   : > { %21337 = vmatpush.bf16.msrb.mxu2 %v34142_v0  ;;  %21306 = vmatmul.bf16.vlgmr.msra.gmra.mxu3 %v5174_v7  ;;  %v34179_v7 = vld [vmem:[%s35902_s30 + $0x1ee0] sm:$0xff] }
 0x3db   : > { %21350 = vmatpush.bf16.msrb.mxu3 %v34150_v4  ;;  %v34163_v4 = vld [vmem:[%s35902_s30 + $0x1e60] sm:$0xff] }
 0x3dc   : > { %21312 = vmatpush.bf16.msrb.mxu0 %v34125_v6  ;;  %v21086_v26 = vpop.f32.mrf.mxu2  ;;  %v21062_v30 = vpop.f32.mrf.mxu0 }
 0x3dd   : > { %21325 = vmatpush.bf16.msrb.mxu1 %v34133_v8  ;;  %v21087_v27 = vadd.f32 %v21086_v26, %v21074_v21  ;;  %v21099_v29 = vpop.f32.mrf.mxu3  ;;  %v21075_v33 = vpop.f32.mrf.mxu1  ;;  %v34154_v8 = vld [vmem:[%s35902_s30 + $0x1e18] sm:$0xff]  ;;  %v34177_v21 = vld [vmem:[%s35902_s30 + $0x1ed0] sm:$0xff]  ;;  %v34176_v26 = vld [vmem:[%s35902_s30 + $0x1ec8] sm:$0xff] }
 0x3de   : > { %21338 = vmatpush.bf16.msrb.mxu2 %v34141_v9  ;;  %v34162_v9 = vld [vmem:[%s35902_s30 + $0x1e58] sm:$0xff]  ;;  %v34167_v30 = vld [vmem:[%s35902_s30 + $0x1e80] sm:$0xff] }
 0x3df   : > { %21351 = vmatpush.bf16.msrb.mxu3 %v34149_v10  ;;  %v36913_v31 = vadd.f32 %v21099_v29, %v21087_v27  ;;  %v34170_v10 = vld [vmem:[%s35902_s30 + $0x1e98] sm:$0xff]  ;;  %v34159_v29 = vld [vmem:[%s35902_s30 + $0x1e40] sm:$0xff] }
 0x3e0   : > { %21313 = vmatpush.bf16.msrb.mxu0 %v34124_v11  ;;  %v34206_v33 = vld [vmem:[%s35902_s30 + $0x1fb8] sm:$0xff] }
 0x3e1   : > { %21326 = vmatpush.bf16.msrb.mxu1 %v34132_v12 }
 0x3e2   : > { %21339 = vmatpush.bf16.msrb.mxu2 %v34140_v13  ;;  %v34178_v13 = vld [vmem:[%s35902_s30 + $0x1ed8] sm:$0xff] }
 0x3e3   : > { %21352 = vmatpush.bf16.msrb.mxu3 %v34148_v14 }
 0x3e4   : > { %21314 = vmatpush.bf16.msrb.mxu0 %v34123_v17  ;;  %v21088_v42 = vpop.f32.mrf.mxu2  ;;  %v34153_v17 = vld [vmem:[%s35902_s30 + $0x1e10] sm:$0xff] }
 0x3e5   : > { %21327 = vmatpush.bf16.msrb.mxu1 %v34131_v19  ;;  %v21101_v47 = vpop.f32.mrf.mxu3  ;;  %v34161_v19 = vld [vmem:[%s35902_s30 + $0x1e50] sm:$0xff] }
 0x3e6   : > { %21340 = vmatpush.bf16.msrb.mxu2 %v34139_v20  ;;  %v34169_v20 = vld [vmem:[%s35902_s30 + $0x1e90] sm:$0xff]  ;;  %v34212_v47 = vld [vmem:[%s35902_s30 + $0x1fe8] sm:$0xff] }
 0x3e7   : > { %21353 = vmatpush.bf16.msrb.mxu3 %v34147_v22  ;;  %v34152_v22 = vld [vmem:[%s35902_s30 + $0x1e08] sm:$0xff]  ;;  %v34205_v42 = vld [vmem:[%s35902_s30 + $0x1fb0] sm:$0xff] }
 0x3e8   : > { %21315 = vmatpush.bf16.msrb.mxu0 %v34122_v23  ;;  %v34160_v23 = vld [vmem:[%s35902_s30 + $0x1e48] sm:$0xff] }
 0x3e9   : > { %21328 = vmatpush.bf16.msrb.mxu1 %v34130_v24  ;;  %v34168_v24 = vld [vmem:[%s35902_s30 + $0x1e88] sm:$0xff] }
 0x3ea   : > { %21341 = vmatpush.bf16.msrb.mxu2 %v34138_v25 }
 0x3eb   : > { %21354 = vmatpush.bf16.msrb.mxu3 %v34146_v28  ;;  %v34151_v28 = vld [vmem:[%s35902_s30 + $0x1e00] sm:$0xff] }
 0x3ec   : > { %21316 = vmatpush.bf16.msrb.mxu0 %v34121_v32  ;;  %v34198_v32 = vld [vmem:[%s35902_s30 + $0x1f78] sm:$0xff] }
 0x3ed   : > { %21329 = vmatpush.bf16.msrb.mxu1 %v34129_v34  ;;  %v34175_v34 = vld [vmem:[%s35902_s30 + $0x1ec0] sm:$0xff] }
 0x3ee   : > { %21342 = vmatpush.bf16.msrb.mxu2 %v34137_v35  ;;  %v5181_v35 = vld [vmem:[#allocation1] sm:$0xff] }
 0x3ef   : > { %21355 = vmatpush.bf16.msrb.mxu3 %v34145_v36  ;;  %v5183_v36 = vld [vmem:[#allocation1 + $0x12] sm:$0xff] }
 0x3f0   : > { %21317 = vmatpush.bf16.msrb.mxu0 %v34120_v37  ;;  %v34214_v37 = vld [vmem:[%s35902_s30 + $0x1ff8] sm:$0xff] }
 0x3f1   : > { %21330 = vmatpush.bf16.msrb.mxu1 %v34128_v38  ;;  %v5182_v38 = vld [vmem:[#allocation1 + $0x9] sm:$0xff] }
 0x3f2   : > { %21343 = vmatpush.bf16.msrb.mxu2 %v34136_v39  ;;  %v34189_v39 = vld [vmem:[%s35902_s30 + $0x1f30] sm:$0xff] }
 0x3f3   : > { %21356 = vmatpush.bf16.msrb.mxu3 %v34144_v46  ;;  %v34204_v46 = vld [vmem:[%s35902_s30 + $0x1fa8] sm:$0xff] }
 0x3f4   : > { %21318 = vmatpush.bf16.msrb.mxu0 %v34119_v48  ;;  %v21112_v0 = vpop.f32.mrf.mxu0 }
 0x3f5   : > { %21331 = vmatpush.bf16.msrb.mxu1 %v34127_v49  ;;  %v21113_v1 = vadd.f32 %v21112_v0, %v36913_v31  ;;  %v21125_v3 = vpop.f32.mrf.mxu1  ;;  %v34190_v31 = vld [vmem:[%s35902_s30 + $0x1f38] sm:$0xff] }
 0x3f6   : > { %21344 = vmatpush.bf16.msrb.mxu2 %v34135_v50  ;;  %v34187_v50 = vld [vmem:[%s35902_s30 + $0x1f20] sm:$0xff] }
 0x3f7   : > { %21357 = vmatpush.bf16.msrb.mxu3 %v34143_v54  ;;  %21319 = vmatmul.bf16.vlgmr.msrb.gmra.mxu0 %v5175_v40  ;;  %v21126_v6 = vadd.f32 %v21125_v3, %v21113_v1  ;;  %v5184_v40 = vld [vmem:[#allocation1 + $0x1b] sm:$0xff] }
 0x3f8   : > { %21363 = vmatpush.bf16.msra.mxu0 %v34158_v51  ;;  %21332 = vmatmul.bf16.vlgmr.msrb.gmra.mxu1 %v5176_v43  ;;  %v34213_v43 = vld [vmem:[%s35902_s30 + $0x1ff0] sm:$0xff] }
 0x3f9   : > { %21376 = vmatpush.bf16.msra.mxu1 %v34166_v52  ;;  %21345 = vmatmul.bf16.vlgmr.msrb.gmra.mxu2 %v5177_v41  ;;  %v34197_v41 = vld [vmem:[%s35902_s30 + $0x1f70] sm:$0xff]  ;;  %v34195_v52 = vld [vmem:[%s35902_s30 + $0x1f60] sm:$0xff] }
 0x3fa   : > { %21389 = vmatpush.bf16.msra.mxu2 %v34174_v53  ;;  %21358 = vmatmul.bf16.vlgmr.msrb.gmra.mxu3 %v5178_v44  ;;  %v34188_v44 = vld [vmem:[%s35902_s30 + $0x1f28] sm:$0xff]  ;;  %v34203_v53 = vld [vmem:[%s35902_s30 + $0x1fa0] sm:$0xff]  ;;  %v34185_v1 = vld [vmem:[%s35902_s30 + $0x1f10] sm:$0xff] }
 0x3fb   : > { %21402 = vmatpush.bf16.msra.mxu3 %v34182_v55  ;;  %v34211_v55 = vld [vmem:[%s35902_s30 + $0x1fe0] sm:$0xff]  ;;  %v34193_v3 = vld [vmem:[%s35902_s30 + $0x1f50] sm:$0xff] }
 0x3fc   : > { %21364 = vmatpush.bf16.msra.mxu0 %v34157_v56  ;;  %v21138_v11 = vpop.f32.mrf.mxu2  ;;  %v21114_v15 = vpop.f32.mrf.mxu0  ;;  %v34186_v56 = vld [vmem:[%s35902_s30 + $0x1f18] sm:$0xff] }
 0x3fd   : > { %21377 = vmatpush.bf16.msra.mxu1 %v34165_v57  ;;  %v21139_v12 = vadd.f32 %v21138_v11, %v21126_v6  ;;  %v21151_v14 = vpop.f32.mrf.mxu3  ;;  %v21127_v18 = vpop.f32.mrf.mxu1  ;;  %v34194_v57 = vld [vmem:[%s35902_s30 + $0x1f58] sm:$0xff]  ;;  %v34184_v6 = vld [vmem:[%s35902_s30 + $0x1f08] sm:$0xff] }
 0x3fe   : > { %21390 = vmatpush.bf16.msra.mxu2 %v34173_v58  ;;  %v34202_v58 = vld [vmem:[%s35902_s30 + $0x1f98] sm:$0xff]  ;;  %v34208_v15 = vld [vmem:[%s35902_s30 + $0x1fc8] sm:$0xff]  ;;  %v34191_v18 = vld [vmem:[%s35902_s30 + $0x1f40] sm:$0xff] }
 0x3ff   : > { %21403 = vmatpush.bf16.msra.mxu3 %v34181_v59  ;;  %v21152_v16 = vadd.f32 %v21151_v14, %v21139_v12  ;;  %v5186_v12 = vld [vmem:[#allocation1 + $0x2d] sm:$0xff]  ;;  %v304_v14 = vld [vmem:[%s35916_s27 + $0x80] sm:$0xff] }
 0x400   : > { %21365 = vmatpush.bf16.msra.mxu0 %v34156_v60 }
 0x401   : > { %21378 = vmatpush.bf16.msra.mxu1 %v34164_v61  ;;  %v34210_v61 = vld [vmem:[%s35902_s30 + $0x1fd8] sm:$0xff] }
 0x402   : > { %21391 = vmatpush.bf16.msra.mxu2 %v34172_v62 }
 0x403   : > { %21404 = vmatpush.bf16.msra.mxu3 %v34180_v63 }
 0x404   : > { %21366 = vmatpush.bf16.msra.mxu0 %v34155_v2  ;;  %v21140_v25 = vpop.f32.mrf.mxu2 }
 0x405   : > { %21379 = vmatpush.bf16.msra.mxu1 %v34163_v4  ;;  %v21153_v27 = vpop.f32.mrf.mxu3  ;;  %v34201_v4 = vld [vmem:[%s35902_s30 + $0x1f90] sm:$0xff] }
 0x406   : > { %21392 = vmatpush.bf16.msra.mxu2 %v34171_v5  ;;  %v34209_v5 = vld [vmem:[%s35902_s30 + $0x1fd0] sm:$0xff] }
 0x407   : > { %21405 = vmatpush.bf16.msra.mxu3 %v34179_v7  ;;  %v34192_v7 = vld [vmem:[%s35902_s30 + $0x1f48] sm:$0xff]  ;;  %v34221_v25 = vld [vmem:[%s35902_s30 + $0x2030] sm:$0xff] }
 0x408   : > { %21367 = vmatpush.bf16.msra.mxu0 %v34154_v8  ;;  %v34200_v8 = vld [vmem:[%s35902_s30 + $0x1f88] sm:$0xff]  ;;  %v34237_v27 = vld [vmem:[%s35902_s30 + $0x20b0] sm:$0xff] }
 0x409   : > { %21380 = vmatpush.bf16.msra.mxu1 %v34162_v9  ;;  %v5185_v9 = vld [vmem:[#allocation1 + $0x24] sm:$0xff] }
 0x40a   : > { %21393 = vmatpush.bf16.msra.mxu2 %v34170_v10  ;;  %v5187_v10 = vld [vmem:[#allocation1 + $0x36] sm:$0xff] }
 0x40b   : > { %21406 = vmatpush.bf16.msra.mxu3 %v34178_v13  ;;  %v5188_v13 = vld [vmem:[#allocation1 + $0x3f] sm:$0xff] }
 0x40c   : > { %21368 = vmatpush.bf16.msra.mxu0 %v34153_v17  ;;  %5190 = vst [vmem:[#allocation1] ss:$9 sm:$0xff] %v304_v14  ;;  %v34183_v17 = vld [vmem:[%s35902_s30 + $0x1f00] sm:$0xff]  ;;  %v34260_v14 = vld [vmem:[%s35902_s30 + $0x2168] sm:$0xff] }
 0x40d   : > { %21381 = vmatpush.bf16.msra.mxu1 %v34161_v19  ;;  %v34199_v19 = vld [vmem:[%s35902_s30 + $0x1f80] sm:$0xff] }
 0x40e   : > { %21394 = vmatpush.bf16.msra.mxu2 %v34169_v20  ;;  %v34222_v20 = vld [vmem:[%s35902_s30 + $0x2038] sm:$0xff] }
 0x40f   : > { %21407 = vmatpush.bf16.msra.mxu3 %v34177_v21  ;;  %v34230_v21 = vld [vmem:[%s35902_s30 + $0x2078] sm:$0xff] }
 0x410   : > { %21369 = vmatpush.bf16.msra.mxu0 %v34152_v22  ;;  %v34238_v22 = vld [vmem:[%s35902_s30 + $0x20b8] sm:$0xff] }
 0x411   : > { %21382 = vmatpush.bf16.msra.mxu1 %v34160_v23  ;;  %v34207_v23 = vld [vmem:[%s35902_s30 + $0x1fc0] sm:$0xff] }
 0x412   : > { %21395 = vmatpush.bf16.msra.mxu2 %v34168_v24  ;;  %v34246_v24 = vld [vmem:[%s35902_s30 + $0x20f8] sm:$0xff] }
 0x413   : > { %21408 = vmatpush.bf16.msra.mxu3 %v34176_v26  ;;  %v34229_v26 = vld [vmem:[%s35902_s30 + $0x2070] sm:$0xff] }
 0x414   : > { %21370 = vmatpush.bf16.msra.mxu0 %v34151_v28  ;;  %v21164_v48 = vpop.f32.mrf.mxu0  ;;  %v34245_v28 = vld [vmem:[%s35902_s30 + $0x20f0] sm:$0xff] }
 0x415   : > { %21383 = vmatpush.bf16.msra.mxu1 %v34159_v29  ;;  %v21165_v49 = vadd.f32 %v21164_v48, %v21152_v16  ;;  %v21177_v51 = vpop.f32.mrf.mxu1  ;;  %v34220_v29 = vld [vmem:[%s35902_s30 + $0x2028] sm:$0xff] }
 0x416   : > { %21396 = vmatpush.bf16.msra.mxu2 %v34167_v30  ;;  %v34228_v30 = vld [vmem:[%s35902_s30 + $0x2068] sm:$0xff] }
 0x417   : > { %21409 = vmatpush.bf16.msra.mxu3 %v34175_v34  ;;  %21371 = vmatmul.bf16.vlgmr.msra.gmra.mxu0 %v5181_v35  ;;  %v21178_v54 = vadd.f32 %v21177_v51, %v21165_v49  ;;  %v34219_v35 = vld [vmem:[%s35902_s30 + $0x2020] sm:$0xff] }
 0x418   : > { %21415 = vmatpush.bf16.msrb.mxu0 %v34190_v31  ;;  %21384 = vmatmul.bf16.vlgmr.msra.gmra.mxu1 %v5182_v38  ;;  %v34236_v31 = vld [vmem:[%s35902_s30 + $0x20a8] sm:$0xff]  ;;  %v34235_v38 = vld [vmem:[%s35902_s30 + $0x20a0] sm:$0xff] }
 0x419   : > { %21428 = vmatpush.bf16.msrb.mxu1 %v34198_v32  ;;  %21397 = vmatmul.bf16.vlgmr.msra.gmra.mxu2 %v5183_v36  ;;  %v34244_v32 = vld [vmem:[%s35902_s30 + $0x20e8] sm:$0xff] }
 0x41a   : > { %21441 = vmatpush.bf16.msrb.mxu2 %v34206_v33  ;;  %21410 = vmatmul.bf16.vlgmr.msra.gmra.mxu3 %v5184_v40  ;;  %v34243_v40 = vld [vmem:[%s35902_s30 + $0x20e0] sm:$0xff] }
 0x41b   : > { %21454 = vmatpush.bf16.msrb.mxu3 %v34214_v37  ;;  %v34227_v37 = vld [vmem:[%s35902_s30 + $0x2060] sm:$0xff] }
 0x41c   : > { %21416 = vmatpush.bf16.msrb.mxu0 %v34189_v39  ;;  %v21190_v59 = vpop.f32.mrf.mxu2  ;;  %v21166_v63 = vpop.f32.mrf.mxu0 }
 0x41d   : > { %21429 = vmatpush.bf16.msrb.mxu1 %v34197_v41  ;;  %v21191_v60 = vadd.f32 %v21190_v59, %v21178_v54  ;;  %v21203_v62 = vpop.f32.mrf.mxu3  ;;  %v21179_v2 = vpop.f32.mrf.mxu1  ;;  %v34218_v41 = vld [vmem:[%s35902_s30 + $0x2018] sm:$0xff]  ;;  %v34241_v54 = vld [vmem:[%s35902_s30 + $0x20d0] sm:$0xff]  ;;  %v34240_v59 = vld [vmem:[%s35902_s30 + $0x20c8] sm:$0xff] }
 0x41e   : > { %21442 = vmatpush.bf16.msrb.mxu2 %v34205_v42  ;;  %v34226_v42 = vld [vmem:[%s35902_s30 + $0x2058] sm:$0xff]  ;;  %v34231_v63 = vld [vmem:[%s35902_s30 + $0x2080] sm:$0xff] }
 0x41f   : > { %21455 = vmatpush.bf16.msrb.mxu3 %v34213_v43  ;;  %v36981_v0 = vadd.f32 %v21203_v62, %v21191_v60  ;;  %v34234_v43 = vld [vmem:[%s35902_s30 + $0x2098] sm:$0xff]  ;;  %v34223_v62 = vld [vmem:[%s35902_s30 + $0x2040] sm:$0xff] }
 0x420   : > { %21417 = vmatpush.bf16.msrb.mxu0 %v34188_v44  ;;  %v34270_v2 = vld [vmem:[%s35902_s30 + $0x21b8] sm:$0xff] }
 0x421   : > { %21430 = vmatpush.bf16.msrb.mxu1 %v34196_v45 }
 0x422   : > { %21443 = vmatpush.bf16.msrb.mxu2 %v34204_v46  ;;  %v34242_v46 = vld [vmem:[%s35902_s30 + $0x20d8] sm:$0xff] }
 0x423   : > { %21456 = vmatpush.bf16.msrb.mxu3 %v34212_v47 }
 0x424   : > { %21418 = vmatpush.bf16.msrb.mxu0 %v34187_v50  ;;  %v21192_v11 = vpop.f32.mrf.mxu2  ;;  %v34217_v50 = vld [vmem:[%s35902_s30 + $0x2010] sm:$0xff] }
 0x425   : > { %21431 = vmatpush.bf16.msrb.mxu1 %v34195_v52  ;;  %v21205_v16 = vpop.f32.mrf.mxu3  ;;  %v34225_v52 = vld [vmem:[%s35902_s30 + $0x2050] sm:$0xff] }
 0x426   : > { %21444 = vmatpush.bf16.msrb.mxu2 %v34203_v53  ;;  %v34233_v53 = vld [vmem:[%s35902_s30 + $0x2090] sm:$0xff]  ;;  %v34276_v16 = vld [vmem:[%s35902_s30 + $0x21e8] sm:$0xff] }
 0x427   : > { %21457 = vmatpush.bf16.msrb.mxu3 %v34211_v55  ;;  %v34216_v55 = vld [vmem:[%s35902_s30 + $0x2008] sm:$0xff]  ;;  %v34269_v11 = vld [vmem:[%s35902_s30 + $0x21b0] sm:$0xff] }
 0x428   : > { %21419 = vmatpush.bf16.msrb.mxu0 %v34186_v56  ;;  %v34224_v56 = vld [vmem:[%s35902_s30 + $0x2048] sm:$0xff] }
 0x429   : > { %21432 = vmatpush.bf16.msrb.mxu1 %v34194_v57  ;;  %v34232_v57 = vld [vmem:[%s35902_s30 + $0x2088] sm:$0xff] }
 0x42a   : > { %21445 = vmatpush.bf16.msrb.mxu2 %v34202_v58 }
 0x42b   : > { %21458 = vmatpush.bf16.msrb.mxu3 %v34210_v61  ;;  %v34215_v61 = vld [vmem:[%s35902_s30 + $0x2000] sm:$0xff] }
 0x42c   : > { %21420 = vmatpush.bf16.msrb.mxu0 %v34185_v1  ;;  %v34262_v1 = vld [vmem:[%s35902_s30 + $0x2178] sm:$0xff] }
 0x42d   : > { %21433 = vmatpush.bf16.msrb.mxu1 %v34193_v3  ;;  %v34239_v3 = vld [vmem:[%s35902_s30 + $0x20c0] sm:$0xff] }
 0x42e   : > { %21446 = vmatpush.bf16.msrb.mxu2 %v34201_v4  ;;  %v5191_v4 = vld [vmem:[#allocation1] sm:$0xff] }
 0x42f   : > { %21459 = vmatpush.bf16.msrb.mxu3 %v34209_v5  ;;  %v5193_v5 = vld [vmem:[#allocation1 + $0x12] sm:$0xff] }
 0x430   : > { %21421 = vmatpush.bf16.msrb.mxu0 %v34184_v6  ;;  %v34278_v6 = vld [vmem:[%s35902_s30 + $0x21f8] sm:$0xff] }
 0x431   : > { %21434 = vmatpush.bf16.msrb.mxu1 %v34192_v7  ;;  %v5192_v7 = vld [vmem:[#allocation1 + $0x9] sm:$0xff] }
 0x432   : > { %21447 = vmatpush.bf16.msrb.mxu2 %v34200_v8  ;;  %v34253_v8 = vld [vmem:[%s35902_s30 + $0x2130] sm:$0xff] }
 0x433   : > { %21460 = vmatpush.bf16.msrb.mxu3 %v34208_v15  ;;  %v34268_v15 = vld [vmem:[%s35902_s30 + $0x21a8] sm:$0xff] }
 0x434   : > { %21422 = vmatpush.bf16.msrb.mxu0 %v34183_v17  ;;  %v21216_v33 = vpop.f32.mrf.mxu0 }
 0x435   : > { %21435 = vmatpush.bf16.msrb.mxu1 %v34191_v18  ;;  %v21217_v34 = vadd.f32 %v21216_v33, %v36981_v0  ;;  %v21229_v36 = vpop.f32.mrf.mxu1  ;;  %v34254_v0 = vld [vmem:[%s35902_s30 + $0x2138] sm:$0xff] }
 0x436   : > { %21448 = vmatpush.bf16.msrb.mxu2 %v34199_v19  ;;  %v34251_v19 = vld [vmem:[%s35902_s30 + $0x2120] sm:$0xff] }
 0x437   : > { %21461 = vmatpush.bf16.msrb.mxu3 %v34207_v23  ;;  %21423 = vmatmul.bf16.vlgmr.msrb.gmra.mxu0 %v5185_v9  ;;  %v21230_v39 = vadd.f32 %v21229_v36, %v21217_v34  ;;  %v5194_v9 = vld [vmem:[#allocation1 + $0x1b] sm:$0xff] }
 0x438   : > { %21467 = vmatpush.bf16.msra.mxu0 %v34222_v20  ;;  %21436 = vmatmul.bf16.vlgmr.msrb.gmra.mxu1 %v5186_v12  ;;  %v34277_v12 = vld [vmem:[%s35902_s30 + $0x21f0] sm:$0xff] }
 0x439   : > { %21480 = vmatpush.bf16.msra.mxu1 %v34230_v21  ;;  %21449 = vmatmul.bf16.vlgmr.msrb.gmra.mxu2 %v5187_v10  ;;  %v34261_v10 = vld [vmem:[%s35902_s30 + $0x2170] sm:$0xff]  ;;  %v34259_v21 = vld [vmem:[%s35902_s30 + $0x2160] sm:$0xff] }
 0x43a   : > { %21493 = vmatpush.bf16.msra.mxu2 %v34238_v22  ;;  %21462 = vmatmul.bf16.vlgmr.msrb.gmra.mxu3 %v5188_v13  ;;  %v34252_v13 = vld [vmem:[%s35902_s30 + $0x2128] sm:$0xff]  ;;  %v34267_v22 = vld [vmem:[%s35902_s30 + $0x21a0] sm:$0xff]  ;;  %v34249_v34 = vld [vmem:[%s35902_s30 + $0x2110] sm:$0xff] }
 0x43b   : > { %21506 = vmatpush.bf16.msra.mxu3 %v34246_v24  ;;  %v34275_v24 = vld [vmem:[%s35902_s30 + $0x21e0] sm:$0xff]  ;;  %v34257_v36 = vld [vmem:[%s35902_s30 + $0x2150] sm:$0xff] }
 0x43c   : > { %21468 = vmatpush.bf16.msra.mxu0 %v34221_v25  ;;  %v21242_v44 = vpop.f32.mrf.mxu2  ;;  %v21218_v48 = vpop.f32.mrf.mxu0  ;;  %v34250_v25 = vld [vmem:[%s35902_s30 + $0x2118] sm:$0xff] }
 0x43d   : > { %21481 = vmatpush.bf16.msra.mxu1 %v34229_v26  ;;  %v21243_v45 = vadd.f32 %v21242_v44, %v21230_v39  ;;  %v21255_v47 = vpop.f32.mrf.mxu3  ;;  %v21231_v51 = vpop.f32.mrf.mxu1  ;;  %v34258_v26 = vld [vmem:[%s35902_s30 + $0x2158] sm:$0xff]  ;;  %v34248_v39 = vld [vmem:[%s35902_s30 + $0x2108] sm:$0xff] }
 0x43e   : > { %21494 = vmatpush.bf16.msra.mxu2 %v34237_v27  ;;  %v34266_v27 = vld [vmem:[%s35902_s30 + $0x2198] sm:$0xff]  ;;  %v34272_v48 = vld [vmem:[%s35902_s30 + $0x21c8] sm:$0xff]  ;;  %v34255_v51 = vld [vmem:[%s35902_s30 + $0x2140] sm:$0xff] }
 0x43f   : > { %21507 = vmatpush.bf16.msra.mxu3 %v34245_v28  ;;  %v21256_v49 = vadd.f32 %v21255_v47, %v21243_v45  ;;  %v5196_v45 = vld [vmem:[#allocation1 + $0x2d] sm:$0xff] }
 0x440   : > { %21469 = vmatpush.bf16.msra.mxu0 %v34220_v29  ;;  %v305_v47 = vld [vmem:[%s35916_s27 + $0x88] sm:$0xff] }
 0x441   : > { %21482 = vmatpush.bf16.msra.mxu1 %v34228_v30  ;;  %v34274_v30 = vld [vmem:[%s35902_s30 + $0x21d8] sm:$0xff] }
 0x442   : > { %21495 = vmatpush.bf16.msra.mxu2 %v34236_v31 }
 0x443   : > { %21508 = vmatpush.bf16.msra.mxu3 %v34244_v32 }
 0x444   : > { %21470 = vmatpush.bf16.msra.mxu0 %v34219_v35  ;;  %v21244_v58 = vpop.f32.mrf.mxu2 }
 0x445   : > { %21483 = vmatpush.bf16.msra.mxu1 %v34227_v37  ;;  %v21257_v60 = vpop.f32.mrf.mxu3  ;;  %v34265_v37 = vld [vmem:[%s35902_s30 + $0x2190] sm:$0xff] }
 0x446   : > { %21496 = vmatpush.bf16.msra.mxu2 %v34235_v38  ;;  %v34273_v38 = vld [vmem:[%s35902_s30 + $0x21d0] sm:$0xff] }
 0x447   : > { %21509 = vmatpush.bf16.msra.mxu3 %v34243_v40  ;;  %v34256_v40 = vld [vmem:[%s35902_s30 + $0x2148] sm:$0xff]  ;;  %v34285_v58 = vld [vmem:[%s35902_s30 + $0x2230] sm:$0xff] }
 0x448   : > { %21471 = vmatpush.bf16.msra.mxu0 %v34218_v41  ;;  %v34264_v41 = vld [vmem:[%s35902_s30 + $0x2188] sm:$0xff]  ;;  %v34301_v60 = vld [vmem:[%s35902_s30 + $0x22b0] sm:$0xff] }
 0x449   : > { %21484 = vmatpush.bf16.msra.mxu1 %v34226_v42  ;;  %v5195_v42 = vld [vmem:[#allocation1 + $0x24] sm:$0xff] }
 0x44a   : > { %21497 = vmatpush.bf16.msra.mxu2 %v34234_v43  ;;  %v5197_v43 = vld [vmem:[#allocation1 + $0x36] sm:$0xff] }
 0x44b   : > { %21510 = vmatpush.bf16.msra.mxu3 %v34242_v46  ;;  %v5198_v46 = vld [vmem:[#allocation1 + $0x3f] sm:$0xff] }
 0x44c   : > { %21472 = vmatpush.bf16.msra.mxu0 %v34217_v50  ;;  %5200 = vst [vmem:[#allocation1] ss:$9 sm:$0xff] %v305_v47  ;;  %v34247_v50 = vld [vmem:[%s35902_s30 + $0x2100] sm:$0xff]  ;;  %v34324_v47 = vld [vmem:[%s35902_s30 + $0x2368] sm:$0xff] }
 0x44d   : > { %21485 = vmatpush.bf16.msra.mxu1 %v34225_v52  ;;  %v34263_v52 = vld [vmem:[%s35902_s30 + $0x2180] sm:$0xff] }
 0x44e   : > { %21498 = vmatpush.bf16.msra.mxu2 %v34233_v53  ;;  %v34286_v53 = vld [vmem:[%s35902_s30 + $0x2238] sm:$0xff] }
 0x44f   : > { %21511 = vmatpush.bf16.msra.mxu3 %v34241_v54  ;;  %v34294_v54 = vld [vmem:[%s35902_s30 + $0x2278] sm:$0xff] }
 0x450   : > { %21473 = vmatpush.bf16.msra.mxu0 %v34216_v55  ;;  %v34302_v55 = vld [vmem:[%s35902_s30 + $0x22b8] sm:$0xff] }
 0x451   : > { %21486 = vmatpush.bf16.msra.mxu1 %v34224_v56  ;;  %v34271_v56 = vld [vmem:[%s35902_s30 + $0x21c0] sm:$0xff] }
 0x452   : > { %21499 = vmatpush.bf16.msra.mxu2 %v34232_v57  ;;  %v34310_v57 = vld [vmem:[%s35902_s30 + $0x22f8] sm:$0xff] }
 0x453   : > { %21512 = vmatpush.bf16.msra.mxu3 %v34240_v59  ;;  %v34293_v59 = vld [vmem:[%s35902_s30 + $0x2270] sm:$0xff] }
 0x454   : > { %21474 = vmatpush.bf16.msra.mxu0 %v34215_v61  ;;  %v21268_v17 = vpop.f32.mrf.mxu0  ;;  %v34309_v61 = vld [vmem:[%s35902_s30 + $0x22f0] sm:$0xff] }
 0x455   : > { %21487 = vmatpush.bf16.msra.mxu1 %v34223_v62  ;;  %v21269_v18 = vadd.f32 %v21268_v17, %v21256_v49  ;;  %v21281_v20 = vpop.f32.mrf.mxu1  ;;  %v34284_v62 = vld [vmem:[%s35902_s30 + $0x2228] sm:$0xff] }
 0x456   : > { %21500 = vmatpush.bf16.msra.mxu2 %v34231_v63  ;;  %v34292_v63 = vld [vmem:[%s35902_s30 + $0x2268] sm:$0xff] }
 0x457   : > { %21513 = vmatpush.bf16.msra.mxu3 %v34239_v3  ;;  %21475 = vmatmul.bf16.vlgmr.msra.gmra.mxu0 %v5191_v4  ;;  %v21282_v23 = vadd.f32 %v21281_v20, %v21269_v18  ;;  %v34283_v4 = vld [vmem:[%s35902_s30 + $0x2220] sm:$0xff] }
 0x458   : > { %21519 = vmatpush.bf16.msrb.mxu0 %v34254_v0  ;;  %21488 = vmatmul.bf16.vlgmr.msra.gmra.mxu1 %v5192_v7  ;;  %v34300_v0 = vld [vmem:[%s35902_s30 + $0x22a8] sm:$0xff]  ;;  %v34299_v7 = vld [vmem:[%s35902_s30 + $0x22a0] sm:$0xff] }
 0x459   : > { %21532 = vmatpush.bf16.msrb.mxu1 %v34262_v1  ;;  %21501 = vmatmul.bf16.vlgmr.msra.gmra.mxu2 %v5193_v5  ;;  %v34308_v1 = vld [vmem:[%s35902_s30 + $0x22e8] sm:$0xff] }
 0x45a   : > { %21545 = vmatpush.bf16.msrb.mxu2 %v34270_v2  ;;  %21514 = vmatmul.bf16.vlgmr.msra.gmra.mxu3 %v5194_v9  ;;  %v34307_v9 = vld [vmem:[%s35902_s30 + $0x22e0] sm:$0xff] }
 0x45b   : > { %21558 = vmatpush.bf16.msrb.mxu3 %v34278_v6  ;;  %v34291_v6 = vld [vmem:[%s35902_s30 + $0x2260] sm:$0xff] }
 0x45c   : > { %21520 = vmatpush.bf16.msrb.mxu0 %v34253_v8  ;;  %v21294_v28 = vpop.f32.mrf.mxu2  ;;  %v21270_v32 = vpop.f32.mrf.mxu0 }
 0x45d   : > { %21533 = vmatpush.bf16.msrb.mxu1 %v34261_v10  ;;  %v21295_v29 = vadd.f32 %v21294_v28, %v21282_v23  ;;  %v21307_v31 = vpop.f32.mrf.mxu3  ;;  %v21283_v35 = vpop.f32.mrf.mxu1  ;;  %v34282_v10 = vld [vmem:[%s35902_s30 + $0x2218] sm:$0xff]  ;;  %v34305_v23 = vld [vmem:[%s35902_s30 + $0x22d0] sm:$0xff]  ;;  %v34304_v28 = vld [vmem:[%s35902_s30 + $0x22c8] sm:$0xff] }
 0x45e   : > { %21546 = vmatpush.bf16.msrb.mxu2 %v34269_v11  ;;  %v34290_v11 = vld [vmem:[%s35902_s30 + $0x2258] sm:$0xff]  ;;  %v34295_v32 = vld [vmem:[%s35902_s30 + $0x2280] sm:$0xff] }
 0x45f   : > { %21559 = vmatpush.bf16.msrb.mxu3 %v34277_v12  ;;  %v37049_v33 = vadd.f32 %v21307_v31, %v21295_v29  ;;  %v34298_v12 = vld [vmem:[%s35902_s30 + $0x2298] sm:$0xff]  ;;  %v34287_v31 = vld [vmem:[%s35902_s30 + $0x2240] sm:$0xff] }
 0x460   : > { %21521 = vmatpush.bf16.msrb.mxu0 %v34252_v13  ;;  %v34334_v35 = vld [vmem:[%s35902_s30 + $0x23b8] sm:$0xff] }
 0x461   : > { %21534 = vmatpush.bf16.msrb.mxu1 %v34260_v14 }
 0x462   : > { %21547 = vmatpush.bf16.msrb.mxu2 %v34268_v15  ;;  %v34306_v15 = vld [vmem:[%s35902_s30 + $0x22d8] sm:$0xff] }
 0x463   : > { %21560 = vmatpush.bf16.msrb.mxu3 %v34276_v16 }
 0x464   : > { %21522 = vmatpush.bf16.msrb.mxu0 %v34251_v19  ;;  %v21296_v44 = vpop.f32.mrf.mxu2  ;;  %v34281_v19 = vld [vmem:[%s35902_s30 + $0x2210] sm:$0xff] }
 0x465   : > { %21535 = vmatpush.bf16.msrb.mxu1 %v34259_v21  ;;  %v21309_v49 = vpop.f32.mrf.mxu3  ;;  %v34289_v21 = vld [vmem:[%s35902_s30 + $0x2250] sm:$0xff] }
 0x466   : > { %21548 = vmatpush.bf16.msrb.mxu2 %v34267_v22  ;;  %v34297_v22 = vld [vmem:[%s35902_s30 + $0x2290] sm:$0xff]  ;;  %v34340_v49 = vld [vmem:[%s35902_s30 + $0x23e8] sm:$0xff] }
 0x467   : > { %21561 = vmatpush.bf16.msrb.mxu3 %v34275_v24  ;;  %v34280_v24 = vld [vmem:[%s35902_s30 + $0x2208] sm:$0xff]  ;;  %v34333_v44 = vld [vmem:[%s35902_s30 + $0x23b0] sm:$0xff] }
 0x468   : > { %21523 = vmatpush.bf16.msrb.mxu0 %v34250_v25  ;;  %v34288_v25 = vld [vmem:[%s35902_s30 + $0x2248] sm:$0xff] }
 0x469   : > { %21536 = vmatpush.bf16.msrb.mxu1 %v34258_v26  ;;  %v34296_v26 = vld [vmem:[%s35902_s30 + $0x2288] sm:$0xff] }
 0x46a   : > { %21549 = vmatpush.bf16.msrb.mxu2 %v34266_v27 }
 0x46b   : > { %21562 = vmatpush.bf16.msrb.mxu3 %v34274_v30  ;;  %v34279_v30 = vld [vmem:[%s35902_s30 + $0x2200] sm:$0xff] }
 0x46c   : > { %21524 = vmatpush.bf16.msrb.mxu0 %v34249_v34  ;;  %v34326_v34 = vld [vmem:[%s35902_s30 + $0x2378] sm:$0xff] }
 0x46d   : > { %21537 = vmatpush.bf16.msrb.mxu1 %v34257_v36  ;;  %v34303_v36 = vld [vmem:[%s35902_s30 + $0x22c0] sm:$0xff] }
 0x46e   : > { %21550 = vmatpush.bf16.msrb.mxu2 %v34265_v37  ;;  %v5201_v37 = vld [vmem:[#allocation1] sm:$0xff] }
 0x46f   : > { %21563 = vmatpush.bf16.msrb.mxu3 %v34273_v38  ;;  %v5203_v38 = vld [vmem:[#allocation1 + $0x12] sm:$0xff] }
 0x470   : > { %21525 = vmatpush.bf16.msrb.mxu0 %v34248_v39  ;;  %v34342_v39 = vld [vmem:[%s35902_s30 + $0x23f8] sm:$0xff] }
 0x471   : > { %21538 = vmatpush.bf16.msrb.mxu1 %v34256_v40  ;;  %v5202_v40 = vld [vmem:[#allocation1 + $0x9] sm:$0xff] }
 0x472   : > { %21551 = vmatpush.bf16.msrb.mxu2 %v34264_v41  ;;  %v34317_v41 = vld [vmem:[%s35902_s30 + $0x2330] sm:$0xff] }
 0x473   : > { %21564 = vmatpush.bf16.msrb.mxu3 %v34272_v48  ;;  %v34332_v48 = vld [vmem:[%s35902_s30 + $0x23a8] sm:$0xff] }
 0x474   : > { %21526 = vmatpush.bf16.msrb.mxu0 %v34247_v50  ;;  %v21320_v2 = vpop.f32.mrf.mxu0 }
 0x475   : > { %21539 = vmatpush.bf16.msrb.mxu1 %v34255_v51  ;;  %v21321_v3 = vadd.f32 %v21320_v2, %v37049_v33  ;;  %v21333_v5 = vpop.f32.mrf.mxu1  ;;  %v34318_v33 = vld [vmem:[%s35902_s30 + $0x2338] sm:$0xff] }
 0x476   : > { %21552 = vmatpush.bf16.msrb.mxu2 %v34263_v52  ;;  %v34315_v52 = vld [vmem:[%s35902_s30 + $0x2320] sm:$0xff] }
 0x477   : > { %21565 = vmatpush.bf16.msrb.mxu3 %v34271_v56  ;;  %21527 = vmatmul.bf16.vlgmr.msrb.gmra.mxu0 %v5195_v42  ;;  %v21334_v8 = vadd.f32 %v21333_v5, %v21321_v3  ;;  %v5204_v42 = vld [vmem:[#allocation1 + $0x1b] sm:$0xff] }
 0x478   : > { %21571 = vmatpush.bf16.msra.mxu0 %v34286_v53  ;;  %21540 = vmatmul.bf16.vlgmr.msrb.gmra.mxu1 %v5196_v45  ;;  %v34341_v45 = vld [vmem:[%s35902_s30 + $0x23f0] sm:$0xff] }
 0x479   : > { %21584 = vmatpush.bf16.msra.mxu1 %v34294_v54  ;;  %21553 = vmatmul.bf16.vlgmr.msrb.gmra.mxu2 %v5197_v43  ;;  %v34325_v43 = vld [vmem:[%s35902_s30 + $0x2370] sm:$0xff]  ;;  %v34323_v54 = vld [vmem:[%s35902_s30 + $0x2360] sm:$0xff] }
 0x47a   : > { %21597 = vmatpush.bf16.msra.mxu2 %v34302_v55  ;;  %21566 = vmatmul.bf16.vlgmr.msrb.gmra.mxu3 %v5198_v46  ;;  %v34316_v46 = vld [vmem:[%s35902_s30 + $0x2328] sm:$0xff]  ;;  %v34331_v55 = vld [vmem:[%s35902_s30 + $0x23a0] sm:$0xff]  ;;  %v34313_v3 = vld [vmem:[%s35902_s30 + $0x2310] sm:$0xff] }
 0x47b   : > { %21610 = vmatpush.bf16.msra.mxu3 %v34310_v57  ;;  %v34339_v57 = vld [vmem:[%s35902_s30 + $0x23e0] sm:$0xff]  ;;  %v34321_v5 = vld [vmem:[%s35902_s30 + $0x2350] sm:$0xff] }
 0x47c   : > { %21572 = vmatpush.bf16.msra.mxu0 %v34285_v58  ;;  %v21346_v13 = vpop.f32.mrf.mxu2  ;;  %v21322_v17 = vpop.f32.mrf.mxu0  ;;  %v34314_v58 = vld [vmem:[%s35902_s30 + $0x2318] sm:$0xff] }
 0x47d   : > { %21585 = vmatpush.bf16.msra.mxu1 %v34293_v59  ;;  %v21347_v14 = vadd.f32 %v21346_v13, %v21334_v8  ;;  %v21359_v16 = vpop.f32.mrf.mxu3  ;;  %v21335_v20 = vpop.f32.mrf.mxu1  ;;  %v34322_v59 = vld [vmem:[%s35902_s30 + $0x2358] sm:$0xff]  ;;  %v34312_v8 = vld [vmem:[%s35902_s30 + $0x2308] sm:$0xff] }
 0x47e   : > { %21598 = vmatpush.bf16.msra.mxu2 %v34301_v60  ;;  %v34330_v60 = vld [vmem:[%s35902_s30 + $0x2398] sm:$0xff]  ;;  %v34336_v17 = vld [vmem:[%s35902_s30 + $0x23c8] sm:$0xff]  ;;  %v34319_v20 = vld [vmem:[%s35902_s30 + $0x2340] sm:$0xff] }
 0x47f   : > { %21611 = vmatpush.bf16.msra.mxu3 %v34309_v61  ;;  %v21360_v18 = vadd.f32 %v21359_v16, %v21347_v14  ;;  %v5206_v14 = vld [vmem:[#allocation1 + $0x2d] sm:$0xff] }
 0x480   : > { %21573 = vmatpush.bf16.msra.mxu0 %v34284_v62  ;;  %v306_v16 = vld [vmem:[%s35916_s27 + $0x90] sm:$0xff] }
 0x481   : > { %21586 = vmatpush.bf16.msra.mxu1 %v34292_v63  ;;  %v34338_v63 = vld [vmem:[%s35902_s30 + $0x23d8] sm:$0xff] }
 0x482   : > { %21599 = vmatpush.bf16.msra.mxu2 %v34300_v0 }
 0x483   : > { %21612 = vmatpush.bf16.msra.mxu3 %v34308_v1 }
 0x484   : > { %21574 = vmatpush.bf16.msra.mxu0 %v34283_v4  ;;  %v21348_v27 = vpop.f32.mrf.mxu2 }
 0x485   : > { %21587 = vmatpush.bf16.msra.mxu1 %v34291_v6  ;;  %v21361_v29 = vpop.f32.mrf.mxu3  ;;  %v34329_v6 = vld [vmem:[%s35902_s30 + $0x2390] sm:$0xff] }
 0x486   : > { %21600 = vmatpush.bf16.msra.mxu2 %v34299_v7  ;;  %v34337_v7 = vld [vmem:[%s35902_s30 + $0x23d0] sm:$0xff] }
 0x487   : > { %21613 = vmatpush.bf16.msra.mxu3 %v34307_v9  ;;  %v34320_v9 = vld [vmem:[%s35902_s30 + $0x2348] sm:$0xff]  ;;  %v34349_v27 = vld [vmem:[%s35902_s30 + $0x2430] sm:$0xff] }
 0x488   : > { %21575 = vmatpush.bf16.msra.mxu0 %v34282_v10  ;;  %v34328_v10 = vld [vmem:[%s35902_s30 + $0x2388] sm:$0xff]  ;;  %v34365_v29 = vld [vmem:[%s35902_s30 + $0x24b0] sm:$0xff] }
 0x489   : > { %21588 = vmatpush.bf16.msra.mxu1 %v34290_v11  ;;  %v5205_v11 = vld [vmem:[#allocation1 + $0x24] sm:$0xff] }
 0x48a   : > { %21601 = vmatpush.bf16.msra.mxu2 %v34298_v12  ;;  %v5207_v12 = vld [vmem:[#allocation1 + $0x36] sm:$0xff] }
 0x48b   : > { %21614 = vmatpush.bf16.msra.mxu3 %v34306_v15  ;;  %v5208_v15 = vld [vmem:[#allocation1 + $0x3f] sm:$0xff] }
 0x48c   : > { %21576 = vmatpush.bf16.msra.mxu0 %v34281_v19  ;;  %5210 = vst [vmem:[#allocation1] ss:$9 sm:$0xff] %v306_v16  ;;  %v34311_v19 = vld [vmem:[%s35902_s30 + $0x2300] sm:$0xff]  ;;  %v34388_v16 = vld [vmem:[%s35902_s30 + $0x2568] sm:$0xff] }
 0x48d   : > { %21589 = vmatpush.bf16.msra.mxu1 %v34289_v21  ;;  %v34327_v21 = vld [vmem:[%s35902_s30 + $0x2380] sm:$0xff] }
 0x48e   : > { %21602 = vmatpush.bf16.msra.mxu2 %v34297_v22  ;;  %v34350_v22 = vld [vmem:[%s35902_s30 + $0x2438] sm:$0xff] }
 0x48f   : > { %21615 = vmatpush.bf16.msra.mxu3 %v34305_v23  ;;  %v34358_v23 = vld [vmem:[%s35902_s30 + $0x2478] sm:$0xff] }
 0x490   : > { %21577 = vmatpush.bf16.msra.mxu0 %v34280_v24  ;;  %v34366_v24 = vld [vmem:[%s35902_s30 + $0x24b8] sm:$0xff] }
 0x491   : > { %21590 = vmatpush.bf16.msra.mxu1 %v34288_v25  ;;  %v34335_v25 = vld [vmem:[%s35902_s30 + $0x23c0] sm:$0xff] }
 0x492   : > { %21603 = vmatpush.bf16.msra.mxu2 %v34296_v26  ;;  %v34374_v26 = vld [vmem:[%s35902_s30 + $0x24f8] sm:$0xff] }
 0x493   : > { %21616 = vmatpush.bf16.msra.mxu3 %v34304_v28  ;;  %v34357_v28 = vld [vmem:[%s35902_s30 + $0x2470] sm:$0xff] }
 0x494   : > { %21578 = vmatpush.bf16.msra.mxu0 %v34279_v30  ;;  %v21372_v50 = vpop.f32.mrf.mxu0  ;;  %v34373_v30 = vld [vmem:[%s35902_s30 + $0x24f0] sm:$0xff] }
 0x495   : > { %21591 = vmatpush.bf16.msra.mxu1 %v34287_v31  ;;  %v21373_v51 = vadd.f32 %v21372_v50, %v21360_v18  ;;  %v21385_v53 = vpop.f32.mrf.mxu1  ;;  %v34348_v31 = vld [vmem:[%s35902_s30 + $0x2428] sm:$0xff] }
 0x496   : > { %21604 = vmatpush.bf16.msra.mxu2 %v34295_v32  ;;  %v34356_v32 = vld [vmem:[%s35902_s30 + $0x2468] sm:$0xff] }
 0x497   : > { %21617 = vmatpush.bf16.msra.mxu3 %v34303_v36  ;;  %21579 = vmatmul.bf16.vlgmr.msra.gmra.mxu0 %v5201_v37  ;;  %v21386_v56 = vadd.f32 %v21385_v53, %v21373_v51  ;;  %v34347_v37 = vld [vmem:[%s35902_s30 + $0x2420] sm:$0xff] }
 0x498   : > { %21623 = vmatpush.bf16.msrb.mxu0 %v34318_v33  ;;  %21592 = vmatmul.bf16.vlgmr.msra.gmra.mxu1 %v5202_v40  ;;  %v34364_v33 = vld [vmem:[%s35902_s30 + $0x24a8] sm:$0xff]  ;;  %v34363_v40 = vld [vmem:[%s35902_s30 + $0x24a0] sm:$0xff] }
 0x499   : > { %21636 = vmatpush.bf16.msrb.mxu1 %v34326_v34  ;;  %21605 = vmatmul.bf16.vlgmr.msra.gmra.mxu2 %v5203_v38  ;;  %v34372_v34 = vld [vmem:[%s35902_s30 + $0x24e8] sm:$0xff] }
 0x49a   : > { %21649 = vmatpush.bf16.msrb.mxu2 %v34334_v35  ;;  %21618 = vmatmul.bf16.vlgmr.msra.gmra.mxu3 %v5204_v42  ;;  %v34371_v42 = vld [vmem:[%s35902_s30 + $0x24e0] sm:$0xff] }
 0x49b   : > { %21662 = vmatpush.bf16.msrb.mxu3 %v34342_v39  ;;  %v34355_v39 = vld [vmem:[%s35902_s30 + $0x2460] sm:$0xff] }
 0x49c   : > { %21624 = vmatpush.bf16.msrb.mxu0 %v34317_v41  ;;  %v21398_v61 = vpop.f32.mrf.mxu2  ;;  %v21374_v1 = vpop.f32.mrf.mxu0 }
 0x49d   : > { %21637 = vmatpush.bf16.msrb.mxu1 %v34325_v43  ;;  %v21399_v62 = vadd.f32 %v21398_v61, %v21386_v56  ;;  %v21411_v0 = vpop.f32.mrf.mxu3  ;;  %v21387_v4 = vpop.f32.mrf.mxu1  ;;  %v34346_v43 = vld [vmem:[%s35902_s30 + $0x2418] sm:$0xff]  ;;  %v34369_v56 = vld [vmem:[%s35902_s30 + $0x24d0] sm:$0xff]  ;;  %v34368_v61 = vld [vmem:[%s35902_s30 + $0x24c8] sm:$0xff] }
 0x49e   : > { %21650 = vmatpush.bf16.msrb.mxu2 %v34333_v44  ;;  %v34354_v44 = vld [vmem:[%s35902_s30 + $0x2458] sm:$0xff]  ;;  %v34359_v1 = vld [vmem:[%s35902_s30 + $0x2480] sm:$0xff] }
 0x49f   : > { %21663 = vmatpush.bf16.msrb.mxu3 %v34341_v45  ;;  %v37117_v2 = vadd.f32 %v21411_v0, %v21399_v62  ;;  %v34362_v45 = vld [vmem:[%s35902_s30 + $0x2498] sm:$0xff]  ;;  %v34351_v0 = vld [vmem:[%s35902_s30 + $0x2440] sm:$0xff] }
 0x4a0   : > { %21625 = vmatpush.bf16.msrb.mxu0 %v34316_v46  ;;  %v34398_v4 = vld [vmem:[%s35902_s30 + $0x25b8] sm:$0xff] }
 0x4a1   : > { %21638 = vmatpush.bf16.msrb.mxu1 %v34324_v47 }
 0x4a2   : > { %21651 = vmatpush.bf16.msrb.mxu2 %v34332_v48  ;;  %v34370_v48 = vld [vmem:[%s35902_s30 + $0x24d8] sm:$0xff] }
 0x4a3   : > { %21664 = vmatpush.bf16.msrb.mxu3 %v34340_v49 }
 0x4a4   : > { %21626 = vmatpush.bf16.msrb.mxu0 %v34315_v52  ;;  %v21400_v13 = vpop.f32.mrf.mxu2  ;;  %v34345_v52 = vld [vmem:[%s35902_s30 + $0x2410] sm:$0xff] }
 0x4a5   : > { %21639 = vmatpush.bf16.msrb.mxu1 %v34323_v54  ;;  %v21413_v18 = vpop.f32.mrf.mxu3  ;;  %v34353_v54 = vld [vmem:[%s35902_s30 + $0x2450] sm:$0xff] }
 0x4a6   : > { %21652 = vmatpush.bf16.msrb.mxu2 %v34331_v55  ;;  %v34361_v55 = vld [vmem:[%s35902_s30 + $0x2490] sm:$0xff]  ;;  %v34404_v18 = vld [vmem:[%s35902_s30 + $0x25e8] sm:$0xff] }
 0x4a7   : > { %21665 = vmatpush.bf16.msrb.mxu3 %v34339_v57  ;;  %v34344_v57 = vld [vmem:[%s35902_s30 + $0x2408] sm:$0xff]  ;;  %v34397_v13 = vld [vmem:[%s35902_s30 + $0x25b0] sm:$0xff] }
 0x4a8   : > { %21627 = vmatpush.bf16.msrb.mxu0 %v34314_v58  ;;  %v34352_v58 = vld [vmem:[%s35902_s30 + $0x2448] sm:$0xff] }
 0x4a9   : > { %21640 = vmatpush.bf16.msrb.mxu1 %v34322_v59  ;;  %v34360_v59 = vld [vmem:[%s35902_s30 + $0x2488] sm:$0xff] }
 0x4aa   : > { %21653 = vmatpush.bf16.msrb.mxu2 %v34330_v60 }
 0x4ab   : > { %21666 = vmatpush.bf16.msrb.mxu3 %v34338_v63  ;;  %v34343_v63 = vld [vmem:[%s35902_s30 + $0x2400] sm:$0xff] }
 0x4ac   : > { %21628 = vmatpush.bf16.msrb.mxu0 %v34313_v3  ;;  %v34390_v3 = vld [vmem:[%s35902_s30 + $0x2578] sm:$0xff] }
 0x4ad   : > { %21641 = vmatpush.bf16.msrb.mxu1 %v34321_v5  ;;  %v34367_v5 = vld [vmem:[%s35902_s30 + $0x24c0] sm:$0xff] }
 0x4ae   : > { %21654 = vmatpush.bf16.msrb.mxu2 %v34329_v6  ;;  %v5211_v6 = vld [vmem:[#allocation1] sm:$0xff] }
 0x4af   : > { %21667 = vmatpush.bf16.msrb.mxu3 %v34337_v7  ;;  %v5213_v7 = vld [vmem:[#allocation1 + $0x12] sm:$0xff] }
 0x4b0   : > { %21629 = vmatpush.bf16.msrb.mxu0 %v34312_v8  ;;  %v34406_v8 = vld [vmem:[%s35902_s30 + $0x25f8] sm:$0xff] }
 0x4b1   : > { %21642 = vmatpush.bf16.msrb.mxu1 %v34320_v9  ;;  %v5212_v9 = vld [vmem:[#allocation1 + $0x9] sm:$0xff] }
 0x4b2   : > { %21655 = vmatpush.bf16.msrb.mxu2 %v34328_v10  ;;  %v34381_v10 = vld [vmem:[%s35902_s30 + $0x2530] sm:$0xff] }
 0x4b3   : > { %21668 = vmatpush.bf16.msrb.mxu3 %v34336_v17  ;;  %v34396_v17 = vld [vmem:[%s35902_s30 + $0x25a8] sm:$0xff] }
 0x4b4   : > { %21630 = vmatpush.bf16.msrb.mxu0 %v34311_v19  ;;  %v21424_v35 = vpop.f32.mrf.mxu0 }
 0x4b5   : > { %21643 = vmatpush.bf16.msrb.mxu1 %v34319_v20  ;;  %v21425_v36 = vadd.f32 %v21424_v35, %v37117_v2  ;;  %v21437_v38 = vpop.f32.mrf.mxu1  ;;  %v34382_v2 = vld [vmem:[%s35902_s30 + $0x2538] sm:$0xff] }
 0x4b6   : > { %21656 = vmatpush.bf16.msrb.mxu2 %v34327_v21  ;;  %v34379_v21 = vld [vmem:[%s35902_s30 + $0x2520] sm:$0xff] }
 0x4b7   : > { %21669 = vmatpush.bf16.msrb.mxu3 %v34335_v25  ;;  %21631 = vmatmul.bf16.vlgmr.msrb.gmra.mxu0 %v5205_v11  ;;  %v21438_v41 = vadd.f32 %v21437_v38, %v21425_v36  ;;  %v5214_v11 = vld [vmem:[#allocation1 + $0x1b] sm:$0xff] }
 0x4b8   : > { %21675 = vmatpush.bf16.msra.mxu0 %v34350_v22  ;;  %21644 = vmatmul.bf16.vlgmr.msrb.gmra.mxu1 %v5206_v14  ;;  %v34405_v14 = vld [vmem:[%s35902_s30 + $0x25f0] sm:$0xff] }
 0x4b9   : > { %21688 = vmatpush.bf16.msra.mxu1 %v34358_v23  ;;  %21657 = vmatmul.bf16.vlgmr.msrb.gmra.mxu2 %v5207_v12  ;;  %v34389_v12 = vld [vmem:[%s35902_s30 + $0x2570] sm:$0xff]  ;;  %v34387_v23 = vld [vmem:[%s35902_s30 + $0x2560] sm:$0xff] }
 0x4ba   : > { %21701 = vmatpush.bf16.msra.mxu2 %v34366_v24  ;;  %21670 = vmatmul.bf16.vlgmr.msrb.gmra.mxu3 %v5208_v15  ;;  %v34380_v15 = vld [vmem:[%s35902_s30 + $0x2528] sm:$0xff]  ;;  %v34395_v24 = vld [vmem:[%s35902_s30 + $0x25a0] sm:$0xff]  ;;  %v34377_v36 = vld [vmem:[%s35902_s30 + $0x2510] sm:$0xff] }
 0x4bb   : > { %21714 = vmatpush.bf16.msra.mxu3 %v34374_v26  ;;  %v34403_v26 = vld [vmem:[%s35902_s30 + $0x25e0] sm:$0xff]  ;;  %v34385_v38 = vld [vmem:[%s35902_s30 + $0x2550] sm:$0xff] }
 0x4bc   : > { %21676 = vmatpush.bf16.msra.mxu0 %v34349_v27  ;;  %v21450_v46 = vpop.f32.mrf.mxu2  ;;  %v21426_v50 = vpop.f32.mrf.mxu0  ;;  %v34378_v27 = vld [vmem:[%s35902_s30 + $0x2518] sm:$0xff] }
 0x4bd   : > { %21689 = vmatpush.bf16.msra.mxu1 %v34357_v28  ;;  %v21451_v47 = vadd.f32 %v21450_v46, %v21438_v41  ;;  %v21463_v49 = vpop.f32.mrf.mxu3  ;;  %v21439_v53 = vpop.f32.mrf.mxu1  ;;  %v34386_v28 = vld [vmem:[%s35902_s30 + $0x2558] sm:$0xff]  ;;  %v34376_v41 = vld [vmem:[%s35902_s30 + $0x2508] sm:$0xff] }
 0x4be   : > { %21702 = vmatpush.bf16.msra.mxu2 %v34365_v29  ;;  %v34394_v29 = vld [vmem:[%s35902_s30 + $0x2598] sm:$0xff]  ;;  %v34400_v50 = vld [vmem:[%s35902_s30 + $0x25c8] sm:$0xff]  ;;  %v34383_v53 = vld [vmem:[%s35902_s30 + $0x2540] sm:$0xff] }
 0x4bf   : > { %21715 = vmatpush.bf16.msra.mxu3 %v34373_v30  ;;  %v21464_v51 = vadd.f32 %v21463_v49, %v21451_v47  ;;  %v5216_v47 = vld [vmem:[#allocation1 + $0x2d] sm:$0xff]  ;;  %v307_v49 = vld [vmem:[%s35916_s27 + $0x98] sm:$0xff] }
 0x4c0   : > { %21677 = vmatpush.bf16.msra.mxu0 %v34348_v31 }
 0x4c1   : > { %21690 = vmatpush.bf16.msra.mxu1 %v34356_v32  ;;  %v34402_v32 = vld [vmem:[%s35902_s30 + $0x25d8] sm:$0xff] }
 0x4c2   : > { %21703 = vmatpush.bf16.msra.mxu2 %v34364_v33 }
 0x4c3   : > { %21716 = vmatpush.bf16.msra.mxu3 %v34372_v34 }
 0x4c4   : > { %21678 = vmatpush.bf16.msra.mxu0 %v34347_v37  ;;  %v21452_v60 = vpop.f32.mrf.mxu2 }
 0x4c5   : > { %21691 = vmatpush.bf16.msra.mxu1 %v34355_v39  ;;  %v21465_v62 = vpop.f32.mrf.mxu3  ;;  %v34393_v39 = vld [vmem:[%s35902_s30 + $0x2590] sm:$0xff] }
 0x4c6   : > { %21704 = vmatpush.bf16.msra.mxu2 %v34363_v40  ;;  %v34401_v40 = vld [vmem:[%s35902_s30 + $0x25d0] sm:$0xff] }
 0x4c7   : > { %21717 = vmatpush.bf16.msra.mxu3 %v34371_v42  ;;  %v34384_v42 = vld [vmem:[%s35902_s30 + $0x2548] sm:$0xff]  ;;  %v34413_v60 = vld [vmem:[%s35902_s30 + $0x2630] sm:$0xff] }
 0x4c8   : > { %21679 = vmatpush.bf16.msra.mxu0 %v34346_v43  ;;  %v34392_v43 = vld [vmem:[%s35902_s30 + $0x2588] sm:$0xff]  ;;  %v34429_v62 = vld [vmem:[%s35902_s30 + $0x26b0] sm:$0xff] }
 0x4c9   : > { %21692 = vmatpush.bf16.msra.mxu1 %v34354_v44  ;;  %v5215_v44 = vld [vmem:[#allocation1 + $0x24] sm:$0xff] }
 0x4ca   : > { %21705 = vmatpush.bf16.msra.mxu2 %v34362_v45  ;;  %v5217_v45 = vld [vmem:[#allocation1 + $0x36] sm:$0xff] }
 0x4cb   : > { %21718 = vmatpush.bf16.msra.mxu3 %v34370_v48  ;;  %v5218_v48 = vld [vmem:[#allocation1 + $0x3f] sm:$0xff] }
 0x4cc   : > { %21680 = vmatpush.bf16.msra.mxu0 %v34345_v52  ;;  %5220 = vst [vmem:[#allocation1] ss:$9 sm:$0xff] %v307_v49  ;;  %v34375_v52 = vld [vmem:[%s35902_s30 + $0x2500] sm:$0xff]  ;;  %v34452_v49 = vld [vmem:[%s35902_s30 + $0x2768] sm:$0xff] }
 0x4cd   : > { %21693 = vmatpush.bf16.msra.mxu1 %v34353_v54  ;;  %v34391_v54 = vld [vmem:[%s35902_s30 + $0x2580] sm:$0xff] }
 0x4ce   : > { %21706 = vmatpush.bf16.msra.mxu2 %v34361_v55  ;;  %v34414_v55 = vld [vmem:[%s35902_s30 + $0x2638] sm:$0xff] }
 0x4cf   : > { %21719 = vmatpush.bf16.msra.mxu3 %v34369_v56  ;;  %v34422_v56 = vld [vmem:[%s35902_s30 + $0x2678] sm:$0xff] }
 0x4d0   : > { %21681 = vmatpush.bf16.msra.mxu0 %v34344_v57  ;;  %v34430_v57 = vld [vmem:[%s35902_s30 + $0x26b8] sm:$0xff] }
 0x4d1   : > { %21694 = vmatpush.bf16.msra.mxu1 %v34352_v58  ;;  %v34399_v58 = vld [vmem:[%s35902_s30 + $0x25c0] sm:$0xff] }
 0x4d2   : > { %21707 = vmatpush.bf16.msra.mxu2 %v34360_v59  ;;  %v34438_v59 = vld [vmem:[%s35902_s30 + $0x26f8] sm:$0xff] }
 0x4d3   : > { %21720 = vmatpush.bf16.msra.mxu3 %v34368_v61  ;;  %v34421_v61 = vld [vmem:[%s35902_s30 + $0x2670] sm:$0xff] }
 0x4d4   : > { %21682 = vmatpush.bf16.msra.mxu0 %v34343_v63  ;;  %v21476_v19 = vpop.f32.mrf.mxu0  ;;  %v34437_v63 = vld [vmem:[%s35902_s30 + $0x26f0] sm:$0xff] }
 0x4d5   : > { %21695 = vmatpush.bf16.msra.mxu1 %v34351_v0  ;;  %v21477_v20 = vadd.f32 %v21476_v19, %v21464_v51  ;;  %v21489_v22 = vpop.f32.mrf.mxu1  ;;  %v34412_v0 = vld [vmem:[%s35902_s30 + $0x2628] sm:$0xff] }
 0x4d6   : > { %21708 = vmatpush.bf16.msra.mxu2 %v34359_v1  ;;  %v34420_v1 = vld [vmem:[%s35902_s30 + $0x2668] sm:$0xff] }
 0x4d7   : > { %21721 = vmatpush.bf16.msra.mxu3 %v34367_v5  ;;  %21683 = vmatmul.bf16.vlgmr.msra.gmra.mxu0 %v5211_v6  ;;  %v21490_v25 = vadd.f32 %v21489_v22, %v21477_v20  ;;  %v34411_v6 = vld [vmem:[%s35902_s30 + $0x2620] sm:$0xff] }
 0x4d8   : > { %21727 = vmatpush.bf16.msrb.mxu0 %v34382_v2  ;;  %21696 = vmatmul.bf16.vlgmr.msra.gmra.mxu1 %v5212_v9  ;;  %v34428_v2 = vld [vmem:[%s35902_s30 + $0x26a8] sm:$0xff]  ;;  %v34427_v9 = vld [vmem:[%s35902_s30 + $0x26a0] sm:$0xff] }
 0x4d9   : > { %21740 = vmatpush.bf16.msrb.mxu1 %v34390_v3  ;;  %21709 = vmatmul.bf16.vlgmr.msra.gmra.mxu2 %v5213_v7  ;;  %v34436_v3 = vld [vmem:[%s35902_s30 + $0x26e8] sm:$0xff] }
 0x4da   : > { %21753 = vmatpush.bf16.msrb.mxu2 %v34398_v4  ;;  %21722 = vmatmul.bf16.vlgmr.msra.gmra.mxu3 %v5214_v11  ;;  %v34435_v11 = vld [vmem:[%s35902_s30 + $0x26e0] sm:$0xff] }
 0x4db   : > { %21766 = vmatpush.bf16.msrb.mxu3 %v34406_v8  ;;  %v34419_v8 = vld [vmem:[%s35902_s30 + $0x2660] sm:$0xff] }
 0x4dc   : > { %21728 = vmatpush.bf16.msrb.mxu0 %v34381_v10  ;;  %v21502_v30 = vpop.f32.mrf.mxu2  ;;  %v21478_v34 = vpop.f32.mrf.mxu0 }
 0x4dd   : > { %21741 = vmatpush.bf16.msrb.mxu1 %v34389_v12  ;;  %v21503_v31 = vadd.f32 %v21502_v30, %v21490_v25  ;;  %v21515_v33 = vpop.f32.mrf.mxu3  ;;  %v21491_v37 = vpop.f32.mrf.mxu1  ;;  %v34410_v12 = vld [vmem:[%s35902_s30 + $0x2618] sm:$0xff]  ;;  %v34433_v25 = vld [vmem:[%s35902_s30 + $0x26d0] sm:$0xff]  ;;  %v34432_v30 = vld [vmem:[%s35902_s30 + $0x26c8] sm:$0xff] }
 0x4de   : > { %21754 = vmatpush.bf16.msrb.mxu2 %v34397_v13  ;;  %v34418_v13 = vld [vmem:[%s35902_s30 + $0x2658] sm:$0xff]  ;;  %v34423_v34 = vld [vmem:[%s35902_s30 + $0x2680] sm:$0xff] }
 0x4df   : > { %21767 = vmatpush.bf16.msrb.mxu3 %v34405_v14  ;;  %v37185_v35 = vadd.f32 %v21515_v33, %v21503_v31  ;;  %v34426_v14 = vld [vmem:[%s35902_s30 + $0x2698] sm:$0xff]  ;;  %v34415_v33 = vld [vmem:[%s35902_s30 + $0x2640] sm:$0xff] }
 0x4e0   : > { %21729 = vmatpush.bf16.msrb.mxu0 %v34380_v15  ;;  %v34462_v37 = vld [vmem:[%s35902_s30 + $0x27b8] sm:$0xff] }
 0x4e1   : > { %21742 = vmatpush.bf16.msrb.mxu1 %v34388_v16 }
 0x4e2   : > { %21755 = vmatpush.bf16.msrb.mxu2 %v34396_v17  ;;  %v34434_v17 = vld [vmem:[%s35902_s30 + $0x26d8] sm:$0xff] }
 0x4e3   : > { %21768 = vmatpush.bf16.msrb.mxu3 %v34404_v18 }
 0x4e4   : > { %21730 = vmatpush.bf16.msrb.mxu0 %v34379_v21  ;;  %v21504_v46 = vpop.f32.mrf.mxu2  ;;  %v34409_v21 = vld [vmem:[%s35902_s30 + $0x2610] sm:$0xff] }
 0x4e5   : > { %21743 = vmatpush.bf16.msrb.mxu1 %v34387_v23  ;;  %v21517_v51 = vpop.f32.mrf.mxu3  ;;  %v34417_v23 = vld [vmem:[%s35902_s30 + $0x2650] sm:$0xff] }
 0x4e6   : > { %21756 = vmatpush.bf16.msrb.mxu2 %v34395_v24  ;;  %v34425_v24 = vld [vmem:[%s35902_s30 + $0x2690] sm:$0xff]  ;;  %v34468_v51 = vld [vmem:[%s35902_s30 + $0x27e8] sm:$0xff] }
 0x4e7   : > { %21769 = vmatpush.bf16.msrb.mxu3 %v34403_v26  ;;  %v34408_v26 = vld [vmem:[%s35902_s30 + $0x2608] sm:$0xff]  ;;  %v34461_v46 = vld [vmem:[%s35902_s30 + $0x27b0] sm:$0xff] }
 0x4e8   : > { %21731 = vmatpush.bf16.msrb.mxu0 %v34378_v27  ;;  %v34416_v27 = vld [vmem:[%s35902_s30 + $0x2648] sm:$0xff] }
 0x4e9   : > { %21744 = vmatpush.bf16.msrb.mxu1 %v34386_v28  ;;  %v34424_v28 = vld [vmem:[%s35902_s30 + $0x2688] sm:$0xff] }
 0x4ea   : > { %21757 = vmatpush.bf16.msrb.mxu2 %v34394_v29 }
 0x4eb   : > { %21770 = vmatpush.bf16.msrb.mxu3 %v34402_v32  ;;  %v34407_v32 = vld [vmem:[%s35902_s30 + $0x2600] sm:$0xff] }
 0x4ec   : > { %21732 = vmatpush.bf16.msrb.mxu0 %v34377_v36  ;;  %v34454_v36 = vld [vmem:[%s35902_s30 + $0x2778] sm:$0xff] }
 0x4ed   : > { %21745 = vmatpush.bf16.msrb.mxu1 %v34385_v38  ;;  %v34431_v38 = vld [vmem:[%s35902_s30 + $0x26c0] sm:$0xff] }
 0x4ee   : > { %21758 = vmatpush.bf16.msrb.mxu2 %v34393_v39  ;;  %v5221_v39 = vld [vmem:[#allocation1] sm:$0xff] }
 0x4ef   : > { %21771 = vmatpush.bf16.msrb.mxu3 %v34401_v40  ;;  %v5223_v40 = vld [vmem:[#allocation1 + $0x12] sm:$0xff] }
 0x4f0   : > { %21733 = vmatpush.bf16.msrb.mxu0 %v34376_v41  ;;  %v34470_v41 = vld [vmem:[%s35902_s30 + $0x27f8] sm:$0xff] }
 0x4f1   : > { %21746 = vmatpush.bf16.msrb.mxu1 %v34384_v42  ;;  %v5222_v42 = vld [vmem:[#allocation1 + $0x9] sm:$0xff] }
 0x4f2   : > { %21759 = vmatpush.bf16.msrb.mxu2 %v34392_v43  ;;  %v34445_v43 = vld [vmem:[%s35902_s30 + $0x2730] sm:$0xff] }
 0x4f3   : > { %21772 = vmatpush.bf16.msrb.mxu3 %v34400_v50  ;;  %v34460_v50 = vld [vmem:[%s35902_s30 + $0x27a8] sm:$0xff] }
 0x4f4   : > { %21734 = vmatpush.bf16.msrb.mxu0 %v34375_v52  ;;  %v21528_v4 = vpop.f32.mrf.mxu0 }
 0x4f5   : > { %21747 = vmatpush.bf16.msrb.mxu1 %v34383_v53  ;;  %v21529_v5 = vadd.f32 %v21528_v4, %v37185_v35  ;;  %v21541_v7 = vpop.f32.mrf.mxu1  ;;  %v34446_v35 = vld [vmem:[%s35902_s30 + $0x2738] sm:$0xff] }
 0x4f6   : > { %21760 = vmatpush.bf16.msrb.mxu2 %v34391_v54  ;;  %v34443_v54 = vld [vmem:[%s35902_s30 + $0x2720] sm:$0xff] }
 0x4f7   : > { %21773 = vmatpush.bf16.msrb.mxu3 %v34399_v58  ;;  %21735 = vmatmul.bf16.vlgmr.msrb.gmra.mxu0 %v5215_v44  ;;  %v21542_v10 = vadd.f32 %v21541_v7, %v21529_v5  ;;  %v5224_v44 = vld [vmem:[#allocation1 + $0x1b] sm:$0xff] }
 0x4f8   : > { %21779 = vmatpush.bf16.msra.mxu0 %v34414_v55  ;;  %21748 = vmatmul.bf16.vlgmr.msrb.gmra.mxu1 %v5216_v47  ;;  %v34469_v47 = vld [vmem:[%s35902_s30 + $0x27f0] sm:$0xff] }
 0x4f9   : > { %21792 = vmatpush.bf16.msra.mxu1 %v34422_v56  ;;  %21761 = vmatmul.bf16.vlgmr.msrb.gmra.mxu2 %v5217_v45  ;;  %v34453_v45 = vld [vmem:[%s35902_s30 + $0x2770] sm:$0xff]  ;;  %v34451_v56 = vld [vmem:[%s35902_s30 + $0x2760] sm:$0xff] }
 0x4fa   : > { %21805 = vmatpush.bf16.msra.mxu2 %v34430_v57  ;;  %21774 = vmatmul.bf16.vlgmr.msrb.gmra.mxu3 %v5218_v48  ;;  %v34444_v48 = vld [vmem:[%s35902_s30 + $0x2728] sm:$0xff]  ;;  %v34459_v57 = vld [vmem:[%s35902_s30 + $0x27a0] sm:$0xff]  ;;  %v34441_v5 = vld [vmem:[%s35902_s30 + $0x2710] sm:$0xff] }
 0x4fb   : > { %21818 = vmatpush.bf16.msra.mxu3 %v34438_v59  ;;  %v34467_v59 = vld [vmem:[%s35902_s30 + $0x27e0] sm:$0xff]  ;;  %v34449_v7 = vld [vmem:[%s35902_s30 + $0x2750] sm:$0xff] }
 0x4fc   : > { %21780 = vmatpush.bf16.msra.mxu0 %v34413_v60  ;;  %v21554_v15 = vpop.f32.mrf.mxu2  ;;  %v21530_v19 = vpop.f32.mrf.mxu0  ;;  %v34442_v60 = vld [vmem:[%s35902_s30 + $0x2718] sm:$0xff] }
 0x4fd   : > { %21793 = vmatpush.bf16.msra.mxu1 %v34421_v61  ;;  %v21555_v16 = vadd.f32 %v21554_v15, %v21542_v10  ;;  %v21567_v18 = vpop.f32.mrf.mxu3  ;;  %v21543_v22 = vpop.f32.mrf.mxu1  ;;  %v34450_v61 = vld [vmem:[%s35902_s30 + $0x2758] sm:$0xff]  ;;  %v34440_v10 = vld [vmem:[%s35902_s30 + $0x2708] sm:$0xff] }
 0x4fe   : > { %21806 = vmatpush.bf16.msra.mxu2 %v34429_v62  ;;  %v34458_v62 = vld [vmem:[%s35902_s30 + $0x2798] sm:$0xff]  ;;  %v34464_v19 = vld [vmem:[%s35902_s30 + $0x27c8] sm:$0xff]  ;;  %v34447_v22 = vld [vmem:[%s35902_s30 + $0x2740] sm:$0xff] }
 0x4ff   : > { %21819 = vmatpush.bf16.msra.mxu3 %v34437_v63  ;;  %v21568_v20 = vadd.f32 %v21567_v18, %v21555_v16  ;;  %v5226_v16 = vld [vmem:[#allocation1 + $0x2d] sm:$0xff]  ;;  %v308_v18 = vld [vmem:[%s35916_s27 + $0xa0] sm:$0xff] }
 0x500   : > { %21781 = vmatpush.bf16.msra.mxu0 %v34412_v0 }
 0x501   : > { %21794 = vmatpush.bf16.msra.mxu1 %v34420_v1  ;;  %v34466_v1 = vld [vmem:[%s35902_s30 + $0x27d8] sm:$0xff] }
 0x502   : > { %21807 = vmatpush.bf16.msra.mxu2 %v34428_v2 }
 0x503   : > { %21820 = vmatpush.bf16.msra.mxu3 %v34436_v3 }
 0x504   : > { %21782 = vmatpush.bf16.msra.mxu0 %v34411_v6  ;;  %v21556_v29 = vpop.f32.mrf.mxu2 }
 0x505   : > { %21795 = vmatpush.bf16.msra.mxu1 %v34419_v8  ;;  %v21569_v31 = vpop.f32.mrf.mxu3  ;;  %v34457_v8 = vld [vmem:[%s35902_s30 + $0x2790] sm:$0xff] }
 0x506   : > { %21808 = vmatpush.bf16.msra.mxu2 %v34427_v9  ;;  %v34465_v9 = vld [vmem:[%s35902_s30 + $0x27d0] sm:$0xff] }
 0x507   : > { %21821 = vmatpush.bf16.msra.mxu3 %v34435_v11  ;;  %v34448_v11 = vld [vmem:[%s35902_s30 + $0x2748] sm:$0xff]  ;;  %v34477_v29 = vld [vmem:[%s35902_s30 + $0x2830] sm:$0xff] }
 0x508   : > { %21783 = vmatpush.bf16.msra.mxu0 %v34410_v12  ;;  %v34456_v12 = vld [vmem:[%s35902_s30 + $0x2788] sm:$0xff]  ;;  %v34493_v31 = vld [vmem:[%s35902_s30 + $0x28b0] sm:$0xff] }
 0x509   : > { %21796 = vmatpush.bf16.msra.mxu1 %v34418_v13  ;;  %v5225_v13 = vld [vmem:[#allocation1 + $0x24] sm:$0xff] }
 0x50a   : > { %21809 = vmatpush.bf16.msra.mxu2 %v34426_v14  ;;  %v5227_v14 = vld [vmem:[#allocation1 + $0x36] sm:$0xff] }
 0x50b   : > { %21822 = vmatpush.bf16.msra.mxu3 %v34434_v17  ;;  %v5228_v17 = vld [vmem:[#allocation1 + $0x3f] sm:$0xff] }
 0x50c   : > { %21784 = vmatpush.bf16.msra.mxu0 %v34409_v21  ;;  %5230 = vst [vmem:[#allocation1] ss:$9 sm:$0xff] %v308_v18  ;;  %v34439_v21 = vld [vmem:[%s35902_s30 + $0x2700] sm:$0xff]  ;;  %v34516_v18 = vld [vmem:[%s35902_s30 + $0x2968] sm:$0xff] }
 0x50d   : > { %21797 = vmatpush.bf16.msra.mxu1 %v34417_v23  ;;  %v34455_v23 = vld [vmem:[%s35902_s30 + $0x2780] sm:$0xff] }
 0x50e   : > { %21810 = vmatpush.bf16.msra.mxu2 %v34425_v24  ;;  %v34478_v24 = vld [vmem:[%s35902_s30 + $0x2838] sm:$0xff] }
 0x50f   : > { %21823 = vmatpush.bf16.msra.mxu3 %v34433_v25  ;;  %v34486_v25 = vld [vmem:[%s35902_s30 + $0x2878] sm:$0xff] }
 0x510   : > { %21785 = vmatpush.bf16.msra.mxu0 %v34408_v26  ;;  %v34494_v26 = vld [vmem:[%s35902_s30 + $0x28b8] sm:$0xff] }
 0x511   : > { %21798 = vmatpush.bf16.msra.mxu1 %v34416_v27  ;;  %v34463_v27 = vld [vmem:[%s35902_s30 + $0x27c0] sm:$0xff] }
 0x512   : > { %21811 = vmatpush.bf16.msra.mxu2 %v34424_v28  ;;  %v34502_v28 = vld [vmem:[%s35902_s30 + $0x28f8] sm:$0xff] }
 0x513   : > { %21824 = vmatpush.bf16.msra.mxu3 %v34432_v30  ;;  %v34485_v30 = vld [vmem:[%s35902_s30 + $0x2870] sm:$0xff] }
 0x514   : > { %21786 = vmatpush.bf16.msra.mxu0 %v34407_v32  ;;  %v21580_v52 = vpop.f32.mrf.mxu0  ;;  %v34501_v32 = vld [vmem:[%s35902_s30 + $0x28f0] sm:$0xff] }
 0x515   : > { %21799 = vmatpush.bf16.msra.mxu1 %v34415_v33  ;;  %v21581_v53 = vadd.f32 %v21580_v52, %v21568_v20  ;;  %v21593_v55 = vpop.f32.mrf.mxu1  ;;  %v34476_v33 = vld [vmem:[%s35902_s30 + $0x2828] sm:$0xff] }
 0x516   : > { %21812 = vmatpush.bf16.msra.mxu2 %v34423_v34  ;;  %v34484_v34 = vld [vmem:[%s35902_s30 + $0x2868] sm:$0xff] }
 0x517   : > { %21825 = vmatpush.bf16.msra.mxu3 %v34431_v38  ;;  %21787 = vmatmul.bf16.vlgmr.msra.gmra.mxu0 %v5221_v39  ;;  %v21594_v58 = vadd.f32 %v21593_v55, %v21581_v53  ;;  %v34475_v39 = vld [vmem:[%s35902_s30 + $0x2820] sm:$0xff] }
 0x518   : > { %21831 = vmatpush.bf16.msrb.mxu0 %v34446_v35  ;;  %21800 = vmatmul.bf16.vlgmr.msra.gmra.mxu1 %v5222_v42  ;;  %v34492_v35 = vld [vmem:[%s35902_s30 + $0x28a8] sm:$0xff]  ;;  %v34491_v42 = vld [vmem:[%s35902_s30 + $0x28a0] sm:$0xff] }
 0x519   : > { %21844 = vmatpush.bf16.msrb.mxu1 %v34454_v36  ;;  %21813 = vmatmul.bf16.vlgmr.msra.gmra.mxu2 %v5223_v40  ;;  %v34500_v36 = vld [vmem:[%s35902_s30 + $0x28e8] sm:$0xff] }
 0x51a   : > { %21857 = vmatpush.bf16.msrb.mxu2 %v34462_v37  ;;  %21826 = vmatmul.bf16.vlgmr.msra.gmra.mxu3 %v5224_v44  ;;  %v34499_v44 = vld [vmem:[%s35902_s30 + $0x28e0] sm:$0xff] }
 0x51b   : > { %21870 = vmatpush.bf16.msrb.mxu3 %v34470_v41  ;;  %v34483_v41 = vld [vmem:[%s35902_s30 + $0x2860] sm:$0xff] }
 0x51c   : > { %21832 = vmatpush.bf16.msrb.mxu0 %v34445_v43  ;;  %v21606_v63 = vpop.f32.mrf.mxu2  ;;  %v21582_v3 = vpop.f32.mrf.mxu0 }
 0x51d   : > { %21845 = vmatpush.bf16.msrb.mxu1 %v34453_v45  ;;  %v21607_v0 = vadd.f32 %v21606_v63, %v21594_v58  ;;  %v21619_v2 = vpop.f32.mrf.mxu3  ;;  %v21595_v6 = vpop.f32.mrf.mxu1  ;;  %v34474_v45 = vld [vmem:[%s35902_s30 + $0x2818] sm:$0xff]  ;;  %v34497_v58 = vld [vmem:[%s35902_s30 + $0x28d0] sm:$0xff]  ;;  %v34496_v63 = vld [vmem:[%s35902_s30 + $0x28c8] sm:$0xff] }
 0x51e   : > { %21858 = vmatpush.bf16.msrb.mxu2 %v34461_v46  ;;  %v34482_v46 = vld [vmem:[%s35902_s30 + $0x2858] sm:$0xff]  ;;  %v34487_v3 = vld [vmem:[%s35902_s30 + $0x2880] sm:$0xff] }
 0x51f   : > { %21871 = vmatpush.bf16.msrb.mxu3 %v34469_v47  ;;  %v37253_v4 = vadd.f32 %v21619_v2, %v21607_v0  ;;  %v34490_v47 = vld [vmem:[%s35902_s30 + $0x2898] sm:$0xff]  ;;  %v34479_v2 = vld [vmem:[%s35902_s30 + $0x2840] sm:$0xff] }
 0x520   : > { %21833 = vmatpush.bf16.msrb.mxu0 %v34444_v48  ;;  %v34526_v6 = vld [vmem:[%s35902_s30 + $0x29b8] sm:$0xff] }
 0x521   : > { %21846 = vmatpush.bf16.msrb.mxu1 %v34452_v49 }
 0x522   : > { %21859 = vmatpush.bf16.msrb.mxu2 %v34460_v50  ;;  %v34498_v50 = vld [vmem:[%s35902_s30 + $0x28d8] sm:$0xff] }
 0x523   : > { %21872 = vmatpush.bf16.msrb.mxu3 %v34468_v51 }
 0x524   : > { %21834 = vmatpush.bf16.msrb.mxu0 %v34443_v54  ;;  %v21608_v15 = vpop.f32.mrf.mxu2  ;;  %v34473_v54 = vld [vmem:[%s35902_s30 + $0x2810] sm:$0xff] }
 0x525   : > { %21847 = vmatpush.bf16.msrb.mxu1 %v34451_v56  ;;  %v21621_v20 = vpop.f32.mrf.mxu3  ;;  %v34481_v56 = vld [vmem:[%s35902_s30 + $0x2850] sm:$0xff] }
 0x526   : > { %21860 = vmatpush.bf16.msrb.mxu2 %v34459_v57  ;;  %v34489_v57 = vld [vmem:[%s35902_s30 + $0x2890] sm:$0xff]  ;;  %v34532_v20 = vld [vmem:[%s35902_s30 + $0x29e8] sm:$0xff] }
 0x527   : > { %21873 = vmatpush.bf16.msrb.mxu3 %v34467_v59  ;;  %v34472_v59 = vld [vmem:[%s35902_s30 + $0x2808] sm:$0xff]  ;;  %v34525_v15 = vld [vmem:[%s35902_s30 + $0x29b0] sm:$0xff] }
 0x528   : > { %21835 = vmatpush.bf16.msrb.mxu0 %v34442_v60  ;;  %v34480_v60 = vld [vmem:[%s35902_s30 + $0x2848] sm:$0xff] }
 0x529   : > { %21848 = vmatpush.bf16.msrb.mxu1 %v34450_v61  ;;  %v34488_v61 = vld [vmem:[%s35902_s30 + $0x2888] sm:$0xff] }
 0x52a   : > { %21861 = vmatpush.bf16.msrb.mxu2 %v34458_v62 }
 0x52b   : > { %21874 = vmatpush.bf16.msrb.mxu3 %v34466_v1  ;;  %v34471_v1 = vld [vmem:[%s35902_s30 + $0x2800] sm:$0xff] }
 0x52c   : > { %21836 = vmatpush.bf16.msrb.mxu0 %v34441_v5  ;;  %v34518_v5 = vld [vmem:[%s35902_s30 + $0x2978] sm:$0xff] }
 0x52d   : > { %21849 = vmatpush.bf16.msrb.mxu1 %v34449_v7  ;;  %v34495_v7 = vld [vmem:[%s35902_s30 + $0x28c0] sm:$0xff] }
 0x52e   : > { %21862 = vmatpush.bf16.msrb.mxu2 %v34457_v8  ;;  %v5231_v8 = vld [vmem:[#allocation1] sm:$0xff] }
 0x52f   : > { %21875 = vmatpush.bf16.msrb.mxu3 %v34465_v9  ;;  %v5233_v9 = vld [vmem:[#allocation1 + $0x12] sm:$0xff] }
 0x530   : > { %21837 = vmatpush.bf16.msrb.mxu0 %v34440_v10  ;;  %v34534_v10 = vld [vmem:[%s35902_s30 + $0x29f8] sm:$0xff] }
 0x531   : > { %21850 = vmatpush.bf16.msrb.mxu1 %v34448_v11  ;;  %v5232_v11 = vld [vmem:[#allocation1 + $0x9] sm:$0xff] }
 0x532   : > { %21863 = vmatpush.bf16.msrb.mxu2 %v34456_v12  ;;  %v34509_v12 = vld [vmem:[%s35902_s30 + $0x2930] sm:$0xff] }
 0x533   : > { %21876 = vmatpush.bf16.msrb.mxu3 %v34464_v19  ;;  %v34524_v19 = vld [vmem:[%s35902_s30 + $0x29a8] sm:$0xff] }
 0x534   : > { %21838 = vmatpush.bf16.msrb.mxu0 %v34439_v21  ;;  %v21632_v37 = vpop.f32.mrf.mxu0 }
 0x535   : > { %21851 = vmatpush.bf16.msrb.mxu1 %v34447_v22  ;;  %v21633_v38 = vadd.f32 %v21632_v37, %v37253_v4  ;;  %v21645_v40 = vpop.f32.mrf.mxu1  ;;  %v34510_v4 = vld [vmem:[%s35902_s30 + $0x2938] sm:$0xff] }
 0x536   : > { %21864 = vmatpush.bf16.msrb.mxu2 %v34455_v23  ;;  %v34507_v23 = vld [vmem:[%s35902_s30 + $0x2920] sm:$0xff] }
 0x537   : > { %21877 = vmatpush.bf16.msrb.mxu3 %v34463_v27  ;;  %21839 = vmatmul.bf16.vlgmr.msrb.gmra.mxu0 %v5225_v13  ;;  %v21646_v43 = vadd.f32 %v21645_v40, %v21633_v38  ;;  %v5234_v13 = vld [vmem:[#allocation1 + $0x1b] sm:$0xff] }
 0x538   : > { %21883 = vmatpush.bf16.msra.mxu0 %v34478_v24  ;;  %21852 = vmatmul.bf16.vlgmr.msrb.gmra.mxu1 %v5226_v16  ;;  %v34533_v16 = vld [vmem:[%s35902_s30 + $0x29f0] sm:$0xff] }
 0x539   : > { %21896 = vmatpush.bf16.msra.mxu1 %v34486_v25  ;;  %21865 = vmatmul.bf16.vlgmr.msrb.gmra.mxu2 %v5227_v14  ;;  %v34517_v14 = vld [vmem:[%s35902_s30 + $0x2970] sm:$0xff]  ;;  %v34515_v25 = vld [vmem:[%s35902_s30 + $0x2960] sm:$0xff] }
 0x53a   : > { %21909 = vmatpush.bf16.msra.mxu2 %v34494_v26  ;;  %21878 = vmatmul.bf16.vlgmr.msrb.gmra.mxu3 %v5228_v17  ;;  %v34508_v17 = vld [vmem:[%s35902_s30 + $0x2928] sm:$0xff]  ;;  %v34523_v26 = vld [vmem:[%s35902_s30 + $0x29a0] sm:$0xff]  ;;  %v34505_v38 = vld [vmem:[%s35902_s30 + $0x2910] sm:$0xff] }
 0x53b   : > { %21922 = vmatpush.bf16.msra.mxu3 %v34502_v28  ;;  %v34531_v28 = vld [vmem:[%s35902_s30 + $0x29e0] sm:$0xff]  ;;  %v34513_v40 = vld [vmem:[%s35902_s30 + $0x2950] sm:$0xff] }
 0x53c   : > { %21884 = vmatpush.bf16.msra.mxu0 %v34477_v29  ;;  %v21658_v48 = vpop.f32.mrf.mxu2  ;;  %v21634_v52 = vpop.f32.mrf.mxu0  ;;  %v34506_v29 = vld [vmem:[%s35902_s30 + $0x2918] sm:$0xff] }
 0x53d   : > { %21897 = vmatpush.bf16.msra.mxu1 %v34485_v30  ;;  %v21659_v49 = vadd.f32 %v21658_v48, %v21646_v43  ;;  %v21671_v51 = vpop.f32.mrf.mxu3  ;;  %v21647_v55 = vpop.f32.mrf.mxu1  ;;  %v34514_v30 = vld [vmem:[%s35902_s30 + $0x2958] sm:$0xff]  ;;  %v34504_v43 = vld [vmem:[%s35902_s30 + $0x2908] sm:$0xff] }
 0x53e   : > { %21910 = vmatpush.bf16.msra.mxu2 %v34493_v31  ;;  %v34522_v31 = vld [vmem:[%s35902_s30 + $0x2998] sm:$0xff]  ;;  %v34528_v52 = vld [vmem:[%s35902_s30 + $0x29c8] sm:$0xff]  ;;  %v34511_v55 = vld [vmem:[%s35902_s30 + $0x2940] sm:$0xff] }
 0x53f   : > { %21923 = vmatpush.bf16.msra.mxu3 %v34501_v32  ;;  %v21672_v53 = vadd.f32 %v21671_v51, %v21659_v49  ;;  %v5236_v49 = vld [vmem:[#allocation1 + $0x2d] sm:$0xff] }
 0x540   : > { %21885 = vmatpush.bf16.msra.mxu0 %v34476_v33  ;;  %v309_v51 = vld [vmem:[%s35916_s27 + $0xa8] sm:$0xff] }
 0x541   : > { %21898 = vmatpush.bf16.msra.mxu1 %v34484_v34  ;;  %v34530_v34 = vld [vmem:[%s35902_s30 + $0x29d8] sm:$0xff] }
 0x542   : > { %21911 = vmatpush.bf16.msra.mxu2 %v34492_v35 }
 0x543   : > { %21924 = vmatpush.bf16.msra.mxu3 %v34500_v36 }
 0x544   : > { %21886 = vmatpush.bf16.msra.mxu0 %v34475_v39  ;;  %v21660_v62 = vpop.f32.mrf.mxu2 }
 0x545   : > { %21899 = vmatpush.bf16.msra.mxu1 %v34483_v41  ;;  %v21673_v0 = vpop.f32.mrf.mxu3  ;;  %v34521_v41 = vld [vmem:[%s35902_s30 + $0x2990] sm:$0xff] }
 0x546   : > { %21912 = vmatpush.bf16.msra.mxu2 %v34491_v42  ;;  %v34529_v42 = vld [vmem:[%s35902_s30 + $0x29d0] sm:$0xff] }
 0x547   : > { %21925 = vmatpush.bf16.msra.mxu3 %v34499_v44  ;;  %v34512_v44 = vld [vmem:[%s35902_s30 + $0x2948] sm:$0xff]  ;;  %v34541_v62 = vld [vmem:[%s35902_s30 + $0x2a30] sm:$0xff] }
 0x548   : > { %21887 = vmatpush.bf16.msra.mxu0 %v34474_v45  ;;  %v34520_v45 = vld [vmem:[%s35902_s30 + $0x2988] sm:$0xff]  ;;  %v34557_v0 = vld [vmem:[%s35902_s30 + $0x2ab0] sm:$0xff] }
 0x549   : > { %21900 = vmatpush.bf16.msra.mxu1 %v34482_v46  ;;  %v5235_v46 = vld [vmem:[#allocation1 + $0x24] sm:$0xff] }
 0x54a   : > { %21913 = vmatpush.bf16.msra.mxu2 %v34490_v47  ;;  %v5237_v47 = vld [vmem:[#allocation1 + $0x36] sm:$0xff] }
 0x54b   : > { %21926 = vmatpush.bf16.msra.mxu3 %v34498_v50  ;;  %v5238_v50 = vld [vmem:[#allocation1 + $0x3f] sm:$0xff] }
 0x54c   : > { %21888 = vmatpush.bf16.msra.mxu0 %v34473_v54  ;;  %5240 = vst [vmem:[#allocation1] ss:$9 sm:$0xff] %v309_v51  ;;  %v34503_v54 = vld [vmem:[%s35902_s30 + $0x2900] sm:$0xff]  ;;  %v34580_v51 = vld [vmem:[%s35902_s30 + $0x2b68] sm:$0xff] }
 0x54d   : > { %21901 = vmatpush.bf16.msra.mxu1 %v34481_v56  ;;  %v34519_v56 = vld [vmem:[%s35902_s30 + $0x2980] sm:$0xff] }
 0x54e   : > { %21914 = vmatpush.bf16.msra.mxu2 %v34489_v57  ;;  %v34542_v57 = vld [vmem:[%s35902_s30 + $0x2a38] sm:$0xff] }
 0x54f   : > { %21927 = vmatpush.bf16.msra.mxu3 %v34497_v58  ;;  %v34550_v58 = vld [vmem:[%s35902_s30 + $0x2a78] sm:$0xff] }
 0x550   : > { %21889 = vmatpush.bf16.msra.mxu0 %v34472_v59  ;;  %v34558_v59 = vld [vmem:[%s35902_s30 + $0x2ab8] sm:$0xff] }
 0x551   : > { %21902 = vmatpush.bf16.msra.mxu1 %v34480_v60  ;;  %v34527_v60 = vld [vmem:[%s35902_s30 + $0x29c0] sm:$0xff] }
 0x552   : > { %21915 = vmatpush.bf16.msra.mxu2 %v34488_v61  ;;  %v34566_v61 = vld [vmem:[%s35902_s30 + $0x2af8] sm:$0xff] }
 0x553   : > { %21928 = vmatpush.bf16.msra.mxu3 %v34496_v63  ;;  %v34549_v63 = vld [vmem:[%s35902_s30 + $0x2a70] sm:$0xff] }
 0x554   : > { %21890 = vmatpush.bf16.msra.mxu0 %v34471_v1  ;;  %v21684_v21 = vpop.f32.mrf.mxu0  ;;  %v34565_v1 = vld [vmem:[%s35902_s30 + $0x2af0] sm:$0xff] }
 0x555   : > { %21903 = vmatpush.bf16.msra.mxu1 %v34479_v2  ;;  %v21685_v22 = vadd.f32 %v21684_v21, %v21672_v53  ;;  %v21697_v24 = vpop.f32.mrf.mxu1  ;;  %v34540_v2 = vld [vmem:[%s35902_s30 + $0x2a28] sm:$0xff] }
 0x556   : > { %21916 = vmatpush.bf16.msra.mxu2 %v34487_v3  ;;  %v34548_v3 = vld [vmem:[%s35902_s30 + $0x2a68] sm:$0xff] }
 0x557   : > { %21929 = vmatpush.bf16.msra.mxu3 %v34495_v7  ;;  %21891 = vmatmul.bf16.vlgmr.msra.gmra.mxu0 %v5231_v8  ;;  %v21698_v27 = vadd.f32 %v21697_v24, %v21685_v22  ;;  %v34539_v8 = vld [vmem:[%s35902_s30 + $0x2a20] sm:$0xff] }
 0x558   : > { %21935 = vmatpush.bf16.msrb.mxu0 %v34510_v4  ;;  %21904 = vmatmul.bf16.vlgmr.msra.gmra.mxu1 %v5232_v11  ;;  %v34556_v4 = vld [vmem:[%s35902_s30 + $0x2aa8] sm:$0xff]  ;;  %v34555_v11 = vld [vmem:[%s35902_s30 + $0x2aa0] sm:$0xff] }
 0x559   : > { %21948 = vmatpush.bf16.msrb.mxu1 %v34518_v5  ;;  %21917 = vmatmul.bf16.vlgmr.msra.gmra.mxu2 %v5233_v9  ;;  %v34564_v5 = vld [vmem:[%s35902_s30 + $0x2ae8] sm:$0xff] }
 0x55a   : > { %21961 = vmatpush.bf16.msrb.mxu2 %v34526_v6  ;;  %21930 = vmatmul.bf16.vlgmr.msra.gmra.mxu3 %v5234_v13  ;;  %v34563_v13 = vld [vmem:[%s35902_s30 + $0x2ae0] sm:$0xff] }
 0x55b   : > { %21974 = vmatpush.bf16.msrb.mxu3 %v34534_v10  ;;  %v34547_v10 = vld [vmem:[%s35902_s30 + $0x2a60] sm:$0xff] }
 0x55c   : > { %21936 = vmatpush.bf16.msrb.mxu0 %v34509_v12  ;;  %v21710_v32 = vpop.f32.mrf.mxu2  ;;  %v21686_v36 = vpop.f32.mrf.mxu0 }
 0x55d   : > { %21949 = vmatpush.bf16.msrb.mxu1 %v34517_v14  ;;  %v21711_v33 = vadd.f32 %v21710_v32, %v21698_v27  ;;  %v21723_v35 = vpop.f32.mrf.mxu3  ;;  %v21699_v39 = vpop.f32.mrf.mxu1  ;;  %v34538_v14 = vld [vmem:[%s35902_s30 + $0x2a18] sm:$0xff]  ;;  %v34561_v27 = vld [vmem:[%s35902_s30 + $0x2ad0] sm:$0xff]  ;;  %v34560_v32 = vld [vmem:[%s35902_s30 + $0x2ac8] sm:$0xff] }
 0x55e   : > { %21962 = vmatpush.bf16.msrb.mxu2 %v34525_v15  ;;  %v34546_v15 = vld [vmem:[%s35902_s30 + $0x2a58] sm:$0xff]  ;;  %v34551_v36 = vld [vmem:[%s35902_s30 + $0x2a80] sm:$0xff] }
 0x55f   : > { %21975 = vmatpush.bf16.msrb.mxu3 %v34533_v16  ;;  %v37321_v37 = vadd.f32 %v21723_v35, %v21711_v33  ;;  %v34554_v16 = vld [vmem:[%s35902_s30 + $0x2a98] sm:$0xff]  ;;  %v34543_v35 = vld [vmem:[%s35902_s30 + $0x2a40] sm:$0xff] }
 0x560   : > { %21937 = vmatpush.bf16.msrb.mxu0 %v34508_v17  ;;  %v34590_v39 = vld [vmem:[%s35902_s30 + $0x2bb8] sm:$0xff] }
 0x561   : > { %21950 = vmatpush.bf16.msrb.mxu1 %v34516_v18 }
 0x562   : > { %21963 = vmatpush.bf16.msrb.mxu2 %v34524_v19  ;;  %v34562_v19 = vld [vmem:[%s35902_s30 + $0x2ad8] sm:$0xff] }
 0x563   : > { %21976 = vmatpush.bf16.msrb.mxu3 %v34532_v20 }
 0x564   : > { %21938 = vmatpush.bf16.msrb.mxu0 %v34507_v23  ;;  %v21712_v48 = vpop.f32.mrf.mxu2  ;;  %v34537_v23 = vld [vmem:[%s35902_s30 + $0x2a10] sm:$0xff] }
 0x565   : > { %21951 = vmatpush.bf16.msrb.mxu1 %v34515_v25  ;;  %v21725_v53 = vpop.f32.mrf.mxu3  ;;  %v34545_v25 = vld [vmem:[%s35902_s30 + $0x2a50] sm:$0xff] }
 0x566   : > { %21964 = vmatpush.bf16.msrb.mxu2 %v34523_v26  ;;  %v34553_v26 = vld [vmem:[%s35902_s30 + $0x2a90] sm:$0xff]  ;;  %v34596_v53 = vld [vmem:[%s35902_s30 + $0x2be8] sm:$0xff] }
 0x567   : > { %21977 = vmatpush.bf16.msrb.mxu3 %v34531_v28  ;;  %v34536_v28 = vld [vmem:[%s35902_s30 + $0x2a08] sm:$0xff]  ;;  %v34589_v48 = vld [vmem:[%s35902_s30 + $0x2bb0] sm:$0xff] }
 0x568   : > { %21939 = vmatpush.bf16.msrb.mxu0 %v34506_v29  ;;  %v34544_v29 = vld [vmem:[%s35902_s30 + $0x2a48] sm:$0xff] }
 0x569   : > { %21952 = vmatpush.bf16.msrb.mxu1 %v34514_v30  ;;  %v34552_v30 = vld [vmem:[%s35902_s30 + $0x2a88] sm:$0xff] }
 0x56a   : > { %21965 = vmatpush.bf16.msrb.mxu2 %v34522_v31 }
 0x56b   : > { %21978 = vmatpush.bf16.msrb.mxu3 %v34530_v34  ;;  %v34535_v34 = vld [vmem:[%s35902_s30 + $0x2a00] sm:$0xff] }
 0x56c   : > { %21940 = vmatpush.bf16.msrb.mxu0 %v34505_v38  ;;  %v34582_v38 = vld [vmem:[%s35902_s30 + $0x2b78] sm:$0xff] }
 0x56d   : > { %21953 = vmatpush.bf16.msrb.mxu1 %v34513_v40  ;;  %v34559_v40 = vld [vmem:[%s35902_s30 + $0x2ac0] sm:$0xff] }
 0x56e   : > { %21966 = vmatpush.bf16.msrb.mxu2 %v34521_v41  ;;  %v5241_v41 = vld [vmem:[#allocation1] sm:$0xff] }
 0x56f   : > { %21979 = vmatpush.bf16.msrb.mxu3 %v34529_v42  ;;  %v5243_v42 = vld [vmem:[#allocation1 + $0x12] sm:$0xff] }
 0x570   : > { %21941 = vmatpush.bf16.msrb.mxu0 %v34504_v43  ;;  %v34598_v43 = vld [vmem:[%s35902_s30 + $0x2bf8] sm:$0xff] }
 0x571   : > { %21954 = vmatpush.bf16.msrb.mxu1 %v34512_v44  ;;  %v5242_v44 = vld [vmem:[#allocation1 + $0x9] sm:$0xff] }
 0x572   : > { %21967 = vmatpush.bf16.msrb.mxu2 %v34520_v45  ;;  %v34573_v45 = vld [vmem:[%s35902_s30 + $0x2b30] sm:$0xff] }
 0x573   : > { %21980 = vmatpush.bf16.msrb.mxu3 %v34528_v52  ;;  %v34588_v52 = vld [vmem:[%s35902_s30 + $0x2ba8] sm:$0xff] }
 0x574   : > { %21942 = vmatpush.bf16.msrb.mxu0 %v34503_v54  ;;  %v21736_v6 = vpop.f32.mrf.mxu0 }
 0x575   : > { %21955 = vmatpush.bf16.msrb.mxu1 %v34511_v55  ;;  %v21737_v7 = vadd.f32 %v21736_v6, %v37321_v37  ;;  %v21749_v9 = vpop.f32.mrf.mxu1  ;;  %v34574_v37 = vld [vmem:[%s35902_s30 + $0x2b38] sm:$0xff] }
 0x576   : > { %21968 = vmatpush.bf16.msrb.mxu2 %v34519_v56  ;;  %v34571_v56 = vld [vmem:[%s35902_s30 + $0x2b20] sm:$0xff] }
 0x577   : > { %21981 = vmatpush.bf16.msrb.mxu3 %v34527_v60  ;;  %21943 = vmatmul.bf16.vlgmr.msrb.gmra.mxu0 %v5235_v46  ;;  %v21750_v12 = vadd.f32 %v21749_v9, %v21737_v7  ;;  %v5244_v46 = vld [vmem:[#allocation1 + $0x1b] sm:$0xff] }
 0x578   : > { %21987 = vmatpush.bf16.msra.mxu0 %v34542_v57  ;;  %21956 = vmatmul.bf16.vlgmr.msrb.gmra.mxu1 %v5236_v49  ;;  %v34597_v49 = vld [vmem:[%s35902_s30 + $0x2bf0] sm:$0xff] }
 0x579   : > { %22000 = vmatpush.bf16.msra.mxu1 %v34550_v58  ;;  %21969 = vmatmul.bf16.vlgmr.msrb.gmra.mxu2 %v5237_v47  ;;  %v34581_v47 = vld [vmem:[%s35902_s30 + $0x2b70] sm:$0xff]  ;;  %v34579_v58 = vld [vmem:[%s35902_s30 + $0x2b60] sm:$0xff] }
 0x57a   : > { %22013 = vmatpush.bf16.msra.mxu2 %v34558_v59  ;;  %21982 = vmatmul.bf16.vlgmr.msrb.gmra.mxu3 %v5238_v50  ;;  %v34572_v50 = vld [vmem:[%s35902_s30 + $0x2b28] sm:$0xff]  ;;  %v34587_v59 = vld [vmem:[%s35902_s30 + $0x2ba0] sm:$0xff]  ;;  %v34569_v7 = vld [vmem:[%s35902_s30 + $0x2b10] sm:$0xff] }
 0x57b   : > { %22026 = vmatpush.bf16.msra.mxu3 %v34566_v61  ;;  %v34595_v61 = vld [vmem:[%s35902_s30 + $0x2be0] sm:$0xff]  ;;  %v34577_v9 = vld [vmem:[%s35902_s30 + $0x2b50] sm:$0xff] }
 0x57c   : > { %21988 = vmatpush.bf16.msra.mxu0 %v34541_v62  ;;  %v21762_v17 = vpop.f32.mrf.mxu2  ;;  %v21738_v21 = vpop.f32.mrf.mxu0  ;;  %v34570_v62 = vld [vmem:[%s35902_s30 + $0x2b18] sm:$0xff] }
 0x57d   : > { %22001 = vmatpush.bf16.msra.mxu1 %v34549_v63  ;;  %v21763_v18 = vadd.f32 %v21762_v17, %v21750_v12  ;;  %v21775_v20 = vpop.f32.mrf.mxu3  ;;  %v21751_v24 = vpop.f32.mrf.mxu1  ;;  %v34578_v63 = vld [vmem:[%s35902_s30 + $0x2b58] sm:$0xff]  ;;  %v34568_v12 = vld [vmem:[%s35902_s30 + $0x2b08] sm:$0xff] }
 0x57e   : > { %22014 = vmatpush.bf16.msra.mxu2 %v34557_v0  ;;  %v34586_v0 = vld [vmem:[%s35902_s30 + $0x2b98] sm:$0xff]  ;;  %v34592_v21 = vld [vmem:[%s35902_s30 + $0x2bc8] sm:$0xff]  ;;  %v34575_v24 = vld [vmem:[%s35902_s30 + $0x2b40] sm:$0xff] }
 0x57f   : > { %22027 = vmatpush.bf16.msra.mxu3 %v34565_v1  ;;  %v21776_v22 = vadd.f32 %v21775_v20, %v21763_v18  ;;  %v5246_v18 = vld [vmem:[#allocation1 + $0x2d] sm:$0xff] }
 0x580   : > { %21989 = vmatpush.bf16.msra.mxu0 %v34540_v2  ;;  %v310_v20 = vld [vmem:[%s35916_s27 + $0xb0] sm:$0xff] }
 0x581   : > { %22002 = vmatpush.bf16.msra.mxu1 %v34548_v3  ;;  %v34594_v3 = vld [vmem:[%s35902_s30 + $0x2bd8] sm:$0xff] }
 0x582   : > { %22015 = vmatpush.bf16.msra.mxu2 %v34556_v4 }
 0x583   : > { %22028 = vmatpush.bf16.msra.mxu3 %v34564_v5 }
 0x584   : > { %21990 = vmatpush.bf16.msra.mxu0 %v34539_v8  ;;  %v21764_v31 = vpop.f32.mrf.mxu2 }
 0x585   : > { %22003 = vmatpush.bf16.msra.mxu1 %v34547_v10  ;;  %v21777_v33 = vpop.f32.mrf.mxu3  ;;  %v34585_v10 = vld [vmem:[%s35902_s30 + $0x2b90] sm:$0xff] }
 0x586   : > { %22016 = vmatpush.bf16.msra.mxu2 %v34555_v11  ;;  %v34593_v11 = vld [vmem:[%s35902_s30 + $0x2bd0] sm:$0xff] }
 0x587   : > { %22029 = vmatpush.bf16.msra.mxu3 %v34563_v13  ;;  %v34576_v13 = vld [vmem:[%s35902_s30 + $0x2b48] sm:$0xff]  ;;  %v34605_v31 = vld [vmem:[%s35902_s30 + $0x2c30] sm:$0xff] }
 0x588   : > { %21991 = vmatpush.bf16.msra.mxu0 %v34538_v14  ;;  %v34584_v14 = vld [vmem:[%s35902_s30 + $0x2b88] sm:$0xff]  ;;  %v34621_v33 = vld [vmem:[%s35902_s30 + $0x2cb0] sm:$0xff] }
 0x589   : > { %22004 = vmatpush.bf16.msra.mxu1 %v34546_v15  ;;  %v5245_v15 = vld [vmem:[#allocation1 + $0x24] sm:$0xff] }
 0x58a   : > { %22017 = vmatpush.bf16.msra.mxu2 %v34554_v16  ;;  %v5247_v16 = vld [vmem:[#allocation1 + $0x36] sm:$0xff] }
 0x58b   : > { %22030 = vmatpush.bf16.msra.mxu3 %v34562_v19  ;;  %v5248_v19 = vld [vmem:[#allocation1 + $0x3f] sm:$0xff] }
 0x58c   : > { %21992 = vmatpush.bf16.msra.mxu0 %v34537_v23  ;;  %5250 = vst [vmem:[#allocation1] ss:$9 sm:$0xff] %v310_v20  ;;  %v34567_v23 = vld [vmem:[%s35902_s30 + $0x2b00] sm:$0xff]  ;;  %v34644_v20 = vld [vmem:[%s35902_s30 + $0x2d68] sm:$0xff] }
 0x58d   : > { %22005 = vmatpush.bf16.msra.mxu1 %v34545_v25  ;;  %v34583_v25 = vld [vmem:[%s35902_s30 + $0x2b80] sm:$0xff] }
 0x58e   : > { %22018 = vmatpush.bf16.msra.mxu2 %v34553_v26  ;;  %v34606_v26 = vld [vmem:[%s35902_s30 + $0x2c38] sm:$0xff] }
 0x58f   : > { %22031 = vmatpush.bf16.msra.mxu3 %v34561_v27  ;;  %v34614_v27 = vld [vmem:[%s35902_s30 + $0x2c78] sm:$0xff] }
 0x590   : > { %21993 = vmatpush.bf16.msra.mxu0 %v34536_v28  ;;  %v34622_v28 = vld [vmem:[%s35902_s30 + $0x2cb8] sm:$0xff] }
 0x591   : > { %22006 = vmatpush.bf16.msra.mxu1 %v34544_v29  ;;  %v34591_v29 = vld [vmem:[%s35902_s30 + $0x2bc0] sm:$0xff] }
 0x592   : > { %22019 = vmatpush.bf16.msra.mxu2 %v34552_v30  ;;  %v34630_v30 = vld [vmem:[%s35902_s30 + $0x2cf8] sm:$0xff] }
 0x593   : > { %22032 = vmatpush.bf16.msra.mxu3 %v34560_v32  ;;  %v34613_v32 = vld [vmem:[%s35902_s30 + $0x2c70] sm:$0xff] }
 0x594   : > { %21994 = vmatpush.bf16.msra.mxu0 %v34535_v34  ;;  %v21788_v54 = vpop.f32.mrf.mxu0  ;;  %v34629_v34 = vld [vmem:[%s35902_s30 + $0x2cf0] sm:$0xff] }
 0x595   : > { %22007 = vmatpush.bf16.msra.mxu1 %v34543_v35  ;;  %v21789_v55 = vadd.f32 %v21788_v54, %v21776_v22  ;;  %v21801_v57 = vpop.f32.mrf.mxu1  ;;  %v34604_v35 = vld [vmem:[%s35902_s30 + $0x2c28] sm:$0xff] }
 0x596   : > { %22020 = vmatpush.bf16.msra.mxu2 %v34551_v36  ;;  %v34612_v36 = vld [vmem:[%s35902_s30 + $0x2c68] sm:$0xff] }
 0x597   : > { %22033 = vmatpush.bf16.msra.mxu3 %v34559_v40  ;;  %21995 = vmatmul.bf16.vlgmr.msra.gmra.mxu0 %v5241_v41  ;;  %v21802_v60 = vadd.f32 %v21801_v57, %v21789_v55  ;;  %v34603_v41 = vld [vmem:[%s35902_s30 + $0x2c20] sm:$0xff] }
 0x598   : > { %22039 = vmatpush.bf16.msrb.mxu0 %v34574_v37  ;;  %22008 = vmatmul.bf16.vlgmr.msra.gmra.mxu1 %v5242_v44  ;;  %v34620_v37 = vld [vmem:[%s35902_s30 + $0x2ca8] sm:$0xff]  ;;  %v34619_v44 = vld [vmem:[%s35902_s30 + $0x2ca0] sm:$0xff] }
 0x599   : > { %22052 = vmatpush.bf16.msrb.mxu1 %v34582_v38  ;;  %22021 = vmatmul.bf16.vlgmr.msra.gmra.mxu2 %v5243_v42  ;;  %v34628_v38 = vld [vmem:[%s35902_s30 + $0x2ce8] sm:$0xff] }
 0x59a   : > { %22065 = vmatpush.bf16.msrb.mxu2 %v34590_v39  ;;  %22034 = vmatmul.bf16.vlgmr.msra.gmra.mxu3 %v5244_v46  ;;  %v34627_v46 = vld [vmem:[%s35902_s30 + $0x2ce0] sm:$0xff] }
 0x59b   : > { %22078 = vmatpush.bf16.msrb.mxu3 %v34598_v43  ;;  %v34611_v43 = vld [vmem:[%s35902_s30 + $0x2c60] sm:$0xff] }
 0x59c   : > { %22040 = vmatpush.bf16.msrb.mxu0 %v34573_v45  ;;  %v21814_v1 = vpop.f32.mrf.mxu2  ;;  %v21790_v5 = vpop.f32.mrf.mxu0 }
 0x59d   : > { %22053 = vmatpush.bf16.msrb.mxu1 %v34581_v47  ;;  %v21815_v2 = vadd.f32 %v21814_v1, %v21802_v60  ;;  %v21827_v4 = vpop.f32.mrf.mxu3  ;;  %v21803_v8 = vpop.f32.mrf.mxu1  ;;  %v34602_v47 = vld [vmem:[%s35902_s30 + $0x2c18] sm:$0xff]  ;;  %v34625_v60 = vld [vmem:[%s35902_s30 + $0x2cd0] sm:$0xff]  ;;  %v34624_v1 = vld [vmem:[%s35902_s30 + $0x2cc8] sm:$0xff] }
 0x59e   : > { %22066 = vmatpush.bf16.msrb.mxu2 %v34589_v48  ;;  %v34610_v48 = vld [vmem:[%s35902_s30 + $0x2c58] sm:$0xff]  ;;  %v34615_v5 = vld [vmem:[%s35902_s30 + $0x2c80] sm:$0xff] }
 0x59f   : > { %22079 = vmatpush.bf16.msrb.mxu3 %v34597_v49  ;;  %v37389_v6 = vadd.f32 %v21827_v4, %v21815_v2  ;;  %v34618_v49 = vld [vmem:[%s35902_s30 + $0x2c98] sm:$0xff]  ;;  %v34607_v4 = vld [vmem:[%s35902_s30 + $0x2c40] sm:$0xff] }
 0x5a0   : > { %22041 = vmatpush.bf16.msrb.mxu0 %v34572_v50  ;;  %v34654_v8 = vld [vmem:[%s35902_s30 + $0x2db8] sm:$0xff] }
 0x5a1   : > { %22054 = vmatpush.bf16.msrb.mxu1 %v34580_v51 }
 0x5a2   : > { %22067 = vmatpush.bf16.msrb.mxu2 %v34588_v52  ;;  %v34626_v52 = vld [vmem:[%s35902_s30 + $0x2cd8] sm:$0xff] }
 0x5a3   : > { %22080 = vmatpush.bf16.msrb.mxu3 %v34596_v53 }
 0x5a4   : > { %22042 = vmatpush.bf16.msrb.mxu0 %v34571_v56  ;;  %v21816_v17 = vpop.f32.mrf.mxu2  ;;  %v34601_v56 = vld [vmem:[%s35902_s30 + $0x2c10] sm:$0xff] }
 0x5a5   : > { %22055 = vmatpush.bf16.msrb.mxu1 %v34579_v58  ;;  %v21829_v22 = vpop.f32.mrf.mxu3  ;;  %v34609_v58 = vld [vmem:[%s35902_s30 + $0x2c50] sm:$0xff] }
 0x5a6   : > { %22068 = vmatpush.bf16.msrb.mxu2 %v34587_v59  ;;  %v34617_v59 = vld [vmem:[%s35902_s30 + $0x2c90] sm:$0xff]  ;;  %v34660_v22 = vld [vmem:[%s35902_s30 + $0x2de8] sm:$0xff] }
 0x5a7   : > { %22081 = vmatpush.bf16.msrb.mxu3 %v34595_v61  ;;  %v34600_v61 = vld [vmem:[%s35902_s30 + $0x2c08] sm:$0xff]  ;;  %v34653_v17 = vld [vmem:[%s35902_s30 + $0x2db0] sm:$0xff] }
 0x5a8   : > { %22043 = vmatpush.bf16.msrb.mxu0 %v34570_v62  ;;  %v34608_v62 = vld [vmem:[%s35902_s30 + $0x2c48] sm:$0xff] }
 0x5a9   : > { %22056 = vmatpush.bf16.msrb.mxu1 %v34578_v63  ;;  %v34616_v63 = vld [vmem:[%s35902_s30 + $0x2c88] sm:$0xff] }
 0x5aa   : > { %22069 = vmatpush.bf16.msrb.mxu2 %v34586_v0 }
 0x5ab   : > { %22082 = vmatpush.bf16.msrb.mxu3 %v34594_v3  ;;  %v34599_v3 = vld [vmem:[%s35902_s30 + $0x2c00] sm:$0xff] }
 0x5ac   : > { %22044 = vmatpush.bf16.msrb.mxu0 %v34569_v7  ;;  %v34646_v7 = vld [vmem:[%s35902_s30 + $0x2d78] sm:$0xff] }
 0x5ad   : > { %22057 = vmatpush.bf16.msrb.mxu1 %v34577_v9  ;;  %v34623_v9 = vld [vmem:[%s35902_s30 + $0x2cc0] sm:$0xff] }
 0x5ae   : > { %22070 = vmatpush.bf16.msrb.mxu2 %v34585_v10  ;;  %v5251_v10 = vld [vmem:[#allocation1] sm:$0xff] }
 0x5af   : > { %22083 = vmatpush.bf16.msrb.mxu3 %v34593_v11  ;;  %v5253_v11 = vld [vmem:[#allocation1 + $0x12] sm:$0xff] }
 0x5b0   : > { %22045 = vmatpush.bf16.msrb.mxu0 %v34568_v12  ;;  %v34662_v12 = vld [vmem:[%s35902_s30 + $0x2df8] sm:$0xff] }
 0x5b1   : > { %22058 = vmatpush.bf16.msrb.mxu1 %v34576_v13  ;;  %v5252_v13 = vld [vmem:[#allocation1 + $0x9] sm:$0xff] }
 0x5b2   : > { %22071 = vmatpush.bf16.msrb.mxu2 %v34584_v14  ;;  %v34637_v14 = vld [vmem:[%s35902_s30 + $0x2d30] sm:$0xff] }
 0x5b3   : > { %22084 = vmatpush.bf16.msrb.mxu3 %v34592_v21  ;;  %v34652_v21 = vld [vmem:[%s35902_s30 + $0x2da8] sm:$0xff] }
 0x5b4   : > { %22046 = vmatpush.bf16.msrb.mxu0 %v34567_v23  ;;  %v21840_v39 = vpop.f32.mrf.mxu0 }
 0x5b5   : > { %22059 = vmatpush.bf16.msrb.mxu1 %v34575_v24  ;;  %v21841_v40 = vadd.f32 %v21840_v39, %v37389_v6  ;;  %v21853_v42 = vpop.f32.mrf.mxu1  ;;  %v34638_v6 = vld [vmem:[%s35902_s30 + $0x2d38] sm:$0xff] }
 0x5b6   : > { %22072 = vmatpush.bf16.msrb.mxu2 %v34583_v25  ;;  %v34635_v25 = vld [vmem:[%s35902_s30 + $0x2d20] sm:$0xff] }
 0x5b7   : > { %22085 = vmatpush.bf16.msrb.mxu3 %v34591_v29  ;;  %22047 = vmatmul.bf16.vlgmr.msrb.gmra.mxu0 %v5245_v15  ;;  %v21854_v45 = vadd.f32 %v21853_v42, %v21841_v40  ;;  %v5254_v15 = vld [vmem:[#allocation1 + $0x1b] sm:$0xff] }
 0x5b8   : > { %22091 = vmatpush.bf16.msra.mxu0 %v34606_v26  ;;  %22060 = vmatmul.bf16.vlgmr.msrb.gmra.mxu1 %v5246_v18  ;;  %v34661_v18 = vld [vmem:[%s35902_s30 + $0x2df0] sm:$0xff] }
 0x5b9   : > { %22104 = vmatpush.bf16.msra.mxu1 %v34614_v27  ;;  %22073 = vmatmul.bf16.vlgmr.msrb.gmra.mxu2 %v5247_v16  ;;  %v34645_v16 = vld [vmem:[%s35902_s30 + $0x2d70] sm:$0xff]  ;;  %v34643_v27 = vld [vmem:[%s35902_s30 + $0x2d60] sm:$0xff] }
 0x5ba   : > { %22117 = vmatpush.bf16.msra.mxu2 %v34622_v28  ;;  %22086 = vmatmul.bf16.vlgmr.msrb.gmra.mxu3 %v5248_v19  ;;  %v34636_v19 = vld [vmem:[%s35902_s30 + $0x2d28] sm:$0xff]  ;;  %v34651_v28 = vld [vmem:[%s35902_s30 + $0x2da0] sm:$0xff]  ;;  %v34633_v40 = vld [vmem:[%s35902_s30 + $0x2d10] sm:$0xff] }
 0x5bb   : > { %22130 = vmatpush.bf16.msra.mxu3 %v34630_v30  ;;  %v34659_v30 = vld [vmem:[%s35902_s30 + $0x2de0] sm:$0xff]  ;;  %v34641_v42 = vld [vmem:[%s35902_s30 + $0x2d50] sm:$0xff] }
 0x5bc   : > { %22092 = vmatpush.bf16.msra.mxu0 %v34605_v31  ;;  %v21866_v50 = vpop.f32.mrf.mxu2  ;;  %v21842_v54 = vpop.f32.mrf.mxu0  ;;  %v34634_v31 = vld [vmem:[%s35902_s30 + $0x2d18] sm:$0xff] }
 0x5bd   : > { %22105 = vmatpush.bf16.msra.mxu1 %v34613_v32  ;;  %v21867_v51 = vadd.f32 %v21866_v50, %v21854_v45  ;;  %v21879_v53 = vpop.f32.mrf.mxu3  ;;  %v21855_v57 = vpop.f32.mrf.mxu1  ;;  %v34642_v32 = vld [vmem:[%s35902_s30 + $0x2d58] sm:$0xff]  ;;  %v34632_v45 = vld [vmem:[%s35902_s30 + $0x2d08] sm:$0xff] }
 0x5be   : > { %22118 = vmatpush.bf16.msra.mxu2 %v34621_v33  ;;  %v34650_v33 = vld [vmem:[%s35902_s30 + $0x2d98] sm:$0xff]  ;;  %v34656_v54 = vld [vmem:[%s35902_s30 + $0x2dc8] sm:$0xff]  ;;  %v34639_v57 = vld [vmem:[%s35902_s30 + $0x2d40] sm:$0xff] }
 0x5bf   : > { %22131 = vmatpush.bf16.msra.mxu3 %v34629_v34  ;;  %v21880_v55 = vadd.f32 %v21879_v53, %v21867_v51  ;;  %v5256_v51 = vld [vmem:[#allocation1 + $0x2d] sm:$0xff]  ;;  %v311_v53 = vld [vmem:[%s35916_s27 + $0xb8] sm:$0xff] }
 0x5c0   : > { %22093 = vmatpush.bf16.msra.mxu0 %v34604_v35 }
 0x5c1   : > { %22106 = vmatpush.bf16.msra.mxu1 %v34612_v36  ;;  %v34658_v36 = vld [vmem:[%s35902_s30 + $0x2dd8] sm:$0xff] }
 0x5c2   : > { %22119 = vmatpush.bf16.msra.mxu2 %v34620_v37 }
 0x5c3   : > { %22132 = vmatpush.bf16.msra.mxu3 %v34628_v38 }
 0x5c4   : > { %22094 = vmatpush.bf16.msra.mxu0 %v34603_v41  ;;  %v21868_v0 = vpop.f32.mrf.mxu2 }
 0x5c5   : > { %22107 = vmatpush.bf16.msra.mxu1 %v34611_v43  ;;  %v21881_v2 = vpop.f32.mrf.mxu3  ;;  %v34649_v43 = vld [vmem:[%s35902_s30 + $0x2d90] sm:$0xff] }
 0x5c6   : > { %22120 = vmatpush.bf16.msra.mxu2 %v34619_v44  ;;  %v34657_v44 = vld [vmem:[%s35902_s30 + $0x2dd0] sm:$0xff] }
 0x5c7   : > { %22133 = vmatpush.bf16.msra.mxu3 %v34627_v46  ;;  %v34640_v46 = vld [vmem:[%s35902_s30 + $0x2d48] sm:$0xff]  ;;  %v34669_v0 = vld [vmem:[%s35902_s30 + $0x2e30] sm:$0xff] }
 0x5c8   : > { %22095 = vmatpush.bf16.msra.mxu0 %v34602_v47  ;;  %v34648_v47 = vld [vmem:[%s35902_s30 + $0x2d88] sm:$0xff]  ;;  %v34685_v2 = vld [vmem:[%s35902_s30 + $0x2eb0] sm:$0xff] }
 0x5c9   : > { %22108 = vmatpush.bf16.msra.mxu1 %v34610_v48  ;;  %v5255_v48 = vld [vmem:[#allocation1 + $0x24] sm:$0xff] }
 0x5ca   : > { %22121 = vmatpush.bf16.msra.mxu2 %v34618_v49  ;;  %v5257_v49 = vld [vmem:[#allocation1 + $0x36] sm:$0xff] }
 0x5cb   : > { %22134 = vmatpush.bf16.msra.mxu3 %v34626_v52  ;;  %v5258_v52 = vld [vmem:[#allocation1 + $0x3f] sm:$0xff] }
 0x5cc   : > { %22096 = vmatpush.bf16.msra.mxu0 %v34601_v56  ;;  %5260 = vst [vmem:[#allocation1] ss:$9 sm:$0xff] %v311_v53  ;;  %v34631_v56 = vld [vmem:[%s35902_s30 + $0x2d00] sm:$0xff]  ;;  %v34708_v53 = vld [vmem:[%s35902_s30 + $0x2f68] sm:$0xff] }
 0x5cd   : > { %22109 = vmatpush.bf16.msra.mxu1 %v34609_v58  ;;  %v34647_v58 = vld [vmem:[%s35902_s30 + $0x2d80] sm:$0xff] }
 0x5ce   : > { %22122 = vmatpush.bf16.msra.mxu2 %v34617_v59  ;;  %v34670_v59 = vld [vmem:[%s35902_s30 + $0x2e38] sm:$0xff] }
 0x5cf   : > { %22135 = vmatpush.bf16.msra.mxu3 %v34625_v60  ;;  %v34678_v60 = vld [vmem:[%s35902_s30 + $0x2e78] sm:$0xff] }
 0x5d0   : > { %22097 = vmatpush.bf16.msra.mxu0 %v34600_v61  ;;  %v34686_v61 = vld [vmem:[%s35902_s30 + $0x2eb8] sm:$0xff] }
 0x5d1   : > { %22110 = vmatpush.bf16.msra.mxu1 %v34608_v62  ;;  %v34655_v62 = vld [vmem:[%s35902_s30 + $0x2dc0] sm:$0xff] }
 0x5d2   : > { %22123 = vmatpush.bf16.msra.mxu2 %v34616_v63  ;;  %v34694_v63 = vld [vmem:[%s35902_s30 + $0x2ef8] sm:$0xff] }
 0x5d3   : > { %22136 = vmatpush.bf16.msra.mxu3 %v34624_v1  ;;  %v34677_v1 = vld [vmem:[%s35902_s30 + $0x2e70] sm:$0xff] }
 0x5d4   : > { %22098 = vmatpush.bf16.msra.mxu0 %v34599_v3  ;;  %v21892_v23 = vpop.f32.mrf.mxu0  ;;  %v34693_v3 = vld [vmem:[%s35902_s30 + $0x2ef0] sm:$0xff] }
 0x5d5   : > { %22111 = vmatpush.bf16.msra.mxu1 %v34607_v4  ;;  %v21893_v24 = vadd.f32 %v21892_v23, %v21880_v55  ;;  %v21905_v26 = vpop.f32.mrf.mxu1  ;;  %v34668_v4 = vld [vmem:[%s35902_s30 + $0x2e28] sm:$0xff] }
 0x5d6   : > { %22124 = vmatpush.bf16.msra.mxu2 %v34615_v5  ;;  %v34676_v5 = vld [vmem:[%s35902_s30 + $0x2e68] sm:$0xff] }
 0x5d7   : > { %22137 = vmatpush.bf16.msra.mxu3 %v34623_v9  ;;  %22099 = vmatmul.bf16.vlgmr.msra.gmra.mxu0 %v5251_v10  ;;  %v21906_v29 = vadd.f32 %v21905_v26, %v21893_v24  ;;  %v34667_v10 = vld [vmem:[%s35902_s30 + $0x2e20] sm:$0xff] }
 0x5d8   : > { %22143 = vmatpush.bf16.msrb.mxu0 %v34638_v6  ;;  %22112 = vmatmul.bf16.vlgmr.msra.gmra.mxu1 %v5252_v13  ;;  %v34684_v6 = vld [vmem:[%s35902_s30 + $0x2ea8] sm:$0xff]  ;;  %v34683_v13 = vld [vmem:[%s35902_s30 + $0x2ea0] sm:$0xff] }
 0x5d9   : > { %22156 = vmatpush.bf16.msrb.mxu1 %v34646_v7  ;;  %22125 = vmatmul.bf16.vlgmr.msra.gmra.mxu2 %v5253_v11  ;;  %v34692_v7 = vld [vmem:[%s35902_s30 + $0x2ee8] sm:$0xff] }
 0x5da   : > { %22169 = vmatpush.bf16.msrb.mxu2 %v34654_v8  ;;  %22138 = vmatmul.bf16.vlgmr.msra.gmra.mxu3 %v5254_v15  ;;  %v34691_v15 = vld [vmem:[%s35902_s30 + $0x2ee0] sm:$0xff] }
 0x5db   : > { %22182 = vmatpush.bf16.msrb.mxu3 %v34662_v12  ;;  %v34675_v12 = vld [vmem:[%s35902_s30 + $0x2e60] sm:$0xff] }
 0x5dc   : > { %22144 = vmatpush.bf16.msrb.mxu0 %v34637_v14  ;;  %v21918_v34 = vpop.f32.mrf.mxu2  ;;  %v21894_v38 = vpop.f32.mrf.mxu0 }
 0x5dd   : > { %22157 = vmatpush.bf16.msrb.mxu1 %v34645_v16  ;;  %v21919_v35 = vadd.f32 %v21918_v34, %v21906_v29  ;;  %v21931_v37 = vpop.f32.mrf.mxu3  ;;  %v21907_v41 = vpop.f32.mrf.mxu1  ;;  %v34666_v16 = vld [vmem:[%s35902_s30 + $0x2e18] sm:$0xff]  ;;  %v34689_v29 = vld [vmem:[%s35902_s30 + $0x2ed0] sm:$0xff]  ;;  %v34688_v34 = vld [vmem:[%s35902_s30 + $0x2ec8] sm:$0xff] }
 0x5de   : > { %22170 = vmatpush.bf16.msrb.mxu2 %v34653_v17  ;;  %v34674_v17 = vld [vmem:[%s35902_s30 + $0x2e58] sm:$0xff]  ;;  %v34679_v38 = vld [vmem:[%s35902_s30 + $0x2e80] sm:$0xff] }
 0x5df   : > { %22183 = vmatpush.bf16.msrb.mxu3 %v34661_v18  ;;  %v37457_v39 = vadd.f32 %v21931_v37, %v21919_v35  ;;  %v34682_v18 = vld [vmem:[%s35902_s30 + $0x2e98] sm:$0xff]  ;;  %v34671_v37 = vld [vmem:[%s35902_s30 + $0x2e40] sm:$0xff] }
 0x5e0   : > { %22145 = vmatpush.bf16.msrb.mxu0 %v34636_v19  ;;  %v34718_v41 = vld [vmem:[%s35902_s30 + $0x2fb8] sm:$0xff] }
 0x5e1   : > { %22158 = vmatpush.bf16.msrb.mxu1 %v34644_v20 }
 0x5e2   : > { %22171 = vmatpush.bf16.msrb.mxu2 %v34652_v21  ;;  %v34690_v21 = vld [vmem:[%s35902_s30 + $0x2ed8] sm:$0xff] }
 0x5e3   : > { %22184 = vmatpush.bf16.msrb.mxu3 %v34660_v22 }
 0x5e4   : > { %22146 = vmatpush.bf16.msrb.mxu0 %v34635_v25  ;;  %v21920_v50 = vpop.f32.mrf.mxu2  ;;  %v34665_v25 = vld [vmem:[%s35902_s30 + $0x2e10] sm:$0xff] }
 0x5e5   : > { %22159 = vmatpush.bf16.msrb.mxu1 %v34643_v27  ;;  %v21933_v55 = vpop.f32.mrf.mxu3  ;;  %v34673_v27 = vld [vmem:[%s35902_s30 + $0x2e50] sm:$0xff] }
 0x5e6   : > { %22172 = vmatpush.bf16.msrb.mxu2 %v34651_v28  ;;  %v34681_v28 = vld [vmem:[%s35902_s30 + $0x2e90] sm:$0xff]  ;;  %v34724_v55 = vld [vmem:[%s35902_s30 + $0x2fe8] sm:$0xff] }
 0x5e7   : > { %22185 = vmatpush.bf16.msrb.mxu3 %v34659_v30  ;;  %v34664_v30 = vld [vmem:[%s35902_s30 + $0x2e08] sm:$0xff]  ;;  %v34717_v50 = vld [vmem:[%s35902_s30 + $0x2fb0] sm:$0xff] }
 0x5e8   : > { %22147 = vmatpush.bf16.msrb.mxu0 %v34634_v31  ;;  %v34672_v31 = vld [vmem:[%s35902_s30 + $0x2e48] sm:$0xff] }
 0x5e9   : > { %22160 = vmatpush.bf16.msrb.mxu1 %v34642_v32  ;;  %v34680_v32 = vld [vmem:[%s35902_s30 + $0x2e88] sm:$0xff] }
 0x5ea   : > { %22173 = vmatpush.bf16.msrb.mxu2 %v34650_v33 }
 0x5eb   : > { %22186 = vmatpush.bf16.msrb.mxu3 %v34658_v36  ;;  %v34663_v36 = vld [vmem:[%s35902_s30 + $0x2e00] sm:$0xff] }
 0x5ec   : > { %22148 = vmatpush.bf16.msrb.mxu0 %v34633_v40  ;;  %v34710_v40 = vld [vmem:[%s35902_s30 + $0x2f78] sm:$0xff] }
 0x5ed   : > { %22161 = vmatpush.bf16.msrb.mxu1 %v34641_v42  ;;  %v34687_v42 = vld [vmem:[%s35902_s30 + $0x2ec0] sm:$0xff] }
 0x5ee   : > { %22174 = vmatpush.bf16.msrb.mxu2 %v34649_v43  ;;  %v5261_v43 = vld [vmem:[#allocation1] sm:$0xff] }
 0x5ef   : > { %22187 = vmatpush.bf16.msrb.mxu3 %v34657_v44  ;;  %v5263_v44 = vld [vmem:[#allocation1 + $0x12] sm:$0xff] }
 0x5f0   : > { %22149 = vmatpush.bf16.msrb.mxu0 %v34632_v45  ;;  %v34726_v45 = vld [vmem:[%s35902_s30 + $0x2ff8] sm:$0xff] }
 0x5f1   : > { %22162 = vmatpush.bf16.msrb.mxu1 %v34640_v46  ;;  %v5262_v46 = vld [vmem:[#allocation1 + $0x9] sm:$0xff] }
 0x5f2   : > { %22175 = vmatpush.bf16.msrb.mxu2 %v34648_v47  ;;  %v34701_v47 = vld [vmem:[%s35902_s30 + $0x2f30] sm:$0xff] }
 0x5f3   : > { %22188 = vmatpush.bf16.msrb.mxu3 %v34656_v54  ;;  %v34716_v54 = vld [vmem:[%s35902_s30 + $0x2fa8] sm:$0xff] }
 0x5f4   : > { %22150 = vmatpush.bf16.msrb.mxu0 %v34631_v56  ;;  %v21944_v8 = vpop.f32.mrf.mxu0 }
 0x5f5   : > { %22163 = vmatpush.bf16.msrb.mxu1 %v34639_v57  ;;  %v21945_v9 = vadd.f32 %v21944_v8, %v37457_v39  ;;  %v21957_v11 = vpop.f32.mrf.mxu1  ;;  %v34702_v39 = vld [vmem:[%s35902_s30 + $0x2f38] sm:$0xff] }
 0x5f6   : > { %22176 = vmatpush.bf16.msrb.mxu2 %v34647_v58  ;;  %v34699_v58 = vld [vmem:[%s35902_s30 + $0x2f20] sm:$0xff] }
 0x5f7   : > { %22189 = vmatpush.bf16.msrb.mxu3 %v34655_v62  ;;  %22151 = vmatmul.bf16.vlgmr.msrb.gmra.mxu0 %v5255_v48  ;;  %v21958_v14 = vadd.f32 %v21957_v11, %v21945_v9  ;;  %v5264_v48 = vld [vmem:[#allocation1 + $0x1b] sm:$0xff] }
 0x5f8   : > { %22195 = vmatpush.bf16.msra.mxu0 %v34670_v59  ;;  %22164 = vmatmul.bf16.vlgmr.msrb.gmra.mxu1 %v5256_v51  ;;  %v34725_v51 = vld [vmem:[%s35902_s30 + $0x2ff0] sm:$0xff] }
 0x5f9   : > { %22208 = vmatpush.bf16.msra.mxu1 %v34678_v60  ;;  %22177 = vmatmul.bf16.vlgmr.msrb.gmra.mxu2 %v5257_v49  ;;  %v34709_v49 = vld [vmem:[%s35902_s30 + $0x2f70] sm:$0xff]  ;;  %v34707_v60 = vld [vmem:[%s35902_s30 + $0x2f60] sm:$0xff] }
 0x5fa   : > { %22221 = vmatpush.bf16.msra.mxu2 %v34686_v61  ;;  %22190 = vmatmul.bf16.vlgmr.msrb.gmra.mxu3 %v5258_v52  ;;  %v34700_v52 = vld [vmem:[%s35902_s30 + $0x2f28] sm:$0xff]  ;;  %v34715_v61 = vld [vmem:[%s35902_s30 + $0x2fa0] sm:$0xff]  ;;  %v34697_v9 = vld [vmem:[%s35902_s30 + $0x2f10] sm:$0xff] }
 0x5fb   : > { %22234 = vmatpush.bf16.msra.mxu3 %v34694_v63  ;;  %v34723_v63 = vld [vmem:[%s35902_s30 + $0x2fe0] sm:$0xff]  ;;  %v34705_v11 = vld [vmem:[%s35902_s30 + $0x2f50] sm:$0xff] }
 0x5fc   : > { %22196 = vmatpush.bf16.msra.mxu0 %v34669_v0  ;;  %v21970_v19 = vpop.f32.mrf.mxu2  ;;  %v21946_v23 = vpop.f32.mrf.mxu0  ;;  %v34698_v0 = vld [vmem:[%s35902_s30 + $0x2f18] sm:$0xff] }
 0x5fd   : > { %22209 = vmatpush.bf16.msra.mxu1 %v34677_v1  ;;  %v21971_v20 = vadd.f32 %v21970_v19, %v21958_v14  ;;  %v21983_v22 = vpop.f32.mrf.mxu3  ;;  %v21959_v26 = vpop.f32.mrf.mxu1  ;;  %v34706_v1 = vld [vmem:[%s35902_s30 + $0x2f58] sm:$0xff]  ;;  %v34696_v14 = vld [vmem:[%s35902_s30 + $0x2f08] sm:$0xff] }
 0x5fe   : > { %22222 = vmatpush.bf16.msra.mxu2 %v34685_v2  ;;  %v34714_v2 = vld [vmem:[%s35902_s30 + $0x2f98] sm:$0xff]  ;;  %v34720_v23 = vld [vmem:[%s35902_s30 + $0x2fc8] sm:$0xff]  ;;  %v34703_v26 = vld [vmem:[%s35902_s30 + $0x2f40] sm:$0xff] }
 0x5ff   : > { %22235 = vmatpush.bf16.msra.mxu3 %v34693_v3  ;;  %v21984_v24 = vadd.f32 %v21983_v22, %v21971_v20  ;;  %v5266_v20 = vld [vmem:[#allocation1 + $0x2d] sm:$0xff]  ;;  %v312_v22 = vld [vmem:[%s35916_s27 + $0xc0] sm:$0xff] }
 0x600   : > { %22197 = vmatpush.bf16.msra.mxu0 %v34668_v4 }
 0x601   : > { %22210 = vmatpush.bf16.msra.mxu1 %v34676_v5  ;;  %v34722_v5 = vld [vmem:[%s35902_s30 + $0x2fd8] sm:$0xff] }
 0x602   : > { %22223 = vmatpush.bf16.msra.mxu2 %v34684_v6 }
 0x603   : > { %22236 = vmatpush.bf16.msra.mxu3 %v34692_v7 }
 0x604   : > { %22198 = vmatpush.bf16.msra.mxu0 %v34667_v10  ;;  %v21972_v33 = vpop.f32.mrf.mxu2 }
 0x605   : > { %22211 = vmatpush.bf16.msra.mxu1 %v34675_v12  ;;  %v21985_v35 = vpop.f32.mrf.mxu3  ;;  %v34713_v12 = vld [vmem:[%s35902_s30 + $0x2f90] sm:$0xff] }
 0x606   : > { %22224 = vmatpush.bf16.msra.mxu2 %v34683_v13  ;;  %v34721_v13 = vld [vmem:[%s35902_s30 + $0x2fd0] sm:$0xff] }
 0x607   : > { %22237 = vmatpush.bf16.msra.mxu3 %v34691_v15  ;;  %v34704_v15 = vld [vmem:[%s35902_s30 + $0x2f48] sm:$0xff]  ;;  %v34733_v33 = vld [vmem:[%s35902_s30 + $0x3030] sm:$0xff] }
 0x608   : > { %22199 = vmatpush.bf16.msra.mxu0 %v34666_v16  ;;  %v34712_v16 = vld [vmem:[%s35902_s30 + $0x2f88] sm:$0xff]  ;;  %v34749_v35 = vld [vmem:[%s35902_s30 + $0x30b0] sm:$0xff] }
 0x609   : > { %22212 = vmatpush.bf16.msra.mxu1 %v34674_v17  ;;  %v5265_v17 = vld [vmem:[#allocation1 + $0x24] sm:$0xff] }
 0x60a   : > { %22225 = vmatpush.bf16.msra.mxu2 %v34682_v18  ;;  %v5267_v18 = vld [vmem:[#allocation1 + $0x36] sm:$0xff] }
 0x60b   : > { %22238 = vmatpush.bf16.msra.mxu3 %v34690_v21  ;;  %v5268_v21 = vld [vmem:[#allocation1 + $0x3f] sm:$0xff] }
 0x60c   : > { %22200 = vmatpush.bf16.msra.mxu0 %v34665_v25  ;;  %5270 = vst [vmem:[#allocation1] ss:$9 sm:$0xff] %v312_v22  ;;  %v34695_v25 = vld [vmem:[%s35902_s30 + $0x2f00] sm:$0xff]  ;;  %v34772_v22 = vld [vmem:[%s35902_s30 + $0x3168] sm:$0xff] }
 0x60d   : > { %22213 = vmatpush.bf16.msra.mxu1 %v34673_v27  ;;  %v34711_v27 = vld [vmem:[%s35902_s30 + $0x2f80] sm:$0xff] }
 0x60e   : > { %22226 = vmatpush.bf16.msra.mxu2 %v34681_v28  ;;  %v34734_v28 = vld [vmem:[%s35902_s30 + $0x3038] sm:$0xff] }
 0x60f   : > { %22239 = vmatpush.bf16.msra.mxu3 %v34689_v29  ;;  %v34742_v29 = vld [vmem:[%s35902_s30 + $0x3078] sm:$0xff] }
 0x610   : > { %22201 = vmatpush.bf16.msra.mxu0 %v34664_v30  ;;  %v34750_v30 = vld [vmem:[%s35902_s30 + $0x30b8] sm:$0xff] }
 0x611   : > { %22214 = vmatpush.bf16.msra.mxu1 %v34672_v31  ;;  %v34719_v31 = vld [vmem:[%s35902_s30 + $0x2fc0] sm:$0xff] }
 0x612   : > { %22227 = vmatpush.bf16.msra.mxu2 %v34680_v32  ;;  %v34758_v32 = vld [vmem:[%s35902_s30 + $0x30f8] sm:$0xff] }
 0x613   : > { %22240 = vmatpush.bf16.msra.mxu3 %v34688_v34  ;;  %v34741_v34 = vld [vmem:[%s35902_s30 + $0x3070] sm:$0xff] }
 0x614   : > { %22202 = vmatpush.bf16.msra.mxu0 %v34663_v36  ;;  %v21996_v56 = vpop.f32.mrf.mxu0  ;;  %v34757_v36 = vld [vmem:[%s35902_s30 + $0x30f0] sm:$0xff] }
 0x615   : > { %22215 = vmatpush.bf16.msra.mxu1 %v34671_v37  ;;  %v21997_v57 = vadd.f32 %v21996_v56, %v21984_v24  ;;  %v22009_v59 = vpop.f32.mrf.mxu1  ;;  %v34732_v37 = vld [vmem:[%s35902_s30 + $0x3028] sm:$0xff] }
 0x616   : > { %22228 = vmatpush.bf16.msra.mxu2 %v34679_v38  ;;  %v34740_v38 = vld [vmem:[%s35902_s30 + $0x3068] sm:$0xff] }
 0x617   : > { %22241 = vmatpush.bf16.msra.mxu3 %v34687_v42  ;;  %22203 = vmatmul.bf16.vlgmr.msra.gmra.mxu0 %v5261_v43  ;;  %v22010_v62 = vadd.f32 %v22009_v59, %v21997_v57  ;;  %v34731_v43 = vld [vmem:[%s35902_s30 + $0x3020] sm:$0xff] }
 0x618   : > { %22247 = vmatpush.bf16.msrb.mxu0 %v34702_v39  ;;  %22216 = vmatmul.bf16.vlgmr.msra.gmra.mxu1 %v5262_v46  ;;  %v34748_v39 = vld [vmem:[%s35902_s30 + $0x30a8] sm:$0xff]  ;;  %v34747_v46 = vld [vmem:[%s35902_s30 + $0x30a0] sm:$0xff] }
 0x619   : > { %22260 = vmatpush.bf16.msrb.mxu1 %v34710_v40  ;;  %22229 = vmatmul.bf16.vlgmr.msra.gmra.mxu2 %v5263_v44  ;;  %v34756_v40 = vld [vmem:[%s35902_s30 + $0x30e8] sm:$0xff] }
 0x61a   : > { %22273 = vmatpush.bf16.msrb.mxu2 %v34718_v41  ;;  %22242 = vmatmul.bf16.vlgmr.msra.gmra.mxu3 %v5264_v48  ;;  %v34755_v48 = vld [vmem:[%s35902_s30 + $0x30e0] sm:$0xff] }
 0x61b   : > { %22286 = vmatpush.bf16.msrb.mxu3 %v34726_v45  ;;  %v34739_v45 = vld [vmem:[%s35902_s30 + $0x3060] sm:$0xff] }
 0x61c   : > { %22248 = vmatpush.bf16.msrb.mxu0 %v34701_v47  ;;  %v22022_v3 = vpop.f32.mrf.mxu2  ;;  %v21998_v7 = vpop.f32.mrf.mxu0 }
 0x61d   : > { %22261 = vmatpush.bf16.msrb.mxu1 %v34709_v49  ;;  %v22023_v4 = vadd.f32 %v22022_v3, %v22010_v62  ;;  %v22035_v6 = vpop.f32.mrf.mxu3  ;;  %v22011_v10 = vpop.f32.mrf.mxu1  ;;  %v34730_v49 = vld [vmem:[%s35902_s30 + $0x3018] sm:$0xff]  ;;  %v34753_v62 = vld [vmem:[%s35902_s30 + $0x30d0] sm:$0xff]  ;;  %v34752_v3 = vld [vmem:[%s35902_s30 + $0x30c8] sm:$0xff] }
 0x61e   : > { %22274 = vmatpush.bf16.msrb.mxu2 %v34717_v50  ;;  %v34738_v50 = vld [vmem:[%s35902_s30 + $0x3058] sm:$0xff]  ;;  %v34743_v7 = vld [vmem:[%s35902_s30 + $0x3080] sm:$0xff] }
 0x61f   : > { %22287 = vmatpush.bf16.msrb.mxu3 %v34725_v51  ;;  %v37525_v8 = vadd.f32 %v22035_v6, %v22023_v4  ;;  %v34746_v51 = vld [vmem:[%s35902_s30 + $0x3098] sm:$0xff]  ;;  %v34735_v6 = vld [vmem:[%s35902_s30 + $0x3040] sm:$0xff] }
 0x620   : > { %22249 = vmatpush.bf16.msrb.mxu0 %v34700_v52  ;;  %v34782_v10 = vld [vmem:[%s35902_s30 + $0x31b8] sm:$0xff] }
 0x621   : > { %22262 = vmatpush.bf16.msrb.mxu1 %v34708_v53 }
 0x622   : > { %22275 = vmatpush.bf16.msrb.mxu2 %v34716_v54  ;;  %v34754_v54 = vld [vmem:[%s35902_s30 + $0x30d8] sm:$0xff] }
 0x623   : > { %22288 = vmatpush.bf16.msrb.mxu3 %v34724_v55 }
 0x624   : > { %22250 = vmatpush.bf16.msrb.mxu0 %v34699_v58  ;;  %v22024_v19 = vpop.f32.mrf.mxu2  ;;  %v34729_v58 = vld [vmem:[%s35902_s30 + $0x3010] sm:$0xff] }
 0x625   : > { %22263 = vmatpush.bf16.msrb.mxu1 %v34707_v60  ;;  %v22037_v24 = vpop.f32.mrf.mxu3  ;;  %v34737_v60 = vld [vmem:[%s35902_s30 + $0x3050] sm:$0xff] }
 0x626   : > { %22276 = vmatpush.bf16.msrb.mxu2 %v34715_v61  ;;  %v34745_v61 = vld [vmem:[%s35902_s30 + $0x3090] sm:$0xff]  ;;  %v34788_v24 = vld [vmem:[%s35902_s30 + $0x31e8] sm:$0xff] }
 0x627   : > { %22289 = vmatpush.bf16.msrb.mxu3 %v34723_v63  ;;  %v34728_v63 = vld [vmem:[%s35902_s30 + $0x3008] sm:$0xff]  ;;  %v34781_v19 = vld [vmem:[%s35902_s30 + $0x31b0] sm:$0xff] }
 0x628   : > { %22251 = vmatpush.bf16.msrb.mxu0 %v34698_v0  ;;  %v34736_v0 = vld [vmem:[%s35902_s30 + $0x3048] sm:$0xff] }
 0x629   : > { %22264 = vmatpush.bf16.msrb.mxu1 %v34706_v1  ;;  %v34744_v1 = vld [vmem:[%s35902_s30 + $0x3088] sm:$0xff] }
 0x62a   : > { %22277 = vmatpush.bf16.msrb.mxu2 %v34714_v2 }
 0x62b   : > { %22290 = vmatpush.bf16.msrb.mxu3 %v34722_v5  ;;  %v34727_v5 = vld [vmem:[%s35902_s30 + $0x3000] sm:$0xff] }
 0x62c   : > { %22252 = vmatpush.bf16.msrb.mxu0 %v34697_v9  ;;  %v34774_v9 = vld [vmem:[%s35902_s30 + $0x3178] sm:$0xff] }
 0x62d   : > { %22265 = vmatpush.bf16.msrb.mxu1 %v34705_v11  ;;  %v34751_v11 = vld [vmem:[%s35902_s30 + $0x30c0] sm:$0xff] }
 0x62e   : > { %22278 = vmatpush.bf16.msrb.mxu2 %v34713_v12  ;;  %v5271_v12 = vld [vmem:[#allocation1] sm:$0xff] }
 0x62f   : > { %22291 = vmatpush.bf16.msrb.mxu3 %v34721_v13  ;;  %v5273_v13 = vld [vmem:[#allocation1 + $0x12] sm:$0xff] }
 0x630   : > { %22253 = vmatpush.bf16.msrb.mxu0 %v34696_v14  ;;  %v34790_v14 = vld [vmem:[%s35902_s30 + $0x31f8] sm:$0xff] }
 0x631   : > { %22266 = vmatpush.bf16.msrb.mxu1 %v34704_v15  ;;  %v5272_v15 = vld [vmem:[#allocation1 + $0x9] sm:$0xff] }
 0x632   : > { %22279 = vmatpush.bf16.msrb.mxu2 %v34712_v16  ;;  %v34765_v16 = vld [vmem:[%s35902_s30 + $0x3130] sm:$0xff] }
 0x633   : > { %22292 = vmatpush.bf16.msrb.mxu3 %v34720_v23  ;;  %v34780_v23 = vld [vmem:[%s35902_s30 + $0x31a8] sm:$0xff] }
 0x634   : > { %22254 = vmatpush.bf16.msrb.mxu0 %v34695_v25  ;;  %v22048_v41 = vpop.f32.mrf.mxu0 }
 0x635   : > { %22267 = vmatpush.bf16.msrb.mxu1 %v34703_v26  ;;  %v22049_v42 = vadd.f32 %v22048_v41, %v37525_v8  ;;  %v22061_v44 = vpop.f32.mrf.mxu1  ;;  %v34766_v8 = vld [vmem:[%s35902_s30 + $0x3138] sm:$0xff] }
 0x636   : > { %22280 = vmatpush.bf16.msrb.mxu2 %v34711_v27  ;;  %v34763_v27 = vld [vmem:[%s35902_s30 + $0x3120] sm:$0xff] }
 0x637   : > { %22293 = vmatpush.bf16.msrb.mxu3 %v34719_v31  ;;  %22255 = vmatmul.bf16.vlgmr.msrb.gmra.mxu0 %v5265_v17  ;;  %v22062_v47 = vadd.f32 %v22061_v44, %v22049_v42  ;;  %v5274_v17 = vld [vmem:[#allocation1 + $0x1b] sm:$0xff] }
 0x638   : > { %22299 = vmatpush.bf16.msra.mxu0 %v34734_v28  ;;  %22268 = vmatmul.bf16.vlgmr.msrb.gmra.mxu1 %v5266_v20  ;;  %v34789_v20 = vld [vmem:[%s35902_s30 + $0x31f0] sm:$0xff] }
 0x639   : > { %22312 = vmatpush.bf16.msra.mxu1 %v34742_v29  ;;  %22281 = vmatmul.bf16.vlgmr.msrb.gmra.mxu2 %v5267_v18  ;;  %v34773_v18 = vld [vmem:[%s35902_s30 + $0x3170] sm:$0xff]  ;;  %v34771_v29 = vld [vmem:[%s35902_s30 + $0x3160] sm:$0xff] }
 0x63a   : > { %22325 = vmatpush.bf16.msra.mxu2 %v34750_v30  ;;  %22294 = vmatmul.bf16.vlgmr.msrb.gmra.mxu3 %v5268_v21  ;;  %v34764_v21 = vld [vmem:[%s35902_s30 + $0x3128] sm:$0xff]  ;;  %v34779_v30 = vld [vmem:[%s35902_s30 + $0x31a0] sm:$0xff]  ;;  %v34761_v42 = vld [vmem:[%s35902_s30 + $0x3110] sm:$0xff] }
 0x63b   : > { %22338 = vmatpush.bf16.msra.mxu3 %v34758_v32  ;;  %v34787_v32 = vld [vmem:[%s35902_s30 + $0x31e0] sm:$0xff]  ;;  %v34769_v44 = vld [vmem:[%s35902_s30 + $0x3150] sm:$0xff] }
 0x63c   : > { %22300 = vmatpush.bf16.msra.mxu0 %v34733_v33  ;;  %v22074_v52 = vpop.f32.mrf.mxu2  ;;  %v22050_v56 = vpop.f32.mrf.mxu0  ;;  %v34762_v33 = vld [vmem:[%s35902_s30 + $0x3118] sm:$0xff] }
 0x63d   : > { %22313 = vmatpush.bf16.msra.mxu1 %v34741_v34  ;;  %v22075_v53 = vadd.f32 %v22074_v52, %v22062_v47  ;;  %v22087_v55 = vpop.f32.mrf.mxu3  ;;  %v22063_v59 = vpop.f32.mrf.mxu1  ;;  %v34770_v34 = vld [vmem:[%s35902_s30 + $0x3158] sm:$0xff]  ;;  %v34760_v47 = vld [vmem:[%s35902_s30 + $0x3108] sm:$0xff] }
 0x63e   : > { %22326 = vmatpush.bf16.msra.mxu2 %v34749_v35  ;;  %v34778_v35 = vld [vmem:[%s35902_s30 + $0x3198] sm:$0xff]  ;;  %v34784_v56 = vld [vmem:[%s35902_s30 + $0x31c8] sm:$0xff]  ;;  %v34767_v59 = vld [vmem:[%s35902_s30 + $0x3140] sm:$0xff] }
 0x63f   : > { %22339 = vmatpush.bf16.msra.mxu3 %v34757_v36  ;;  %v22088_v57 = vadd.f32 %v22087_v55, %v22075_v53  ;;  %v5276_v53 = vld [vmem:[#allocation1 + $0x2d] sm:$0xff] }
 0x640   : > { %22301 = vmatpush.bf16.msra.mxu0 %v34732_v37  ;;  %v313_v55 = vld [vmem:[%s35916_s27 + $0xc8] sm:$0xff] }
 0x641   : > { %22314 = vmatpush.bf16.msra.mxu1 %v34740_v38  ;;  %v34786_v38 = vld [vmem:[%s35902_s30 + $0x31d8] sm:$0xff] }
 0x642   : > { %22327 = vmatpush.bf16.msra.mxu2 %v34748_v39 }
 0x643   : > { %22340 = vmatpush.bf16.msra.mxu3 %v34756_v40 }
 0x644   : > { %22302 = vmatpush.bf16.msra.mxu0 %v34731_v43  ;;  %v22076_v2 = vpop.f32.mrf.mxu2 }
 0x645   : > { %22315 = vmatpush.bf16.msra.mxu1 %v34739_v45  ;;  %v22089_v4 = vpop.f32.mrf.mxu3  ;;  %v34777_v45 = vld [vmem:[%s35902_s30 + $0x3190] sm:$0xff] }
 0x646   : > { %22328 = vmatpush.bf16.msra.mxu2 %v34747_v46  ;;  %v34785_v46 = vld [vmem:[%s35902_s30 + $0x31d0] sm:$0xff] }
 0x647   : > { %22341 = vmatpush.bf16.msra.mxu3 %v34755_v48  ;;  %v34768_v48 = vld [vmem:[%s35902_s30 + $0x3148] sm:$0xff]  ;;  %v34797_v2 = vld [vmem:[%s35902_s30 + $0x3230] sm:$0xff] }
 0x648   : > { %22303 = vmatpush.bf16.msra.mxu0 %v34730_v49  ;;  %v34776_v49 = vld [vmem:[%s35902_s30 + $0x3188] sm:$0xff]  ;;  %v34813_v4 = vld [vmem:[%s35902_s30 + $0x32b0] sm:$0xff] }
 0x649   : > { %22316 = vmatpush.bf16.msra.mxu1 %v34738_v50  ;;  %v5275_v50 = vld [vmem:[#allocation1 + $0x24] sm:$0xff] }
 0x64a   : > { %22329 = vmatpush.bf16.msra.mxu2 %v34746_v51  ;;  %v5277_v51 = vld [vmem:[#allocation1 + $0x36] sm:$0xff] }
 0x64b   : > { %22342 = vmatpush.bf16.msra.mxu3 %v34754_v54  ;;  %v5278_v54 = vld [vmem:[#allocation1 + $0x3f] sm:$0xff] }
 0x64c   : > { %22304 = vmatpush.bf16.msra.mxu0 %v34729_v58  ;;  %5280 = vst [vmem:[#allocation1] ss:$9 sm:$0xff] %v313_v55  ;;  %v34759_v58 = vld [vmem:[%s35902_s30 + $0x3100] sm:$0xff]  ;;  %v34836_v55 = vld [vmem:[%s35902_s30 + $0x3368] sm:$0xff] }
 0x64d   : > { %22317 = vmatpush.bf16.msra.mxu1 %v34737_v60  ;;  %v34775_v60 = vld [vmem:[%s35902_s30 + $0x3180] sm:$0xff] }
 0x64e   : > { %22330 = vmatpush.bf16.msra.mxu2 %v34745_v61  ;;  %v34798_v61 = vld [vmem:[%s35902_s30 + $0x3238] sm:$0xff] }
 0x64f   : > { %22343 = vmatpush.bf16.msra.mxu3 %v34753_v62  ;;  %v34806_v62 = vld [vmem:[%s35902_s30 + $0x3278] sm:$0xff] }
 0x650   : > { %22305 = vmatpush.bf16.msra.mxu0 %v34728_v63  ;;  %v34814_v63 = vld [vmem:[%s35902_s30 + $0x32b8] sm:$0xff] }
 0x651   : > { %22318 = vmatpush.bf16.msra.mxu1 %v34736_v0  ;;  %v34783_v0 = vld [vmem:[%s35902_s30 + $0x31c0] sm:$0xff] }
 0x652   : > { %22331 = vmatpush.bf16.msra.mxu2 %v34744_v1  ;;  %v34822_v1 = vld [vmem:[%s35902_s30 + $0x32f8] sm:$0xff] }
 0x653   : > { %22344 = vmatpush.bf16.msra.mxu3 %v34752_v3  ;;  %v34805_v3 = vld [vmem:[%s35902_s30 + $0x3270] sm:$0xff] }
 0x654   : > { %22306 = vmatpush.bf16.msra.mxu0 %v34727_v5  ;;  %v22100_v25 = vpop.f32.mrf.mxu0  ;;  %v34821_v5 = vld [vmem:[%s35902_s30 + $0x32f0] sm:$0xff] }
 0x655   : > { %22319 = vmatpush.bf16.msra.mxu1 %v34735_v6  ;;  %v22101_v26 = vadd.f32 %v22100_v25, %v22088_v57  ;;  %v22113_v28 = vpop.f32.mrf.mxu1  ;;  %v34796_v6 = vld [vmem:[%s35902_s30 + $0x3228] sm:$0xff] }
 0x656   : > { %22332 = vmatpush.bf16.msra.mxu2 %v34743_v7  ;;  %v34804_v7 = vld [vmem:[%s35902_s30 + $0x3268] sm:$0xff] }
 0x657   : > { %22345 = vmatpush.bf16.msra.mxu3 %v34751_v11  ;;  %22307 = vmatmul.bf16.vlgmr.msra.gmra.mxu0 %v5271_v12  ;;  %v22114_v31 = vadd.f32 %v22113_v28, %v22101_v26  ;;  %v34795_v12 = vld [vmem:[%s35902_s30 + $0x3220] sm:$0xff] }
 0x658   : > { %22351 = vmatpush.bf16.msrb.mxu0 %v34766_v8  ;;  %22320 = vmatmul.bf16.vlgmr.msra.gmra.mxu1 %v5272_v15  ;;  %v34812_v8 = vld [vmem:[%s35902_s30 + $0x32a8] sm:$0xff]  ;;  %v34811_v15 = vld [vmem:[%s35902_s30 + $0x32a0] sm:$0xff] }
 0x659   : > { %22364 = vmatpush.bf16.msrb.mxu1 %v34774_v9  ;;  %22333 = vmatmul.bf16.vlgmr.msra.gmra.mxu2 %v5273_v13  ;;  %v34820_v9 = vld [vmem:[%s35902_s30 + $0x32e8] sm:$0xff] }
 0x65a   : > { %22377 = vmatpush.bf16.msrb.mxu2 %v34782_v10  ;;  %22346 = vmatmul.bf16.vlgmr.msra.gmra.mxu3 %v5274_v17  ;;  %v34819_v17 = vld [vmem:[%s35902_s30 + $0x32e0] sm:$0xff] }
 0x65b   : > { %22390 = vmatpush.bf16.msrb.mxu3 %v34790_v14  ;;  %v34803_v14 = vld [vmem:[%s35902_s30 + $0x3260] sm:$0xff] }
 0x65c   : > { %22352 = vmatpush.bf16.msrb.mxu0 %v34765_v16  ;;  %v22126_v36 = vpop.f32.mrf.mxu2  ;;  %v22102_v40 = vpop.f32.mrf.mxu0 }
 0x65d   : > { %22365 = vmatpush.bf16.msrb.mxu1 %v34773_v18  ;;  %v22127_v37 = vadd.f32 %v22126_v36, %v22114_v31  ;;  %v22139_v39 = vpop.f32.mrf.mxu3  ;;  %v22115_v43 = vpop.f32.mrf.mxu1  ;;  %v34794_v18 = vld [vmem:[%s35902_s30 + $0x3218] sm:$0xff]  ;;  %v34817_v31 = vld [vmem:[%s35902_s30 + $0x32d0] sm:$0xff]  ;;  %v34816_v36 = vld [vmem:[%s35902_s30 + $0x32c8] sm:$0xff] }
 0x65e   : > { %22378 = vmatpush.bf16.msrb.mxu2 %v34781_v19  ;;  %v34802_v19 = vld [vmem:[%s35902_s30 + $0x3258] sm:$0xff]  ;;  %v34807_v40 = vld [vmem:[%s35902_s30 + $0x3280] sm:$0xff] }
 0x65f   : > { %22391 = vmatpush.bf16.msrb.mxu3 %v34789_v20  ;;  %v37593_v41 = vadd.f32 %v22139_v39, %v22127_v37  ;;  %v34810_v20 = vld [vmem:[%s35902_s30 + $0x3298] sm:$0xff]  ;;  %v34799_v39 = vld [vmem:[%s35902_s30 + $0x3240] sm:$0xff] }
 0x660   : > { %22353 = vmatpush.bf16.msrb.mxu0 %v34764_v21  ;;  %v34846_v43 = vld [vmem:[%s35902_s30 + $0x33b8] sm:$0xff] }
 0x661   : > { %22366 = vmatpush.bf16.msrb.mxu1 %v34772_v22 }
 0x662   : > { %22379 = vmatpush.bf16.msrb.mxu2 %v34780_v23  ;;  %v34818_v23 = vld [vmem:[%s35902_s30 + $0x32d8] sm:$0xff] }
 0x663   : > { %22392 = vmatpush.bf16.msrb.mxu3 %v34788_v24 }
 0x664   : > { %22354 = vmatpush.bf16.msrb.mxu0 %v34763_v27  ;;  %v22128_v52 = vpop.f32.mrf.mxu2  ;;  %v34793_v27 = vld [vmem:[%s35902_s30 + $0x3210] sm:$0xff] }
 0x665   : > { %22367 = vmatpush.bf16.msrb.mxu1 %v34771_v29  ;;  %v22141_v57 = vpop.f32.mrf.mxu3  ;;  %v34801_v29 = vld [vmem:[%s35902_s30 + $0x3250] sm:$0xff] }
 0x666   : > { %22380 = vmatpush.bf16.msrb.mxu2 %v34779_v30  ;;  %v34809_v30 = vld [vmem:[%s35902_s30 + $0x3290] sm:$0xff]  ;;  %v34852_v57 = vld [vmem:[%s35902_s30 + $0x33e8] sm:$0xff] }
 0x667   : > { %22393 = vmatpush.bf16.msrb.mxu3 %v34787_v32  ;;  %v34792_v32 = vld [vmem:[%s35902_s30 + $0x3208] sm:$0xff]  ;;  %v34845_v52 = vld [vmem:[%s35902_s30 + $0x33b0] sm:$0xff] }
 0x668   : > { %22355 = vmatpush.bf16.msrb.mxu0 %v34762_v33  ;;  %v34800_v33 = vld [vmem:[%s35902_s30 + $0x3248] sm:$0xff] }
 0x669   : > { %22368 = vmatpush.bf16.msrb.mxu1 %v34770_v34  ;;  %v34808_v34 = vld [vmem:[%s35902_s30 + $0x3288] sm:$0xff] }
 0x66a   : > { %22381 = vmatpush.bf16.msrb.mxu2 %v34778_v35 }
 0x66b   : > { %22394 = vmatpush.bf16.msrb.mxu3 %v34786_v38  ;;  %v34791_v38 = vld [vmem:[%s35902_s30 + $0x3200] sm:$0xff] }
 0x66c   : > { %22356 = vmatpush.bf16.msrb.mxu0 %v34761_v42  ;;  %v34838_v42 = vld [vmem:[%s35902_s30 + $0x3378] sm:$0xff] }
 0x66d   : > { %22369 = vmatpush.bf16.msrb.mxu1 %v34769_v44  ;;  %v34815_v44 = vld [vmem:[%s35902_s30 + $0x32c0] sm:$0xff] }
 0x66e   : > { %22382 = vmatpush.bf16.msrb.mxu2 %v34777_v45  ;;  %v5281_v45 = vld [vmem:[#allocation1] sm:$0xff] }
 0x66f   : > { %22395 = vmatpush.bf16.msrb.mxu3 %v34785_v46  ;;  %v5283_v46 = vld [vmem:[#allocation1 + $0x12] sm:$0xff] }
 0x670   : > { %22357 = vmatpush.bf16.msrb.mxu0 %v34760_v47  ;;  %v34854_v47 = vld [vmem:[%s35902_s30 + $0x33f8] sm:$0xff] }
 0x671   : > { %22370 = vmatpush.bf16.msrb.mxu1 %v34768_v48  ;;  %v5282_v48 = vld [vmem:[#allocation1 + $0x9] sm:$0xff] }
 0x672   : > { %22383 = vmatpush.bf16.msrb.mxu2 %v34776_v49  ;;  %v34829_v49 = vld [vmem:[%s35902_s30 + $0x3330] sm:$0xff] }
 0x673   : > { %22396 = vmatpush.bf16.msrb.mxu3 %v34784_v56  ;;  %v34844_v56 = vld [vmem:[%s35902_s30 + $0x33a8] sm:$0xff] }
 0x674   : > { %22358 = vmatpush.bf16.msrb.mxu0 %v34759_v58  ;;  %v22152_v10 = vpop.f32.mrf.mxu0 }
 0x675   : > { %22371 = vmatpush.bf16.msrb.mxu1 %v34767_v59  ;;  %v22153_v11 = vadd.f32 %v22152_v10, %v37593_v41  ;;  %v22165_v13 = vpop.f32.mrf.mxu1  ;;  %v34830_v41 = vld [vmem:[%s35902_s30 + $0x3338] sm:$0xff] }
 0x676   : > { %22384 = vmatpush.bf16.msrb.mxu2 %v34775_v60  ;;  %v34827_v60 = vld [vmem:[%s35902_s30 + $0x3320] sm:$0xff] }
 0x677   : > { %22397 = vmatpush.bf16.msrb.mxu3 %v34783_v0  ;;  %22359 = vmatmul.bf16.vlgmr.msrb.gmra.mxu0 %v5275_v50  ;;  %v22166_v16 = vadd.f32 %v22165_v13, %v22153_v11  ;;  %v5284_v50 = vld [vmem:[#allocation1 + $0x1b] sm:$0xff] }
 0x678   : > { %22403 = vmatpush.bf16.msra.mxu0 %v34798_v61  ;;  %22372 = vmatmul.bf16.vlgmr.msrb.gmra.mxu1 %v5276_v53  ;;  %v34853_v53 = vld [vmem:[%s35902_s30 + $0x33f0] sm:$0xff] }
 0x679   : > { %22416 = vmatpush.bf16.msra.mxu1 %v34806_v62  ;;  %22385 = vmatmul.bf16.vlgmr.msrb.gmra.mxu2 %v5277_v51  ;;  %v34837_v51 = vld [vmem:[%s35902_s30 + $0x3370] sm:$0xff]  ;;  %v34835_v62 = vld [vmem:[%s35902_s30 + $0x3360] sm:$0xff] }
 0x67a   : > { %22429 = vmatpush.bf16.msra.mxu2 %v34814_v63  ;;  %22398 = vmatmul.bf16.vlgmr.msrb.gmra.mxu3 %v5278_v54  ;;  %v34828_v54 = vld [vmem:[%s35902_s30 + $0x3328] sm:$0xff]  ;;  %v34843_v63 = vld [vmem:[%s35902_s30 + $0x33a0] sm:$0xff]  ;;  %v34825_v11 = vld [vmem:[%s35902_s30 + $0x3310] sm:$0xff] }
 0x67b   : > { %22442 = vmatpush.bf16.msra.mxu3 %v34822_v1  ;;  %v34851_v1 = vld [vmem:[%s35902_s30 + $0x33e0] sm:$0xff]  ;;  %v34833_v13 = vld [vmem:[%s35902_s30 + $0x3350] sm:$0xff] }
 0x67c   : > { %22404 = vmatpush.bf16.msra.mxu0 %v34797_v2  ;;  %v22178_v21 = vpop.f32.mrf.mxu2  ;;  %v22154_v25 = vpop.f32.mrf.mxu0  ;;  %v34826_v2 = vld [vmem:[%s35902_s30 + $0x3318] sm:$0xff] }
 0x67d   : > { %22417 = vmatpush.bf16.msra.mxu1 %v34805_v3  ;;  %v22179_v22 = vadd.f32 %v22178_v21, %v22166_v16  ;;  %v22191_v24 = vpop.f32.mrf.mxu3  ;;  %v22167_v28 = vpop.f32.mrf.mxu1  ;;  %v34834_v3 = vld [vmem:[%s35902_s30 + $0x3358] sm:$0xff]  ;;  %v34824_v16 = vld [vmem:[%s35902_s30 + $0x3308] sm:$0xff] }
 0x67e   : > { %22430 = vmatpush.bf16.msra.mxu2 %v34813_v4  ;;  %v34842_v4 = vld [vmem:[%s35902_s30 + $0x3398] sm:$0xff]  ;;  %v34848_v25 = vld [vmem:[%s35902_s30 + $0x33c8] sm:$0xff]  ;;  %v34831_v28 = vld [vmem:[%s35902_s30 + $0x3340] sm:$0xff] }
 0x67f   : > { %22443 = vmatpush.bf16.msra.mxu3 %v34821_v5  ;;  %v22192_v26 = vadd.f32 %v22191_v24, %v22179_v22  ;;  %v5286_v22 = vld [vmem:[#allocation1 + $0x2d] sm:$0xff] }
 0x680   : > { %22405 = vmatpush.bf16.msra.mxu0 %v34796_v6  ;;  %v314_v24 = vld [vmem:[%s35916_s27 + $0xd0] sm:$0xff] }
 0x681   : > { %22418 = vmatpush.bf16.msra.mxu1 %v34804_v7  ;;  %v34850_v7 = vld [vmem:[%s35902_s30 + $0x33d8] sm:$0xff] }
 0x682   : > { %22431 = vmatpush.bf16.msra.mxu2 %v34812_v8 }
 0x683   : > { %22444 = vmatpush.bf16.msra.mxu3 %v34820_v9 }
 0x684   : > { %22406 = vmatpush.bf16.msra.mxu0 %v34795_v12  ;;  %v22180_v35 = vpop.f32.mrf.mxu2 }
 0x685   : > { %22419 = vmatpush.bf16.msra.mxu1 %v34803_v14  ;;  %v22193_v37 = vpop.f32.mrf.mxu3  ;;  %v34841_v14 = vld [vmem:[%s35902_s30 + $0x3390] sm:$0xff] }
 0x686   : > { %22432 = vmatpush.bf16.msra.mxu2 %v34811_v15  ;;  %v34849_v15 = vld [vmem:[%s35902_s30 + $0x33d0] sm:$0xff] }
 0x687   : > { %22445 = vmatpush.bf16.msra.mxu3 %v34819_v17  ;;  %v34832_v17 = vld [vmem:[%s35902_s30 + $0x3348] sm:$0xff]  ;;  %v34861_v35 = vld [vmem:[%s35902_s30 + $0x3430] sm:$0xff] }
 0x688   : > { %22407 = vmatpush.bf16.msra.mxu0 %v34794_v18  ;;  %v34840_v18 = vld [vmem:[%s35902_s30 + $0x3388] sm:$0xff]  ;;  %v34877_v37 = vld [vmem:[%s35902_s30 + $0x34b0] sm:$0xff] }
 0x689   : > { %22420 = vmatpush.bf16.msra.mxu1 %v34802_v19  ;;  %v5285_v19 = vld [vmem:[#allocation1 + $0x24] sm:$0xff] }
 0x68a   : > { %22433 = vmatpush.bf16.msra.mxu2 %v34810_v20  ;;  %v5287_v20 = vld [vmem:[#allocation1 + $0x36] sm:$0xff] }
 0x68b   : > { %22446 = vmatpush.bf16.msra.mxu3 %v34818_v23  ;;  %v5288_v23 = vld [vmem:[#allocation1 + $0x3f] sm:$0xff] }
 0x68c   : > { %22408 = vmatpush.bf16.msra.mxu0 %v34793_v27  ;;  %5290 = vst [vmem:[#allocation1] ss:$9 sm:$0xff] %v314_v24  ;;  %v34823_v27 = vld [vmem:[%s35902_s30 + $0x3300] sm:$0xff]  ;;  %v34900_v24 = vld [vmem:[%s35902_s30 + $0x3568] sm:$0xff] }
 0x68d   : > { %22421 = vmatpush.bf16.msra.mxu1 %v34801_v29  ;;  %v34839_v29 = vld [vmem:[%s35902_s30 + $0x3380] sm:$0xff] }
 0x68e   : > { %22434 = vmatpush.bf16.msra.mxu2 %v34809_v30  ;;  %v34862_v30 = vld [vmem:[%s35902_s30 + $0x3438] sm:$0xff] }
 0x68f   : > { %22447 = vmatpush.bf16.msra.mxu3 %v34817_v31  ;;  %v34870_v31 = vld [vmem:[%s35902_s30 + $0x3478] sm:$0xff] }
 0x690   : > { %22409 = vmatpush.bf16.msra.mxu0 %v34792_v32  ;;  %v34878_v32 = vld [vmem:[%s35902_s30 + $0x34b8] sm:$0xff] }
 0x691   : > { %22422 = vmatpush.bf16.msra.mxu1 %v34800_v33  ;;  %v34847_v33 = vld [vmem:[%s35902_s30 + $0x33c0] sm:$0xff] }
 0x692   : > { %22435 = vmatpush.bf16.msra.mxu2 %v34808_v34  ;;  %v34886_v34 = vld [vmem:[%s35902_s30 + $0x34f8] sm:$0xff] }
 0x693   : > { %22448 = vmatpush.bf16.msra.mxu3 %v34816_v36  ;;  %v34869_v36 = vld [vmem:[%s35902_s30 + $0x3470] sm:$0xff] }
 0x694   : > { %22410 = vmatpush.bf16.msra.mxu0 %v34791_v38  ;;  %v22204_v58 = vpop.f32.mrf.mxu0  ;;  %v34885_v38 = vld [vmem:[%s35902_s30 + $0x34f0] sm:$0xff] }
 0x695   : > { %22423 = vmatpush.bf16.msra.mxu1 %v34799_v39  ;;  %v22205_v59 = vadd.f32 %v22204_v58, %v22192_v26  ;;  %v22217_v61 = vpop.f32.mrf.mxu1  ;;  %v34860_v39 = vld [vmem:[%s35902_s30 + $0x3428] sm:$0xff] }
 0x696   : > { %22436 = vmatpush.bf16.msra.mxu2 %v34807_v40  ;;  %v34868_v40 = vld [vmem:[%s35902_s30 + $0x3468] sm:$0xff] }
 0x697   : > { %22449 = vmatpush.bf16.msra.mxu3 %v34815_v44  ;;  %22411 = vmatmul.bf16.vlgmr.msra.gmra.mxu0 %v5281_v45  ;;  %v22218_v0 = vadd.f32 %v22217_v61, %v22205_v59  ;;  %v34859_v45 = vld [vmem:[%s35902_s30 + $0x3420] sm:$0xff] }
 0x698   : > { %22455 = vmatpush.bf16.msrb.mxu0 %v34830_v41  ;;  %22424 = vmatmul.bf16.vlgmr.msra.gmra.mxu1 %v5282_v48  ;;  %v34876_v41 = vld [vmem:[%s35902_s30 + $0x34a8] sm:$0xff]  ;;  %v34875_v48 = vld [vmem:[%s35902_s30 + $0x34a0] sm:$0xff] }
 0x699   : > { %22468 = vmatpush.bf16.msrb.mxu1 %v34838_v42  ;;  %22437 = vmatmul.bf16.vlgmr.msra.gmra.mxu2 %v5283_v46  ;;  %v34884_v42 = vld [vmem:[%s35902_s30 + $0x34e8] sm:$0xff] }
 0x69a   : > { %22481 = vmatpush.bf16.msrb.mxu2 %v34846_v43  ;;  %22450 = vmatmul.bf16.vlgmr.msra.gmra.mxu3 %v5284_v50  ;;  %v34883_v50 = vld [vmem:[%s35902_s30 + $0x34e0] sm:$0xff] }
 0x69b   : > { %22494 = vmatpush.bf16.msrb.mxu3 %v34854_v47  ;;  %v34867_v47 = vld [vmem:[%s35902_s30 + $0x3460] sm:$0xff] }
 0x69c   : > { %22456 = vmatpush.bf16.msrb.mxu0 %v34829_v49  ;;  %v22230_v5 = vpop.f32.mrf.mxu2  ;;  %v22206_v9 = vpop.f32.mrf.mxu0 }
 0x69d   : > { %22469 = vmatpush.bf16.msrb.mxu1 %v34837_v51  ;;  %v22231_v6 = vadd.f32 %v22230_v5, %v22218_v0  ;;  %v22243_v8 = vpop.f32.mrf.mxu3  ;;  %v22219_v12 = vpop.f32.mrf.mxu1  ;;  %v34858_v51 = vld [vmem:[%s35902_s30 + $0x3418] sm:$0xff]  ;;  %v34881_v0 = vld [vmem:[%s35902_s30 + $0x34d0] sm:$0xff]  ;;  %v34880_v5 = vld [vmem:[%s35902_s30 + $0x34c8] sm:$0xff] }
 0x69e   : > { %22482 = vmatpush.bf16.msrb.mxu2 %v34845_v52  ;;  %v34866_v52 = vld [vmem:[%s35902_s30 + $0x3458] sm:$0xff]  ;;  %v34871_v9 = vld [vmem:[%s35902_s30 + $0x3480] sm:$0xff] }
 0x69f   : > { %22495 = vmatpush.bf16.msrb.mxu3 %v34853_v53  ;;  %v37661_v10 = vadd.f32 %v22243_v8, %v22231_v6  ;;  %v34874_v53 = vld [vmem:[%s35902_s30 + $0x3498] sm:$0xff]  ;;  %v34863_v8 = vld [vmem:[%s35902_s30 + $0x3440] sm:$0xff] }
 0x6a0   : > { %22457 = vmatpush.bf16.msrb.mxu0 %v34828_v54  ;;  %v34910_v12 = vld [vmem:[%s35902_s30 + $0x35b8] sm:$0xff] }
 0x6a1   : > { %22470 = vmatpush.bf16.msrb.mxu1 %v34836_v55 }
 0x6a2   : > { %22483 = vmatpush.bf16.msrb.mxu2 %v34844_v56  ;;  %v34882_v56 = vld [vmem:[%s35902_s30 + $0x34d8] sm:$0xff] }
 0x6a3   : > { %22496 = vmatpush.bf16.msrb.mxu3 %v34852_v57 }
 0x6a4   : > { %22458 = vmatpush.bf16.msrb.mxu0 %v34827_v60  ;;  %v22232_v21 = vpop.f32.mrf.mxu2  ;;  %v34857_v60 = vld [vmem:[%s35902_s30 + $0x3410] sm:$0xff] }
 0x6a5   : > { %22471 = vmatpush.bf16.msrb.mxu1 %v34835_v62  ;;  %v22245_v26 = vpop.f32.mrf.mxu3  ;;  %v34865_v62 = vld [vmem:[%s35902_s30 + $0x3450] sm:$0xff] }
 0x6a6   : > { %22484 = vmatpush.bf16.msrb.mxu2 %v34843_v63  ;;  %v34873_v63 = vld [vmem:[%s35902_s30 + $0x3490] sm:$0xff]  ;;  %v34916_v26 = vld [vmem:[%s35902_s30 + $0x35e8] sm:$0xff] }
 0x6a7   : > { %22497 = vmatpush.bf16.msrb.mxu3 %v34851_v1  ;;  %v34856_v1 = vld [vmem:[%s35902_s30 + $0x3408] sm:$0xff]  ;;  %v34909_v21 = vld [vmem:[%s35902_s30 + $0x35b0] sm:$0xff] }
 0x6a8   : > { %22459 = vmatpush.bf16.msrb.mxu0 %v34826_v2  ;;  %v34864_v2 = vld [vmem:[%s35902_s30 + $0x3448] sm:$0xff] }
 0x6a9   : > { %22472 = vmatpush.bf16.msrb.mxu1 %v34834_v3  ;;  %v34872_v3 = vld [vmem:[%s35902_s30 + $0x3488] sm:$0xff] }
 0x6aa   : > { %22485 = vmatpush.bf16.msrb.mxu2 %v34842_v4 }
 0x6ab   : > { %22498 = vmatpush.bf16.msrb.mxu3 %v34850_v7  ;;  %v34855_v7 = vld [vmem:[%s35902_s30 + $0x3400] sm:$0xff] }
 0x6ac   : > { %22460 = vmatpush.bf16.msrb.mxu0 %v34825_v11  ;;  %v34902_v11 = vld [vmem:[%s35902_s30 + $0x3578] sm:$0xff] }
 0x6ad   : > { %22473 = vmatpush.bf16.msrb.mxu1 %v34833_v13  ;;  %v34879_v13 = vld [vmem:[%s35902_s30 + $0x34c0] sm:$0xff] }
 0x6ae   : > { %22486 = vmatpush.bf16.msrb.mxu2 %v34841_v14  ;;  %v5291_v14 = vld [vmem:[#allocation1] sm:$0xff] }
 0x6af   : > { %22499 = vmatpush.bf16.msrb.mxu3 %v34849_v15  ;;  %v5293_v15 = vld [vmem:[#allocation1 + $0x12] sm:$0xff] }
 0x6b0   : > { %22461 = vmatpush.bf16.msrb.mxu0 %v34824_v16  ;;  %v34918_v16 = vld [vmem:[%s35902_s30 + $0x35f8] sm:$0xff] }
 0x6b1   : > { %22474 = vmatpush.bf16.msrb.mxu1 %v34832_v17  ;;  %v5292_v17 = vld [vmem:[#allocation1 + $0x9] sm:$0xff] }
 0x6b2   : > { %22487 = vmatpush.bf16.msrb.mxu2 %v34840_v18  ;;  %v34893_v18 = vld [vmem:[%s35902_s30 + $0x3530] sm:$0xff] }
 0x6b3   : > { %22500 = vmatpush.bf16.msrb.mxu3 %v34848_v25  ;;  %v34908_v25 = vld [vmem:[%s35902_s30 + $0x35a8] sm:$0xff] }
 0x6b4   : > { %22462 = vmatpush.bf16.msrb.mxu0 %v34823_v27  ;;  %v22256_v43 = vpop.f32.mrf.mxu0 }
 0x6b5   : > { %22475 = vmatpush.bf16.msrb.mxu1 %v34831_v28  ;;  %v22257_v44 = vadd.f32 %v22256_v43, %v37661_v10  ;;  %v22269_v46 = vpop.f32.mrf.mxu1  ;;  %v34894_v10 = vld [vmem:[%s35902_s30 + $0x3538] sm:$0xff] }
 0x6b6   : > { %22488 = vmatpush.bf16.msrb.mxu2 %v34839_v29  ;;  %v34891_v29 = vld [vmem:[%s35902_s30 + $0x3520] sm:$0xff] }
 0x6b7   : > { %22501 = vmatpush.bf16.msrb.mxu3 %v34847_v33  ;;  %22463 = vmatmul.bf16.vlgmr.msrb.gmra.mxu0 %v5285_v19  ;;  %v22270_v49 = vadd.f32 %v22269_v46, %v22257_v44  ;;  %v5294_v19 = vld [vmem:[#allocation1 + $0x1b] sm:$0xff] }
 0x6b8   : > { %22507 = vmatpush.bf16.msra.mxu0 %v34862_v30  ;;  %22476 = vmatmul.bf16.vlgmr.msrb.gmra.mxu1 %v5286_v22  ;;  %v34917_v22 = vld [vmem:[%s35902_s30 + $0x35f0] sm:$0xff] }
 0x6b9   : > { %22520 = vmatpush.bf16.msra.mxu1 %v34870_v31  ;;  %22489 = vmatmul.bf16.vlgmr.msrb.gmra.mxu2 %v5287_v20  ;;  %v34901_v20 = vld [vmem:[%s35902_s30 + $0x3570] sm:$0xff]  ;;  %v34899_v31 = vld [vmem:[%s35902_s30 + $0x3560] sm:$0xff] }
 0x6ba   : > { %22533 = vmatpush.bf16.msra.mxu2 %v34878_v32  ;;  %22502 = vmatmul.bf16.vlgmr.msrb.gmra.mxu3 %v5288_v23  ;;  %v34892_v23 = vld [vmem:[%s35902_s30 + $0x3528] sm:$0xff]  ;;  %v34907_v32 = vld [vmem:[%s35902_s30 + $0x35a0] sm:$0xff]  ;;  %v34889_v44 = vld [vmem:[%s35902_s30 + $0x3510] sm:$0xff] }
 0x6bb   : > { %22546 = vmatpush.bf16.msra.mxu3 %v34886_v34  ;;  %v34915_v34 = vld [vmem:[%s35902_s30 + $0x35e0] sm:$0xff]  ;;  %v34897_v46 = vld [vmem:[%s35902_s30 + $0x3550] sm:$0xff] }
 0x6bc   : > { %22508 = vmatpush.bf16.msra.mxu0 %v34861_v35  ;;  %v22282_v54 = vpop.f32.mrf.mxu2  ;;  %v22258_v58 = vpop.f32.mrf.mxu0  ;;  %v34890_v35 = vld [vmem:[%s35902_s30 + $0x3518] sm:$0xff] }
 0x6bd   : > { %22521 = vmatpush.bf16.msra.mxu1 %v34869_v36  ;;  %v22283_v55 = vadd.f32 %v22282_v54, %v22270_v49  ;;  %v22295_v57 = vpop.f32.mrf.mxu3  ;;  %v22271_v61 = vpop.f32.mrf.mxu1  ;;  %v34898_v36 = vld [vmem:[%s35902_s30 + $0x3558] sm:$0xff]  ;;  %v34888_v49 = vld [vmem:[%s35902_s30 + $0x3508] sm:$0xff] }
 0x6be   : > { %22534 = vmatpush.bf16.msra.mxu2 %v34877_v37  ;;  %v34906_v37 = vld [vmem:[%s35902_s30 + $0x3598] sm:$0xff]  ;;  %v34912_v58 = vld [vmem:[%s35902_s30 + $0x35c8] sm:$0xff]  ;;  %v34895_v61 = vld [vmem:[%s35902_s30 + $0x3540] sm:$0xff] }
 0x6bf   : > { %22547 = vmatpush.bf16.msra.mxu3 %v34885_v38  ;;  %v22296_v59 = vadd.f32 %v22295_v57, %v22283_v55  ;;  %v5296_v55 = vld [vmem:[#allocation1 + $0x2d] sm:$0xff]  ;;  %v315_v57 = vld [vmem:[%s35916_s27 + $0xd8] sm:$0xff] }
 0x6c0   : > { %22509 = vmatpush.bf16.msra.mxu0 %v34860_v39 }
 0x6c1   : > { %22522 = vmatpush.bf16.msra.mxu1 %v34868_v40  ;;  %v34914_v40 = vld [vmem:[%s35902_s30 + $0x35d8] sm:$0xff] }
 0x6c2   : > { %22535 = vmatpush.bf16.msra.mxu2 %v34876_v41 }
 0x6c3   : > { %22548 = vmatpush.bf16.msra.mxu3 %v34884_v42 }
 0x6c4   : > { %22510 = vmatpush.bf16.msra.mxu0 %v34859_v45  ;;  %v22284_v4 = vpop.f32.mrf.mxu2 }
 0x6c5   : > { %22523 = vmatpush.bf16.msra.mxu1 %v34867_v47  ;;  %v22297_v6 = vpop.f32.mrf.mxu3  ;;  %v34905_v47 = vld [vmem:[%s35902_s30 + $0x3590] sm:$0xff] }
 0x6c6   : > { %22536 = vmatpush.bf16.msra.mxu2 %v34875_v48  ;;  %v34913_v48 = vld [vmem:[%s35902_s30 + $0x35d0] sm:$0xff] }
 0x6c7   : > { %22549 = vmatpush.bf16.msra.mxu3 %v34883_v50  ;;  %v34896_v50 = vld [vmem:[%s35902_s30 + $0x3548] sm:$0xff]  ;;  %v34925_v4 = vld [vmem:[%s35902_s30 + $0x3630] sm:$0xff] }
 0x6c8   : > { %22511 = vmatpush.bf16.msra.mxu0 %v34858_v51  ;;  %v34904_v51 = vld [vmem:[%s35902_s30 + $0x3588] sm:$0xff]  ;;  %v34941_v6 = vld [vmem:[%s35902_s30 + $0x36b0] sm:$0xff] }
 0x6c9   : > { %22524 = vmatpush.bf16.msra.mxu1 %v34866_v52  ;;  %v5295_v52 = vld [vmem:[#allocation1 + $0x24] sm:$0xff] }
 0x6ca   : > { %22537 = vmatpush.bf16.msra.mxu2 %v34874_v53  ;;  %v5297_v53 = vld [vmem:[#allocation1 + $0x36] sm:$0xff] }
 0x6cb   : > { %22550 = vmatpush.bf16.msra.mxu3 %v34882_v56  ;;  %v5298_v56 = vld [vmem:[#allocation1 + $0x3f] sm:$0xff] }
 0x6cc   : > { %22512 = vmatpush.bf16.msra.mxu0 %v34857_v60  ;;  %5300 = vst [vmem:[#allocation1] ss:$9 sm:$0xff] %v315_v57  ;;  %v34887_v60 = vld [vmem:[%s35902_s30 + $0x3500] sm:$0xff]  ;;  %v34964_v57 = vld [vmem:[%s35902_s30 + $0x3768] sm:$0xff] }
 0x6cd   : > { %22525 = vmatpush.bf16.msra.mxu1 %v34865_v62  ;;  %v34903_v62 = vld [vmem:[%s35902_s30 + $0x3580] sm:$0xff] }
 0x6ce   : > { %22538 = vmatpush.bf16.msra.mxu2 %v34873_v63  ;;  %v34926_v63 = vld [vmem:[%s35902_s30 + $0x3638] sm:$0xff] }
 0x6cf   : > { %22551 = vmatpush.bf16.msra.mxu3 %v34881_v0  ;;  %v34934_v0 = vld [vmem:[%s35902_s30 + $0x3678] sm:$0xff] }
 0x6d0   : > { %22513 = vmatpush.bf16.msra.mxu0 %v34856_v1  ;;  %v34942_v1 = vld [vmem:[%s35902_s30 + $0x36b8] sm:$0xff] }
 0x6d1   : > { %22526 = vmatpush.bf16.msra.mxu1 %v34864_v2  ;;  %v34911_v2 = vld [vmem:[%s35902_s30 + $0x35c0] sm:$0xff] }
 0x6d2   : > { %22539 = vmatpush.bf16.msra.mxu2 %v34872_v3  ;;  %v34950_v3 = vld [vmem:[%s35902_s30 + $0x36f8] sm:$0xff] }
 0x6d3   : > { %22552 = vmatpush.bf16.msra.mxu3 %v34880_v5  ;;  %v34933_v5 = vld [vmem:[%s35902_s30 + $0x3670] sm:$0xff] }
 0x6d4   : > { %22514 = vmatpush.bf16.msra.mxu0 %v34855_v7  ;;  %v22308_v27 = vpop.f32.mrf.mxu0  ;;  %v34949_v7 = vld [vmem:[%s35902_s30 + $0x36f0] sm:$0xff] }
 0x6d5   : > { %22527 = vmatpush.bf16.msra.mxu1 %v34863_v8  ;;  %v22309_v28 = vadd.f32 %v22308_v27, %v22296_v59  ;;  %v22321_v30 = vpop.f32.mrf.mxu1  ;;  %v34924_v8 = vld [vmem:[%s35902_s30 + $0x3628] sm:$0xff] }
 0x6d6   : > { %22540 = vmatpush.bf16.msra.mxu2 %v34871_v9  ;;  %v34932_v9 = vld [vmem:[%s35902_s30 + $0x3668] sm:$0xff] }
 0x6d7   : > { %22553 = vmatpush.bf16.msra.mxu3 %v34879_v13  ;;  %22515 = vmatmul.bf16.vlgmr.msra.gmra.mxu0 %v5291_v14  ;;  %v22322_v33 = vadd.f32 %v22321_v30, %v22309_v28  ;;  %v34923_v14 = vld [vmem:[%s35902_s30 + $0x3620] sm:$0xff] }
 0x6d8   : > { %22559 = vmatpush.bf16.msrb.mxu0 %v34894_v10  ;;  %22528 = vmatmul.bf16.vlgmr.msra.gmra.mxu1 %v5292_v17  ;;  %v34940_v10 = vld [vmem:[%s35902_s30 + $0x36a8] sm:$0xff]  ;;  %v34939_v17 = vld [vmem:[%s35902_s30 + $0x36a0] sm:$0xff] }
 0x6d9   : > { %22572 = vmatpush.bf16.msrb.mxu1 %v34902_v11  ;;  %22541 = vmatmul.bf16.vlgmr.msra.gmra.mxu2 %v5293_v15  ;;  %v34948_v11 = vld [vmem:[%s35902_s30 + $0x36e8] sm:$0xff] }
 0x6da   : > { %22585 = vmatpush.bf16.msrb.mxu2 %v34910_v12  ;;  %22554 = vmatmul.bf16.vlgmr.msra.gmra.mxu3 %v5294_v19  ;;  %v34947_v19 = vld [vmem:[%s35902_s30 + $0x36e0] sm:$0xff] }
 0x6db   : > { %22598 = vmatpush.bf16.msrb.mxu3 %v34918_v16  ;;  %v34931_v16 = vld [vmem:[%s35902_s30 + $0x3660] sm:$0xff] }
 0x6dc   : > { %22560 = vmatpush.bf16.msrb.mxu0 %v34893_v18  ;;  %v22334_v38 = vpop.f32.mrf.mxu2  ;;  %v22310_v42 = vpop.f32.mrf.mxu0 }
 0x6dd   : > { %22573 = vmatpush.bf16.msrb.mxu1 %v34901_v20  ;;  %v22335_v39 = vadd.f32 %v22334_v38, %v22322_v33  ;;  %v22347_v41 = vpop.f32.mrf.mxu3  ;;  %v22323_v45 = vpop.f32.mrf.mxu1  ;;  %v34922_v20 = vld [vmem:[%s35902_s30 + $0x3618] sm:$0xff]  ;;  %v34945_v33 = vld [vmem:[%s35902_s30 + $0x36d0] sm:$0xff]  ;;  %v34944_v38 = vld [vmem:[%s35902_s30 + $0x36c8] sm:$0xff] }
 0x6de   : > { %22586 = vmatpush.bf16.msrb.mxu2 %v34909_v21  ;;  %v34930_v21 = vld [vmem:[%s35902_s30 + $0x3658] sm:$0xff]  ;;  %v34935_v42 = vld [vmem:[%s35902_s30 + $0x3680] sm:$0xff] }
 0x6df   : > { %22599 = vmatpush.bf16.msrb.mxu3 %v34917_v22  ;;  %v37729_v43 = vadd.f32 %v22347_v41, %v22335_v39  ;;  %v34938_v22 = vld [vmem:[%s35902_s30 + $0x3698] sm:$0xff]  ;;  %v34927_v41 = vld [vmem:[%s35902_s30 + $0x3640] sm:$0xff] }
 0x6e0   : > { %22561 = vmatpush.bf16.msrb.mxu0 %v34892_v23  ;;  %v34974_v45 = vld [vmem:[%s35902_s30 + $0x37b8] sm:$0xff] }
 0x6e1   : > { %22574 = vmatpush.bf16.msrb.mxu1 %v34900_v24 }
 0x6e2   : > { %22587 = vmatpush.bf16.msrb.mxu2 %v34908_v25  ;;  %v34946_v25 = vld [vmem:[%s35902_s30 + $0x36d8] sm:$0xff] }
 0x6e3   : > { %22600 = vmatpush.bf16.msrb.mxu3 %v34916_v26 }
 0x6e4   : > { %22562 = vmatpush.bf16.msrb.mxu0 %v34891_v29  ;;  %v22336_v54 = vpop.f32.mrf.mxu2  ;;  %v34921_v29 = vld [vmem:[%s35902_s30 + $0x3610] sm:$0xff] }
 0x6e5   : > { %22575 = vmatpush.bf16.msrb.mxu1 %v34899_v31  ;;  %v22349_v59 = vpop.f32.mrf.mxu3  ;;  %v34929_v31 = vld [vmem:[%s35902_s30 + $0x3650] sm:$0xff] }
 0x6e6   : > { %22588 = vmatpush.bf16.msrb.mxu2 %v34907_v32  ;;  %v34937_v32 = vld [vmem:[%s35902_s30 + $0x3690] sm:$0xff]  ;;  %v34980_v59 = vld [vmem:[%s35902_s30 + $0x37e8] sm:$0xff] }
 0x6e7   : > { %22601 = vmatpush.bf16.msrb.mxu3 %v34915_v34  ;;  %v34920_v34 = vld [vmem:[%s35902_s30 + $0x3608] sm:$0xff]  ;;  %v34973_v54 = vld [vmem:[%s35902_s30 + $0x37b0] sm:$0xff] }
 0x6e8   : > { %22563 = vmatpush.bf16.msrb.mxu0 %v34890_v35  ;;  %v34928_v35 = vld [vmem:[%s35902_s30 + $0x3648] sm:$0xff] }
 0x6e9   : > { %22576 = vmatpush.bf16.msrb.mxu1 %v34898_v36  ;;  %v34936_v36 = vld [vmem:[%s35902_s30 + $0x3688] sm:$0xff] }
 0x6ea   : > { %22589 = vmatpush.bf16.msrb.mxu2 %v34906_v37 }
 0x6eb   : > { %22602 = vmatpush.bf16.msrb.mxu3 %v34914_v40  ;;  %v34919_v40 = vld [vmem:[%s35902_s30 + $0x3600] sm:$0xff] }
 0x6ec   : > { %22564 = vmatpush.bf16.msrb.mxu0 %v34889_v44  ;;  %v34966_v44 = vld [vmem:[%s35902_s30 + $0x3778] sm:$0xff] }
 0x6ed   : > { %22577 = vmatpush.bf16.msrb.mxu1 %v34897_v46  ;;  %v34943_v46 = vld [vmem:[%s35902_s30 + $0x36c0] sm:$0xff] }
 0x6ee   : > { %22590 = vmatpush.bf16.msrb.mxu2 %v34905_v47  ;;  %v5301_v47 = vld [vmem:[#allocation1] sm:$0xff] }
 0x6ef   : > { %22603 = vmatpush.bf16.msrb.mxu3 %v34913_v48  ;;  %v5303_v48 = vld [vmem:[#allocation1 + $0x12] sm:$0xff] }
 0x6f0   : > { %22565 = vmatpush.bf16.msrb.mxu0 %v34888_v49  ;;  %v34982_v49 = vld [vmem:[%s35902_s30 + $0x37f8] sm:$0xff] }
 0x6f1   : > { %22578 = vmatpush.bf16.msrb.mxu1 %v34896_v50  ;;  %v5302_v50 = vld [vmem:[#allocation1 + $0x9] sm:$0xff] }
 0x6f2   : > { %22591 = vmatpush.bf16.msrb.mxu2 %v34904_v51  ;;  %v34957_v51 = vld [vmem:[%s35902_s30 + $0x3730] sm:$0xff] }
 0x6f3   : > { %22604 = vmatpush.bf16.msrb.mxu3 %v34912_v58  ;;  %v34972_v58 = vld [vmem:[%s35902_s30 + $0x37a8] sm:$0xff] }
 0x6f4   : > { %22566 = vmatpush.bf16.msrb.mxu0 %v34887_v60  ;;  %v22360_v12 = vpop.f32.mrf.mxu0 }
 0x6f5   : > { %22579 = vmatpush.bf16.msrb.mxu1 %v34895_v61  ;;  %v22361_v13 = vadd.f32 %v22360_v12, %v37729_v43  ;;  %v22373_v15 = vpop.f32.mrf.mxu1  ;;  %v34958_v43 = vld [vmem:[%s35902_s30 + $0x3738] sm:$0xff] }
 0x6f6   : > { %22592 = vmatpush.bf16.msrb.mxu2 %v34903_v62  ;;  %v34955_v62 = vld [vmem:[%s35902_s30 + $0x3720] sm:$0xff] }
 0x6f7   : > { %22605 = vmatpush.bf16.msrb.mxu3 %v34911_v2  ;;  %22567 = vmatmul.bf16.vlgmr.msrb.gmra.mxu0 %v5295_v52  ;;  %v22374_v18 = vadd.f32 %v22373_v15, %v22361_v13  ;;  %v5304_v52 = vld [vmem:[#allocation1 + $0x1b] sm:$0xff] }
 0x6f8   : > { %22611 = vmatpush.bf16.msra.mxu0 %v34926_v63  ;;  %22580 = vmatmul.bf16.vlgmr.msrb.gmra.mxu1 %v5296_v55  ;;  %v34981_v55 = vld [vmem:[%s35902_s30 + $0x37f0] sm:$0xff] }
 0x6f9   : > { %22624 = vmatpush.bf16.msra.mxu1 %v34934_v0  ;;  %22593 = vmatmul.bf16.vlgmr.msrb.gmra.mxu2 %v5297_v53  ;;  %v34965_v53 = vld [vmem:[%s35902_s30 + $0x3770] sm:$0xff]  ;;  %v34963_v0 = vld [vmem:[%s35902_s30 + $0x3760] sm:$0xff] }
 0x6fa   : > { %22637 = vmatpush.bf16.msra.mxu2 %v34942_v1  ;;  %22606 = vmatmul.bf16.vlgmr.msrb.gmra.mxu3 %v5298_v56  ;;  %v34956_v56 = vld [vmem:[%s35902_s30 + $0x3728] sm:$0xff]  ;;  %v34971_v1 = vld [vmem:[%s35902_s30 + $0x37a0] sm:$0xff]  ;;  %v34953_v13 = vld [vmem:[%s35902_s30 + $0x3710] sm:$0xff] }
 0x6fb   : > { %22650 = vmatpush.bf16.msra.mxu3 %v34950_v3  ;;  %v34979_v3 = vld [vmem:[%s35902_s30 + $0x37e0] sm:$0xff]  ;;  %v34961_v15 = vld [vmem:[%s35902_s30 + $0x3750] sm:$0xff] }
 0x6fc   : > { %22612 = vmatpush.bf16.msra.mxu0 %v34925_v4  ;;  %v22386_v23 = vpop.f32.mrf.mxu2  ;;  %v22362_v27 = vpop.f32.mrf.mxu0  ;;  %v34954_v4 = vld [vmem:[%s35902_s30 + $0x3718] sm:$0xff] }
 0x6fd   : > { %22625 = vmatpush.bf16.msra.mxu1 %v34933_v5  ;;  %v22387_v24 = vadd.f32 %v22386_v23, %v22374_v18  ;;  %v22399_v26 = vpop.f32.mrf.mxu3  ;;  %v22375_v30 = vpop.f32.mrf.mxu1  ;;  %v34962_v5 = vld [vmem:[%s35902_s30 + $0x3758] sm:$0xff]  ;;  %v34952_v18 = vld [vmem:[%s35902_s30 + $0x3708] sm:$0xff] }
 0x6fe   : > { %22638 = vmatpush.bf16.msra.mxu2 %v34941_v6  ;;  %v34970_v6 = vld [vmem:[%s35902_s30 + $0x3798] sm:$0xff]  ;;  %v34976_v27 = vld [vmem:[%s35902_s30 + $0x37c8] sm:$0xff]  ;;  %v34959_v30 = vld [vmem:[%s35902_s30 + $0x3740] sm:$0xff] }
 0x6ff   : > { %22651 = vmatpush.bf16.msra.mxu3 %v34949_v7  ;;  %v22400_v28 = vadd.f32 %v22399_v26, %v22387_v24  ;;  %v5306_v24 = vld [vmem:[#allocation1 + $0x2d] sm:$0xff]  ;;  %v316_v26 = vld [vmem:[%s35916_s27 + $0xe0] sm:$0xff] }
 0x700   : > { %22613 = vmatpush.bf16.msra.mxu0 %v34924_v8 }
 0x701   : > { %22626 = vmatpush.bf16.msra.mxu1 %v34932_v9  ;;  %v34978_v9 = vld [vmem:[%s35902_s30 + $0x37d8] sm:$0xff] }
 0x702   : > { %22639 = vmatpush.bf16.msra.mxu2 %v34940_v10 }
 0x703   : > { %22652 = vmatpush.bf16.msra.mxu3 %v34948_v11 }
 0x704   : > { %22614 = vmatpush.bf16.msra.mxu0 %v34923_v14  ;;  %v22388_v37 = vpop.f32.mrf.mxu2 }
 0x705   : > { %22627 = vmatpush.bf16.msra.mxu1 %v34931_v16  ;;  %v22401_v39 = vpop.f32.mrf.mxu3  ;;  %v34969_v16 = vld [vmem:[%s35902_s30 + $0x3790] sm:$0xff] }
 0x706   : > { %22640 = vmatpush.bf16.msra.mxu2 %v34939_v17  ;;  %v34977_v17 = vld [vmem:[%s35902_s30 + $0x37d0] sm:$0xff] }
 0x707   : > { %22653 = vmatpush.bf16.msra.mxu3 %v34947_v19  ;;  %v34960_v19 = vld [vmem:[%s35902_s30 + $0x3748] sm:$0xff]  ;;  %v34989_v37 = vld [vmem:[%s35902_s30 + $0x3830] sm:$0xff] }
 0x708   : > { %22615 = vmatpush.bf16.msra.mxu0 %v34922_v20  ;;  %v34968_v20 = vld [vmem:[%s35902_s30 + $0x3788] sm:$0xff]  ;;  %v35005_v39 = vld [vmem:[%s35902_s30 + $0x38b0] sm:$0xff] }
 0x709   : > { %22628 = vmatpush.bf16.msra.mxu1 %v34930_v21  ;;  %v5305_v21 = vld [vmem:[#allocation1 + $0x24] sm:$0xff] }
 0x70a   : > { %22641 = vmatpush.bf16.msra.mxu2 %v34938_v22  ;;  %v5307_v22 = vld [vmem:[#allocation1 + $0x36] sm:$0xff] }
 0x70b   : > { %22654 = vmatpush.bf16.msra.mxu3 %v34946_v25  ;;  %v5308_v25 = vld [vmem:[#allocation1 + $0x3f] sm:$0xff] }
 0x70c   : > { %22616 = vmatpush.bf16.msra.mxu0 %v34921_v29  ;;  %5310 = vst [vmem:[#allocation1] ss:$9 sm:$0xff] %v316_v26  ;;  %v34951_v29 = vld [vmem:[%s35902_s30 + $0x3700] sm:$0xff]  ;;  %v35028_v26 = vld [vmem:[%s35902_s30 + $0x3968] sm:$0xff] }
 0x70d   : > { %22629 = vmatpush.bf16.msra.mxu1 %v34929_v31  ;;  %v34967_v31 = vld [vmem:[%s35902_s30 + $0x3780] sm:$0xff] }
 0x70e   : > { %22642 = vmatpush.bf16.msra.mxu2 %v34937_v32  ;;  %v34990_v32 = vld [vmem:[%s35902_s30 + $0x3838] sm:$0xff] }
 0x70f   : > { %22655 = vmatpush.bf16.msra.mxu3 %v34945_v33  ;;  %v34998_v33 = vld [vmem:[%s35902_s30 + $0x3878] sm:$0xff] }
 0x710   : > { %22617 = vmatpush.bf16.msra.mxu0 %v34920_v34  ;;  %v35006_v34 = vld [vmem:[%s35902_s30 + $0x38b8] sm:$0xff] }
 0x711   : > { %22630 = vmatpush.bf16.msra.mxu1 %v34928_v35  ;;  %v34975_v35 = vld [vmem:[%s35902_s30 + $0x37c0] sm:$0xff] }
 0x712   : > { %22643 = vmatpush.bf16.msra.mxu2 %v34936_v36  ;;  %v35014_v36 = vld [vmem:[%s35902_s30 + $0x38f8] sm:$0xff] }
 0x713   : > { %22656 = vmatpush.bf16.msra.mxu3 %v34944_v38  ;;  %v34997_v38 = vld [vmem:[%s35902_s30 + $0x3870] sm:$0xff] }
 0x714   : > { %22618 = vmatpush.bf16.msra.mxu0 %v34919_v40  ;;  %v22412_v60 = vpop.f32.mrf.mxu0  ;;  %v35013_v40 = vld [vmem:[%s35902_s30 + $0x38f0] sm:$0xff] }
 0x715   : > { %22631 = vmatpush.bf16.msra.mxu1 %v34927_v41  ;;  %v22413_v61 = vadd.f32 %v22412_v60, %v22400_v28  ;;  %v22425_v63 = vpop.f32.mrf.mxu1  ;;  %v34988_v41 = vld [vmem:[%s35902_s30 + $0x3828] sm:$0xff] }
 0x716   : > { %22644 = vmatpush.bf16.msra.mxu2 %v34935_v42  ;;  %v34996_v42 = vld [vmem:[%s35902_s30 + $0x3868] sm:$0xff] }
 0x717   : > { %22657 = vmatpush.bf16.msra.mxu3 %v34943_v46  ;;  %22619 = vmatmul.bf16.vlgmr.msra.gmra.mxu0 %v5301_v47  ;;  %v22426_v2 = vadd.f32 %v22425_v63, %v22413_v61  ;;  %v34987_v47 = vld [vmem:[%s35902_s30 + $0x3820] sm:$0xff] }
 0x718   : > { %22663 = vmatpush.bf16.msrb.mxu0 %v34958_v43  ;;  %22632 = vmatmul.bf16.vlgmr.msra.gmra.mxu1 %v5302_v50  ;;  %v35004_v43 = vld [vmem:[%s35902_s30 + $0x38a8] sm:$0xff]  ;;  %v35003_v50 = vld [vmem:[%s35902_s30 + $0x38a0] sm:$0xff] }
 0x719   : > { %22676 = vmatpush.bf16.msrb.mxu1 %v34966_v44  ;;  %22645 = vmatmul.bf16.vlgmr.msra.gmra.mxu2 %v5303_v48  ;;  %v35012_v44 = vld [vmem:[%s35902_s30 + $0x38e8] sm:$0xff] }
 0x71a   : > { %22689 = vmatpush.bf16.msrb.mxu2 %v34974_v45  ;;  %22658 = vmatmul.bf16.vlgmr.msra.gmra.mxu3 %v5304_v52  ;;  %v35011_v52 = vld [vmem:[%s35902_s30 + $0x38e0] sm:$0xff] }
 0x71b   : > { %22702 = vmatpush.bf16.msrb.mxu3 %v34982_v49  ;;  %v34995_v49 = vld [vmem:[%s35902_s30 + $0x3860] sm:$0xff] }
 0x71c   : > { %22664 = vmatpush.bf16.msrb.mxu0 %v34957_v51  ;;  %v22438_v7 = vpop.f32.mrf.mxu2  ;;  %v22414_v11 = vpop.f32.mrf.mxu0 }
 0x71d   : > { %22677 = vmatpush.bf16.msrb.mxu1 %v34965_v53  ;;  %v22439_v8 = vadd.f32 %v22438_v7, %v22426_v2  ;;  %v22451_v10 = vpop.f32.mrf.mxu3  ;;  %v22427_v14 = vpop.f32.mrf.mxu1  ;;  %v34986_v53 = vld [vmem:[%s35902_s30 + $0x3818] sm:$0xff]  ;;  %v35009_v2 = vld [vmem:[%s35902_s30 + $0x38d0] sm:$0xff]  ;;  %v35008_v7 = vld [vmem:[%s35902_s30 + $0x38c8] sm:$0xff] }
 0x71e   : > { %22690 = vmatpush.bf16.msrb.mxu2 %v34973_v54  ;;  %v34994_v54 = vld [vmem:[%s35902_s30 + $0x3858] sm:$0xff]  ;;  %v34999_v11 = vld [vmem:[%s35902_s30 + $0x3880] sm:$0xff] }
 0x71f   : > { %22703 = vmatpush.bf16.msrb.mxu3 %v34981_v55  ;;  %v37797_v12 = vadd.f32 %v22451_v10, %v22439_v8  ;;  %v35002_v55 = vld [vmem:[%s35902_s30 + $0x3898] sm:$0xff]  ;;  %v34991_v10 = vld [vmem:[%s35902_s30 + $0x3840] sm:$0xff] }
 0x720   : > { %22665 = vmatpush.bf16.msrb.mxu0 %v34956_v56  ;;  %v35038_v14 = vld [vmem:[%s35902_s30 + $0x39b8] sm:$0xff] }
 0x721   : > { %22678 = vmatpush.bf16.msrb.mxu1 %v34964_v57 }
 0x722   : > { %22691 = vmatpush.bf16.msrb.mxu2 %v34972_v58  ;;  %v35010_v58 = vld [vmem:[%s35902_s30 + $0x38d8] sm:$0xff] }
 0x723   : > { %22704 = vmatpush.bf16.msrb.mxu3 %v34980_v59 }
 0x724   : > { %22666 = vmatpush.bf16.msrb.mxu0 %v34955_v62  ;;  %v22440_v23 = vpop.f32.mrf.mxu2  ;;  %v34985_v62 = vld [vmem:[%s35902_s30 + $0x3810] sm:$0xff] }
 0x725   : > { %22679 = vmatpush.bf16.msrb.mxu1 %v34963_v0  ;;  %v22453_v28 = vpop.f32.mrf.mxu3  ;;  %v34993_v0 = vld [vmem:[%s35902_s30 + $0x3850] sm:$0xff] }
 0x726   : > { %22692 = vmatpush.bf16.msrb.mxu2 %v34971_v1  ;;  %v35001_v1 = vld [vmem:[%s35902_s30 + $0x3890] sm:$0xff]  ;;  %v35044_v28 = vld [vmem:[%s35902_s30 + $0x39e8] sm:$0xff] }
 0x727   : > { %22705 = vmatpush.bf16.msrb.mxu3 %v34979_v3  ;;  %v34984_v3 = vld [vmem:[%s35902_s30 + $0x3808] sm:$0xff]  ;;  %v35037_v23 = vld [vmem:[%s35902_s30 + $0x39b0] sm:$0xff] }
 0x728   : > { %22667 = vmatpush.bf16.msrb.mxu0 %v34954_v4  ;;  %v34992_v4 = vld [vmem:[%s35902_s30 + $0x3848] sm:$0xff] }
 0x729   : > { %22680 = vmatpush.bf16.msrb.mxu1 %v34962_v5  ;;  %v35000_v5 = vld [vmem:[%s35902_s30 + $0x3888] sm:$0xff] }
 0x72a   : > { %22693 = vmatpush.bf16.msrb.mxu2 %v34970_v6 }
 0x72b   : > { %22706 = vmatpush.bf16.msrb.mxu3 %v34978_v9  ;;  %v34983_v9 = vld [vmem:[%s35902_s30 + $0x3800] sm:$0xff] }
 0x72c   : > { %22668 = vmatpush.bf16.msrb.mxu0 %v34953_v13  ;;  %v35030_v13 = vld [vmem:[%s35902_s30 + $0x3978] sm:$0xff] }
 0x72d   : > { %22681 = vmatpush.bf16.msrb.mxu1 %v34961_v15  ;;  %v35007_v15 = vld [vmem:[%s35902_s30 + $0x38c0] sm:$0xff] }
 0x72e   : > { %22694 = vmatpush.bf16.msrb.mxu2 %v34969_v16  ;;  %v5311_v16 = vld [vmem:[#allocation1] sm:$0xff] }
 0x72f   : > { %22707 = vmatpush.bf16.msrb.mxu3 %v34977_v17  ;;  %v5313_v17 = vld [vmem:[#allocation1 + $0x12] sm:$0xff] }
 0x730   : > { %22669 = vmatpush.bf16.msrb.mxu0 %v34952_v18  ;;  %v35046_v18 = vld [vmem:[%s35902_s30 + $0x39f8] sm:$0xff] }
 0x731   : > { %22682 = vmatpush.bf16.msrb.mxu1 %v34960_v19  ;;  %v5312_v19 = vld [vmem:[#allocation1 + $0x9] sm:$0xff] }
 0x732   : > { %22695 = vmatpush.bf16.msrb.mxu2 %v34968_v20  ;;  %v35021_v20 = vld [vmem:[%s35902_s30 + $0x3930] sm:$0xff] }
 0x733   : > { %22708 = vmatpush.bf16.msrb.mxu3 %v34976_v27  ;;  %v35036_v27 = vld [vmem:[%s35902_s30 + $0x39a8] sm:$0xff] }
 0x734   : > { %22670 = vmatpush.bf16.msrb.mxu0 %v34951_v29  ;;  %v22464_v45 = vpop.f32.mrf.mxu0 }
 0x735   : > { %22683 = vmatpush.bf16.msrb.mxu1 %v34959_v30  ;;  %v22465_v46 = vadd.f32 %v22464_v45, %v37797_v12  ;;  %v22477_v48 = vpop.f32.mrf.mxu1  ;;  %v35022_v12 = vld [vmem:[%s35902_s30 + $0x3938] sm:$0xff] }
 0x736   : > { %22696 = vmatpush.bf16.msrb.mxu2 %v34967_v31  ;;  %v35019_v31 = vld [vmem:[%s35902_s30 + $0x3920] sm:$0xff] }
 0x737   : > { %22709 = vmatpush.bf16.msrb.mxu3 %v34975_v35  ;;  %22671 = vmatmul.bf16.vlgmr.msrb.gmra.mxu0 %v5305_v21  ;;  %v22478_v51 = vadd.f32 %v22477_v48, %v22465_v46  ;;  %v5314_v21 = vld [vmem:[#allocation1 + $0x1b] sm:$0xff] }
 0x738   : > { %22715 = vmatpush.bf16.msra.mxu0 %v34990_v32  ;;  %22684 = vmatmul.bf16.vlgmr.msrb.gmra.mxu1 %v5306_v24  ;;  %v35045_v24 = vld [vmem:[%s35902_s30 + $0x39f0] sm:$0xff] }
 0x739   : > { %22728 = vmatpush.bf16.msra.mxu1 %v34998_v33  ;;  %22697 = vmatmul.bf16.vlgmr.msrb.gmra.mxu2 %v5307_v22  ;;  %v35029_v22 = vld [vmem:[%s35902_s30 + $0x3970] sm:$0xff]  ;;  %v35027_v33 = vld [vmem:[%s35902_s30 + $0x3960] sm:$0xff] }
 0x73a   : > { %22741 = vmatpush.bf16.msra.mxu2 %v35006_v34  ;;  %22710 = vmatmul.bf16.vlgmr.msrb.gmra.mxu3 %v5308_v25  ;;  %v35020_v25 = vld [vmem:[%s35902_s30 + $0x3928] sm:$0xff]  ;;  %v35035_v34 = vld [vmem:[%s35902_s30 + $0x39a0] sm:$0xff]  ;;  %v35017_v46 = vld [vmem:[%s35902_s30 + $0x3910] sm:$0xff] }
 0x73b   : > { %22754 = vmatpush.bf16.msra.mxu3 %v35014_v36  ;;  %v35043_v36 = vld [vmem:[%s35902_s30 + $0x39e0] sm:$0xff]  ;;  %v35025_v48 = vld [vmem:[%s35902_s30 + $0x3950] sm:$0xff] }
 0x73c   : > { %22716 = vmatpush.bf16.msra.mxu0 %v34989_v37  ;;  %v22490_v56 = vpop.f32.mrf.mxu2  ;;  %v22466_v60 = vpop.f32.mrf.mxu0  ;;  %v35018_v37 = vld [vmem:[%s35902_s30 + $0x3918] sm:$0xff] }
 0x73d   : > { %22729 = vmatpush.bf16.msra.mxu1 %v34997_v38  ;;  %v22491_v57 = vadd.f32 %v22490_v56, %v22478_v51  ;;  %v22503_v59 = vpop.f32.mrf.mxu3  ;;  %v22479_v63 = vpop.f32.mrf.mxu1  ;;  %v35026_v38 = vld [vmem:[%s35902_s30 + $0x3958] sm:$0xff]  ;;  %v35016_v51 = vld [vmem:[%s35902_s30 + $0x3908] sm:$0xff] }
 0x73e   : > { %22742 = vmatpush.bf16.msra.mxu2 %v35005_v39  ;;  %v35034_v39 = vld [vmem:[%s35902_s30 + $0x3998] sm:$0xff]  ;;  %v35040_v60 = vld [vmem:[%s35902_s30 + $0x39c8] sm:$0xff]  ;;  %v35023_v63 = vld [vmem:[%s35902_s30 + $0x3940] sm:$0xff] }
 0x73f   : > { %22755 = vmatpush.bf16.msra.mxu3 %v35013_v40  ;;  %v22504_v61 = vadd.f32 %v22503_v59, %v22491_v57  ;;  %v5316_v57 = vld [vmem:[#allocation1 + $0x2d] sm:$0xff] }
 0x740   : > { %22717 = vmatpush.bf16.msra.mxu0 %v34988_v41  ;;  %v317_v59 = vld [vmem:[%s35916_s27 + $0xe8] sm:$0xff] }
 0x741   : > { %22730 = vmatpush.bf16.msra.mxu1 %v34996_v42  ;;  %v35042_v42 = vld [vmem:[%s35902_s30 + $0x39d8] sm:$0xff] }
 0x742   : > { %22743 = vmatpush.bf16.msra.mxu2 %v35004_v43 }
 0x743   : > { %22756 = vmatpush.bf16.msra.mxu3 %v35012_v44 }
 0x744   : > { %22718 = vmatpush.bf16.msra.mxu0 %v34987_v47  ;;  %v22492_v6 = vpop.f32.mrf.mxu2 }
 0x745   : > { %22731 = vmatpush.bf16.msra.mxu1 %v34995_v49  ;;  %v22505_v8 = vpop.f32.mrf.mxu3  ;;  %v35033_v49 = vld [vmem:[%s35902_s30 + $0x3990] sm:$0xff] }
 0x746   : > { %22744 = vmatpush.bf16.msra.mxu2 %v35003_v50  ;;  %v35041_v50 = vld [vmem:[%s35902_s30 + $0x39d0] sm:$0xff] }
 0x747   : > { %22757 = vmatpush.bf16.msra.mxu3 %v35011_v52  ;;  %v35024_v52 = vld [vmem:[%s35902_s30 + $0x3948] sm:$0xff]  ;;  %v35053_v6 = vld [vmem:[%s35902_s30 + $0x3a30] sm:$0xff] }
 0x748   : > { %22719 = vmatpush.bf16.msra.mxu0 %v34986_v53  ;;  %v35032_v53 = vld [vmem:[%s35902_s30 + $0x3988] sm:$0xff]  ;;  %v35069_v8 = vld [vmem:[%s35902_s30 + $0x3ab0] sm:$0xff] }
 0x749   : > { %22732 = vmatpush.bf16.msra.mxu1 %v34994_v54  ;;  %v5315_v54 = vld [vmem:[#allocation1 + $0x24] sm:$0xff] }
 0x74a   : > { %22745 = vmatpush.bf16.msra.mxu2 %v35002_v55  ;;  %v5317_v55 = vld [vmem:[#allocation1 + $0x36] sm:$0xff] }
 0x74b   : > { %22758 = vmatpush.bf16.msra.mxu3 %v35010_v58  ;;  %v5318_v58 = vld [vmem:[#allocation1 + $0x3f] sm:$0xff] }
 0x74c   : > { %22720 = vmatpush.bf16.msra.mxu0 %v34985_v62  ;;  %5320 = vst [vmem:[#allocation1] ss:$9 sm:$0xff] %v317_v59  ;;  %v35015_v62 = vld [vmem:[%s35902_s30 + $0x3900] sm:$0xff]  ;;  %v35092_v59 = vld [vmem:[%s35902_s30 + $0x3b68] sm:$0xff] }
 0x74d   : > { %22733 = vmatpush.bf16.msra.mxu1 %v34993_v0  ;;  %v35031_v0 = vld [vmem:[%s35902_s30 + $0x3980] sm:$0xff] }
 0x74e   : > { %22746 = vmatpush.bf16.msra.mxu2 %v35001_v1  ;;  %v35054_v1 = vld [vmem:[%s35902_s30 + $0x3a38] sm:$0xff] }
 0x74f   : > { %22759 = vmatpush.bf16.msra.mxu3 %v35009_v2  ;;  %v35062_v2 = vld [vmem:[%s35902_s30 + $0x3a78] sm:$0xff] }
 0x750   : > { %22721 = vmatpush.bf16.msra.mxu0 %v34984_v3  ;;  %v35070_v3 = vld [vmem:[%s35902_s30 + $0x3ab8] sm:$0xff] }
 0x751   : > { %22734 = vmatpush.bf16.msra.mxu1 %v34992_v4  ;;  %v35039_v4 = vld [vmem:[%s35902_s30 + $0x39c0] sm:$0xff] }
 0x752   : > { %22747 = vmatpush.bf16.msra.mxu2 %v35000_v5  ;;  %v35078_v5 = vld [vmem:[%s35902_s30 + $0x3af8] sm:$0xff] }
 0x753   : > { %22760 = vmatpush.bf16.msra.mxu3 %v35008_v7  ;;  %v35061_v7 = vld [vmem:[%s35902_s30 + $0x3a70] sm:$0xff] }
 0x754   : > { %22722 = vmatpush.bf16.msra.mxu0 %v34983_v9  ;;  %v22516_v29 = vpop.f32.mrf.mxu0  ;;  %v35077_v9 = vld [vmem:[%s35902_s30 + $0x3af0] sm:$0xff] }
 0x755   : > { %22735 = vmatpush.bf16.msra.mxu1 %v34991_v10  ;;  %v22517_v30 = vadd.f32 %v22516_v29, %v22504_v61  ;;  %v22529_v32 = vpop.f32.mrf.mxu1  ;;  %v35052_v10 = vld [vmem:[%s35902_s30 + $0x3a28] sm:$0xff] }
 0x756   : > { %22748 = vmatpush.bf16.msra.mxu2 %v34999_v11  ;;  %v35060_v11 = vld [vmem:[%s35902_s30 + $0x3a68] sm:$0xff] }
 0x757   : > { %22761 = vmatpush.bf16.msra.mxu3 %v35007_v15  ;;  %22723 = vmatmul.bf16.vlgmr.msra.gmra.mxu0 %v5311_v16  ;;  %v22530_v35 = vadd.f32 %v22529_v32, %v22517_v30  ;;  %v35051_v16 = vld [vmem:[%s35902_s30 + $0x3a20] sm:$0xff] }
 0x758   : > { %22767 = vmatpush.bf16.msrb.mxu0 %v35022_v12  ;;  %22736 = vmatmul.bf16.vlgmr.msra.gmra.mxu1 %v5312_v19  ;;  %v35068_v12 = vld [vmem:[%s35902_s30 + $0x3aa8] sm:$0xff]  ;;  %v35067_v19 = vld [vmem:[%s35902_s30 + $0x3aa0] sm:$0xff] }
 0x759   : > { %22780 = vmatpush.bf16.msrb.mxu1 %v35030_v13  ;;  %22749 = vmatmul.bf16.vlgmr.msra.gmra.mxu2 %v5313_v17  ;;  %v35076_v13 = vld [vmem:[%s35902_s30 + $0x3ae8] sm:$0xff] }
 0x75a   : > { %22793 = vmatpush.bf16.msrb.mxu2 %v35038_v14  ;;  %22762 = vmatmul.bf16.vlgmr.msra.gmra.mxu3 %v5314_v21  ;;  %v35075_v21 = vld [vmem:[%s35902_s30 + $0x3ae0] sm:$0xff] }
 0x75b   : > { %22806 = vmatpush.bf16.msrb.mxu3 %v35046_v18  ;;  %v35059_v18 = vld [vmem:[%s35902_s30 + $0x3a60] sm:$0xff] }
 0x75c   : > { %22768 = vmatpush.bf16.msrb.mxu0 %v35021_v20  ;;  %v22542_v40 = vpop.f32.mrf.mxu2  ;;  %v22518_v44 = vpop.f32.mrf.mxu0 }
 0x75d   : > { %22781 = vmatpush.bf16.msrb.mxu1 %v35029_v22  ;;  %v22543_v41 = vadd.f32 %v22542_v40, %v22530_v35  ;;  %v22555_v43 = vpop.f32.mrf.mxu3  ;;  %v22531_v47 = vpop.f32.mrf.mxu1  ;;  %v35050_v22 = vld [vmem:[%s35902_s30 + $0x3a18] sm:$0xff]  ;;  %v35073_v35 = vld [vmem:[%s35902_s30 + $0x3ad0] sm:$0xff]  ;;  %v35072_v40 = vld [vmem:[%s35902_s30 + $0x3ac8] sm:$0xff] }
 0x75e   : > { %22794 = vmatpush.bf16.msrb.mxu2 %v35037_v23  ;;  %v35058_v23 = vld [vmem:[%s35902_s30 + $0x3a58] sm:$0xff]  ;;  %v35063_v44 = vld [vmem:[%s35902_s30 + $0x3a80] sm:$0xff] }
 0x75f   : > { %22807 = vmatpush.bf16.msrb.mxu3 %v35045_v24  ;;  %v37865_v45 = vadd.f32 %v22555_v43, %v22543_v41  ;;  %v35066_v24 = vld [vmem:[%s35902_s30 + $0x3a98] sm:$0xff]  ;;  %v35055_v43 = vld [vmem:[%s35902_s30 + $0x3a40] sm:$0xff] }
 0x760   : > { %22769 = vmatpush.bf16.msrb.mxu0 %v35020_v25  ;;  %v35102_v47 = vld [vmem:[%s35902_s30 + $0x3bb8] sm:$0xff] }
 0x761   : > { %22782 = vmatpush.bf16.msrb.mxu1 %v35028_v26 }
 0x762   : > { %22795 = vmatpush.bf16.msrb.mxu2 %v35036_v27  ;;  %v35074_v27 = vld [vmem:[%s35902_s30 + $0x3ad8] sm:$0xff] }
 0x763   : > { %22808 = vmatpush.bf16.msrb.mxu3 %v35044_v28 }
 0x764   : > { %22770 = vmatpush.bf16.msrb.mxu0 %v35019_v31  ;;  %v22544_v56 = vpop.f32.mrf.mxu2  ;;  %v35049_v31 = vld [vmem:[%s35902_s30 + $0x3a10] sm:$0xff] }
 0x765   : > { %22783 = vmatpush.bf16.msrb.mxu1 %v35027_v33  ;;  %v22557_v61 = vpop.f32.mrf.mxu3  ;;  %v35057_v33 = vld [vmem:[%s35902_s30 + $0x3a50] sm:$0xff] }
 0x766   : > { %22796 = vmatpush.bf16.msrb.mxu2 %v35035_v34  ;;  %v35065_v34 = vld [vmem:[%s35902_s30 + $0x3a90] sm:$0xff]  ;;  %v35108_v61 = vld [vmem:[%s35902_s30 + $0x3be8] sm:$0xff] }
 0x767   : > { %22809 = vmatpush.bf16.msrb.mxu3 %v35043_v36  ;;  %v35048_v36 = vld [vmem:[%s35902_s30 + $0x3a08] sm:$0xff]  ;;  %v35101_v56 = vld [vmem:[%s35902_s30 + $0x3bb0] sm:$0xff] }
 0x768   : > { %22771 = vmatpush.bf16.msrb.mxu0 %v35018_v37  ;;  %v35056_v37 = vld [vmem:[%s35902_s30 + $0x3a48] sm:$0xff] }
 0x769   : > { %22784 = vmatpush.bf16.msrb.mxu1 %v35026_v38  ;;  %v35064_v38 = vld [vmem:[%s35902_s30 + $0x3a88] sm:$0xff] }
 0x76a   : > { %22797 = vmatpush.bf16.msrb.mxu2 %v35034_v39 }
 0x76b   : > { %22810 = vmatpush.bf16.msrb.mxu3 %v35042_v42  ;;  %v35047_v42 = vld [vmem:[%s35902_s30 + $0x3a00] sm:$0xff] }
 0x76c   : > { %22772 = vmatpush.bf16.msrb.mxu0 %v35017_v46  ;;  %v35094_v46 = vld [vmem:[%s35902_s30 + $0x3b78] sm:$0xff] }
 0x76d   : > { %22785 = vmatpush.bf16.msrb.mxu1 %v35025_v48  ;;  %v35071_v48 = vld [vmem:[%s35902_s30 + $0x3ac0] sm:$0xff] }
 0x76e   : > { %22798 = vmatpush.bf16.msrb.mxu2 %v35033_v49  ;;  %v5321_v49 = vld [vmem:[#allocation1] sm:$0xff] }
 0x76f   : > { %22811 = vmatpush.bf16.msrb.mxu3 %v35041_v50  ;;  %v5323_v50 = vld [vmem:[#allocation1 + $0x12] sm:$0xff] }
 0x770   : > { %22773 = vmatpush.bf16.msrb.mxu0 %v35016_v51  ;;  %v35110_v51 = vld [vmem:[%s35902_s30 + $0x3bf8] sm:$0xff] }
 0x771   : > { %22786 = vmatpush.bf16.msrb.mxu1 %v35024_v52  ;;  %v5322_v52 = vld [vmem:[#allocation1 + $0x9] sm:$0xff] }
 0x772   : > { %22799 = vmatpush.bf16.msrb.mxu2 %v35032_v53  ;;  %v35085_v53 = vld [vmem:[%s35902_s30 + $0x3b30] sm:$0xff] }
 0x773   : > { %22812 = vmatpush.bf16.msrb.mxu3 %v35040_v60  ;;  %v35100_v60 = vld [vmem:[%s35902_s30 + $0x3ba8] sm:$0xff] }
 0x774   : > { %22774 = vmatpush.bf16.msrb.mxu0 %v35015_v62  ;;  %v22568_v14 = vpop.f32.mrf.mxu0 }
 0x775   : > { %22787 = vmatpush.bf16.msrb.mxu1 %v35023_v63  ;;  %v22569_v15 = vadd.f32 %v22568_v14, %v37865_v45  ;;  %v22581_v17 = vpop.f32.mrf.mxu1  ;;  %v35086_v45 = vld [vmem:[%s35902_s30 + $0x3b38] sm:$0xff] }
 0x776   : > { %22800 = vmatpush.bf16.msrb.mxu2 %v35031_v0  ;;  %v35083_v0 = vld [vmem:[%s35902_s30 + $0x3b20] sm:$0xff] }
 0x777   : > { %22813 = vmatpush.bf16.msrb.mxu3 %v35039_v4  ;;  %22775 = vmatmul.bf16.vlgmr.msrb.gmra.mxu0 %v5315_v54  ;;  %v22582_v20 = vadd.f32 %v22581_v17, %v22569_v15  ;;  %v5324_v54 = vld [vmem:[#allocation1 + $0x1b] sm:$0xff] }
 0x778   : > { %22819 = vmatpush.bf16.msra.mxu0 %v35054_v1  ;;  %22788 = vmatmul.bf16.vlgmr.msrb.gmra.mxu1 %v5316_v57  ;;  %v35109_v57 = vld [vmem:[%s35902_s30 + $0x3bf0] sm:$0xff] }
 0x779   : > { %22832 = vmatpush.bf16.msra.mxu1 %v35062_v2  ;;  %22801 = vmatmul.bf16.vlgmr.msrb.gmra.mxu2 %v5317_v55  ;;  %v35093_v55 = vld [vmem:[%s35902_s30 + $0x3b70] sm:$0xff]  ;;  %v35091_v2 = vld [vmem:[%s35902_s30 + $0x3b60] sm:$0xff] }
 0x77a   : > { %22845 = vmatpush.bf16.msra.mxu2 %v35070_v3  ;;  %22814 = vmatmul.bf16.vlgmr.msrb.gmra.mxu3 %v5318_v58  ;;  %v35084_v58 = vld [vmem:[%s35902_s30 + $0x3b28] sm:$0xff]  ;;  %v35099_v3 = vld [vmem:[%s35902_s30 + $0x3ba0] sm:$0xff]  ;;  %v35081_v15 = vld [vmem:[%s35902_s30 + $0x3b10] sm:$0xff] }
 0x77b   : > { %22858 = vmatpush.bf16.msra.mxu3 %v35078_v5  ;;  %v35107_v5 = vld [vmem:[%s35902_s30 + $0x3be0] sm:$0xff]  ;;  %v35089_v17 = vld [vmem:[%s35902_s30 + $0x3b50] sm:$0xff] }
 0x77c   : > { %22820 = vmatpush.bf16.msra.mxu0 %v35053_v6  ;;  %v22594_v25 = vpop.f32.mrf.mxu2  ;;  %v22570_v29 = vpop.f32.mrf.mxu0  ;;  %v35082_v6 = vld [vmem:[%s35902_s30 + $0x3b18] sm:$0xff] }
 0x77d   : > { %22833 = vmatpush.bf16.msra.mxu1 %v35061_v7  ;;  %v22595_v26 = vadd.f32 %v22594_v25, %v22582_v20  ;;  %v22607_v28 = vpop.f32.mrf.mxu3  ;;  %v22583_v32 = vpop.f32.mrf.mxu1  ;;  %v35090_v7 = vld [vmem:[%s35902_s30 + $0x3b58] sm:$0xff]  ;;  %v35080_v20 = vld [vmem:[%s35902_s30 + $0x3b08] sm:$0xff] }
 0x77e   : > { %22846 = vmatpush.bf16.msra.mxu2 %v35069_v8  ;;  %v35098_v8 = vld [vmem:[%s35902_s30 + $0x3b98] sm:$0xff]  ;;  %v35104_v29 = vld [vmem:[%s35902_s30 + $0x3bc8] sm:$0xff]  ;;  %v35087_v32 = vld [vmem:[%s35902_s30 + $0x3b40] sm:$0xff] }
 0x77f   : > { %22859 = vmatpush.bf16.msra.mxu3 %v35077_v9  ;;  %v22608_v30 = vadd.f32 %v22607_v28, %v22595_v26  ;;  %v5326_v26 = vld [vmem:[#allocation1 + $0x2d] sm:$0xff] }
 0x780   : > { %22821 = vmatpush.bf16.msra.mxu0 %v35052_v10  ;;  %v318_v28 = vld [vmem:[%s35916_s27 + $0xf0] sm:$0xff] }
 0x781   : > { %22834 = vmatpush.bf16.msra.mxu1 %v35060_v11  ;;  %v35106_v11 = vld [vmem:[%s35902_s30 + $0x3bd8] sm:$0xff] }
 0x782   : > { %22847 = vmatpush.bf16.msra.mxu2 %v35068_v12 }
 0x783   : > { %22860 = vmatpush.bf16.msra.mxu3 %v35076_v13 }
 0x784   : > { %22822 = vmatpush.bf16.msra.mxu0 %v35051_v16  ;;  %v22596_v39 = vpop.f32.mrf.mxu2 }
 0x785   : > { %22835 = vmatpush.bf16.msra.mxu1 %v35059_v18  ;;  %v22609_v41 = vpop.f32.mrf.mxu3  ;;  %v35097_v18 = vld [vmem:[%s35902_s30 + $0x3b90] sm:$0xff] }
 0x786   : > { %22848 = vmatpush.bf16.msra.mxu2 %v35067_v19  ;;  %v35105_v19 = vld [vmem:[%s35902_s30 + $0x3bd0] sm:$0xff] }
 0x787   : > { %22861 = vmatpush.bf16.msra.mxu3 %v35075_v21  ;;  %v35088_v21 = vld [vmem:[%s35902_s30 + $0x3b48] sm:$0xff]  ;;  %v35117_v39 = vld [vmem:[%s35902_s30 + $0x3c30] sm:$0xff] }
 0x788   : > { %22823 = vmatpush.bf16.msra.mxu0 %v35050_v22  ;;  %v35096_v22 = vld [vmem:[%s35902_s30 + $0x3b88] sm:$0xff]  ;;  %v35133_v41 = vld [vmem:[%s35902_s30 + $0x3cb0] sm:$0xff] }
 0x789   : > { %22836 = vmatpush.bf16.msra.mxu1 %v35058_v23  ;;  %v5325_v23 = vld [vmem:[#allocation1 + $0x24] sm:$0xff] }
 0x78a   : > { %22849 = vmatpush.bf16.msra.mxu2 %v35066_v24  ;;  %v5327_v24 = vld [vmem:[#allocation1 + $0x36] sm:$0xff] }
 0x78b   : > { %22862 = vmatpush.bf16.msra.mxu3 %v35074_v27  ;;  %v5328_v27 = vld [vmem:[#allocation1 + $0x3f] sm:$0xff] }
 0x78c   : > { %22824 = vmatpush.bf16.msra.mxu0 %v35049_v31  ;;  %5330 = vst [vmem:[#allocation1] ss:$9 sm:$0xff] %v318_v28  ;;  %v35079_v31 = vld [vmem:[%s35902_s30 + $0x3b00] sm:$0xff]  ;;  %v35156_v28 = vld [vmem:[%s35902_s30 + $0x3d68] sm:$0xff] }
 0x78d   : > { %22837 = vmatpush.bf16.msra.mxu1 %v35057_v33  ;;  %v35095_v33 = vld [vmem:[%s35902_s30 + $0x3b80] sm:$0xff] }
 0x78e   : > { %22850 = vmatpush.bf16.msra.mxu2 %v35065_v34  ;;  %v35118_v34 = vld [vmem:[%s35902_s30 + $0x3c38] sm:$0xff] }
 0x78f   : > { %22863 = vmatpush.bf16.msra.mxu3 %v35073_v35  ;;  %v35126_v35 = vld [vmem:[%s35902_s30 + $0x3c78] sm:$0xff] }
 0x790   : > { %22825 = vmatpush.bf16.msra.mxu0 %v35048_v36  ;;  %v35134_v36 = vld [vmem:[%s35902_s30 + $0x3cb8] sm:$0xff] }
 0x791   : > { %22838 = vmatpush.bf16.msra.mxu1 %v35056_v37  ;;  %v35103_v37 = vld [vmem:[%s35902_s30 + $0x3bc0] sm:$0xff] }
 0x792   : > { %22851 = vmatpush.bf16.msra.mxu2 %v35064_v38  ;;  %v35142_v38 = vld [vmem:[%s35902_s30 + $0x3cf8] sm:$0xff] }
 0x793   : > { %22864 = vmatpush.bf16.msra.mxu3 %v35072_v40  ;;  %v35125_v40 = vld [vmem:[%s35902_s30 + $0x3c70] sm:$0xff] }
 0x794   : > { %22826 = vmatpush.bf16.msra.mxu0 %v35047_v42  ;;  %v22620_v62 = vpop.f32.mrf.mxu0  ;;  %v35141_v42 = vld [vmem:[%s35902_s30 + $0x3cf0] sm:$0xff] }
 0x795   : > { %22839 = vmatpush.bf16.msra.mxu1 %v35055_v43  ;;  %v22621_v63 = vadd.f32 %v22620_v62, %v22608_v30  ;;  %v22633_v1 = vpop.f32.mrf.mxu1  ;;  %v35116_v43 = vld [vmem:[%s35902_s30 + $0x3c28] sm:$0xff] }
 0x796   : > { %22852 = vmatpush.bf16.msra.mxu2 %v35063_v44  ;;  %v35124_v44 = vld [vmem:[%s35902_s30 + $0x3c68] sm:$0xff] }
 0x797   : > { %22865 = vmatpush.bf16.msra.mxu3 %v35071_v48  ;;  %22827 = vmatmul.bf16.vlgmr.msra.gmra.mxu0 %v5321_v49  ;;  %v22634_v4 = vadd.f32 %v22633_v1, %v22621_v63  ;;  %v35115_v49 = vld [vmem:[%s35902_s30 + $0x3c20] sm:$0xff] }
 0x798   : > { %22871 = vmatpush.bf16.msrb.mxu0 %v35086_v45  ;;  %22840 = vmatmul.bf16.vlgmr.msra.gmra.mxu1 %v5322_v52  ;;  %v35132_v45 = vld [vmem:[%s35902_s30 + $0x3ca8] sm:$0xff]  ;;  %v35131_v52 = vld [vmem:[%s35902_s30 + $0x3ca0] sm:$0xff] }
 0x799   : > { %22884 = vmatpush.bf16.msrb.mxu1 %v35094_v46  ;;  %22853 = vmatmul.bf16.vlgmr.msra.gmra.mxu2 %v5323_v50  ;;  %v35140_v46 = vld [vmem:[%s35902_s30 + $0x3ce8] sm:$0xff] }
 0x79a   : > { %22897 = vmatpush.bf16.msrb.mxu2 %v35102_v47  ;;  %22866 = vmatmul.bf16.vlgmr.msra.gmra.mxu3 %v5324_v54  ;;  %v35139_v54 = vld [vmem:[%s35902_s30 + $0x3ce0] sm:$0xff] }
 0x79b   : > { %22910 = vmatpush.bf16.msrb.mxu3 %v35110_v51  ;;  %v35123_v51 = vld [vmem:[%s35902_s30 + $0x3c60] sm:$0xff] }
 0x79c   : > { %22872 = vmatpush.bf16.msrb.mxu0 %v35085_v53  ;;  %v22646_v9 = vpop.f32.mrf.mxu2  ;;  %v22622_v13 = vpop.f32.mrf.mxu0 }
 0x79d   : > { %22885 = vmatpush.bf16.msrb.mxu1 %v35093_v55  ;;  %v22647_v10 = vadd.f32 %v22646_v9, %v22634_v4  ;;  %v22659_v12 = vpop.f32.mrf.mxu3  ;;  %v22635_v16 = vpop.f32.mrf.mxu1  ;;  %v35114_v55 = vld [vmem:[%s35902_s30 + $0x3c18] sm:$0xff]  ;;  %v35137_v4 = vld [vmem:[%s35902_s30 + $0x3cd0] sm:$0xff]  ;;  %v35136_v9 = vld [vmem:[%s35902_s30 + $0x3cc8] sm:$0xff] }
 0x79e   : > { %22898 = vmatpush.bf16.msrb.mxu2 %v35101_v56  ;;  %v35122_v56 = vld [vmem:[%s35902_s30 + $0x3c58] sm:$0xff]  ;;  %v35127_v13 = vld [vmem:[%s35902_s30 + $0x3c80] sm:$0xff] }
 0x79f   : > { %22911 = vmatpush.bf16.msrb.mxu3 %v35109_v57  ;;  %v37933_v14 = vadd.f32 %v22659_v12, %v22647_v10  ;;  %v35130_v57 = vld [vmem:[%s35902_s30 + $0x3c98] sm:$0xff]  ;;  %v35119_v12 = vld [vmem:[%s35902_s30 + $0x3c40] sm:$0xff] }
 0x7a0   : > { %22873 = vmatpush.bf16.msrb.mxu0 %v35084_v58  ;;  %v35166_v16 = vld [vmem:[%s35902_s30 + $0x3db8] sm:$0xff] }
 0x7a1   : > { %22886 = vmatpush.bf16.msrb.mxu1 %v35092_v59 }
 0x7a2   : > { %22899 = vmatpush.bf16.msrb.mxu2 %v35100_v60  ;;  %v35138_v60 = vld [vmem:[%s35902_s30 + $0x3cd8] sm:$0xff] }
 0x7a3   : > { %22912 = vmatpush.bf16.msrb.mxu3 %v35108_v61 }
 0x7a4   : > { %22874 = vmatpush.bf16.msrb.mxu0 %v35083_v0  ;;  %v22648_v25 = vpop.f32.mrf.mxu2  ;;  %v35113_v0 = vld [vmem:[%s35902_s30 + $0x3c10] sm:$0xff] }
 0x7a5   : > { %22887 = vmatpush.bf16.msrb.mxu1 %v35091_v2  ;;  %v22661_v30 = vpop.f32.mrf.mxu3  ;;  %v35121_v2 = vld [vmem:[%s35902_s30 + $0x3c50] sm:$0xff] }
 0x7a6   : > { %22900 = vmatpush.bf16.msrb.mxu2 %v35099_v3  ;;  %v35129_v3 = vld [vmem:[%s35902_s30 + $0x3c90] sm:$0xff]  ;;  %v35172_v30 = vld [vmem:[%s35902_s30 + $0x3de8] sm:$0xff] }
 0x7a7   : > { %22913 = vmatpush.bf16.msrb.mxu3 %v35107_v5  ;;  %v35112_v5 = vld [vmem:[%s35902_s30 + $0x3c08] sm:$0xff]  ;;  %v35165_v25 = vld [vmem:[%s35902_s30 + $0x3db0] sm:$0xff] }
 0x7a8   : > { %22875 = vmatpush.bf16.msrb.mxu0 %v35082_v6  ;;  %v35120_v6 = vld [vmem:[%s35902_s30 + $0x3c48] sm:$0xff] }
 0x7a9   : > { %22888 = vmatpush.bf16.msrb.mxu1 %v35090_v7  ;;  %v35128_v7 = vld [vmem:[%s35902_s30 + $0x3c88] sm:$0xff] }
 0x7aa   : > { %22901 = vmatpush.bf16.msrb.mxu2 %v35098_v8 }
 0x7ab   : > { %22914 = vmatpush.bf16.msrb.mxu3 %v35106_v11  ;;  %v35111_v11 = vld [vmem:[%s35902_s30 + $0x3c00] sm:$0xff] }
 0x7ac   : > { %22876 = vmatpush.bf16.msrb.mxu0 %v35081_v15  ;;  %v35158_v15 = vld [vmem:[%s35902_s30 + $0x3d78] sm:$0xff] }
 0x7ad   : > { %22889 = vmatpush.bf16.msrb.mxu1 %v35089_v17  ;;  %v35135_v17 = vld [vmem:[%s35902_s30 + $0x3cc0] sm:$0xff] }
 0x7ae   : > { %22902 = vmatpush.bf16.msrb.mxu2 %v35097_v18  ;;  %v5331_v18 = vld [vmem:[#allocation1] sm:$0xff] }
 0x7af   : > { %22915 = vmatpush.bf16.msrb.mxu3 %v35105_v19  ;;  %v5333_v19 = vld [vmem:[#allocation1 + $0x12] sm:$0xff] }
 0x7b0   : > { %22877 = vmatpush.bf16.msrb.mxu0 %v35080_v20  ;;  %v35174_v20 = vld [vmem:[%s35902_s30 + $0x3df8] sm:$0xff] }
 0x7b1   : > { %22890 = vmatpush.bf16.msrb.mxu1 %v35088_v21  ;;  %v5332_v21 = vld [vmem:[#allocation1 + $0x9] sm:$0xff] }
 0x7b2   : > { %22903 = vmatpush.bf16.msrb.mxu2 %v35096_v22  ;;  %v35149_v22 = vld [vmem:[%s35902_s30 + $0x3d30] sm:$0xff] }
 0x7b3   : > { %22916 = vmatpush.bf16.msrb.mxu3 %v35104_v29  ;;  %v35164_v29 = vld [vmem:[%s35902_s30 + $0x3da8] sm:$0xff] }
 0x7b4   : > { %22878 = vmatpush.bf16.msrb.mxu0 %v35079_v31  ;;  %v22672_v47 = vpop.f32.mrf.mxu0 }
 0x7b5   : > { %22891 = vmatpush.bf16.msrb.mxu1 %v35087_v32  ;;  %v22673_v48 = vadd.f32 %v22672_v47, %v37933_v14  ;;  %v22685_v50 = vpop.f32.mrf.mxu1  ;;  %v35150_v14 = vld [vmem:[%s35902_s30 + $0x3d38] sm:$0xff] }
 0x7b6   : > { %22904 = vmatpush.bf16.msrb.mxu2 %v35095_v33  ;;  %v35147_v33 = vld [vmem:[%s35902_s30 + $0x3d20] sm:$0xff] }
 0x7b7   : > { %22917 = vmatpush.bf16.msrb.mxu3 %v35103_v37  ;;  %22879 = vmatmul.bf16.vlgmr.msrb.gmra.mxu0 %v5325_v23  ;;  %v22686_v53 = vadd.f32 %v22685_v50, %v22673_v48  ;;  %v5334_v23 = vld [vmem:[#allocation1 + $0x1b] sm:$0xff] }
 0x7b8   : > { %22923 = vmatpush.bf16.msra.mxu0 %v35118_v34  ;;  %22892 = vmatmul.bf16.vlgmr.msrb.gmra.mxu1 %v5326_v26  ;;  %v35173_v26 = vld [vmem:[%s35902_s30 + $0x3df0] sm:$0xff] }
 0x7b9   : > { %22936 = vmatpush.bf16.msra.mxu1 %v35126_v35  ;;  %22905 = vmatmul.bf16.vlgmr.msrb.gmra.mxu2 %v5327_v24  ;;  %v35157_v24 = vld [vmem:[%s35902_s30 + $0x3d70] sm:$0xff]  ;;  %v35155_v35 = vld [vmem:[%s35902_s30 + $0x3d60] sm:$0xff] }
 0x7ba   : > { %22949 = vmatpush.bf16.msra.mxu2 %v35134_v36  ;;  %22918 = vmatmul.bf16.vlgmr.msrb.gmra.mxu3 %v5328_v27  ;;  %v35148_v27 = vld [vmem:[%s35902_s30 + $0x3d28] sm:$0xff]  ;;  %v35163_v36 = vld [vmem:[%s35902_s30 + $0x3da0] sm:$0xff]  ;;  %v35145_v48 = vld [vmem:[%s35902_s30 + $0x3d10] sm:$0xff] }
 0x7bb   : > { %22962 = vmatpush.bf16.msra.mxu3 %v35142_v38  ;;  %v35171_v38 = vld [vmem:[%s35902_s30 + $0x3de0] sm:$0xff]  ;;  %v35153_v50 = vld [vmem:[%s35902_s30 + $0x3d50] sm:$0xff] }
 0x7bc   : > { %22924 = vmatpush.bf16.msra.mxu0 %v35117_v39  ;;  %v22698_v58 = vpop.f32.mrf.mxu2  ;;  %v22674_v62 = vpop.f32.mrf.mxu0  ;;  %v35146_v39 = vld [vmem:[%s35902_s30 + $0x3d18] sm:$0xff] }
 0x7bd   : > { %22937 = vmatpush.bf16.msra.mxu1 %v35125_v40  ;;  %v22699_v59 = vadd.f32 %v22698_v58, %v22686_v53  ;;  %v22711_v61 = vpop.f32.mrf.mxu3  ;;  %v22687_v1 = vpop.f32.mrf.mxu1  ;;  %v35154_v40 = vld [vmem:[%s35902_s30 + $0x3d58] sm:$0xff]  ;;  %v35144_v53 = vld [vmem:[%s35902_s30 + $0x3d08] sm:$0xff] }
 0x7be   : > { %22950 = vmatpush.bf16.msra.mxu2 %v35133_v41  ;;  %v35162_v41 = vld [vmem:[%s35902_s30 + $0x3d98] sm:$0xff]  ;;  %v35168_v62 = vld [vmem:[%s35902_s30 + $0x3dc8] sm:$0xff]  ;;  %v35151_v1 = vld [vmem:[%s35902_s30 + $0x3d40] sm:$0xff] }
 0x7bf   : > { %22963 = vmatpush.bf16.msra.mxu3 %v35141_v42  ;;  %v22712_v63 = vadd.f32 %v22711_v61, %v22699_v59  ;;  %v5336_v59 = vld [vmem:[#allocation1 + $0x2d] sm:$0xff]  ;;  %v319_v61 = vld [vmem:[%s35916_s27 + $0xf8] sm:$0xff] }
 0x7c0   : > { %22925 = vmatpush.bf16.msra.mxu0 %v35116_v43 }
 0x7c1   : > { %22938 = vmatpush.bf16.msra.mxu1 %v35124_v44  ;;  %v35170_v44 = vld [vmem:[%s35902_s30 + $0x3dd8] sm:$0xff] }
 0x7c2   : > { %22951 = vmatpush.bf16.msra.mxu2 %v35132_v45 }
 0x7c3   : > { %22964 = vmatpush.bf16.msra.mxu3 %v35140_v46 }
 0x7c4   : > { %22926 = vmatpush.bf16.msra.mxu0 %v35115_v49  ;;  %v22700_v8 = vpop.f32.mrf.mxu2 }
 0x7c5   : > { %22939 = vmatpush.bf16.msra.mxu1 %v35123_v51  ;;  %v22713_v10 = vpop.f32.mrf.mxu3  ;;  %v35161_v51 = vld [vmem:[%s35902_s30 + $0x3d90] sm:$0xff] }
 0x7c6   : > { %22952 = vmatpush.bf16.msra.mxu2 %v35131_v52  ;;  %v35169_v52 = vld [vmem:[%s35902_s30 + $0x3dd0] sm:$0xff] }
 0x7c7   : > { %22965 = vmatpush.bf16.msra.mxu3 %v35139_v54  ;;  %v35152_v54 = vld [vmem:[%s35902_s30 + $0x3d48] sm:$0xff]  ;;  %v35181_v8 = vld [vmem:[%s35902_s30 + $0x3e30] sm:$0xff] }
 0x7c8   : > { %22927 = vmatpush.bf16.msra.mxu0 %v35114_v55  ;;  %v35160_v55 = vld [vmem:[%s35902_s30 + $0x3d88] sm:$0xff]  ;;  %v35197_v10 = vld [vmem:[%s35902_s30 + $0x3eb0] sm:$0xff] }
 0x7c9   : > { %22940 = vmatpush.bf16.msra.mxu1 %v35122_v56  ;;  %v5335_v56 = vld [vmem:[#allocation1 + $0x24] sm:$0xff] }
 0x7ca   : > { %22953 = vmatpush.bf16.msra.mxu2 %v35130_v57  ;;  %v5337_v57 = vld [vmem:[#allocation1 + $0x36] sm:$0xff] }
 0x7cb   : > { %22966 = vmatpush.bf16.msra.mxu3 %v35138_v60  ;;  %v5338_v60 = vld [vmem:[#allocation1 + $0x3f] sm:$0xff] }
 0x7cc   : > { %22928 = vmatpush.bf16.msra.mxu0 %v35113_v0  ;;  %5340 = vst [vmem:[#allocation1] ss:$9 sm:$0xff] %v319_v61  ;;  %v35143_v0 = vld [vmem:[%s35902_s30 + $0x3d00] sm:$0xff]  ;;  %v35220_v61 = vld [vmem:[%s35902_s30 + $0x3f68] sm:$0xff] }
 0x7cd   : > { %22941 = vmatpush.bf16.msra.mxu1 %v35121_v2  ;;  %v35159_v2 = vld [vmem:[%s35902_s30 + $0x3d80] sm:$0xff] }
 0x7ce   : > { %22954 = vmatpush.bf16.msra.mxu2 %v35129_v3  ;;  %v35182_v3 = vld [vmem:[%s35902_s30 + $0x3e38] sm:$0xff] }
 0x7cf   : > { %22967 = vmatpush.bf16.msra.mxu3 %v35137_v4  ;;  %v35190_v4 = vld [vmem:[%s35902_s30 + $0x3e78] sm:$0xff] }
 0x7d0   : > { %22929 = vmatpush.bf16.msra.mxu0 %v35112_v5  ;;  %v35198_v5 = vld [vmem:[%s35902_s30 + $0x3eb8] sm:$0xff] }
 0x7d1   : > { %22942 = vmatpush.bf16.msra.mxu1 %v35120_v6  ;;  %v35167_v6 = vld [vmem:[%s35902_s30 + $0x3dc0] sm:$0xff] }
 0x7d2   : > { %22955 = vmatpush.bf16.msra.mxu2 %v35128_v7  ;;  %v35206_v7 = vld [vmem:[%s35902_s30 + $0x3ef8] sm:$0xff] }
 0x7d3   : > { %22968 = vmatpush.bf16.msra.mxu3 %v35136_v9  ;;  %v35189_v9 = vld [vmem:[%s35902_s30 + $0x3e70] sm:$0xff] }
 0x7d4   : > { %22930 = vmatpush.bf16.msra.mxu0 %v35111_v11  ;;  %v22724_v31 = vpop.f32.mrf.mxu0  ;;  %v35205_v11 = vld [vmem:[%s35902_s30 + $0x3ef0] sm:$0xff] }
 0x7d5   : > { %22943 = vmatpush.bf16.msra.mxu1 %v35119_v12  ;;  %v22725_v32 = vadd.f32 %v22724_v31, %v22712_v63  ;;  %v22737_v34 = vpop.f32.mrf.mxu1  ;;  %v35180_v12 = vld [vmem:[%s35902_s30 + $0x3e28] sm:$0xff] }
 0x7d6   : > { %22956 = vmatpush.bf16.msra.mxu2 %v35127_v13  ;;  %v35188_v13 = vld [vmem:[%s35902_s30 + $0x3e68] sm:$0xff] }
 0x7d7   : > { %22969 = vmatpush.bf16.msra.mxu3 %v35135_v17  ;;  %22931 = vmatmul.bf16.vlgmr.msra.gmra.mxu0 %v5331_v18  ;;  %v22738_v37 = vadd.f32 %v22737_v34, %v22725_v32  ;;  %v35179_v18 = vld [vmem:[%s35902_s30 + $0x3e20] sm:$0xff] }
 0x7d8   : > { %22975 = vmatpush.bf16.msrb.mxu0 %v35150_v14  ;;  %22944 = vmatmul.bf16.vlgmr.msra.gmra.mxu1 %v5332_v21  ;;  %v35196_v14 = vld [vmem:[%s35902_s30 + $0x3ea8] sm:$0xff]  ;;  %v35195_v21 = vld [vmem:[%s35902_s30 + $0x3ea0] sm:$0xff] }
 0x7d9   : > { %22988 = vmatpush.bf16.msrb.mxu1 %v35158_v15  ;;  %22957 = vmatmul.bf16.vlgmr.msra.gmra.mxu2 %v5333_v19  ;;  %v35204_v15 = vld [vmem:[%s35902_s30 + $0x3ee8] sm:$0xff] }
 0x7da   : > { %23001 = vmatpush.bf16.msrb.mxu2 %v35166_v16  ;;  %22970 = vmatmul.bf16.vlgmr.msra.gmra.mxu3 %v5334_v23  ;;  %v35203_v23 = vld [vmem:[%s35902_s30 + $0x3ee0] sm:$0xff] }
 0x7db   : > { %23014 = vmatpush.bf16.msrb.mxu3 %v35174_v20  ;;  %v35187_v20 = vld [vmem:[%s35902_s30 + $0x3e60] sm:$0xff] }
 0x7dc   : > { %22976 = vmatpush.bf16.msrb.mxu0 %v35149_v22  ;;  %v22750_v42 = vpop.f32.mrf.mxu2  ;;  %v22726_v46 = vpop.f32.mrf.mxu0 }
 0x7dd   : > { %22989 = vmatpush.bf16.msrb.mxu1 %v35157_v24  ;;  %v22751_v43 = vadd.f32 %v22750_v42, %v22738_v37  ;;  %v22763_v45 = vpop.f32.mrf.mxu3  ;;  %v22739_v49 = vpop.f32.mrf.mxu1  ;;  %v35178_v24 = vld [vmem:[%s35902_s30 + $0x3e18] sm:$0xff]  ;;  %v35201_v37 = vld [vmem:[%s35902_s30 + $0x3ed0] sm:$0xff]  ;;  %v35200_v42 = vld [vmem:[%s35902_s30 + $0x3ec8] sm:$0xff] }
 0x7de   : > { %23002 = vmatpush.bf16.msrb.mxu2 %v35165_v25  ;;  %v35186_v25 = vld [vmem:[%s35902_s30 + $0x3e58] sm:$0xff]  ;;  %v35191_v46 = vld [vmem:[%s35902_s30 + $0x3e80] sm:$0xff] }
 0x7df   : > { %23015 = vmatpush.bf16.msrb.mxu3 %v35173_v26  ;;  %v38001_v47 = vadd.f32 %v22763_v45, %v22751_v43  ;;  %v35194_v26 = vld [vmem:[%s35902_s30 + $0x3e98] sm:$0xff]  ;;  %v35183_v45 = vld [vmem:[%s35902_s30 + $0x3e40] sm:$0xff] }
 0x7e0   : > { %22977 = vmatpush.bf16.msrb.mxu0 %v35148_v27  ;;  %v35230_v49 = vld [vmem:[%s35902_s30 + $0x3fb8] sm:$0xff] }
 0x7e1   : > { %22990 = vmatpush.bf16.msrb.mxu1 %v35156_v28 }
 0x7e2   : > { %23003 = vmatpush.bf16.msrb.mxu2 %v35164_v29  ;;  %v35202_v29 = vld [vmem:[%s35902_s30 + $0x3ed8] sm:$0xff] }
 0x7e3   : > { %23016 = vmatpush.bf16.msrb.mxu3 %v35172_v30 }
 0x7e4   : > { %22978 = vmatpush.bf16.msrb.mxu0 %v35147_v33  ;;  %v22752_v58 = vpop.f32.mrf.mxu2  ;;  %v35177_v33 = vld [vmem:[%s35902_s30 + $0x3e10] sm:$0xff] }
 0x7e5   : > { %22991 = vmatpush.bf16.msrb.mxu1 %v35155_v35  ;;  %v22765_v63 = vpop.f32.mrf.mxu3  ;;  %v35185_v35 = vld [vmem:[%s35902_s30 + $0x3e50] sm:$0xff] }
 0x7e6   : > { %23004 = vmatpush.bf16.msrb.mxu2 %v35163_v36  ;;  %v35193_v36 = vld [vmem:[%s35902_s30 + $0x3e90] sm:$0xff]  ;;  %v35236_v63 = vld [vmem:[%s35902_s30 + $0x3fe8] sm:$0xff] }
 0x7e7   : > { %23017 = vmatpush.bf16.msrb.mxu3 %v35171_v38  ;;  %v35176_v38 = vld [vmem:[%s35902_s30 + $0x3e08] sm:$0xff]  ;;  %v35229_v58 = vld [vmem:[%s35902_s30 + $0x3fb0] sm:$0xff] }
 0x7e8   : > { %22979 = vmatpush.bf16.msrb.mxu0 %v35146_v39  ;;  %v35184_v39 = vld [vmem:[%s35902_s30 + $0x3e48] sm:$0xff] }
 0x7e9   : > { %22992 = vmatpush.bf16.msrb.mxu1 %v35154_v40  ;;  %v35192_v40 = vld [vmem:[%s35902_s30 + $0x3e88] sm:$0xff] }
 0x7ea   : > { %23005 = vmatpush.bf16.msrb.mxu2 %v35162_v41 }
 0x7eb   : > { %23018 = vmatpush.bf16.msrb.mxu3 %v35170_v44  ;;  %v35175_v44 = vld [vmem:[%s35902_s30 + $0x3e00] sm:$0xff] }
 0x7ec   : > { %22980 = vmatpush.bf16.msrb.mxu0 %v35145_v48  ;;  %v35222_v48 = vld [vmem:[%s35902_s30 + $0x3f78] sm:$0xff] }
 0x7ed   : > { %22993 = vmatpush.bf16.msrb.mxu1 %v35153_v50  ;;  %v35199_v50 = vld [vmem:[%s35902_s30 + $0x3ec0] sm:$0xff] }
 0x7ee   : > { %23006 = vmatpush.bf16.msrb.mxu2 %v35161_v51  ;;  %v5341_v51 = vld [vmem:[#allocation1] sm:$0xff] }
 0x7ef   : > { %23019 = vmatpush.bf16.msrb.mxu3 %v35169_v52  ;;  %v5343_v52 = vld [vmem:[#allocation1 + $0x12] sm:$0xff] }
 0x7f0   : > { %22981 = vmatpush.bf16.msrb.mxu0 %v35144_v53  ;;  %v35238_v53 = vld [vmem:[%s35902_s30 + $0x3ff8] sm:$0xff] }
 0x7f1   : > { %22994 = vmatpush.bf16.msrb.mxu1 %v35152_v54  ;;  %v5342_v54 = vld [vmem:[#allocation1 + $0x9] sm:$0xff] }
 0x7f2   : > { %23007 = vmatpush.bf16.msrb.mxu2 %v35160_v55  ;;  %v35213_v55 = vld [vmem:[%s35902_s30 + $0x3f30] sm:$0xff] }
 0x7f3   : > { %23020 = vmatpush.bf16.msrb.mxu3 %v35168_v62  ;;  %v35228_v62 = vld [vmem:[%s35902_s30 + $0x3fa8] sm:$0xff] }
 0x7f4   : > { %22982 = vmatpush.bf16.msrb.mxu0 %v35143_v0  ;;  %v22776_v16 = vpop.f32.mrf.mxu0 }
 0x7f5   : > { %22995 = vmatpush.bf16.msrb.mxu1 %v35151_v1  ;;  %v22777_v17 = vadd.f32 %v22776_v16, %v38001_v47  ;;  %v22789_v19 = vpop.f32.mrf.mxu1  ;;  %v35214_v47 = vld [vmem:[%s35902_s30 + $0x3f38] sm:$0xff] }
 0x7f6   : > { %23008 = vmatpush.bf16.msrb.mxu2 %v35159_v2  ;;  %v35211_v2 = vld [vmem:[%s35902_s30 + $0x3f20] sm:$0xff] }
 0x7f7   : > { %23021 = vmatpush.bf16.msrb.mxu3 %v35167_v6  ;;  %22983 = vmatmul.bf16.vlgmr.msrb.gmra.mxu0 %v5335_v56  ;;  %v22790_v22 = vadd.f32 %v22789_v19, %v22777_v17  ;;  %v5344_v56 = vld [vmem:[#allocation1 + $0x1b] sm:$0xff] }
 0x7f8   : > { %23027 = vmatpush.bf16.msra.mxu0 %v35182_v3  ;;  %22996 = vmatmul.bf16.vlgmr.msrb.gmra.mxu1 %v5336_v59  ;;  %v35237_v59 = vld [vmem:[%s35902_s30 + $0x3ff0] sm:$0xff] }
 0x7f9   : > { %23040 = vmatpush.bf16.msra.mxu1 %v35190_v4  ;;  %23009 = vmatmul.bf16.vlgmr.msrb.gmra.mxu2 %v5337_v57  ;;  %v35221_v57 = vld [vmem:[%s35902_s30 + $0x3f70] sm:$0xff]  ;;  %v35219_v4 = vld [vmem:[%s35902_s30 + $0x3f60] sm:$0xff] }
 0x7fa   : > { %23053 = vmatpush.bf16.msra.mxu2 %v35198_v5  ;;  %23022 = vmatmul.bf16.vlgmr.msrb.gmra.mxu3 %v5338_v60  ;;  %v35212_v60 = vld [vmem:[%s35902_s30 + $0x3f28] sm:$0xff]  ;;  %v35227_v5 = vld [vmem:[%s35902_s30 + $0x3fa0] sm:$0xff]  ;;  %v35209_v17 = vld [vmem:[%s35902_s30 + $0x3f10] sm:$0xff] }
 0x7fb   : > { %23066 = vmatpush.bf16.msra.mxu3 %v35206_v7  ;;  %v35235_v7 = vld [vmem:[%s35902_s30 + $0x3fe0] sm:$0xff]  ;;  %v35217_v19 = vld [vmem:[%s35902_s30 + $0x3f50] sm:$0xff] }
 0x7fc   : > { %23028 = vmatpush.bf16.msra.mxu0 %v35181_v8  ;;  %v22802_v27 = vpop.f32.mrf.mxu2  ;;  %v22778_v31 = vpop.f32.mrf.mxu0  ;;  %v35210_v8 = vld [vmem:[%s35902_s30 + $0x3f18] sm:$0xff] }
 0x7fd   : > { %23041 = vmatpush.bf16.msra.mxu1 %v35189_v9  ;;  %v22803_v28 = vadd.f32 %v22802_v27, %v22790_v22  ;;  %v22815_v30 = vpop.f32.mrf.mxu3  ;;  %v22791_v34 = vpop.f32.mrf.mxu1  ;;  %v35218_v9 = vld [vmem:[%s35902_s30 + $0x3f58] sm:$0xff]  ;;  %v35208_v22 = vld [vmem:[%s35902_s30 + $0x3f08] sm:$0xff] }
 0x7fe   : > { %23054 = vmatpush.bf16.msra.mxu2 %v35197_v10  ;;  %v35226_v10 = vld [vmem:[%s35902_s30 + $0x3f98] sm:$0xff]  ;;  %v35232_v31 = vld [vmem:[%s35902_s30 + $0x3fc8] sm:$0xff]  ;;  %v35215_v34 = vld [vmem:[%s35902_s30 + $0x3f40] sm:$0xff] }
 0x7ff   : > { %23067 = vmatpush.bf16.msra.mxu3 %v35205_v11  ;;  %v22816_v32 = vadd.f32 %v22815_v30, %v22803_v28  ;;  %v5346_v28 = vld [vmem:[#allocation1 + $0x2d] sm:$0xff]  ;;  %v320_v30 = vld [vmem:[%s35916_s27 + $0x100] sm:$0xff] }
 0x800   : > { %23029 = vmatpush.bf16.msra.mxu0 %v35180_v12 }
 0x801   : > { %23042 = vmatpush.bf16.msra.mxu1 %v35188_v13  ;;  %v35234_v13 = vld [vmem:[%s35902_s30 + $0x3fd8] sm:$0xff] }
 0x802   : > { %23055 = vmatpush.bf16.msra.mxu2 %v35196_v14 }
 0x803   : > { %23068 = vmatpush.bf16.msra.mxu3 %v35204_v15 }
 0x804   : > { %23030 = vmatpush.bf16.msra.mxu0 %v35179_v18  ;;  %v22804_v41 = vpop.f32.mrf.mxu2 }
 0x805   : > { %23043 = vmatpush.bf16.msra.mxu1 %v35187_v20  ;;  %v22817_v43 = vpop.f32.mrf.mxu3  ;;  %v35225_v20 = vld [vmem:[%s35902_s30 + $0x3f90] sm:$0xff] }
 0x806   : > { %23056 = vmatpush.bf16.msra.mxu2 %v35195_v21  ;;  %v35233_v21 = vld [vmem:[%s35902_s30 + $0x3fd0] sm:$0xff] }
 0x807   : > { %23069 = vmatpush.bf16.msra.mxu3 %v35203_v23  ;;  %v35216_v23 = vld [vmem:[%s35902_s30 + $0x3f48] sm:$0xff]  ;;  %v35245_v41 = vld [vmem:[%s35902_s30 + $0x4030] sm:$0xff] }
 0x808   : > { %23031 = vmatpush.bf16.msra.mxu0 %v35178_v24  ;;  %v35224_v24 = vld [vmem:[%s35902_s30 + $0x3f88] sm:$0xff]  ;;  %v35261_v43 = vld [vmem:[%s35902_s30 + $0x40b0] sm:$0xff] }
 0x809   : > { %23044 = vmatpush.bf16.msra.mxu1 %v35186_v25  ;;  %v5345_v25 = vld [vmem:[#allocation1 + $0x24] sm:$0xff] }
 0x80a   : > { %23057 = vmatpush.bf16.msra.mxu2 %v35194_v26  ;;  %v5347_v26 = vld [vmem:[#allocation1 + $0x36] sm:$0xff] }
 0x80b   : > { %23070 = vmatpush.bf16.msra.mxu3 %v35202_v29  ;;  %v5348_v29 = vld [vmem:[#allocation1 + $0x3f] sm:$0xff] }
 0x80c   : > { %23032 = vmatpush.bf16.msra.mxu0 %v35177_v33  ;;  %5350 = vst [vmem:[#allocation1] ss:$9 sm:$0xff] %v320_v30  ;;  %v35207_v33 = vld [vmem:[%s35902_s30 + $0x3f00] sm:$0xff]  ;;  %v35284_v30 = vld [vmem:[%s35902_s30 + $0x4168] sm:$0xff] }
 0x80d   : > { %23045 = vmatpush.bf16.msra.mxu1 %v35185_v35  ;;  %v35223_v35 = vld [vmem:[%s35902_s30 + $0x3f80] sm:$0xff] }
 0x80e   : > { %23058 = vmatpush.bf16.msra.mxu2 %v35193_v36  ;;  %v35246_v36 = vld [vmem:[%s35902_s30 + $0x4038] sm:$0xff] }
 0x80f   : > { %23071 = vmatpush.bf16.msra.mxu3 %v35201_v37  ;;  %v35254_v37 = vld [vmem:[%s35902_s30 + $0x4078] sm:$0xff] }
 0x810   : > { %23033 = vmatpush.bf16.msra.mxu0 %v35176_v38  ;;  %v35262_v38 = vld [vmem:[%s35902_s30 + $0x40b8] sm:$0xff] }
 0x811   : > { %23046 = vmatpush.bf16.msra.mxu1 %v35184_v39  ;;  %v35231_v39 = vld [vmem:[%s35902_s30 + $0x3fc0] sm:$0xff] }
 0x812   : > { %23059 = vmatpush.bf16.msra.mxu2 %v35192_v40  ;;  %v35270_v40 = vld [vmem:[%s35902_s30 + $0x40f8] sm:$0xff] }
 0x813   : > { %23072 = vmatpush.bf16.msra.mxu3 %v35200_v42  ;;  %v35253_v42 = vld [vmem:[%s35902_s30 + $0x4070] sm:$0xff] }
 0x814   : > { %23034 = vmatpush.bf16.msra.mxu0 %v35175_v44  ;;  %v22828_v0 = vpop.f32.mrf.mxu0  ;;  %v35269_v44 = vld [vmem:[%s35902_s30 + $0x40f0] sm:$0xff] }
 0x815   : > { %23047 = vmatpush.bf16.msra.mxu1 %v35183_v45  ;;  %v22829_v1 = vadd.f32 %v22828_v0, %v22816_v32  ;;  %v22841_v3 = vpop.f32.mrf.mxu1  ;;  %v35244_v45 = vld [vmem:[%s35902_s30 + $0x4028] sm:$0xff] }
 0x816   : > { %23060 = vmatpush.bf16.msra.mxu2 %v35191_v46  ;;  %v35252_v46 = vld [vmem:[%s35902_s30 + $0x4068] sm:$0xff] }
 0x817   : > { %23073 = vmatpush.bf16.msra.mxu3 %v35199_v50  ;;  %23035 = vmatmul.bf16.vlgmr.msra.gmra.mxu0 %v5341_v51  ;;  %v22842_v6 = vadd.f32 %v22841_v3, %v22829_v1  ;;  %v35243_v51 = vld [vmem:[%s35902_s30 + $0x4020] sm:$0xff] }
 0x818   : > { %23079 = vmatpush.bf16.msrb.mxu0 %v35214_v47  ;;  %23048 = vmatmul.bf16.vlgmr.msra.gmra.mxu1 %v5342_v54  ;;  %v35260_v47 = vld [vmem:[%s35902_s30 + $0x40a8] sm:$0xff]  ;;  %v35259_v54 = vld [vmem:[%s35902_s30 + $0x40a0] sm:$0xff] }
 0x819   : > { %23092 = vmatpush.bf16.msrb.mxu1 %v35222_v48  ;;  %23061 = vmatmul.bf16.vlgmr.msra.gmra.mxu2 %v5343_v52  ;;  %v35268_v48 = vld [vmem:[%s35902_s30 + $0x40e8] sm:$0xff] }
 0x81a   : > { %23105 = vmatpush.bf16.msrb.mxu2 %v35230_v49  ;;  %23074 = vmatmul.bf16.vlgmr.msra.gmra.mxu3 %v5344_v56  ;;  %v35267_v56 = vld [vmem:[%s35902_s30 + $0x40e0] sm:$0xff] }
 0x81b   : > { %23118 = vmatpush.bf16.msrb.mxu3 %v35238_v53  ;;  %v35251_v53 = vld [vmem:[%s35902_s30 + $0x4060] sm:$0xff] }
 0x81c   : > { %23080 = vmatpush.bf16.msrb.mxu0 %v35213_v55  ;;  %v22854_v11 = vpop.f32.mrf.mxu2  ;;  %v22830_v15 = vpop.f32.mrf.mxu0 }
 0x81d   : > { %23093 = vmatpush.bf16.msrb.mxu1 %v35221_v57  ;;  %v22855_v12 = vadd.f32 %v22854_v11, %v22842_v6  ;;  %v22867_v14 = vpop.f32.mrf.mxu3  ;;  %v22843_v18 = vpop.f32.mrf.mxu1  ;;  %v35242_v57 = vld [vmem:[%s35902_s30 + $0x4018] sm:$0xff]  ;;  %v35265_v6 = vld [vmem:[%s35902_s30 + $0x40d0] sm:$0xff]  ;;  %v35264_v11 = vld [vmem:[%s35902_s30 + $0x40c8] sm:$0xff] }
 0x81e   : > { %23106 = vmatpush.bf16.msrb.mxu2 %v35229_v58  ;;  %v35250_v58 = vld [vmem:[%s35902_s30 + $0x4058] sm:$0xff]  ;;  %v35255_v15 = vld [vmem:[%s35902_s30 + $0x4080] sm:$0xff] }
 0x81f   : > { %23119 = vmatpush.bf16.msrb.mxu3 %v35237_v59  ;;  %v38069_v16 = vadd.f32 %v22867_v14, %v22855_v12  ;;  %v35258_v59 = vld [vmem:[%s35902_s30 + $0x4098] sm:$0xff]  ;;  %v35247_v14 = vld [vmem:[%s35902_s30 + $0x4040] sm:$0xff] }
 0x820   : > { %23081 = vmatpush.bf16.msrb.mxu0 %v35212_v60  ;;  %v35294_v18 = vld [vmem:[%s35902_s30 + $0x41b8] sm:$0xff] }
 0x821   : > { %23094 = vmatpush.bf16.msrb.mxu1 %v35220_v61 }
 0x822   : > { %23107 = vmatpush.bf16.msrb.mxu2 %v35228_v62  ;;  %v35266_v62 = vld [vmem:[%s35902_s30 + $0x40d8] sm:$0xff] }
 0x823   : > { %23120 = vmatpush.bf16.msrb.mxu3 %v35236_v63 }
 0x824   : > { %23082 = vmatpush.bf16.msrb.mxu0 %v35211_v2  ;;  %v22856_v27 = vpop.f32.mrf.mxu2  ;;  %v35241_v2 = vld [vmem:[%s35902_s30 + $0x4010] sm:$0xff] }
 0x825   : > { %23095 = vmatpush.bf16.msrb.mxu1 %v35219_v4  ;;  %v22869_v32 = vpop.f32.mrf.mxu3  ;;  %v35249_v4 = vld [vmem:[%s35902_s30 + $0x4050] sm:$0xff] }
 0x826   : > { %23108 = vmatpush.bf16.msrb.mxu2 %v35227_v5  ;;  %v35257_v5 = vld [vmem:[%s35902_s30 + $0x4090] sm:$0xff]  ;;  %v35300_v32 = vld [vmem:[%s35902_s30 + $0x41e8] sm:$0xff] }
 0x827   : > { %23121 = vmatpush.bf16.msrb.mxu3 %v35235_v7  ;;  %v35240_v7 = vld [vmem:[%s35902_s30 + $0x4008] sm:$0xff]  ;;  %v35293_v27 = vld [vmem:[%s35902_s30 + $0x41b0] sm:$0xff] }
 0x828   : > { %23083 = vmatpush.bf16.msrb.mxu0 %v35210_v8  ;;  %v35248_v8 = vld [vmem:[%s35902_s30 + $0x4048] sm:$0xff] }
 0x829   : > { %23096 = vmatpush.bf16.msrb.mxu1 %v35218_v9  ;;  %v35256_v9 = vld [vmem:[%s35902_s30 + $0x4088] sm:$0xff] }
 0x82a   : > { %23109 = vmatpush.bf16.msrb.mxu2 %v35226_v10 }
 0x82b   : > { %23122 = vmatpush.bf16.msrb.mxu3 %v35234_v13  ;;  %v35239_v13 = vld [vmem:[%s35902_s30 + $0x4000] sm:$0xff] }
 0x82c   : > { %23084 = vmatpush.bf16.msrb.mxu0 %v35209_v17  ;;  %v35286_v17 = vld [vmem:[%s35902_s30 + $0x4178] sm:$0xff] }
 0x82d   : > { %23097 = vmatpush.bf16.msrb.mxu1 %v35217_v19  ;;  %v35263_v19 = vld [vmem:[%s35902_s30 + $0x40c0] sm:$0xff] }
 0x82e   : > { %23110 = vmatpush.bf16.msrb.mxu2 %v35225_v20  ;;  %v5351_v20 = vld [vmem:[#allocation1] sm:$0xff] }
 0x82f   : > { %23123 = vmatpush.bf16.msrb.mxu3 %v35233_v21  ;;  %v5353_v21 = vld [vmem:[#allocation1 + $0x12] sm:$0xff] }
 0x830   : > { %23085 = vmatpush.bf16.msrb.mxu0 %v35208_v22  ;;  %v35302_v22 = vld [vmem:[%s35902_s30 + $0x41f8] sm:$0xff] }
 0x831   : > { %23098 = vmatpush.bf16.msrb.mxu1 %v35216_v23  ;;  %v5352_v23 = vld [vmem:[#allocation1 + $0x9] sm:$0xff] }
 0x832   : > { %23111 = vmatpush.bf16.msrb.mxu2 %v35224_v24  ;;  %v35277_v24 = vld [vmem:[%s35902_s30 + $0x4130] sm:$0xff] }
 0x833   : > { %23124 = vmatpush.bf16.msrb.mxu3 %v35232_v31  ;;  %v35292_v31 = vld [vmem:[%s35902_s30 + $0x41a8] sm:$0xff] }
 0x834   : > { %23086 = vmatpush.bf16.msrb.mxu0 %v35207_v33  ;;  %v22880_v49 = vpop.f32.mrf.mxu0 }
 0x835   : > { %23099 = vmatpush.bf16.msrb.mxu1 %v35215_v34  ;;  %v22881_v50 = vadd.f32 %v22880_v49, %v38069_v16  ;;  %v22893_v52 = vpop.f32.mrf.mxu1  ;;  %v35278_v16 = vld [vmem:[%s35902_s30 + $0x4138] sm:$0xff] }
 0x836   : > { %23112 = vmatpush.bf16.msrb.mxu2 %v35223_v35  ;;  %v35275_v35 = vld [vmem:[%s35902_s30 + $0x4120] sm:$0xff] }
 0x837   : > { %23125 = vmatpush.bf16.msrb.mxu3 %v35231_v39  ;;  %23087 = vmatmul.bf16.vlgmr.msrb.gmra.mxu0 %v5345_v25  ;;  %v22894_v55 = vadd.f32 %v22893_v52, %v22881_v50  ;;  %v5354_v25 = vld [vmem:[#allocation1 + $0x1b] sm:$0xff] }
 0x838   : > { %23131 = vmatpush.bf16.msra.mxu0 %v35246_v36  ;;  %23100 = vmatmul.bf16.vlgmr.msrb.gmra.mxu1 %v5346_v28  ;;  %v35301_v28 = vld [vmem:[%s35902_s30 + $0x41f0] sm:$0xff] }
 0x839   : > { %23144 = vmatpush.bf16.msra.mxu1 %v35254_v37  ;;  %23113 = vmatmul.bf16.vlgmr.msrb.gmra.mxu2 %v5347_v26  ;;  %v35285_v26 = vld [vmem:[%s35902_s30 + $0x4170] sm:$0xff]  ;;  %v35283_v37 = vld [vmem:[%s35902_s30 + $0x4160] sm:$0xff] }
 0x83a   : > { %23157 = vmatpush.bf16.msra.mxu2 %v35262_v38  ;;  %23126 = vmatmul.bf16.vlgmr.msrb.gmra.mxu3 %v5348_v29  ;;  %v35276_v29 = vld [vmem:[%s35902_s30 + $0x4128] sm:$0xff]  ;;  %v35291_v38 = vld [vmem:[%s35902_s30 + $0x41a0] sm:$0xff]  ;;  %v35273_v50 = vld [vmem:[%s35902_s30 + $0x4110] sm:$0xff] }
 0x83b   : > { %23170 = vmatpush.bf16.msra.mxu3 %v35270_v40  ;;  %v35299_v40 = vld [vmem:[%s35902_s30 + $0x41e0] sm:$0xff]  ;;  %v35281_v52 = vld [vmem:[%s35902_s30 + $0x4150] sm:$0xff] }
 0x83c   : > { %23132 = vmatpush.bf16.msra.mxu0 %v35245_v41  ;;  %v22906_v60 = vpop.f32.mrf.mxu2  ;;  %v22882_v0 = vpop.f32.mrf.mxu0  ;;  %v35274_v41 = vld [vmem:[%s35902_s30 + $0x4118] sm:$0xff] }
 0x83d   : > { %23145 = vmatpush.bf16.msra.mxu1 %v35253_v42  ;;  %v22907_v61 = vadd.f32 %v22906_v60, %v22894_v55  ;;  %v22919_v63 = vpop.f32.mrf.mxu3  ;;  %v22895_v3 = vpop.f32.mrf.mxu1  ;;  %v35282_v42 = vld [vmem:[%s35902_s30 + $0x4158] sm:$0xff]  ;;  %v35272_v55 = vld [vmem:[%s35902_s30 + $0x4108] sm:$0xff] }
 0x83e   : > { %23158 = vmatpush.bf16.msra.mxu2 %v35261_v43  ;;  %v35290_v43 = vld [vmem:[%s35902_s30 + $0x4198] sm:$0xff]  ;;  %v35296_v0 = vld [vmem:[%s35902_s30 + $0x41c8] sm:$0xff]  ;;  %v35279_v3 = vld [vmem:[%s35902_s30 + $0x4140] sm:$0xff] }
 0x83f   : > { %23171 = vmatpush.bf16.msra.mxu3 %v35269_v44  ;;  %v22920_v1 = vadd.f32 %v22919_v63, %v22907_v61  ;;  %v5356_v61 = vld [vmem:[#allocation1 + $0x2d] sm:$0xff] }
 0x840   : > { %23133 = vmatpush.bf16.msra.mxu0 %v35244_v45  ;;  %v321_v63 = vld [vmem:[%s35916_s27 + $0x108] sm:$0xff] }
 0x841   : > { %23146 = vmatpush.bf16.msra.mxu1 %v35252_v46  ;;  %v35298_v46 = vld [vmem:[%s35902_s30 + $0x41d8] sm:$0xff] }
 0x842   : > { %23159 = vmatpush.bf16.msra.mxu2 %v35260_v47 }
 0x843   : > { %23172 = vmatpush.bf16.msra.mxu3 %v35268_v48 }
 0x844   : > { %23134 = vmatpush.bf16.msra.mxu0 %v35243_v51  ;;  %v22908_v10 = vpop.f32.mrf.mxu2 }
 0x845   : > { %23147 = vmatpush.bf16.msra.mxu1 %v35251_v53  ;;  %v22921_v12 = vpop.f32.mrf.mxu3  ;;  %v35289_v53 = vld [vmem:[%s35902_s30 + $0x4190] sm:$0xff] }
 0x846   : > { %23160 = vmatpush.bf16.msra.mxu2 %v35259_v54  ;;  %v35297_v54 = vld [vmem:[%s35902_s30 + $0x41d0] sm:$0xff] }
 0x847   : > { %23173 = vmatpush.bf16.msra.mxu3 %v35267_v56  ;;  %v35280_v56 = vld [vmem:[%s35902_s30 + $0x4148] sm:$0xff]  ;;  %v35309_v10 = vld [vmem:[%s35902_s30 + $0x4230] sm:$0xff] }
 0x848   : > { %23135 = vmatpush.bf16.msra.mxu0 %v35242_v57  ;;  %v35288_v57 = vld [vmem:[%s35902_s30 + $0x4188] sm:$0xff]  ;;  %v35325_v12 = vld [vmem:[%s35902_s30 + $0x42b0] sm:$0xff] }
 0x849   : > { %23148 = vmatpush.bf16.msra.mxu1 %v35250_v58  ;;  %v5355_v58 = vld [vmem:[#allocation1 + $0x24] sm:$0xff] }
 0x84a   : > { %23161 = vmatpush.bf16.msra.mxu2 %v35258_v59  ;;  %v5357_v59 = vld [vmem:[#allocation1 + $0x36] sm:$0xff] }
 0x84b   : > { %23174 = vmatpush.bf16.msra.mxu3 %v35266_v62  ;;  %v5358_v62 = vld [vmem:[#allocation1 + $0x3f] sm:$0xff] }
 0x84c   : > { %23136 = vmatpush.bf16.msra.mxu0 %v35241_v2  ;;  %5360 = vst [vmem:[#allocation1] ss:$9 sm:$0xff] %v321_v63  ;;  %v35271_v2 = vld [vmem:[%s35902_s30 + $0x4100] sm:$0xff]  ;;  %v35348_v63 = vld [vmem:[%s35902_s30 + $0x4368] sm:$0xff] }
 0x84d   : > { %23149 = vmatpush.bf16.msra.mxu1 %v35249_v4  ;;  %v35287_v4 = vld [vmem:[%s35902_s30 + $0x4180] sm:$0xff] }
 0x84e   : > { %23162 = vmatpush.bf16.msra.mxu2 %v35257_v5  ;;  %v35310_v5 = vld [vmem:[%s35902_s30 + $0x4238] sm:$0xff] }
 0x84f   : > { %23175 = vmatpush.bf16.msra.mxu3 %v35265_v6  ;;  %v35318_v6 = vld [vmem:[%s35902_s30 + $0x4278] sm:$0xff] }
 0x850   : > { %23137 = vmatpush.bf16.msra.mxu0 %v35240_v7  ;;  %v35326_v7 = vld [vmem:[%s35902_s30 + $0x42b8] sm:$0xff] }
 0x851   : > { %23150 = vmatpush.bf16.msra.mxu1 %v35248_v8  ;;  %v35295_v8 = vld [vmem:[%s35902_s30 + $0x41c0] sm:$0xff] }
 0x852   : > { %23163 = vmatpush.bf16.msra.mxu2 %v35256_v9  ;;  %v35334_v9 = vld [vmem:[%s35902_s30 + $0x42f8] sm:$0xff] }
 0x853   : > { %23176 = vmatpush.bf16.msra.mxu3 %v35264_v11  ;;  %v35317_v11 = vld [vmem:[%s35902_s30 + $0x4270] sm:$0xff] }
 0x854   : > { %23138 = vmatpush.bf16.msra.mxu0 %v35239_v13  ;;  %v22932_v33 = vpop.f32.mrf.mxu0  ;;  %v35333_v13 = vld [vmem:[%s35902_s30 + $0x42f0] sm:$0xff] }
 0x855   : > { %23151 = vmatpush.bf16.msra.mxu1 %v35247_v14  ;;  %v22933_v34 = vadd.f32 %v22932_v33, %v22920_v1  ;;  %v22945_v36 = vpop.f32.mrf.mxu1  ;;  %v35308_v14 = vld [vmem:[%s35902_s30 + $0x4228] sm:$0xff] }
 0x856   : > { %23164 = vmatpush.bf16.msra.mxu2 %v35255_v15  ;;  %v35316_v15 = vld [vmem:[%s35902_s30 + $0x4268] sm:$0xff] }
 0x857   : > { %23177 = vmatpush.bf16.msra.mxu3 %v35263_v19  ;;  %23139 = vmatmul.bf16.vlgmr.msra.gmra.mxu0 %v5351_v20  ;;  %v22946_v39 = vadd.f32 %v22945_v36, %v22933_v34  ;;  %v35307_v20 = vld [vmem:[%s35902_s30 + $0x4220] sm:$0xff] }
 0x858   : > { %23183 = vmatpush.bf16.msrb.mxu0 %v35278_v16  ;;  %23152 = vmatmul.bf16.vlgmr.msra.gmra.mxu1 %v5352_v23  ;;  %v35324_v16 = vld [vmem:[%s35902_s30 + $0x42a8] sm:$0xff]  ;;  %v35323_v23 = vld [vmem:[%s35902_s30 + $0x42a0] sm:$0xff] }
 0x859   : > { %23196 = vmatpush.bf16.msrb.mxu1 %v35286_v17  ;;  %23165 = vmatmul.bf16.vlgmr.msra.gmra.mxu2 %v5353_v21  ;;  %v35332_v17 = vld [vmem:[%s35902_s30 + $0x42e8] sm:$0xff] }
 0x85a   : > { %23209 = vmatpush.bf16.msrb.mxu2 %v35294_v18  ;;  %23178 = vmatmul.bf16.vlgmr.msra.gmra.mxu3 %v5354_v25  ;;  %v35331_v25 = vld [vmem:[%s35902_s30 + $0x42e0] sm:$0xff] }
 0x85b   : > { %23222 = vmatpush.bf16.msrb.mxu3 %v35302_v22  ;;  %v35315_v22 = vld [vmem:[%s35902_s30 + $0x4260] sm:$0xff] }
 0x85c   : > { %23184 = vmatpush.bf16.msrb.mxu0 %v35277_v24  ;;  %v22958_v44 = vpop.f32.mrf.mxu2  ;;  %v22934_v48 = vpop.f32.mrf.mxu0 }
 0x85d   : > { %23197 = vmatpush.bf16.msrb.mxu1 %v35285_v26  ;;  %v22959_v45 = vadd.f32 %v22958_v44, %v22946_v39  ;;  %v22971_v47 = vpop.f32.mrf.mxu3  ;;  %v22947_v51 = vpop.f32.mrf.mxu1  ;;  %v35306_v26 = vld [vmem:[%s35902_s30 + $0x4218] sm:$0xff]  ;;  %v35329_v39 = vld [vmem:[%s35902_s30 + $0x42d0] sm:$0xff]  ;;  %v35328_v44 = vld [vmem:[%s35902_s30 + $0x42c8] sm:$0xff] }
 0x85e   : > { %23210 = vmatpush.bf16.msrb.mxu2 %v35293_v27  ;;  %v35314_v27 = vld [vmem:[%s35902_s30 + $0x4258] sm:$0xff]  ;;  %v35319_v48 = vld [vmem:[%s35902_s30 + $0x4280] sm:$0xff] }
 0x85f   : > { %23223 = vmatpush.bf16.msrb.mxu3 %v35301_v28  ;;  %v38137_v49 = vadd.f32 %v22971_v47, %v22959_v45  ;;  %v35322_v28 = vld [vmem:[%s35902_s30 + $0x4298] sm:$0xff]  ;;  %v35311_v47 = vld [vmem:[%s35902_s30 + $0x4240] sm:$0xff] }
 0x860   : > { %23185 = vmatpush.bf16.msrb.mxu0 %v35276_v29  ;;  %v35358_v51 = vld [vmem:[%s35902_s30 + $0x43b8] sm:$0xff] }
 0x861   : > { %23198 = vmatpush.bf16.msrb.mxu1 %v35284_v30 }
 0x862   : > { %23211 = vmatpush.bf16.msrb.mxu2 %v35292_v31  ;;  %v35330_v31 = vld [vmem:[%s35902_s30 + $0x42d8] sm:$0xff] }
 0x863   : > { %23224 = vmatpush.bf16.msrb.mxu3 %v35300_v32 }
 0x864   : > { %23186 = vmatpush.bf16.msrb.mxu0 %v35275_v35  ;;  %v22960_v60 = vpop.f32.mrf.mxu2  ;;  %v35305_v35 = vld [vmem:[%s35902_s30 + $0x4210] sm:$0xff] }
 0x865   : > { %23199 = vmatpush.bf16.msrb.mxu1 %v35283_v37  ;;  %v22973_v1 = vpop.f32.mrf.mxu3  ;;  %v35313_v37 = vld [vmem:[%s35902_s30 + $0x4250] sm:$0xff] }
 0x866   : > { %23212 = vmatpush.bf16.msrb.mxu2 %v35291_v38  ;;  %v35321_v38 = vld [vmem:[%s35902_s30 + $0x4290] sm:$0xff]  ;;  %v35364_v1 = vld [vmem:[%s35902_s30 + $0x43e8] sm:$0xff] }
 0x867   : > { %23225 = vmatpush.bf16.msrb.mxu3 %v35299_v40  ;;  %v35304_v40 = vld [vmem:[%s35902_s30 + $0x4208] sm:$0xff]  ;;  %v35357_v60 = vld [vmem:[%s35902_s30 + $0x43b0] sm:$0xff] }
 0x868   : > { %23187 = vmatpush.bf16.msrb.mxu0 %v35274_v41  ;;  %v35312_v41 = vld [vmem:[%s35902_s30 + $0x4248] sm:$0xff] }
 0x869   : > { %23200 = vmatpush.bf16.msrb.mxu1 %v35282_v42  ;;  %v35320_v42 = vld [vmem:[%s35902_s30 + $0x4288] sm:$0xff] }
 0x86a   : > { %23213 = vmatpush.bf16.msrb.mxu2 %v35290_v43 }
 0x86b   : > { %23226 = vmatpush.bf16.msrb.mxu3 %v35298_v46  ;;  %v35303_v46 = vld [vmem:[%s35902_s30 + $0x4200] sm:$0xff] }
 0x86c   : > { %23188 = vmatpush.bf16.msrb.mxu0 %v35273_v50  ;;  %v35350_v50 = vld [vmem:[%s35902_s30 + $0x4378] sm:$0xff] }
 0x86d   : > { %23201 = vmatpush.bf16.msrb.mxu1 %v35281_v52  ;;  %v35327_v52 = vld [vmem:[%s35902_s30 + $0x42c0] sm:$0xff] }
 0x86e   : > { %23214 = vmatpush.bf16.msrb.mxu2 %v35289_v53  ;;  %v5361_v53 = vld [vmem:[#allocation1] sm:$0xff] }
 0x86f   : > { %23227 = vmatpush.bf16.msrb.mxu3 %v35297_v54  ;;  %v5363_v54 = vld [vmem:[#allocation1 + $0x12] sm:$0xff] }
 0x870   : > { %23189 = vmatpush.bf16.msrb.mxu0 %v35272_v55  ;;  %v35366_v55 = vld [vmem:[%s35902_s30 + $0x43f8] sm:$0xff] }
 0x871   : > { %23202 = vmatpush.bf16.msrb.mxu1 %v35280_v56  ;;  %v5362_v56 = vld [vmem:[#allocation1 + $0x9] sm:$0xff] }
 0x872   : > { %23215 = vmatpush.bf16.msrb.mxu2 %v35288_v57  ;;  %v35341_v57 = vld [vmem:[%s35902_s30 + $0x4330] sm:$0xff] }
 0x873   : > { %23228 = vmatpush.bf16.msrb.mxu3 %v35296_v0  ;;  %v35356_v0 = vld [vmem:[%s35902_s30 + $0x43a8] sm:$0xff] }
 0x874   : > { %23190 = vmatpush.bf16.msrb.mxu0 %v35271_v2  ;;  %v22984_v18 = vpop.f32.mrf.mxu0 }
 0x875   : > { %23203 = vmatpush.bf16.msrb.mxu1 %v35279_v3  ;;  %v22985_v19 = vadd.f32 %v22984_v18, %v38137_v49  ;;  %v22997_v21 = vpop.f32.mrf.mxu1  ;;  %v35342_v49 = vld [vmem:[%s35902_s30 + $0x4338] sm:$0xff] }
 0x876   : > { %23216 = vmatpush.bf16.msrb.mxu2 %v35287_v4  ;;  %v35339_v4 = vld [vmem:[%s35902_s30 + $0x4320] sm:$0xff] }
 0x877   : > { %23229 = vmatpush.bf16.msrb.mxu3 %v35295_v8  ;;  %23191 = vmatmul.bf16.vlgmr.msrb.gmra.mxu0 %v5355_v58  ;;  %v22998_v24 = vadd.f32 %v22997_v21, %v22985_v19  ;;  %v5364_v58 = vld [vmem:[#allocation1 + $0x1b] sm:$0xff] }
 0x878   : > { %23235 = vmatpush.bf16.msra.mxu0 %v35310_v5  ;;  %23204 = vmatmul.bf16.vlgmr.msrb.gmra.mxu1 %v5356_v61  ;;  %v35365_v61 = vld [vmem:[%s35902_s30 + $0x43f0] sm:$0xff] }
 0x879   : > { %23248 = vmatpush.bf16.msra.mxu1 %v35318_v6  ;;  %23217 = vmatmul.bf16.vlgmr.msrb.gmra.mxu2 %v5357_v59  ;;  %v35349_v59 = vld [vmem:[%s35902_s30 + $0x4370] sm:$0xff]  ;;  %v35347_v6 = vld [vmem:[%s35902_s30 + $0x4360] sm:$0xff] }
 0x87a   : > { %23261 = vmatpush.bf16.msra.mxu2 %v35326_v7  ;;  %23230 = vmatmul.bf16.vlgmr.msrb.gmra.mxu3 %v5358_v62  ;;  %v35340_v62 = vld [vmem:[%s35902_s30 + $0x4328] sm:$0xff]  ;;  %v35355_v7 = vld [vmem:[%s35902_s30 + $0x43a0] sm:$0xff]  ;;  %v35337_v19 = vld [vmem:[%s35902_s30 + $0x4310] sm:$0xff] }
 0x87b   : > { %23274 = vmatpush.bf16.msra.mxu3 %v35334_v9  ;;  %v35363_v9 = vld [vmem:[%s35902_s30 + $0x43e0] sm:$0xff]  ;;  %v35345_v21 = vld [vmem:[%s35902_s30 + $0x4350] sm:$0xff] }
 0x87c   : > { %23236 = vmatpush.bf16.msra.mxu0 %v35309_v10  ;;  %v23010_v29 = vpop.f32.mrf.mxu2  ;;  %v22986_v33 = vpop.f32.mrf.mxu0  ;;  %v35338_v10 = vld [vmem:[%s35902_s30 + $0x4318] sm:$0xff] }
 0x87d   : > { %23249 = vmatpush.bf16.msra.mxu1 %v35317_v11  ;;  %v23011_v30 = vadd.f32 %v23010_v29, %v22998_v24  ;;  %v23023_v32 = vpop.f32.mrf.mxu3  ;;  %v22999_v36 = vpop.f32.mrf.mxu1  ;;  %v35346_v11 = vld [vmem:[%s35902_s30 + $0x4358] sm:$0xff]  ;;  %v35336_v24 = vld [vmem:[%s35902_s30 + $0x4308] sm:$0xff] }
 0x87e   : > { %23262 = vmatpush.bf16.msra.mxu2 %v35325_v12  ;;  %v35354_v12 = vld [vmem:[%s35902_s30 + $0x4398] sm:$0xff]  ;;  %v35360_v33 = vld [vmem:[%s35902_s30 + $0x43c8] sm:$0xff]  ;;  %v35343_v36 = vld [vmem:[%s35902_s30 + $0x4340] sm:$0xff] }
 0x87f   : > { %23275 = vmatpush.bf16.msra.mxu3 %v35333_v13  ;;  %v23024_v34 = vadd.f32 %v23023_v32, %v23011_v30  ;;  %v5366_v30 = vld [vmem:[#allocation1 + $0x2d] sm:$0xff] }
 0x880   : > { %23237 = vmatpush.bf16.msra.mxu0 %v35308_v14  ;;  %v322_v32 = vld [vmem:[%s35916_s27 + $0x110] sm:$0xff] }
 0x881   : > { %23250 = vmatpush.bf16.msra.mxu1 %v35316_v15  ;;  %v35362_v15 = vld [vmem:[%s35902_s30 + $0x43d8] sm:$0xff] }
 0x882   : > { %23263 = vmatpush.bf16.msra.mxu2 %v35324_v16 }
 0x883   : > { %23276 = vmatpush.bf16.msra.mxu3 %v35332_v17 }
 0x884   : > { %23238 = vmatpush.bf16.msra.mxu0 %v35307_v20  ;;  %v23012_v43 = vpop.f32.mrf.mxu2 }
 0x885   : > { %23251 = vmatpush.bf16.msra.mxu1 %v35315_v22  ;;  %v23025_v45 = vpop.f32.mrf.mxu3  ;;  %v35353_v22 = vld [vmem:[%s35902_s30 + $0x4390] sm:$0xff] }
 0x886   : > { %23264 = vmatpush.bf16.msra.mxu2 %v35323_v23  ;;  %v35361_v23 = vld [vmem:[%s35902_s30 + $0x43d0] sm:$0xff] }
 0x887   : > { %23277 = vmatpush.bf16.msra.mxu3 %v35331_v25  ;;  %v35344_v25 = vld [vmem:[%s35902_s30 + $0x4348] sm:$0xff]  ;;  %v35373_v43 = vld [vmem:[%s35902_s30 + $0x4430] sm:$0xff] }
 0x888   : > { %23239 = vmatpush.bf16.msra.mxu0 %v35306_v26  ;;  %v35352_v26 = vld [vmem:[%s35902_s30 + $0x4388] sm:$0xff]  ;;  %v35389_v45 = vld [vmem:[%s35902_s30 + $0x44b0] sm:$0xff] }
 0x889   : > { %23252 = vmatpush.bf16.msra.mxu1 %v35314_v27  ;;  %v5365_v27 = vld [vmem:[#allocation1 + $0x24] sm:$0xff] }
 0x88a   : > { %23265 = vmatpush.bf16.msra.mxu2 %v35322_v28  ;;  %v5367_v28 = vld [vmem:[#allocation1 + $0x36] sm:$0xff] }
 0x88b   : > { %23278 = vmatpush.bf16.msra.mxu3 %v35330_v31  ;;  %v5368_v31 = vld [vmem:[#allocation1 + $0x3f] sm:$0xff] }
 0x88c   : > { %23240 = vmatpush.bf16.msra.mxu0 %v35305_v35  ;;  %5370 = vst [vmem:[#allocation1] ss:$9 sm:$0xff] %v322_v32  ;;  %v35335_v35 = vld [vmem:[%s35902_s30 + $0x4300] sm:$0xff]  ;;  %v35412_v32 = vld [vmem:[%s35902_s30 + $0x4568] sm:$0xff] }
 0x88d   : > { %23253 = vmatpush.bf16.msra.mxu1 %v35313_v37  ;;  %v35351_v37 = vld [vmem:[%s35902_s30 + $0x4380] sm:$0xff] }
 0x88e   : > { %23266 = vmatpush.bf16.msra.mxu2 %v35321_v38  ;;  %v35374_v38 = vld [vmem:[%s35902_s30 + $0x4438] sm:$0xff] }
 0x88f   : > { %23279 = vmatpush.bf16.msra.mxu3 %v35329_v39  ;;  %v35382_v39 = vld [vmem:[%s35902_s30 + $0x4478] sm:$0xff] }
 0x890   : > { %23241 = vmatpush.bf16.msra.mxu0 %v35304_v40  ;;  %v35390_v40 = vld [vmem:[%s35902_s30 + $0x44b8] sm:$0xff] }
 0x891   : > { %23254 = vmatpush.bf16.msra.mxu1 %v35312_v41  ;;  %v35359_v41 = vld [vmem:[%s35902_s30 + $0x43c0] sm:$0xff] }
 0x892   : > { %23267 = vmatpush.bf16.msra.mxu2 %v35320_v42  ;;  %v35398_v42 = vld [vmem:[%s35902_s30 + $0x44f8] sm:$0xff] }
 0x893   : > { %23280 = vmatpush.bf16.msra.mxu3 %v35328_v44  ;;  %v35381_v44 = vld [vmem:[%s35902_s30 + $0x4470] sm:$0xff] }
 0x894   : > { %23242 = vmatpush.bf16.msra.mxu0 %v35303_v46  ;;  %v23036_v2 = vpop.f32.mrf.mxu0  ;;  %v35397_v46 = vld [vmem:[%s35902_s30 + $0x44f0] sm:$0xff] }
 0x895   : > { %23255 = vmatpush.bf16.msra.mxu1 %v35311_v47  ;;  %v23037_v3 = vadd.f32 %v23036_v2, %v23024_v34  ;;  %v23049_v5 = vpop.f32.mrf.mxu1  ;;  %v35372_v47 = vld [vmem:[%s35902_s30 + $0x4428] sm:$0xff] }
 0x896   : > { %23268 = vmatpush.bf16.msra.mxu2 %v35319_v48  ;;  %v35380_v48 = vld [vmem:[%s35902_s30 + $0x4468] sm:$0xff] }
 0x897   : > { %23281 = vmatpush.bf16.msra.mxu3 %v35327_v52  ;;  %23243 = vmatmul.bf16.vlgmr.msra.gmra.mxu0 %v5361_v53  ;;  %v23050_v8 = vadd.f32 %v23049_v5, %v23037_v3  ;;  %v35371_v53 = vld [vmem:[%s35902_s30 + $0x4420] sm:$0xff] }
 0x898   : > { %23287 = vmatpush.bf16.msrb.mxu0 %v35342_v49  ;;  %23256 = vmatmul.bf16.vlgmr.msra.gmra.mxu1 %v5362_v56  ;;  %v35388_v49 = vld [vmem:[%s35902_s30 + $0x44a8] sm:$0xff]  ;;  %v35387_v56 = vld [vmem:[%s35902_s30 + $0x44a0] sm:$0xff] }
 0x899   : > { %23300 = vmatpush.bf16.msrb.mxu1 %v35350_v50  ;;  %23269 = vmatmul.bf16.vlgmr.msra.gmra.mxu2 %v5363_v54  ;;  %v35396_v50 = vld [vmem:[%s35902_s30 + $0x44e8] sm:$0xff] }
 0x89a   : > { %23313 = vmatpush.bf16.msrb.mxu2 %v35358_v51  ;;  %23282 = vmatmul.bf16.vlgmr.msra.gmra.mxu3 %v5364_v58  ;;  %v35395_v58 = vld [vmem:[%s35902_s30 + $0x44e0] sm:$0xff] }
 0x89b   : > { %23326 = vmatpush.bf16.msrb.mxu3 %v35366_v55  ;;  %v35379_v55 = vld [vmem:[%s35902_s30 + $0x4460] sm:$0xff] }
 0x89c   : > { %23288 = vmatpush.bf16.msrb.mxu0 %v35341_v57  ;;  %v23062_v13 = vpop.f32.mrf.mxu2  ;;  %v23038_v17 = vpop.f32.mrf.mxu0 }
 0x89d   : > { %23301 = vmatpush.bf16.msrb.mxu1 %v35349_v59  ;;  %v23063_v14 = vadd.f32 %v23062_v13, %v23050_v8  ;;  %v23075_v16 = vpop.f32.mrf.mxu3  ;;  %v23051_v20 = vpop.f32.mrf.mxu1  ;;  %v35370_v59 = vld [vmem:[%s35902_s30 + $0x4418] sm:$0xff]  ;;  %v35393_v8 = vld [vmem:[%s35902_s30 + $0x44d0] sm:$0xff]  ;;  %v35392_v13 = vld [vmem:[%s35902_s30 + $0x44c8] sm:$0xff] }
 0x89e   : > { %23314 = vmatpush.bf16.msrb.mxu2 %v35357_v60  ;;  %v35378_v60 = vld [vmem:[%s35902_s30 + $0x4458] sm:$0xff]  ;;  %v35383_v17 = vld [vmem:[%s35902_s30 + $0x4480] sm:$0xff] }
 0x89f   : > { %23327 = vmatpush.bf16.msrb.mxu3 %v35365_v61  ;;  %v38205_v18 = vadd.f32 %v23075_v16, %v23063_v14  ;;  %v35386_v61 = vld [vmem:[%s35902_s30 + $0x4498] sm:$0xff]  ;;  %v35375_v16 = vld [vmem:[%s35902_s30 + $0x4440] sm:$0xff] }
 0x8a0   : > { %23289 = vmatpush.bf16.msrb.mxu0 %v35340_v62  ;;  %v35422_v20 = vld [vmem:[%s35902_s30 + $0x45b8] sm:$0xff] }
 0x8a1   : > { %23302 = vmatpush.bf16.msrb.mxu1 %v35348_v63 }
 0x8a2   : > { %23315 = vmatpush.bf16.msrb.mxu2 %v35356_v0  ;;  %v35394_v0 = vld [vmem:[%s35902_s30 + $0x44d8] sm:$0xff] }
 0x8a3   : > { %23328 = vmatpush.bf16.msrb.mxu3 %v35364_v1 }
 0x8a4   : > { %23290 = vmatpush.bf16.msrb.mxu0 %v35339_v4  ;;  %v23064_v29 = vpop.f32.mrf.mxu2  ;;  %v35369_v4 = vld [vmem:[%s35902_s30 + $0x4410] sm:$0xff] }
 0x8a5   : > { %23303 = vmatpush.bf16.msrb.mxu1 %v35347_v6  ;;  %v23077_v34 = vpop.f32.mrf.mxu3  ;;  %v35377_v6 = vld [vmem:[%s35902_s30 + $0x4450] sm:$0xff] }
 0x8a6   : > { %23316 = vmatpush.bf16.msrb.mxu2 %v35355_v7  ;;  %v35385_v7 = vld [vmem:[%s35902_s30 + $0x4490] sm:$0xff]  ;;  %v35428_v34 = vld [vmem:[%s35902_s30 + $0x45e8] sm:$0xff] }
 0x8a7   : > { %23329 = vmatpush.bf16.msrb.mxu3 %v35363_v9  ;;  %v35368_v9 = vld [vmem:[%s35902_s30 + $0x4408] sm:$0xff]  ;;  %v35421_v29 = vld [vmem:[%s35902_s30 + $0x45b0] sm:$0xff] }
 0x8a8   : > { %23291 = vmatpush.bf16.msrb.mxu0 %v35338_v10  ;;  %v35376_v10 = vld [vmem:[%s35902_s30 + $0x4448] sm:$0xff] }
 0x8a9   : > { %23304 = vmatpush.bf16.msrb.mxu1 %v35346_v11  ;;  %v35384_v11 = vld [vmem:[%s35902_s30 + $0x4488] sm:$0xff] }
 0x8aa   : > { %23317 = vmatpush.bf16.msrb.mxu2 %v35354_v12 }
 0x8ab   : > { %23330 = vmatpush.bf16.msrb.mxu3 %v35362_v15  ;;  %v35367_v15 = vld [vmem:[%s35902_s30 + $0x4400] sm:$0xff] }
 0x8ac   : > { %23292 = vmatpush.bf16.msrb.mxu0 %v35337_v19  ;;  %v35414_v19 = vld [vmem:[%s35902_s30 + $0x4578] sm:$0xff] }
 0x8ad   : > { %23305 = vmatpush.bf16.msrb.mxu1 %v35345_v21  ;;  %v35391_v21 = vld [vmem:[%s35902_s30 + $0x44c0] sm:$0xff] }
 0x8ae   : > { %23318 = vmatpush.bf16.msrb.mxu2 %v35353_v22  ;;  %v5371_v22 = vld [vmem:[#allocation1] sm:$0xff] }
 0x8af   : > { %23331 = vmatpush.bf16.msrb.mxu3 %v35361_v23  ;;  %v5373_v23 = vld [vmem:[#allocation1 + $0x12] sm:$0xff] }
 0x8b0   : > { %23293 = vmatpush.bf16.msrb.mxu0 %v35336_v24  ;;  %v35430_v24 = vld [vmem:[%s35902_s30 + $0x45f8] sm:$0xff] }
 0x8b1   : > { %23306 = vmatpush.bf16.msrb.mxu1 %v35344_v25  ;;  %v5372_v25 = vld [vmem:[#allocation1 + $0x9] sm:$0xff] }
 0x8b2   : > { %23319 = vmatpush.bf16.msrb.mxu2 %v35352_v26  ;;  %v35405_v26 = vld [vmem:[%s35902_s30 + $0x4530] sm:$0xff] }
 0x8b3   : > { %23332 = vmatpush.bf16.msrb.mxu3 %v35360_v33  ;;  %v35420_v33 = vld [vmem:[%s35902_s30 + $0x45a8] sm:$0xff] }
 0x8b4   : > { %23294 = vmatpush.bf16.msrb.mxu0 %v35335_v35  ;;  %v23088_v51 = vpop.f32.mrf.mxu0 }
 0x8b5   : > { %23307 = vmatpush.bf16.msrb.mxu1 %v35343_v36  ;;  %v23089_v52 = vadd.f32 %v23088_v51, %v38205_v18  ;;  %v23101_v54 = vpop.f32.mrf.mxu1  ;;  %v35406_v18 = vld [vmem:[%s35902_s30 + $0x4538] sm:$0xff] }
 0x8b6   : > { %23320 = vmatpush.bf16.msrb.mxu2 %v35351_v37  ;;  %v35403_v37 = vld [vmem:[%s35902_s30 + $0x4520] sm:$0xff] }
 0x8b7   : > { %23333 = vmatpush.bf16.msrb.mxu3 %v35359_v41  ;;  %23295 = vmatmul.bf16.vlgmr.msrb.gmra.mxu0 %v5365_v27  ;;  %v23102_v57 = vadd.f32 %v23101_v54, %v23089_v52  ;;  %v5374_v27 = vld [vmem:[#allocation1 + $0x1b] sm:$0xff] }
 0x8b8   : > { %23339 = vmatpush.bf16.msra.mxu0 %v35374_v38  ;;  %23308 = vmatmul.bf16.vlgmr.msrb.gmra.mxu1 %v5366_v30  ;;  %v35429_v30 = vld [vmem:[%s35902_s30 + $0x45f0] sm:$0xff] }
 0x8b9   : > { %23352 = vmatpush.bf16.msra.mxu1 %v35382_v39  ;;  %23321 = vmatmul.bf16.vlgmr.msrb.gmra.mxu2 %v5367_v28  ;;  %v35413_v28 = vld [vmem:[%s35902_s30 + $0x4570] sm:$0xff]  ;;  %v35411_v39 = vld [vmem:[%s35902_s30 + $0x4560] sm:$0xff] }
 0x8ba   : > { %23365 = vmatpush.bf16.msra.mxu2 %v35390_v40  ;;  %23334 = vmatmul.bf16.vlgmr.msrb.gmra.mxu3 %v5368_v31  ;;  %v35404_v31 = vld [vmem:[%s35902_s30 + $0x4528] sm:$0xff]  ;;  %v35419_v40 = vld [vmem:[%s35902_s30 + $0x45a0] sm:$0xff]  ;;  %v35401_v52 = vld [vmem:[%s35902_s30 + $0x4510] sm:$0xff] }
 0x8bb   : > { %23378 = vmatpush.bf16.msra.mxu3 %v35398_v42  ;;  %v35427_v42 = vld [vmem:[%s35902_s30 + $0x45e0] sm:$0xff]  ;;  %v35409_v54 = vld [vmem:[%s35902_s30 + $0x4550] sm:$0xff] }
 0x8bc   : > { %23340 = vmatpush.bf16.msra.mxu0 %v35373_v43  ;;  %v23114_v62 = vpop.f32.mrf.mxu2  ;;  %v23090_v2 = vpop.f32.mrf.mxu0  ;;  %v35402_v43 = vld [vmem:[%s35902_s30 + $0x4518] sm:$0xff] }
 0x8bd   : > { %23353 = vmatpush.bf16.msra.mxu1 %v35381_v44  ;;  %v23115_v63 = vadd.f32 %v23114_v62, %v23102_v57  ;;  %v23127_v1 = vpop.f32.mrf.mxu3  ;;  %v23103_v5 = vpop.f32.mrf.mxu1  ;;  %v35410_v44 = vld [vmem:[%s35902_s30 + $0x4558] sm:$0xff]  ;;  %v35400_v57 = vld [vmem:[%s35902_s30 + $0x4508] sm:$0xff] }
 0x8be   : > { %23366 = vmatpush.bf16.msra.mxu2 %v35389_v45  ;;  %v35418_v45 = vld [vmem:[%s35902_s30 + $0x4598] sm:$0xff]  ;;  %v35424_v2 = vld [vmem:[%s35902_s30 + $0x45c8] sm:$0xff]  ;;  %v35407_v5 = vld [vmem:[%s35902_s30 + $0x4540] sm:$0xff] }
 0x8bf   : > { %23379 = vmatpush.bf16.msra.mxu3 %v35397_v46  ;;  %v23128_v3 = vadd.f32 %v23127_v1, %v23115_v63  ;;  %v5376_v63 = vld [vmem:[#allocation1 + $0x2d] sm:$0xff]  ;;  %v323_v1 = vld [vmem:[%s35916_s27 + $0x118] sm:$0xff] }
 0x8c0   : > { %23341 = vmatpush.bf16.msra.mxu0 %v35372_v47 }
 0x8c1   : > { %23354 = vmatpush.bf16.msra.mxu1 %v35380_v48  ;;  %v35426_v48 = vld [vmem:[%s35902_s30 + $0x45d8] sm:$0xff] }
 0x8c2   : > { %23367 = vmatpush.bf16.msra.mxu2 %v35388_v49 }
 0x8c3   : > { %23380 = vmatpush.bf16.msra.mxu3 %v35396_v50 }
 0x8c4   : > { %23342 = vmatpush.bf16.msra.mxu0 %v35371_v53  ;;  %v23116_v12 = vpop.f32.mrf.mxu2 }
 0x8c5   : > { %23355 = vmatpush.bf16.msra.mxu1 %v35379_v55  ;;  %v23129_v14 = vpop.f32.mrf.mxu3  ;;  %v35417_v55 = vld [vmem:[%s35902_s30 + $0x4590] sm:$0xff] }
 0x8c6   : > { %23368 = vmatpush.bf16.msra.mxu2 %v35387_v56  ;;  %v35425_v56 = vld [vmem:[%s35902_s30 + $0x45d0] sm:$0xff] }
 0x8c7   : > { %23381 = vmatpush.bf16.msra.mxu3 %v35395_v58  ;;  %v35408_v58 = vld [vmem:[%s35902_s30 + $0x4548] sm:$0xff]  ;;  %v35437_v12 = vld [vmem:[%s35902_s30 + $0x4630] sm:$0xff] }
 0x8c8   : > { %23343 = vmatpush.bf16.msra.mxu0 %v35370_v59  ;;  %v35416_v59 = vld [vmem:[%s35902_s30 + $0x4588] sm:$0xff]  ;;  %v35453_v14 = vld [vmem:[%s35902_s30 + $0x46b0] sm:$0xff] }
 0x8c9   : > { %23356 = vmatpush.bf16.msra.mxu1 %v35378_v60  ;;  %v5375_v60 = vld [vmem:[#allocation1 + $0x24] sm:$0xff] }
 0x8ca   : > { %23369 = vmatpush.bf16.msra.mxu2 %v35386_v61  ;;  %v5377_v61 = vld [vmem:[#allocation1 + $0x36] sm:$0xff] }
 0x8cb   : > { %23382 = vmatpush.bf16.msra.mxu3 %v35394_v0  ;;  %v5378_v0 = vld [vmem:[#allocation1 + $0x3f] sm:$0xff] }
 0x8cc   : > { %23344 = vmatpush.bf16.msra.mxu0 %v35369_v4  ;;  %5380 = vst [vmem:[#allocation1] ss:$9 sm:$0xff] %v323_v1  ;;  %v35399_v4 = vld [vmem:[%s35902_s30 + $0x4500] sm:$0xff]  ;;  %v35476_v1 = vld [vmem:[%s35902_s30 + $0x4768] sm:$0xff] }
 0x8cd   : > { %23357 = vmatpush.bf16.msra.mxu1 %v35377_v6  ;;  %v35415_v6 = vld [vmem:[%s35902_s30 + $0x4580] sm:$0xff] }
 0x8ce   : > { %23370 = vmatpush.bf16.msra.mxu2 %v35385_v7  ;;  %v35438_v7 = vld [vmem:[%s35902_s30 + $0x4638] sm:$0xff] }
 0x8cf   : > { %23383 = vmatpush.bf16.msra.mxu3 %v35393_v8  ;;  %v35446_v8 = vld [vmem:[%s35902_s30 + $0x4678] sm:$0xff] }
 0x8d0   : > { %23345 = vmatpush.bf16.msra.mxu0 %v35368_v9  ;;  %v35454_v9 = vld [vmem:[%s35902_s30 + $0x46b8] sm:$0xff] }
 0x8d1   : > { %23358 = vmatpush.bf16.msra.mxu1 %v35376_v10  ;;  %v35423_v10 = vld [vmem:[%s35902_s30 + $0x45c0] sm:$0xff] }
 0x8d2   : > { %23371 = vmatpush.bf16.msra.mxu2 %v35384_v11  ;;  %v35462_v11 = vld [vmem:[%s35902_s30 + $0x46f8] sm:$0xff] }
 0x8d3   : > { %23384 = vmatpush.bf16.msra.mxu3 %v35392_v13  ;;  %v35445_v13 = vld [vmem:[%s35902_s30 + $0x4670] sm:$0xff] }
 0x8d4   : > { %23346 = vmatpush.bf16.msra.mxu0 %v35367_v15  ;;  %v23140_v35 = vpop.f32.mrf.mxu0  ;;  %v35461_v15 = vld [vmem:[%s35902_s30 + $0x46f0] sm:$0xff] }
 0x8d5   : > { %23359 = vmatpush.bf16.msra.mxu1 %v35375_v16  ;;  %v23141_v36 = vadd.f32 %v23140_v35, %v23128_v3  ;;  %v23153_v38 = vpop.f32.mrf.mxu1  ;;  %v35436_v16 = vld [vmem:[%s35902_s30 + $0x4628] sm:$0xff] }
 0x8d6   : > { %23372 = vmatpush.bf16.msra.mxu2 %v35383_v17  ;;  %v35444_v17 = vld [vmem:[%s35902_s30 + $0x4668] sm:$0xff] }
 0x8d7   : > { %23385 = vmatpush.bf16.msra.mxu3 %v35391_v21  ;;  %23347 = vmatmul.bf16.vlgmr.msra.gmra.mxu0 %v5371_v22  ;;  %v23154_v41 = vadd.f32 %v23153_v38, %v23141_v36  ;;  %v35435_v22 = vld [vmem:[%s35902_s30 + $0x4620] sm:$0xff] }
 0x8d8   : > { %23391 = vmatpush.bf16.msrb.mxu0 %v35406_v18  ;;  %23360 = vmatmul.bf16.vlgmr.msra.gmra.mxu1 %v5372_v25  ;;  %v35452_v18 = vld [vmem:[%s35902_s30 + $0x46a8] sm:$0xff]  ;;  %v35451_v25 = vld [vmem:[%s35902_s30 + $0x46a0] sm:$0xff] }
 0x8d9   : > { %23404 = vmatpush.bf16.msrb.mxu1 %v35414_v19  ;;  %23373 = vmatmul.bf16.vlgmr.msra.gmra.mxu2 %v5373_v23  ;;  %v35460_v19 = vld [vmem:[%s35902_s30 + $0x46e8] sm:$0xff] }
 0x8da   : > { %23417 = vmatpush.bf16.msrb.mxu2 %v35422_v20  ;;  %23386 = vmatmul.bf16.vlgmr.msra.gmra.mxu3 %v5374_v27  ;;  %v35459_v27 = vld [vmem:[%s35902_s30 + $0x46e0] sm:$0xff] }
 0x8db   : > { %23430 = vmatpush.bf16.msrb.mxu3 %v35430_v24  ;;  %v35443_v24 = vld [vmem:[%s35902_s30 + $0x4660] sm:$0xff] }
 0x8dc   : > { %23392 = vmatpush.bf16.msrb.mxu0 %v35405_v26  ;;  %v23166_v46 = vpop.f32.mrf.mxu2  ;;  %v23142_v50 = vpop.f32.mrf.mxu0 }
 0x8dd   : > { %23405 = vmatpush.bf16.msrb.mxu1 %v35413_v28  ;;  %v23167_v47 = vadd.f32 %v23166_v46, %v23154_v41  ;;  %v23179_v49 = vpop.f32.mrf.mxu3  ;;  %v23155_v53 = vpop.f32.mrf.mxu1  ;;  %v35434_v28 = vld [vmem:[%s35902_s30 + $0x4618] sm:$0xff]  ;;  %v35457_v41 = vld [vmem:[%s35902_s30 + $0x46d0] sm:$0xff]  ;;  %v35456_v46 = vld [vmem:[%s35902_s30 + $0x46c8] sm:$0xff] }
 0x8de   : > { %23418 = vmatpush.bf16.msrb.mxu2 %v35421_v29  ;;  %v35442_v29 = vld [vmem:[%s35902_s30 + $0x4658] sm:$0xff]  ;;  %v35447_v50 = vld [vmem:[%s35902_s30 + $0x4680] sm:$0xff] }
 0x8df   : > { %23431 = vmatpush.bf16.msrb.mxu3 %v35429_v30  ;;  %v38273_v51 = vadd.f32 %v23179_v49, %v23167_v47  ;;  %v35450_v30 = vld [vmem:[%s35902_s30 + $0x4698] sm:$0xff]  ;;  %v35439_v49 = vld [vmem:[%s35902_s30 + $0x4640] sm:$0xff] }
 0x8e0   : > { %23393 = vmatpush.bf16.msrb.mxu0 %v35404_v31  ;;  %v35486_v53 = vld [vmem:[%s35902_s30 + $0x47b8] sm:$0xff] }
 0x8e1   : > { %23406 = vmatpush.bf16.msrb.mxu1 %v35412_v32 }
 0x8e2   : > { %23419 = vmatpush.bf16.msrb.mxu2 %v35420_v33  ;;  %v35458_v33 = vld [vmem:[%s35902_s30 + $0x46d8] sm:$0xff] }
 0x8e3   : > { %23432 = vmatpush.bf16.msrb.mxu3 %v35428_v34 }
 0x8e4   : > { %23394 = vmatpush.bf16.msrb.mxu0 %v35403_v37  ;;  %v23168_v62 = vpop.f32.mrf.mxu2  ;;  %v35433_v37 = vld [vmem:[%s35902_s30 + $0x4610] sm:$0xff] }
 0x8e5   : > { %23407 = vmatpush.bf16.msrb.mxu1 %v35411_v39  ;;  %v23181_v3 = vpop.f32.mrf.mxu3  ;;  %v35441_v39 = vld [vmem:[%s35902_s30 + $0x4650] sm:$0xff] }
 0x8e6   : > { %23420 = vmatpush.bf16.msrb.mxu2 %v35419_v40  ;;  %v35449_v40 = vld [vmem:[%s35902_s30 + $0x4690] sm:$0xff]  ;;  %v35492_v3 = vld [vmem:[%s35902_s30 + $0x47e8] sm:$0xff] }
 0x8e7   : > { %23433 = vmatpush.bf16.msrb.mxu3 %v35427_v42  ;;  %v35432_v42 = vld [vmem:[%s35902_s30 + $0x4608] sm:$0xff]  ;;  %v35485_v62 = vld [vmem:[%s35902_s30 + $0x47b0] sm:$0xff] }
 0x8e8   : > { %23395 = vmatpush.bf16.msrb.mxu0 %v35402_v43  ;;  %v35440_v43 = vld [vmem:[%s35902_s30 + $0x4648] sm:$0xff] }
 0x8e9   : > { %23408 = vmatpush.bf16.msrb.mxu1 %v35410_v44  ;;  %v35448_v44 = vld [vmem:[%s35902_s30 + $0x4688] sm:$0xff] }
 0x8ea   : > { %23421 = vmatpush.bf16.msrb.mxu2 %v35418_v45 }
 0x8eb   : > { %23434 = vmatpush.bf16.msrb.mxu3 %v35426_v48  ;;  %v35431_v48 = vld [vmem:[%s35902_s30 + $0x4600] sm:$0xff] }
 0x8ec   : > { %23396 = vmatpush.bf16.msrb.mxu0 %v35401_v52  ;;  %v35478_v52 = vld [vmem:[%s35902_s30 + $0x4778] sm:$0xff] }
 0x8ed   : > { %23409 = vmatpush.bf16.msrb.mxu1 %v35409_v54  ;;  %v35455_v54 = vld [vmem:[%s35902_s30 + $0x46c0] sm:$0xff] }
 0x8ee   : > { %23422 = vmatpush.bf16.msrb.mxu2 %v35417_v55  ;;  %v5381_v55 = vld [vmem:[#allocation1] sm:$0xff] }
 0x8ef   : > { %23435 = vmatpush.bf16.msrb.mxu3 %v35425_v56  ;;  %v5383_v56 = vld [vmem:[#allocation1 + $0x12] sm:$0xff] }
 0x8f0   : > { %23397 = vmatpush.bf16.msrb.mxu0 %v35400_v57  ;;  %v35494_v57 = vld [vmem:[%s35902_s30 + $0x47f8] sm:$0xff] }
 0x8f1   : > { %23410 = vmatpush.bf16.msrb.mxu1 %v35408_v58  ;;  %v5382_v58 = vld [vmem:[#allocation1 + $0x9] sm:$0xff] }
 0x8f2   : > { %23423 = vmatpush.bf16.msrb.mxu2 %v35416_v59  ;;  %v35469_v59 = vld [vmem:[%s35902_s30 + $0x4730] sm:$0xff] }
 0x8f3   : > { %23436 = vmatpush.bf16.msrb.mxu3 %v35424_v2  ;;  %v35484_v2 = vld [vmem:[%s35902_s30 + $0x47a8] sm:$0xff] }
 0x8f4   : > { %23398 = vmatpush.bf16.msrb.mxu0 %v35399_v4  ;;  %v23192_v20 = vpop.f32.mrf.mxu0 }
 0x8f5   : > { %23411 = vmatpush.bf16.msrb.mxu1 %v35407_v5  ;;  %v23193_v21 = vadd.f32 %v23192_v20, %v38273_v51  ;;  %v23205_v23 = vpop.f32.mrf.mxu1  ;;  %v35470_v51 = vld [vmem:[%s35902_s30 + $0x4738] sm:$0xff] }
 0x8f6   : > { %23424 = vmatpush.bf16.msrb.mxu2 %v35415_v6  ;;  %v35467_v6 = vld [vmem:[%s35902_s30 + $0x4720] sm:$0xff] }
 0x8f7   : > { %23437 = vmatpush.bf16.msrb.mxu3 %v35423_v10  ;;  %23399 = vmatmul.bf16.vlgmr.msrb.gmra.mxu0 %v5375_v60  ;;  %v23206_v26 = vadd.f32 %v23205_v23, %v23193_v21  ;;  %v5384_v60 = vld [vmem:[#allocation1 + $0x1b] sm:$0xff] }
 0x8f8   : > { %23443 = vmatpush.bf16.msra.mxu0 %v35438_v7  ;;  %23412 = vmatmul.bf16.vlgmr.msrb.gmra.mxu1 %v5376_v63  ;;  %v35493_v63 = vld [vmem:[%s35902_s30 + $0x47f0] sm:$0xff] }
 0x8f9   : > { %23456 = vmatpush.bf16.msra.mxu1 %v35446_v8  ;;  %23425 = vmatmul.bf16.vlgmr.msrb.gmra.mxu2 %v5377_v61  ;;  %v35477_v61 = vld [vmem:[%s35902_s30 + $0x4770] sm:$0xff]  ;;  %v35475_v8 = vld [vmem:[%s35902_s30 + $0x4760] sm:$0xff] }
 0x8fa   : > { %23469 = vmatpush.bf16.msra.mxu2 %v35454_v9  ;;  %23438 = vmatmul.bf16.vlgmr.msrb.gmra.mxu3 %v5378_v0  ;;  %v35468_v0 = vld [vmem:[%s35902_s30 + $0x4728] sm:$0xff]  ;;  %v35483_v9 = vld [vmem:[%s35902_s30 + $0x47a0] sm:$0xff]  ;;  %v35465_v21 = vld [vmem:[%s35902_s30 + $0x4710] sm:$0xff] }
 0x8fb   : > { %23482 = vmatpush.bf16.msra.mxu3 %v35462_v11  ;;  %v35491_v11 = vld [vmem:[%s35902_s30 + $0x47e0] sm:$0xff]  ;;  %v35473_v23 = vld [vmem:[%s35902_s30 + $0x4750] sm:$0xff] }
 0x8fc   : > { %23444 = vmatpush.bf16.msra.mxu0 %v35437_v12  ;;  %v23218_v31 = vpop.f32.mrf.mxu2  ;;  %v23194_v35 = vpop.f32.mrf.mxu0  ;;  %v35466_v12 = vld [vmem:[%s35902_s30 + $0x4718] sm:$0xff] }
 0x8fd   : > { %23457 = vmatpush.bf16.msra.mxu1 %v35445_v13  ;;  %v23219_v32 = vadd.f32 %v23218_v31, %v23206_v26  ;;  %v23231_v34 = vpop.f32.mrf.mxu3  ;;  %v23207_v38 = vpop.f32.mrf.mxu1  ;;  %v35474_v13 = vld [vmem:[%s35902_s30 + $0x4758] sm:$0xff]  ;;  %v35464_v26 = vld [vmem:[%s35902_s30 + $0x4708] sm:$0xff] }
 0x8fe   : > { %23470 = vmatpush.bf16.msra.mxu2 %v35453_v14  ;;  %v35482_v14 = vld [vmem:[%s35902_s30 + $0x4798] sm:$0xff]  ;;  %v35488_v35 = vld [vmem:[%s35902_s30 + $0x47c8] sm:$0xff]  ;;  %v35471_v38 = vld [vmem:[%s35902_s30 + $0x4740] sm:$0xff] }
 0x8ff   : > { %23483 = vmatpush.bf16.msra.mxu3 %v35461_v15  ;;  %v23232_v36 = vadd.f32 %v23231_v34, %v23219_v32  ;;  %v5386_v32 = vld [vmem:[#allocation1 + $0x2d] sm:$0xff]  ;;  %v324_v34 = vld [vmem:[%s35916_s27 + $0x120] sm:$0x3f] }
 0x900   : > { %23445 = vmatpush.bf16.msra.mxu0 %v35436_v16 }
 0x901   : > { %23458 = vmatpush.bf16.msra.mxu1 %v35444_v17  ;;  %v35490_v17 = vld [vmem:[%s35902_s30 + $0x47d8] sm:$0xff] }
 0x902   : > { %23471 = vmatpush.bf16.msra.mxu2 %v35452_v18 }
 0x903   : > { %23484 = vmatpush.bf16.msra.mxu3 %v35460_v19 }
 0x904   : > { %23446 = vmatpush.bf16.msra.mxu0 %v35435_v22  ;;  %v23220_v45 = vpop.f32.mrf.mxu2 }
 0x905   : > { %23459 = vmatpush.bf16.msra.mxu1 %v35443_v24  ;;  %v23233_v47 = vpop.f32.mrf.mxu3  ;;  %v35481_v24 = vld [vmem:[%s35902_s30 + $0x4790] sm:$0xff] }
 0x906   : > { %23472 = vmatpush.bf16.msra.mxu2 %v35451_v25  ;;  %v35489_v25 = vld [vmem:[%s35902_s30 + $0x47d0] sm:$0xff] }
 0x907   : > { %23485 = vmatpush.bf16.msra.mxu3 %v35459_v27  ;;  %v35472_v27 = vld [vmem:[%s35902_s30 + $0x4748] sm:$0xff]  ;;  %v35501_v45 = vld [vmem:[%s35902_s30 + $0x4830] sm:$0xff] }
 0x908   : > { %23447 = vmatpush.bf16.msra.mxu0 %v35434_v28  ;;  %v35480_v28 = vld [vmem:[%s35902_s30 + $0x4788] sm:$0xff]  ;;  %v35517_v47 = vld [vmem:[%s35902_s30 + $0x48b0] sm:$0xff] }
 0x909   : > { %23460 = vmatpush.bf16.msra.mxu1 %v35442_v29  ;;  %v5385_v29 = vld [vmem:[#allocation1 + $0x24] sm:$0xff] }
 0x90a   : > { %23473 = vmatpush.bf16.msra.mxu2 %v35450_v30  ;;  %v5387_v30 = vld [vmem:[#allocation1 + $0x36] sm:$0xff] }
 0x90b   : > { %23486 = vmatpush.bf16.msra.mxu3 %v35458_v33  ;;  %v5388_v33 = vld [vmem:[#allocation1 + $0x3f] sm:$0xff] }
 0x90c   : > { %23448 = vmatpush.bf16.msra.mxu0 %v35433_v37  ;;  %5390 = vst [vmem:[#allocation1] ss:$9 sm:$0xff] %v324_v34  ;;  %v35463_v37 = vld [vmem:[%s35902_s30 + $0x4700] sm:$0xff] }
 0x90d   : > { %23461 = vmatpush.bf16.msra.mxu1 %v35441_v39  ;;  %v35479_v39 = vld [vmem:[%s35902_s30 + $0x4780] sm:$0xff] }
 0x90e   : > { %23474 = vmatpush.bf16.msra.mxu2 %v35449_v40  ;;  %v35502_v40 = vld [vmem:[%s35902_s30 + $0x4838] sm:$0xff] }
 0x90f   : > { %23487 = vmatpush.bf16.msra.mxu3 %v35457_v41  ;;  %v35510_v41 = vld [vmem:[%s35902_s30 + $0x4878] sm:$0xff] }
 0x910   : > { %23449 = vmatpush.bf16.msra.mxu0 %v35432_v42  ;;  %v35518_v42 = vld [vmem:[%s35902_s30 + $0x48b8] sm:$0xff] }
 0x911   : > { %23462 = vmatpush.bf16.msra.mxu1 %v35440_v43  ;;  %v35487_v43 = vld [vmem:[%s35902_s30 + $0x47c0] sm:$0xff] }
 0x912   : > { %23475 = vmatpush.bf16.msra.mxu2 %v35448_v44  ;;  %v35526_v44 = vld [vmem:[%s35902_s30 + $0x48f8] sm:$0xff] }
 0x913   : > { %23488 = vmatpush.bf16.msra.mxu3 %v35456_v46  ;;  %v35509_v46 = vld [vmem:[%s35902_s30 + $0x4870] sm:$0xff] }
 0x914   : > { %23450 = vmatpush.bf16.msra.mxu0 %v35431_v48  ;;  %v23244_v4 = vpop.f32.mrf.mxu0  ;;  %v35525_v48 = vld [vmem:[%s35902_s30 + $0x48f0] sm:$0xff] }
 0x915   : > { %23463 = vmatpush.bf16.msra.mxu1 %v35439_v49  ;;  %v23245_v5 = vadd.f32 %v23244_v4, %v23232_v36  ;;  %v23257_v7 = vpop.f32.mrf.mxu1  ;;  %v35500_v49 = vld [vmem:[%s35902_s30 + $0x4828] sm:$0xff] }
 0x916   : > { %23476 = vmatpush.bf16.msra.mxu2 %v35447_v50  ;;  %v35508_v50 = vld [vmem:[%s35902_s30 + $0x4868] sm:$0xff] }
 0x917   : > { %23489 = vmatpush.bf16.msra.mxu3 %v35455_v54  ;;  %23451 = vmatmul.bf16.vlgmr.msra.gmra.mxu0 %v5381_v55  ;;  %v23258_v10 = vadd.f32 %v23257_v7, %v23245_v5  ;;  %v35499_v55 = vld [vmem:[%s35902_s30 + $0x4820] sm:$0xff] }
 0x918   : > { %23495 = vmatpush.bf16.msrb.mxu0 %v35470_v51  ;;  %23464 = vmatmul.bf16.vlgmr.msra.gmra.mxu1 %v5382_v58  ;;  %v35516_v51 = vld [vmem:[%s35902_s30 + $0x48a8] sm:$0xff]  ;;  %v35515_v58 = vld [vmem:[%s35902_s30 + $0x48a0] sm:$0xff] }
 0x919   : > { %23508 = vmatpush.bf16.msrb.mxu1 %v35478_v52  ;;  %23477 = vmatmul.bf16.vlgmr.msra.gmra.mxu2 %v5383_v56  ;;  %v35524_v52 = vld [vmem:[%s35902_s30 + $0x48e8] sm:$0xff] }
 0x91a   : > { %23521 = vmatpush.bf16.msrb.mxu2 %v35486_v53  ;;  %23490 = vmatmul.bf16.vlgmr.msra.gmra.mxu3 %v5384_v60  ;;  %v35523_v60 = vld [vmem:[%s35902_s30 + $0x48e0] sm:$0xff] }
 0x91b   : > { %23534 = vmatpush.bf16.msrb.mxu3 %v35494_v57  ;;  %v35507_v57 = vld [vmem:[%s35902_s30 + $0x4860] sm:$0xff] }
 0x91c   : > { %23496 = vmatpush.bf16.msrb.mxu0 %v35469_v59  ;;  %v23270_v15 = vpop.f32.mrf.mxu2  ;;  %v23246_v19 = vpop.f32.mrf.mxu0 }
 0x91d   : > { %23509 = vmatpush.bf16.msrb.mxu1 %v35477_v61  ;;  %v23271_v16 = vadd.f32 %v23270_v15, %v23258_v10  ;;  %v23283_v18 = vpop.f32.mrf.mxu3  ;;  %v23259_v22 = vpop.f32.mrf.mxu1  ;;  %v35498_v61 = vld [vmem:[%s35902_s30 + $0x4818] sm:$0xff]  ;;  %v35521_v10 = vld [vmem:[%s35902_s30 + $0x48d0] sm:$0xff]  ;;  %v35520_v15 = vld [vmem:[%s35902_s30 + $0x48c8] sm:$0xff] }
 0x91e   : > { %23522 = vmatpush.bf16.msrb.mxu2 %v35485_v62  ;;  %v35506_v62 = vld [vmem:[%s35902_s30 + $0x4858] sm:$0xff]  ;;  %v35511_v19 = vld [vmem:[%s35902_s30 + $0x4880] sm:$0xff] }
 0x91f   : > { %23535 = vmatpush.bf16.msrb.mxu3 %v35493_v63  ;;  %v38341_v20 = vadd.f32 %v23283_v18, %v23271_v16  ;;  %v35514_v63 = vld [vmem:[%s35902_s30 + $0x4898] sm:$0xff]  ;;  %v35503_v18 = vld [vmem:[%s35902_s30 + $0x4840] sm:$0xff] }
 0x920   : > { %23497 = vmatpush.bf16.msrb.mxu0 %v35468_v0  ;;  %v35519_v22 = vld [vmem:[%s35902_s30 + $0x48c0] sm:$0xff] }
 0x921   : > { %23510 = vmatpush.bf16.msrb.mxu1 %v35476_v1 }
 0x922   : > { %23523 = vmatpush.bf16.msrb.mxu2 %v35484_v2  ;;  %v35522_v2 = vld [vmem:[%s35902_s30 + $0x48d8] sm:$0xff] }
 0x923   : > { %23536 = vmatpush.bf16.msrb.mxu3 %v35492_v3 }
 0x924   : > { %23498 = vmatpush.bf16.msrb.mxu0 %v35467_v6  ;;  %v23272_v31 = vpop.f32.mrf.mxu2  ;;  %v35497_v6 = vld [vmem:[%s35902_s30 + $0x4810] sm:$0xff] }
 0x925   : > { %23511 = vmatpush.bf16.msrb.mxu1 %v35475_v8  ;;  %v23285_v36 = vpop.f32.mrf.mxu3  ;;  %v35505_v8 = vld [vmem:[%s35902_s30 + $0x4850] sm:$0xff] }
 0x926   : > { %23524 = vmatpush.bf16.msrb.mxu2 %v35483_v9  ;;  %v35513_v9 = vld [vmem:[%s35902_s30 + $0x4890] sm:$0xff] }
 0x927   : > { %23537 = vmatpush.bf16.msrb.mxu3 %v35491_v11  ;;  %v35496_v11 = vld [vmem:[%s35902_s30 + $0x4808] sm:$0xff] }
 0x928   : > { %23499 = vmatpush.bf16.msrb.mxu0 %v35466_v12  ;;  %v35504_v12 = vld [vmem:[%s35902_s30 + $0x4848] sm:$0xff] }
 0x929   : > { %23512 = vmatpush.bf16.msrb.mxu1 %v35474_v13  ;;  %v35512_v13 = vld [vmem:[%s35902_s30 + $0x4888] sm:$0xff] }
 0x92a   : > { %23525 = vmatpush.bf16.msrb.mxu2 %v35482_v14 }
 0x92b   : > { %23538 = vmatpush.bf16.msrb.mxu3 %v35490_v17  ;;  %v35495_v17 = vld [vmem:[%s35902_s30 + $0x4800] sm:$0xff] }
 0x92c   : > { %23500 = vmatpush.bf16.msrb.mxu0 %v35465_v21  ;;  %v35542_v21 = vld [vmem:[%s35902_s30 + $0x4978] sm:$0xff] }
 0x92d   : > { %23513 = vmatpush.bf16.msrb.mxu1 %v35473_v23  ;;  %v5391_v23 = vld [vmem:[#allocation1] sm:$0xff] }
 0x92e   : > { %23526 = vmatpush.bf16.msrb.mxu2 %v35481_v24  ;;  %v5393_v24 = vld [vmem:[#allocation1 + $0x12] sm:$0xff] }
 0x92f   : > { %23539 = vmatpush.bf16.msrb.mxu3 %v35489_v25  ;;  %v5392_v25 = vld [vmem:[#allocation1 + $0x9] sm:$0xff] }
 0x930   : > { %23501 = vmatpush.bf16.msrb.mxu0 %v35464_v26  ;;  %v35533_v26 = vld [vmem:[%s35902_s30 + $0x4930] sm:$0xff] }
 0x931   : > { %23514 = vmatpush.bf16.msrb.mxu1 %v35472_v27  ;;  %v5394_v27 = vld [vmem:[#allocation1 + $0x1b] sm:$0xff] }
 0x932   : > { %23527 = vmatpush.bf16.msrb.mxu2 %v35480_v28  ;;  %v35541_v28 = vld [vmem:[%s35902_s30 + $0x4970] sm:$0xff] }
 0x933   : > { %23540 = vmatpush.bf16.msrb.mxu3 %v35488_v35  ;;  %v35539_v35 = vld [vmem:[%s35902_s30 + $0x4960] sm:$0xff] }
 0x934   : > { %23502 = vmatpush.bf16.msrb.mxu0 %v35463_v37  ;;  %v23296_v53 = vpop.f32.mrf.mxu0  ;;  %v35530_v37 = vld [vmem:[%s35902_s30 + $0x4918] sm:$0xff] }
 0x935   : > { %23515 = vmatpush.bf16.msrb.mxu1 %v35471_v38  ;;  %v23297_v54 = vadd.f32 %v23296_v53, %v38341_v20  ;;  %v23309_v56 = vpop.f32.mrf.mxu1  ;;  %v35534_v20 = vld [vmem:[%s35902_s30 + $0x4938] sm:$0xff] }
 0x936   : > { %23528 = vmatpush.bf16.msrb.mxu2 %v35479_v39  ;;  %v35538_v38 = vld [vmem:[%s35902_s30 + $0x4958] sm:$0xff] }
 0x937   : > { %23541 = vmatpush.bf16.msrb.mxu3 %v35487_v43  ;;  %23503 = vmatmul.bf16.vlgmr.msrb.gmra.mxu0 %v5385_v29  ;;  %v23310_v59 = vadd.f32 %v23309_v56, %v23297_v54  ;;  %v35532_v29 = vld [vmem:[%s35902_s30 + $0x4928] sm:$0xff]  ;;  %v5395_v53 = vld [vmem:[#allocation1 + $0x24] sm:$0xff] }
 0x938   : > { %23547 = vmatpush.bf16.msra.mxu0 %v35502_v40  ;;  %23516 = vmatmul.bf16.vlgmr.msrb.gmra.mxu1 %v5386_v32  ;;  %v5396_v54 = vld [vmem:[#allocation1 + $0x2d] sm:$0xff] }
 0x939   : > { %23560 = vmatpush.bf16.msra.mxu1 %v35510_v41  ;;  %23529 = vmatmul.bf16.vlgmr.msrb.gmra.mxu2 %v5387_v30  ;;  %v35540_v30 = vld [vmem:[%s35902_s30 + $0x4968] sm:$0xff] }
 0x93a   : > { %23573 = vmatpush.bf16.msra.mxu2 %v35518_v42  ;;  %23542 = vmatmul.bf16.vlgmr.msrb.gmra.mxu3 %v5388_v33  ;;  %v35531_v33 = vld [vmem:[%s35902_s30 + $0x4920] sm:$0xff] }
 0x93b   : > { %23586 = vmatpush.bf16.msra.mxu3 %v35526_v44  ;;  %v35529_v44 = vld [vmem:[%s35902_s30 + $0x4910] sm:$0xff] }
 0x93c   : > { %23548 = vmatpush.bf16.msra.mxu0 %v35501_v45  ;;  %v23322_v0 = vpop.f32.mrf.mxu2  ;;  %v23298_v4 = vpop.f32.mrf.mxu0 }
 0x93d   : > { %23561 = vmatpush.bf16.msra.mxu1 %v35509_v46  ;;  %v23323_v1 = vadd.f32 %v23322_v0, %v23310_v59  ;;  %v23335_v3 = vpop.f32.mrf.mxu3  ;;  %v23311_v7 = vpop.f32.mrf.mxu1  ;;  %v35537_v46 = vld [vmem:[%s35902_s30 + $0x4950] sm:$0xff] }
 0x93e   : > { %23574 = vmatpush.bf16.msra.mxu2 %v35517_v47  ;;  %v35528_v47 = vld [vmem:[%s35902_s30 + $0x4908] sm:$0xff] }
 0x93f   : > { %23587 = vmatpush.bf16.msra.mxu3 %v35525_v48  ;;  %v23336_v5 = vadd.f32 %v23335_v3, %v23323_v1  ;;  %v35536_v48 = vld [vmem:[%s35902_s30 + $0x4948] sm:$0xff] }
 0x940   : > { %23549 = vmatpush.bf16.msra.mxu0 %v35500_v49 }
 0x941   : > { %23562 = vmatpush.bf16.msra.mxu1 %v35508_v50 }
 0x942   : > { %23575 = vmatpush.bf16.msra.mxu2 %v35516_v51  ;;  %v35527_v51 = vld [vmem:[%s35902_s30 + $0x4900] sm:$0xff] }
 0x943   : > { %23588 = vmatpush.bf16.msra.mxu3 %v35524_v52  ;;  %v35535_v52 = vld [vmem:[%s35902_s30 + $0x4940] sm:$0xff] }
 0x944   : > { %23550 = vmatpush.bf16.msra.mxu0 %v35499_v55  ;;  %v23324_v14 = vpop.f32.mrf.mxu2 }
 0x945   : > { %23563 = vmatpush.bf16.msra.mxu1 %v35507_v57  ;;  %v23337_v16 = vpop.f32.mrf.mxu3 }
 0x946   : > { %23576 = vmatpush.bf16.msra.mxu2 %v35515_v58 }
 0x947   : > { %23589 = vmatpush.bf16.msra.mxu3 %v35523_v60 }
 0x948   : > { %23551 = vmatpush.bf16.msra.mxu0 %v35498_v61 }
 0x949   : > { %23564 = vmatpush.bf16.msra.mxu1 %v35506_v62 }
 0x94a   : > { %23577 = vmatpush.bf16.msra.mxu2 %v35514_v63 }
 0x94b   : > { %23590 = vmatpush.bf16.msra.mxu3 %v35522_v2 }
 0x94c   : > { %23552 = vmatpush.bf16.msra.mxu0 %v35497_v6 }
 0x94d   : > { %23565 = vmatpush.bf16.msra.mxu1 %v35505_v8 }
 0x94e   : > { %23578 = vmatpush.bf16.msra.mxu2 %v35513_v9 }
 0x94f   : > { %23591 = vmatpush.bf16.msra.mxu3 %v35521_v10 }
 0x950   : > { %23553 = vmatpush.bf16.msra.mxu0 %v35496_v11 }
 0x951   : > { %23566 = vmatpush.bf16.msra.mxu1 %v35504_v12 }
 0x952   : > { %23579 = vmatpush.bf16.msra.mxu2 %v35512_v13 }
 0x953   : > { %23592 = vmatpush.bf16.msra.mxu3 %v35520_v15 }
 0x954   : > { %23554 = vmatpush.bf16.msra.mxu0 %v35495_v17  ;;  %v23348_v31 = vpop.f32.mrf.mxu0 }
 0x955   : > { %23567 = vmatpush.bf16.msra.mxu1 %v35503_v18  ;;  %v23349_v32 = vadd.f32 %v23348_v31, %v23336_v5  ;;  %v23361_v34 = vpop.f32.mrf.mxu1 }
 0x956   : > { %23580 = vmatpush.bf16.msra.mxu2 %v35511_v19 }
 0x957   : > { %23593 = vmatpush.bf16.msra.mxu3 %v35519_v22  ;;  %23555 = vmatmul.bf16.vlgmr.msra.gmra.mxu0 %v5391_v23  ;;  %v23362_v36 = vadd.f32 %v23361_v34, %v23349_v32 }
 0x958   : > { %23599 = vmatpush.bf16.msrb.mxu0 %v35534_v20  ;;  %23568 = vmatmul.bf16.vlgmr.msra.gmra.mxu1 %v5392_v25 }
 0x959   : > { %23612 = vmatpush.bf16.msrb.mxu1 %v35542_v21  ;;  %23581 = vmatmul.bf16.vlgmr.msra.gmra.mxu2 %v5393_v24 }
 0x95a   : > { %23594 = vmatmul.bf16.vlgmr.msra.gmra.mxu3 %v5394_v27 }
 0x95c   : > { %23600 = vmatpush.bf16.msrb.mxu0 %v35533_v26  ;;  %v23374_v39 = vpop.f32.mrf.mxu2  ;;  %v23350_v42 = vpop.f32.mrf.mxu0 }
 0x95d   : > { %23613 = vmatpush.bf16.msrb.mxu1 %v35541_v28  ;;  %v23375_v40 = vadd.f32 %v23374_v39, %v23362_v36  ;;  %v23387_v41 = vpop.f32.mrf.mxu3  ;;  %v23363_v45 = vpop.f32.mrf.mxu1  ;;  %v287_v42 = vld [vmem:[#allocation2] sm:$0x3] }
 0x95f   : > { %v23388_v43 = vadd.f32 %v23387_v41, %v23375_v40 }
 0x960   : > { %23601 = vmatpush.bf16.msrb.mxu0 %v35532_v29 }
 0x961   : > { %23614 = vmatpush.bf16.msrb.mxu1 %v35540_v30 }
 0x964   : > { %23602 = vmatpush.bf16.msrb.mxu0 %v35531_v33  ;;  %v23376_v49 = vpop.f32.mrf.mxu2 }
 0x965   : > { %23615 = vmatpush.bf16.msrb.mxu1 %v35539_v35  ;;  %v23389_v50 = vpop.f32.mrf.mxu3 }
 0x968   : > { %23603 = vmatpush.bf16.msrb.mxu0 %v35530_v37 }
 0x969   : > { %23616 = vmatpush.bf16.msrb.mxu1 %v35538_v38 }
 0x96c   : > { %23604 = vmatpush.bf16.msrb.mxu0 %v35529_v44 }
 0x96d   : > { %23617 = vmatpush.bf16.msrb.mxu1 %v35537_v46 }
 0x970   : > { %23605 = vmatpush.bf16.msrb.mxu0 %v35528_v47 }
 0x971   : > { %23618 = vmatpush.bf16.msrb.mxu1 %v35536_v48 }
 0x974   : > { %23606 = vmatpush.bf16.msrb.mxu0 %v35527_v51  ;;  %v23400_v55 = vpop.f32.mrf.mxu0 }
 0x975   : > { %23619 = vmatpush.bf16.msrb.mxu1 %v35535_v52  ;;  %v23401_v56 = vadd.f32 %v23400_v55, %v23388_v43  ;;  %v23413_v57 = vpop.f32.mrf.mxu1 }
 0x977   : > { %23607 = vmatmul.bf16.vlgmr.msrb.gmra.mxu0 %v5395_v53  ;;  %v23414_v58 = vadd.f32 %v23413_v57, %v23401_v56 }
 0x978   : > { %23620 = vmatmul.bf16.vlgmr.msrb.gmra.mxu1 %v5396_v54 }
 0x97c   : > { %v23426_v59 = vpop.f32.mrf.mxu2  ;;  %v23402_v62 = vpop.f32.mrf.mxu0 }
 0x97d   : > { %v23427_v60 = vadd.f32 %v23426_v59, %v23414_v58  ;;  %v23439_v61 = vpop.f32.mrf.mxu3  ;;  %v23415_v0 = vpop.f32.mrf.mxu1 }
 0x97f   : > { %v23440_v63 = vadd.f32 %v23439_v61, %v23427_v60 }
 0x984   : > { %v23428_v1 = vpop.f32.mrf.mxu2 }
 0x985   : > { %v23441_v2 = vpop.f32.mrf.mxu3 }
 0x994   : > { %v23452_v3 = vpop.f32.mrf.mxu0 }
 0x995   : > { %v23453_v4 = vadd.f32 %v23452_v3, %v23440_v63  ;;  %v23465_v5 = vpop.f32.mrf.mxu1 }
 0x997   : > { %v23466_v6 = vadd.f32 %v23465_v5, %v23453_v4 }
 0x99c   : > { %v23478_v7 = vpop.f32.mrf.mxu2  ;;  %v23454_v9 = vpop.f32.mrf.mxu0 }
 0x99d   : > { %v23491_v8 = vpop.f32.mrf.mxu3  ;;  %v23467_v10 = vpop.f32.mrf.mxu1  ;;  %v23479_v22 = vadd.f32 %v23478_v7, %v23466_v6 }
 0x99f   : > { %v23492_v24 = vadd.f32 %v23491_v8, %v23479_v22 }
 0x9a4   : > { %v23480_v11 = vpop.f32.mrf.mxu2 }
 0x9a5   : > { %v23493_v12 = vpop.f32.mrf.mxu3 }
 0x9b4   : > { %v23504_v13 = vpop.f32.mrf.mxu0 }
 0x9b5   : > { %v23517_v14 = vpop.f32.mrf.mxu1  ;;  %v23505_v25 = vadd.f32 %v23504_v13, %v23492_v24 }
 0x9b7   : > { %v23518_v30 = vadd.f32 %v23517_v14, %v23505_v25 }
 0x9bc   : > { %v23530_v15 = vpop.f32.mrf.mxu2  ;;  %v23506_v17 = vpop.f32.mrf.mxu0 }
 0x9bd   : > { %v23543_v16 = vpop.f32.mrf.mxu3  ;;  %v23519_v18 = vpop.f32.mrf.mxu1  ;;  %v23531_v31 = vadd.f32 %v23530_v15, %v23518_v30 }
 0x9bf   : > { %v23544_v33 = vadd.f32 %v23543_v16, %v23531_v31 }
 0x9c4   : > { %v23532_v19 = vpop.f32.mrf.mxu2 }
 0x9c5   : > { %v23545_v20 = vpop.f32.mrf.mxu3 }
 0x9d4   : > { %v23556_v21 = vpop.f32.mrf.mxu0 }
 0x9d5   : > { %v23569_v23 = vpop.f32.mrf.mxu1  ;;  %v23557_v35 = vadd.f32 %v23556_v21, %v23544_v33 }
 0x9d7   : > { %v23570_v36 = vadd.f32 %v23569_v23, %v23557_v35 }
 0x9dc   : > { %v23582_v26 = vpop.f32.mrf.mxu2  ;;  %v23558_v27 = vpop.f32.mrf.mxu0 }
 0x9dd   : > { %v23595_v28 = vpop.f32.mrf.mxu3  ;;  %v23571_v29 = vpop.f32.mrf.mxu1  ;;  %v23583_v37 = vadd.f32 %v23582_v26, %v23570_v36 }
 0x9df   : > { %v23596_v38 = vadd.f32 %v23595_v28, %v23583_v37 }
 0x9e4   : > { %v23584_v32 = vpop.f32.mrf.mxu2 }
 0x9e5   : > { %v23597_v34 = vpop.f32.mrf.mxu3 }
 0x9f4   : > { %v23608_v39 = vpop.f32.mrf.mxu0 }
 0x9f5   : > { %v23609_v40 = vadd.f32 %v23608_v39, %v23596_v38  ;;  %v23621_v41 = vpop.f32.mrf.mxu1 }
 0x9f7   : > { %v23622_v43 = vadd.f32 %v23621_v41, %v23609_v40 }
 0x9f9   : > { %v23625_v44 = vadd.f32 %v23622_v43, %v287_v42  ;;  %23630 = sbr.rel (%p33185_p5) target bundleno = 2719 (0xa9f), region = 60 }
 0x9fb   : > { %23626 = vst [vmem:[#allocation2] sm:$0x3] %v23625_v44 }
 0x9fc   : > { %v23610_v45 = vpop.f32.mrf.mxu0 }
 0x9fd   : > { %v23623_v46 = vpop.f32.mrf.mxu1 }
 0x9fe   : > { %v23653_v47 = vld [vmem:[%s38474_s3 + $0x78] sm:$0xff]  ;;  %v23652_v48 = vld [vmem:[%s38474_s3 + $0x70] sm:$0xff]  ;;  %v23651_v49 = vld [vmem:[%s38474_s3 + $0x68] sm:$0xff]  ;;  %vm23678_vm0 = vcmask 9216  }
 0x9ff   : > { %23658 = vmatpush.msra.mxu0 %v23653_v47  ;;  %v23650_v50 = vld [vmem:[%s38474_s3 + $0x60] sm:$0xff]  ;;  %v23649_v51 = vld [vmem:[%s38474_s3 + $0x58] sm:$0xff]  ;;  %v23648_v52 = vld [vmem:[%s38474_s3 + $0x50] sm:$0xff] }
 0xa00   : > { %v23647_v53 = vld [vmem:[%s38474_s3 + $0x48] sm:$0xff]  ;;  %v23646_v54 = vld [vmem:[%s38474_s3 + $0x40] sm:$0xff]  ;;  %v23645_v55 = vld [vmem:[%s38474_s3 + $0x38] sm:$0xff] }
 0xa01   : > { %23659 = vmatpush.msra.mxu0 %v23652_v48  ;;  %v23644_v56 = vld [vmem:[%s38474_s3 + $0x30] sm:$0xff]  ;;  %v23643_v57 = vld [vmem:[%s38474_s3 + $0x28] sm:$0xff]  ;;  %v23642_v58 = vld [vmem:[%s38474_s3 + $0x20] sm:$0xff] }
 0xa02   : > { %v35615_v59 = vld [vmem:[#allocation6] ss:$0 sm:$0xff]  ;;  %v23631_v60 = vld [vmem:[#allocation2] sm:$0x3]  ;;  %v23641_v61 = vld [vmem:[%s38474_s3 + $0x18] sm:$0xff] }
 0xa03   : > { %23660 = vmatpush.msra.mxu0 %v23651_v49  ;;  %v23640_v62 = vld [vmem:[%s38474_s3 + $0x10] sm:$0xff]  ;;  %v23636_v63 = vadd.f32 %v35615_v59, %v23631_v60  ;;  %v23639_v0 = vld [vmem:[%s38474_s3 + $0x8] sm:$0xff]  ;;  %v23638_v1 = vld [vmem:[%s38474_s3] sm:$0xff] }
 0xa04   : > { %v35616_v3 = vld [vmem:[#allocation8] ss:$0 sm:$0xff] }
 0xa05   : > { %23661 = vmatpush.msra.mxu0 %v23650_v50  ;;  %v23637_v2 = vmax.f32 %v23636_v63, 0.0 }
 0xa07   : > { %23662 = vmatpush.msra.mxu0 %v23649_v51 }
 0xa09   : > { %23663 = vmatpush.msra.mxu0 %v23648_v52 }
 0xa0b   : > { %23664 = vmatpush.msra.mxu0 %v23647_v53 }
 0xa0d   : > { %23665 = vmatpush.msra.mxu0 %v23646_v54 }
 0xa0f   : > { %23666 = vmatpush.msra.mxu0 %v23645_v55 }
 0xa11   : > { %23667 = vmatpush.msra.mxu0 %v23644_v56 }
 0xa13   : > { %23668 = vmatpush.msra.mxu0 %v23643_v57 }
 0xa15   : > { %23669 = vmatpush.msra.mxu0 %v23642_v58 }
 0xa17   : > { %23670 = vmatpush.msra.mxu0 %v23641_v61 }
 0xa19   : > { %23671 = vmatpush.msra.mxu0 %v23640_v62 }
 0xa1b   : > { %23672 = vmatpush.msra.mxu0 %v23639_v0 }
 0xa1d   : > { %23673 = vmatpush.msra.mxu0 %v23638_v1 }
 0xa1e   : > { %23674 = vmatmul.f32.vlgmr.msra.gmra.mxu0 %v23637_v2 }
 0xa9b   : > { %v23675_v4 = vpop.f32.mrf.mxu0 }
 0xa9c   : > { %v23676_v5 = vadd.f32 %v35616_v3, %v23675_v4 }
 0xa9e   : > { %23679 = vst.msk [vmem:[#allocation9] sm:$0x3] %vm23678_vm0, %v23676_v5 }
 0xa9f PF: > { %p35575_p8 = scmp.eq.s32.totalorder %s35834_s22, 3  ;;  %s35784_s18 = smov [#allocation9]  }
 0xaa0   : > { %s23686_s24 = sshll.u32 %s35784_s18, 4  ;;  %s23688_s29 = sshll.u32 %s38476_s5, 4  ;;  %s23687_s24 = int_to_ptr.vmem [resolvable:$true] %s23686_s24  ;;  %s23689_s29 = int_to_ptr.hbm [resolvable:$true] %s23688_s29 }
 0xaa1   : > { %35556 = dma.vmem_to_hbm [thread:$0]  (%p35575_p8), %s23687_s24, 32, %s23689_s29, [#allocation5]  }
 0xaa2   : > { %35760 = dma.done.wait (%p35575_p8), [#allocation5], 32  }
 0xaa3   : > { %35762 = vsyncadd (%p35575_p8), [#allocation5], 4294967264 }
 0xaa4 PF: > { %p17_p9 = scmp.ge.s32.totalorder %s35837_s23, 6   ;;  %s38481_s18 = smov %s35769_s19 }
 0xaa5   : > { %s38482_s19 = smov %s35773_s20  ;;  %s38483_s20 = smov %s35847_s26 }
 0xaa6   : > { %s38484_s21 = smov %s35837_s23  ;;  %19 = sbr.rel (!%p17_p9) target bundleno = 5 (0x5), region = 96 }
 0xaab   :  { %23702 = vsyncpa [#allocation4], 1 }
 0xaac   :  { %23704 = vsyncpa [#allocation4 + $0x1], 1 }
 0xaad   :  { %23705 = vsyncpa [#allocation7], 1 }
 0xaae   :  { %23706 = vsyncpa [#allocation5], 1 }
 0xaaf   :  { %23708 = vsyncpa [#allocation5 + $0x1], 1 }

</bundles_post_ra>
